<compile_context>
chip_gen: v5e
topology: v5e:2x2
jax: 0.10.0
libtpu: 0.0.40
codegen_flags: <defaults>
</compile_context>

<pallas_src>
import functools
import math

import numpy as np

import jax
import jax.numpy as jnp
from jax.experimental import pallas as pl
from jax.experimental.pallas import tpu as pltpu

PSP_SIZES = (2, 3, 6, 14)


def _round_up(x, m):
    return ((x + m - 1) // m) * m


def _pick_block(dim, candidates):
    for c in candidates:
        if dim % c == 0:
            return c
    return dim  # full-extent block is always legal, regardless of (8,128) divisibility


# --------------------------------------------------------------------------------------
# Static spatial operators (pure index math, built once per shape; trace-time constants)
# --------------------------------------------------------------------------------------
def _adaptive_avg_pool_matrix(out_size, in_size):
    """Row i = PyTorch AdaptiveAvgPool window weights: [floor(i*I/O), ceil((i+1)*I/O))."""
    m = np.zeros((out_size, in_size), np.float32)
    for i in range(out_size):
        start = (i * in_size) // out_size
        a = (i + 1) * in_size
        end = -((-a) // out_size)  # ceil
        m[i, start:end] = 1.0 / (end - start)
    return m


def _bilinear_upsample_matrix(out_size, in_size):
    """Row o = 1-D bilinear weights, align_corners=False (F.upsample bilinear default)."""
    m = np.zeros((out_size, in_size), np.float32)
    scale = in_size / out_size
    for o in range(out_size):
        src = (o + 0.5) * scale - 0.5
        src = min(max(src, 0.0), float(in_size - 1))
        i0 = int(math.floor(src))
        i1 = min(i0 + 1, in_size - 1)
        f = src - i0
        m[o, i0] += 1.0 - f
        m[o, i1] += f
    return m


def _build_spatial_operators(H, W, sizes):
    """A_exp (L, Qp, H*W): level-k 2-D pool operator placed in its own row band (other rows 0).
       U_all (H*W, Qp): concatenated 2-D bilinear upsample operators (sums all level priors).
       Qp = sum(s*s) rounded up to a multiple of 8 (extra rows/cols are zero => exact)."""
    L = len(sizes)
    Q = sum(s * s for s in sizes)
    Qp = _round_up(Q, 8)
    HW = H * W
    A_exp = np.zeros((L, Qp, HW), np.float32)
    U_all = np.zeros((HW, Qp), np.float32)
    off = 0
    for k, s in enumerate(sizes):
        ph = _adaptive_avg_pool_matrix(s, H)
        pw = _adaptive_avg_pool_matrix(s, W)
        A_exp[k, off:off + s * s, :] = np.einsum("ih,jw->ijhw", ph, pw).reshape(s * s, HW)
        uh = _bilinear_upsample_matrix(H, s)
        uw = _bilinear_upsample_matrix(W, s)
        U_all[:, off:off + s * s] = np.einsum("oi,pj->opij", uh, uw).reshape(HW, s * s)
        off += s * s
    return jnp.asarray(A_exp, jnp.bfloat16), jnp.asarray(U_all, jnp.bfloat16)


# --------------------------------------------------------------------------------------
# Kernel A: all pyramid levels for one sample (pool GEMM + combined 1x1-conv GEMM, fused)
#   Y[n] = sum_k (A_k @ x_flat[n]) @ Wcomb_k            (Q x Fo, stays tiny / bf16)
# --------------------------------------------------------------------------------------
def _levels_kernel(a_ref, x_ref, w_ref, y_ref, *, n_levels):
    x = x_ref[0]                                                   # (HW, C) bf16
    acc = None
    for k in range(n_levels):                                      # static unroll (4 levels)
        p = jnp.dot(a_ref[k], x, preferred_element_type=jnp.float32)          # (Qp, C)
        t = jnp.dot(p.astype(jnp.bfloat16), w_ref[k],
                    preferred_element_type=jnp.float32)                        # (Qp, Fo)
        acc = t if acc is None else acc + t
    y_ref[0] = acc.astype(y_ref.dtype)


def _pyramid_levels(A_exp, x_bf, wcomb):
    L, Qp, HW = A_exp.shape
    N, _, C = x_bf.shape
    Fo = wcomb.shape[2]
    flops = 2 * N * L * (Qp * HW * C + Qp * C * Fo)
    bytes_accessed = int(A_exp.size * 2 + x_bf.size * 2 + wcomb.size * 2 + N * Qp * Fo * 2)
    return pl.pallas_call(
        functools.partial(_levels_kernel, n_levels=L),
        out_shape=jax.ShapeDtypeStruct((N, Qp, Fo), jnp.bfloat16),
        grid_spec=pltpu.PrefetchScalarGridSpec(
            num_scalar_prefetch=0,
            grid=(N,),
            in_specs=[
                pl.BlockSpec((L, Qp, HW), lambda n: (0, 0, 0)),    # pool operators (invariant)
                pl.BlockSpec((1, HW, C), lambda n: (n, 0, 0)),     # this sample's features
                pl.BlockSpec((L, C, Fo), lambda n: (0, 0, 0)),     # combined stage+bottleneck W
            ],
            out_specs=pl.BlockSpec((1, Qp, Fo), lambda n: (n, 0, 0)),
        ),
        compiler_params=pltpu.CompilerParams(
            dimension_semantics=("parallel",),                     # samples -> both v7x TCs
        ),
        cost_estimate=pl.CostEstimate(flops=flops, transcendentals=0,
                                      bytes_accessed=bytes_accessed),
    )(A_exp, x_bf, wcomb)


# --------------------------------------------------------------------------------------
# Kernel B: fused bottleneck -- out[n] = ReLU(x_flat[n] @ Wb_last + U_all @ Y[n] + b)
#   Single K step per dot => no accumulator scratch; priors never hit HBM at full resolution.
# --------------------------------------------------------------------------------------
def _final_kernel(x_ref, w_ref, u_ref, y_ref, b_ref, o_ref):
    acc = jnp.dot(x_ref[0], w_ref[...], preferred_element_type=jnp.float32)   # x chunk of Wb
    acc = acc + jnp.dot(u_ref[...], y_ref[0], preferred_element_type=jnp.float32)  # priors
    acc = acc + b_ref[...]
    o_ref[0] = jnp.maximum(acc, 0.0).astype(o_ref.dtype)


def _fused_bottleneck(x_bf, wb_last, U_all, Y, bias, out_dtype=jnp.float32):
    N, HW, C = x_bf.shape
    Fo = wb_last.shape[1]
    Qp = U_all.shape[1]
    bm = _pick_block(HW, (512, 256, 128))
    bn = _pick_block(Fo, (256, 128))
    gm, gn = HW // bm, Fo // bn
    flops = 2 * N * HW * (C + Qp) * Fo
    bytes_accessed = int(
        x_bf.size * 2 * gn + wb_last.size * 2 * N * gm + U_all.size * 2 * N * gn
        + Y.size * 2 * gm + bias.size * 4 * N * gm
        + N * HW * Fo * jnp.dtype(out_dtype).itemsize)
    return pl.pallas_call(
        _final_kernel,
        out_shape=jax.ShapeDtypeStruct((N, HW, Fo), out_dtype),
        grid_spec=pltpu.PrefetchScalarGridSpec(
            num_scalar_prefetch=0,
            grid=(N, gm, gn),
            in_specs=[
                pl.BlockSpec((1, bm, C), lambda n, i, j: (n, i, 0)),   # x rows (full K = C)
                pl.BlockSpec((C, bn), lambda n, i, j: (0, j)),         # Wb_last (full K)
                pl.BlockSpec((bm, Qp), lambda n, i, j: (i, 0)),        # upsample operator rows
                pl.BlockSpec((1, Qp, bn), lambda n, i, j: (n, 0, j)),  # this sample's priors Y
                pl.BlockSpec((1, bn), lambda n, i, j: (0, j)),         # bias
            ],
            out_specs=pl.BlockSpec((1, bm, bn), lambda n, i, j: (n, i, j)),
        ),
        compiler_params=pltpu.CompilerParams(
            dimension_semantics=("parallel", "parallel", "parallel"),
        ),
        cost_estimate=pl.CostEstimate(flops=flops, transcendentals=0,
                                      bytes_accessed=bytes_accessed),
    )(x_bf, wb_last, U_all, Y, bias)


# --------------------------------------------------------------------------------------
# Parameters (synthetic, deterministic) and forward
# --------------------------------------------------------------------------------------
def init_psp(key, features, out_features=1024, sizes=PSP_SIZES):
    n = len(sizes)
    ks = jax.random.split(key, n + 2)
    stage_w = [jax.random.normal(ks[i], (features, features), jnp.float32) / math.sqrt(features)
               for i in range(n)]                                   # 1x1 conv, bias=False
    cin = features * (n + 1)
    bottleneck_w = jax.random.normal(ks[n], (cin, out_features), jnp.float32) / math.sqrt(cin)
    bottleneck_b = 0.01 * jax.random.normal(ks[n + 1], (out_features,), jnp.float32)
    return {"stage_w": stage_w, "bottleneck_w": bottleneck_w, "bottleneck_b": bottleneck_b}


def psp_forward(params, x, sizes=PSP_SIZES):
    """PSPModule forward.  x: (N, H, W, C) NHWC  ->  (N, H, W, out_features)."""
    N, H, W, C = x.shape
    L = len(sizes)
    Fo = params["bottleneck_b"].shape[0]

    A_exp, U_all = _build_spatial_operators(H, W, sizes)

    # Trace-time weight combine (tiny f32 GEMMs): Wcomb_k = Wstage_k @ Wb_k  -> (L, C, Fo) bf16.
    wcomb = jnp.stack([params["stage_w"][k] @ params["bottleneck_w"][k * C:(k + 1) * C, :]
                       for k in range(L)]).astype(jnp.bfloat16)
    wb_last = params["bottleneck_w"][L * C:, :].astype(jnp.bfloat16)          # (C, Fo)
    bias = params["bottleneck_b"].reshape(1, Fo).astype(jnp.float32)

    x_bf = x.astype(jnp.bfloat16).reshape(N, H * W, C)                        # cast once

    # Kernel A: per-sample pyramid levels -> Y (N, Qp, Fo) bf16 (tiny; stays out of the hot path).
    Y = _pyramid_levels(A_exp, x_bf, wcomb)

    # Kernel B: fused bottleneck GEMM with prior contribution + bias + ReLU epilogue.
    out = _fused_bottleneck(x_bf, wb_last, U_all, Y, bias)
    return out.reshape(N, H, W, Fo)


def psp_reference(params, x, sizes=PSP_SIZES):
    """Literal plain-JAX (f32) transcription of the PyTorch forward, for validation only."""
    # NOTE: bilinear upsample uses align_corners=False (modern F.upsample/interpolate default).
    N, H, W, C = x.shape
    priors = []
    for k, s in enumerate(sizes):
        ph = jnp.asarray(_adaptive_avg_pool_matrix(s, H))
        pw = jnp.asarray(_adaptive_avg_pool_matrix(s, W))
        pooled = jnp.einsum("ih,jw,nhwc->nijc", ph, pw, x)
        conv = jnp.einsum("nijc,cd->nijd", pooled, params["stage_w"][k])
        uh = jnp.asarray(_bilinear_upsample_matrix(H, s))
        uw = jnp.asarray(_bilinear_upsample_matrix(W, s))
        priors.append(jnp.einsum("oi,pj,nijc->nopc", uh, uw, conv))
    priors.append(x)
    cat = jnp.concatenate(priors, axis=-1)
    bottle = jnp.einsum("nhwc,cf->nhwf", cat, params["bottleneck_w"]) + params["bottleneck_b"]
    return jnp.maximum(bottle, 0.0)


# --------------------------------------------------------------------------------------
if __name__ == "__main__":
    # Small but representative shapes: spatial 32 (>= max pyramid size 14, H*W divisible by the
    # 512-row GEMM tile), 64 input features, 128 output features (lane-dense).
    # NHWC (2, 32, 32, 64) corresponds to PyTorch NCHW (2, 64, 32, 32).
    N, H, W, C, FOUT = 2, 32, 32, 64, 128
    key = jax.random.PRNGKey(0)
    pkey, xkey = jax.random.split(key)
    params = init_psp(pkey, features=C, out_features=FOUT, sizes=PSP_SIZES)
    x = jax.random.normal(xkey, (N, H, W, C), jnp.float32)

    fwd = jax.jit(psp_forward)
    out = fwd(params, x)
    out = jax.block_until_ready(out)

    assert out.shape == (N, H, W, FOUT), out.shape
    assert bool(jnp.all(jnp.isfinite(out)))
    assert bool(jnp.all(out >= 0.0))  # ReLU output

    # Validate against the literal f32 reference (loose tolerance: GEMM operands are bf16).
    ref = psp_reference(params, x)
    err = float(jnp.max(jnp.abs(out - ref)))
    scale = float(jnp.max(jnp.abs(ref))) + 1e-6
    assert err / scale < 0.05, (err, scale)

    print("KERNEL_OK")
</pallas_src>

<mosaic_0001>
module attributes {stable_mosaic.version = 11 : i64} {
  func.func @_levels_kernel(%arg0: i32, %arg1: memref<4x248x1024xbf16, #tpu.memory_space<vmem>>, %arg2: memref<1x1024x64xbf16, #tpu.memory_space<vmem>>, %arg3: memref<4x64x128xbf16, #tpu.memory_space<vmem>>, %arg4: memref<1x248x128xbf16, #tpu.memory_space<vmem>>) attributes {dimension_semantics = [#tpu.dimension_semantics<parallel>], iteration_bounds = array<i64: 2>, scalar_prefetch = 0 : i64, scratch_operands = 0 : i64, tpu.core_type = #tpu.core_type<tc>, window_params = [{pipeline_mode = #tpu.pipeline_mode<synchronous>, transform_indices = @transform_0, window_bounds = array<i64: 4, 248, 1024>}, {transform_indices = @transform_1, window_bounds = array<i64: 1, 1024, 64>}, {pipeline_mode = #tpu.pipeline_mode<synchronous>, transform_indices = @transform_2, window_bounds = array<i64: 4, 64, 128>}, {transform_indices = @transform_3, window_bounds = array<i64: 1, 248, 128>}]} {
    %c0 = arith.constant 0 : index
    %c0_0 = arith.constant 0 : index
    %c0_1 = arith.constant 0 : index
    %0 = vector.load %arg2[%c0, %c0_0, %c0_1] : memref<1x1024x64xbf16, #tpu.memory_space<vmem>>, vector<1x1024x64xbf16>
    %1 = vector.shape_cast %0 : vector<1x1024x64xbf16> to vector<1024x64xbf16>
    %c0_2 = arith.constant 0 : index
    %c0_3 = arith.constant 0 : index
    %c0_4 = arith.constant 0 : index
    %2 = vector.load %arg1[%c0_2, %c0_3, %c0_4] : memref<4x248x1024xbf16, #tpu.memory_space<vmem>>, vector<1x248x1024xbf16>
    %3 = vector.shape_cast %2 : vector<1x248x1024xbf16> to vector<248x1024xbf16>
    %cst = arith.constant dense<0.000000e+00> : vector<248x64xf32>
    %4 = tpu.matmul %3, %1, %cst {dimension_numbers = #tpu.dot_dimension_numbers<[1], [0], [0], [1], [0, 0, 1, 1], [], []>} : vector<248x1024xbf16>, vector<1024x64xbf16>, vector<248x64xf32> -> vector<248x64xf32>
    %5 = arith.truncf %4 : vector<248x64xf32> to vector<248x64xbf16>
    %c0_5 = arith.constant 0 : index
    %c0_6 = arith.constant 0 : index
    %c0_7 = arith.constant 0 : index
    %6 = vector.load %arg3[%c0_5, %c0_6, %c0_7] : memref<4x64x128xbf16, #tpu.memory_space<vmem>>, vector<1x64x128xbf16>
    %7 = vector.shape_cast %6 : vector<1x64x128xbf16> to vector<64x128xbf16>
    %cst_8 = arith.constant dense<0.000000e+00> : vector<248x128xf32>
    %8 = tpu.matmul %5, %7, %cst_8 {dimension_numbers = #tpu.dot_dimension_numbers<[1], [0], [0], [1], [0, 0, 1, 1], [], []>} : vector<248x64xbf16>, vector<64x128xbf16>, vector<248x128xf32> -> vector<248x128xf32>
    %c1 = arith.constant 1 : index
    %c0_9 = arith.constant 0 : index
    %c0_10 = arith.constant 0 : index
    %9 = vector.load %arg1[%c1, %c0_9, %c0_10] : memref<4x248x1024xbf16, #tpu.memory_space<vmem>>, vector<1x248x1024xbf16>
    %10 = vector.shape_cast %9 : vector<1x248x1024xbf16> to vector<248x1024xbf16>
    %cst_11 = arith.constant dense<0.000000e+00> : vector<248x64xf32>
    %11 = tpu.matmul %10, %1, %cst_11 {dimension_numbers = #tpu.dot_dimension_numbers<[1], [0], [0], [1], [0, 0, 1, 1], [], []>} : vector<248x1024xbf16>, vector<1024x64xbf16>, vector<248x64xf32> -> vector<248x64xf32>
    %12 = arith.truncf %11 : vector<248x64xf32> to vector<248x64xbf16>
    %c1_12 = arith.constant 1 : index
    %c0_13 = arith.constant 0 : index
    %c0_14 = arith.constant 0 : index
    %13 = vector.load %arg3[%c1_12, %c0_13, %c0_14] : memref<4x64x128xbf16, #tpu.memory_space<vmem>>, vector<1x64x128xbf16>
    %14 = vector.shape_cast %13 : vector<1x64x128xbf16> to vector<64x128xbf16>
    %cst_15 = arith.constant dense<0.000000e+00> : vector<248x128xf32>
    %15 = tpu.matmul %12, %14, %cst_15 {dimension_numbers = #tpu.dot_dimension_numbers<[1], [0], [0], [1], [0, 0, 1, 1], [], []>} : vector<248x64xbf16>, vector<64x128xbf16>, vector<248x128xf32> -> vector<248x128xf32>
    %16 = arith.addf %8, %15 : vector<248x128xf32>
    %c2 = arith.constant 2 : index
    %c0_16 = arith.constant 0 : index
    %c0_17 = arith.constant 0 : index
    %17 = vector.load %arg1[%c2, %c0_16, %c0_17] : memref<4x248x1024xbf16, #tpu.memory_space<vmem>>, vector<1x248x1024xbf16>
    %18 = vector.shape_cast %17 : vector<1x248x1024xbf16> to vector<248x1024xbf16>
    %cst_18 = arith.constant dense<0.000000e+00> : vector<248x64xf32>
    %19 = tpu.matmul %18, %1, %cst_18 {dimension_numbers = #tpu.dot_dimension_numbers<[1], [0], [0], [1], [0, 0, 1, 1], [], []>} : vector<248x1024xbf16>, vector<1024x64xbf16>, vector<248x64xf32> -> vector<248x64xf32>
    %20 = arith.truncf %19 : vector<248x64xf32> to vector<248x64xbf16>
    %c2_19 = arith.constant 2 : index
    %c0_20 = arith.constant 0 : index
    %c0_21 = arith.constant 0 : index
    %21 = vector.load %arg3[%c2_19, %c0_20, %c0_21] : memref<4x64x128xbf16, #tpu.memory_space<vmem>>, vector<1x64x128xbf16>
    %22 = vector.shape_cast %21 : vector<1x64x128xbf16> to vector<64x128xbf16>
    %cst_22 = arith.constant dense<0.000000e+00> : vector<248x128xf32>
    %23 = tpu.matmul %20, %22, %cst_22 {dimension_numbers = #tpu.dot_dimension_numbers<[1], [0], [0], [1], [0, 0, 1, 1], [], []>} : vector<248x64xbf16>, vector<64x128xbf16>, vector<248x128xf32> -> vector<248x128xf32>
    %24 = arith.addf %16, %23 : vector<248x128xf32>
    %c3 = arith.constant 3 : index
    %c0_23 = arith.constant 0 : index
    %c0_24 = arith.constant 0 : index
    %25 = vector.load %arg1[%c3, %c0_23, %c0_24] : memref<4x248x1024xbf16, #tpu.memory_space<vmem>>, vector<1x248x1024xbf16>
    %26 = vector.shape_cast %25 : vector<1x248x1024xbf16> to vector<248x1024xbf16>
    %cst_25 = arith.constant dense<0.000000e+00> : vector<248x64xf32>
    %27 = tpu.matmul %26, %1, %cst_25 {dimension_numbers = #tpu.dot_dimension_numbers<[1], [0], [0], [1], [0, 0, 1, 1], [], []>} : vector<248x1024xbf16>, vector<1024x64xbf16>, vector<248x64xf32> -> vector<248x64xf32>
    %28 = arith.truncf %27 : vector<248x64xf32> to vector<248x64xbf16>
    %c3_26 = arith.constant 3 : index
    %c0_27 = arith.constant 0 : index
    %c0_28 = arith.constant 0 : index
    %29 = vector.load %arg3[%c3_26, %c0_27, %c0_28] : memref<4x64x128xbf16, #tpu.memory_space<vmem>>, vector<1x64x128xbf16>
    %30 = vector.shape_cast %29 : vector<1x64x128xbf16> to vector<64x128xbf16>
    %cst_29 = arith.constant dense<0.000000e+00> : vector<248x128xf32>
    %31 = tpu.matmul %28, %30, %cst_29 {dimension_numbers = #tpu.dot_dimension_numbers<[1], [0], [0], [1], [0, 0, 1, 1], [], []>} : vector<248x64xbf16>, vector<64x128xbf16>, vector<248x128xf32> -> vector<248x128xf32>
    %32 = arith.addf %24, %31 : vector<248x128xf32>
    %33 = arith.truncf %32 : vector<248x128xf32> to vector<248x128xbf16>
    %c0_30 = arith.constant 0 : index
    %c0_31 = arith.constant 0 : index
    %c0_32 = arith.constant 0 : index
    %34 = vector.load %arg4[%c0_30, %c0_31, %c0_32] : memref<1x248x128xbf16, #tpu.memory_space<vmem>>, vector<1x248x128xbf16>
    %35 = vector.shape_cast %34 : vector<1x248x128xbf16> to vector<248x128xbf16>
    %36 = vector.shape_cast %33 : vector<248x128xbf16> to vector<1x248x128xbf16>
    tpu.vector_store %arg4[%c0_30, %c0_31, %c0_32], %36 {strides = array<i32>} : memref<1x248x128xbf16, #tpu.memory_space<vmem>>, vector<1x248x128xbf16>,
    return
  }
  func.func @transform_0(%arg0: i32) -> (i32, i32, i32) {
    %c0_i32 = arith.constant 0 : i32
    %c0_i32_0 = arith.constant 0 : i32
    %c0_i32_1 = arith.constant 0 : i32
    %c0_i32_2 = arith.constant 0 : i32
    return %c0_i32, %c0_i32_0, %c0_i32_1 : i32, i32, i32
  }
  func.func @transform_1(%arg0: i32) -> (i32, i32, i32) {
    %c0_i32 = arith.constant 0 : i32
    %c0_i32_0 = arith.constant 0 : i32
    %c0_i32_1 = arith.constant 0 : i32
    return %arg0, %c0_i32, %c0_i32_0 : i32, i32, i32
  }
  func.func @transform_2(%arg0: i32) -> (i32, i32, i32) {
    %c0_i32 = arith.constant 0 : i32
    %c0_i32_0 = arith.constant 0 : i32
    %c0_i32_1 = arith.constant 0 : i32
    %c0_i32_2 = arith.constant 0 : i32
    return %c0_i32, %c0_i32_0, %c0_i32_1 : i32, i32, i32
  }
  func.func @transform_3(%arg0: i32) -> (i32, i32, i32) {
    %c0_i32 = arith.constant 0 : i32
    %c0_i32_0 = arith.constant 0 : i32
    %c0_i32_1 = arith.constant 0 : i32
    return %arg0, %c0_i32, %c0_i32_0 : i32, i32, i32
  }
}

module attributes {stable_mosaic.version = 11 : i64} {
  func.func @_final_kernel(%arg0: i32, %arg1: i32, %arg2: i32, %arg3: memref<1x512x64xbf16, #tpu.memory_space<vmem>>, %arg4: memref<64x128xbf16, #tpu.memory_space<vmem>>, %arg5: memref<512x248xbf16, #tpu.memory_space<vmem>>, %arg6: memref<1x248x128xbf16, #tpu.memory_space<vmem>>, %arg7: memref<1x128xf32, #tpu.memory_space<vmem>>, %arg8: memref<1x512x128xf32, #tpu.memory_space<vmem>>) attributes {dimension_semantics = [#tpu.dimension_semantics<parallel>, #tpu.dimension_semantics<parallel>, #tpu.dimension_semantics<parallel>], iteration_bounds = array<i64: 2, 2, 1>, scalar_prefetch = 0 : i64, scratch_operands = 0 : i64, tpu.core_type = #tpu.core_type<tc>, window_params = [{transform_indices = @transform_0, window_bounds = array<i64: 1, 512, 64>}, {transform_indices = @transform_1, window_bounds = array<i64: 64, 128>}, {transform_indices = @transform_2, window_bounds = array<i64: 512, 248>}, {transform_indices = @transform_3, window_bounds = array<i64: 1, 248, 128>}, {transform_indices = @transform_4, window_bounds = array<i64: 1, 128>}, {transform_indices = @transform_5, window_bounds = array<i64: 1, 512, 128>}]} {
    %c0 = arith.constant 0 : index
    %c0_0 = arith.constant 0 : index
    %c0_1 = arith.constant 0 : index
    %0 = vector.load %arg3[%c0, %c0_0, %c0_1] : memref<1x512x64xbf16, #tpu.memory_space<vmem>>, vector<1x512x64xbf16>
    %1 = vector.shape_cast %0 : vector<1x512x64xbf16> to vector<512x64xbf16>
    %c0_2 = arith.constant 0 : index
    %c0_3 = arith.constant 0 : index
    %2 = vector.load %arg4[%c0_2, %c0_3] : memref<64x128xbf16, #tpu.memory_space<vmem>>, vector<64x128xbf16>
    %cst = arith.constant dense<0.000000e+00> : vector<512x128xf32>
    %3 = tpu.matmul %1, %2, %cst {dimension_numbers = #tpu.dot_dimension_numbers<[1], [0], [0], [1], [0, 0, 1, 1], [], []>} : vector<512x64xbf16>, vector<64x128xbf16>, vector<512x128xf32> -> vector<512x128xf32>
    %c0_4 = arith.constant 0 : index
    %c0_5 = arith.constant 0 : index
    %4 = vector.load %arg5[%c0_4, %c0_5] : memref<512x248xbf16, #tpu.memory_space<vmem>>, vector<512x248xbf16>
    %c0_6 = arith.constant 0 : index
    %c0_7 = arith.constant 0 : index
    %c0_8 = arith.constant 0 : index
    %5 = vector.load %arg6[%c0_6, %c0_7, %c0_8] : memref<1x248x128xbf16, #tpu.memory_space<vmem>>, vector<1x248x128xbf16>
    %6 = vector.shape_cast %5 : vector<1x248x128xbf16> to vector<248x128xbf16>
    %cst_9 = arith.constant dense<0.000000e+00> : vector<512x128xf32>
    %7 = tpu.matmul %4, %6, %cst_9 {dimension_numbers = #tpu.dot_dimension_numbers<[1], [0], [0], [1], [0, 0, 1, 1], [], []>} : vector<512x248xbf16>, vector<248x128xbf16>, vector<512x128xf32> -> vector<512x128xf32>
    %8 = arith.addf %3, %7 : vector<512x128xf32>
    %c0_10 = arith.constant 0 : index
    %c0_11 = arith.constant 0 : index
    %9 = vector.load %arg7[%c0_10, %c0_11] : memref<1x128xf32, #tpu.memory_space<vmem>>, vector<1x128xf32>
    %10 = vector.broadcast %9 : vector<1x128xf32> to vector<512x128xf32>
    %11 = arith.addf %8, %10 : vector<512x128xf32>
    %cst_12 = arith.constant 0.000000e+00 : f32
    %12 = vector.broadcast %cst_12 : f32 to vector<512x128xf32>
    %13 = arith.maximumf %11, %12 : vector<512x128xf32>
    %c0_13 = arith.constant 0 : index
    %c0_14 = arith.constant 0 : index
    %c0_15 = arith.constant 0 : index
    %14 = vector.load %arg8[%c0_13, %c0_14, %c0_15] : memref<1x512x128xf32, #tpu.memory_space<vmem>>, vector<1x512x128xf32>
    %15 = vector.shape_cast %14 : vector<1x512x128xf32> to vector<512x128xf32>
    %16 = vector.shape_cast %13 : vector<512x128xf32> to vector<1x512x128xf32>
    tpu.vector_store %arg8[%c0_13, %c0_14, %c0_15], %16 {strides = array<i32>} : memref<1x512x128xf32, #tpu.memory_space<vmem>>, vector<1x512x128xf32>,
    return
  }
  func.func @transform_0(%arg0: i32, %arg1: i32, %arg2: i32) -> (i32, i32, i32) {
    %c0_i32 = arith.constant 0 : i32
    %c0_i32_0 = arith.constant 0 : i32
    return %arg0, %arg1, %c0_i32 : i32, i32, i32
  }
  func.func @transform_1(%arg0: i32, %arg1: i32, %arg2: i32) -> (i32, i32) {
    %c0_i32 = arith.constant 0 : i32
    %c0_i32_0 = arith.constant 0 : i32
    return %c0_i32, %arg2 : i32, i32
  }
  func.func @transform_2(%arg0: i32, %arg1: i32, %arg2: i32) -> (i32, i32) {
    %c0_i32 = arith.constant 0 : i32
    %c0_i32_0 = arith.constant 0 : i32
    return %arg1, %c0_i32 : i32, i32
  }
  func.func @transform_3(%arg0: i32, %arg1: i32, %arg2: i32) -> (i32, i32, i32) {
    %c0_i32 = arith.constant 0 : i32
    %c0_i32_0 = arith.constant 0 : i32
    return %arg0, %c0_i32, %arg2 : i32, i32, i32
  }
  func.func @transform_4(%arg0: i32, %arg1: i32, %arg2: i32) -> (i32, i32) {
    %c0_i32 = arith.constant 0 : i32
    %c0_i32_0 = arith.constant 0 : i32
    return %c0_i32, %arg2 : i32, i32
  }
  func.func @transform_5(%arg0: i32, %arg1: i32, %arg2: i32) -> (i32, i32, i32) {
    %c0_i32 = arith.constant 0 : i32
    return %arg0, %arg1, %arg2 : i32, i32, i32
  }
}

</mosaic_0001>

<bundles_post_ra>
// kernel: psp_forward.3
= control target key start
LH: loop header
LB: loop body
LE: loop exit
PB: predicated region body
PF: predicated region fallthrough
CT: control target
= control target key end

     0   :  { %10 = vsyncpa [#allocation3], 0  ;;  %s3681_s0 = inlined_call_operand.vmem [shape: bf16[2,1024,64], index: 0, kind: input, shape index: {}]   ;;  %s3682_s1 = inlined_call_operand.vmem [shape: bf16[64,128], index: 1, kind: input, shape index: {}]   ;;  %s3683_s2 = inlined_call_operand.vmem [shape: bf16[1024,248], index: 2, kind: input, shape index: {}]   ;;  %s3684_s3 = inlined_call_operand.vmem [shape: bf16[2,248,128], index: 3, kind: input, shape index: {}]   ;;  %s3685_s4 = inlined_call_operand.vmem [shape: f32[1,128], index: 4, kind: input, shape index: {}]   ;;  %s3686_s5 = inlined_call_operand.hbm [shape: f32[2,1024,128], index: 5, kind: output, shape index: {}]  }
   0x1   :  { %12 = vsyncpa [#allocation3 + $0x1], 0  ;;  %s3031_s18 = smov 0   ;;  %s3033_s19 = smov 0  }
   0x2   :  { %s3035_s20 = smov 0   ;;  %s3037_s21 = smov 0  }
   0x3   :  { %s3039_s22 = smov 0   ;;  %s3041_s23 = smov 0  }
   0x4   :  { %s3043_s24 = smov 0   ;;  %s3045_s25 = smov 0  }
   0x5 LB: > { %s2146_s26 = sadd.s32 4294967295, %s2997_s25   ;;  %s2147_s27 = sadd.s32 4294967294, %s2997_s25   ;;  %s2997_s25 = sphi %s3045_s25, %s18_s25   ;;  %s2993_s24 = sphi %s3043_s24, %s3695_s24   ;;  %s2989_s23 = sphi %s3041_s23, %s3694_s23   ;;  %s2985_s22 = sphi %s3039_s22, %s3693_s22   ;;  %s2981_s21 = sphi %s3037_s21, %s3692_s21   ;;  %s2977_s20 = sphi %s3035_s20, %s3691_s20   ;;  %s2973_s19 = sphi %s3033_s19, %s3690_s19   ;;  %s2969_s18 = sphi %s3031_s18, %s3689_s18  }
   0x6   : > { %s33_s28 = sadd.s32 1, %s2989_s23  ;;  %s37_s29 = sadd.s32 1, %s2993_s24 }
   0x7   : > { %p35_p0 = scmp.ge.s32.totalorder %s33_s28, 2  ;;  %p192_p1 = scmp.ne.s32.totalorder %s2977_s20, %s2973_s19 }
   0x8   : > { %p193_p2 = scmp.eq.s32.totalorder %s2146_s26, 3  ;;  %p198_p5 = scmp.ne.s32.totalorder %s2973_s19, %s2969_s18 }
   0x9   : > { %s3697_s28 = smov (%p35_p0, %s33_s28), 0  ;;  %s3699_s29 = smov (!%p35_p0, %s37_s29), %s2993_s24 }
   0xa   : > { %s176_s30 = ssub.s32 %s2989_s23, %s3697_s28  ;;  %p3082_p3 = por %p193_p2, %p192_p1 }
   0xb   : > { %p39_p4 = scmp.ge.s32.totalorder %s3699_s29, 2  ;;  %p199_p6 = scmp.eq.s32.totalorder %s2147_s27, 3 }
   0xc   : > { %p2152_p7 = scmp.ge.s32.totalorder %s2997_s25, 1  ;;  %p264_p9 = scmp.lt.s32.totalorder %s2997_s25, 5 }
   0xd   : > { %s3701_s29 = smov (%p39_p4, %s3699_s29), 0  ;;  %p3091_p8 = por %p199_p6, %p198_p5 }
   0xe   : > { %s175_s8 = ssub.s32 %s2993_s24, %s3701_s29  ;;  %s182_s9 = sadd.s32 1, %s2977_s20 }
   0xf   : > { %s177_s10 = sor.u32 %s176_s30, %s175_s8  ;;  %p265_p10 = pnand %p2152_p7, %p264_p9 }
  0x10   : > { %p180_p11 = scmp.eq.s32.totalorder %s177_s10, 0  ;;  %s3108_s14 = sshll.u32 (!%p265_p10), %s2981_s21, 6 }
  0x11   : > { %268 = sbr.rel (%p265_p10) target bundleno = 579 (0x243), region = 40  ;;  %p318_p12 = scmp.lt.s32.totalorder (!%p265_p10), %s2985_s22, 1 }
  0x12   : > { %s3100_s11 = scalar_select %p180_p11, %s2977_s20, %s182_s9  }
  0x13   : > { %p320_p13 = scmp.lt.s32.totalorder (!%p265_p10), %s3108_s14, 127 }
  0x16   : > { %v3105_v0 = vld [vmem:[%s3682_s1 + $0x18] sm:$0xff]  ;;  %v3116_v1 = vld [vmem:[%s3682_s1 + $0x10] sm:$0xff]  ;;  %s319_s17 = scalar_select %p318_p12, %s2985_s22, 1  ;;  %v3132_v2 = vld [vmem:[%s3682_s1 + $0x8] sm:$0xff]  ;;  %vm996_vm0 = vcmask 1043456   ;;  %vm1522_vm1 = vcmask 523264  }
  0x17   : > { %1623 = vmatpush.bf16.msra.mxu2 %v3105_v0  ;;  %s3120_s26 = scalar_select %p320_p13, %s3108_s14, 127  ;;  %v3141_v8 = vld [vmem:[%s3682_s1] sm:$0xff]  ;;  %vm899_vm2 = vcmask 982016  }
  0x18   : > { %s2155_s27 = sshll.u32 %s319_s17, 7  ;;  %s2827_s30 = smul.u32 124, %s319_s17 }
  0x19   : > { %s323_s21 = sadd.s32 %s2155_s27, %s3120_s26 }
  0x1a   : > { %s3127_s10 = scalar_lea.vmem %s3684_s3, %s2827_s30  ;;  %s2156_s15 = sshll.u32 %s323_s21, 2 }
  0x1b   : > { %1624 = vmatpush.bf16.msra.mxu2 %v3116_v1  ;;  %v2799_v3 = vld [vmem:[%s3127_s10 + $0x38] sm:$0xff]  ;;  %v2798_v6 = vld [vmem:[%s3127_s10 + $0x30] sm:$0xff]  ;;  %s3146_s8 = scalar_lea.vmem %s3681_s0, %s2156_s15  ;;  %v2797_v11 = vld [vmem:[%s3127_s10 + $0x28] sm:$0xff]  ;;  %s2691_s21 = sshll.u32 %s3120_s26, 3 }
  0x1c   : > { %v517_v4 = vld [vmem:[%s3127_s10 + $0x78] sm:$0xf]  ;;  %1000 = vmatpush.bf16.msra.mxu0 %v2799_v3  ;;  %2807 = vmatpush.bf16.msra.mxu3 %v2799_v3  ;;  %v2806_v10 = vld [vmem:[%s3127_s10 + $0x70] sm:$0xff]  ;;  %v2692_v12 = vld [vmem:[%s3146_s8] sm:$0xff]  ;;  %s3163_s13 = scalar_lea.vmem %s3683_s2, %s2691_s21  ;;  %s314_s26 = sand.u32 1, %s2973_s19  }
  0x1d   : > { %v867_v5 = vunpack.c.l.b16 %v517_v4  ;;  %v2805_v13 = vld [vmem:[%s3127_s10 + $0x68] sm:$0xff]  ;;  %v2796_v14 = vld [vmem:[%s3127_s10 + $0x20] sm:$0xff]  ;;  %v2795_v16 = vld [vmem:[%s3127_s10 + $0x18] sm:$0xff]  ;;  %s2153_s16 = sshll.u32 %s314_s26, 9  ;;  %s1985_s15 = scalar_lea.sflag [#allocation3], %s314_s26 }
  0x1e   : > { %v2804_v15 = vld [vmem:[%s3127_s10 + $0x60] sm:$0xff]  ;;  %v2803_v17 = vld [vmem:[%s3127_s10 + $0x58] sm:$0xff]  ;;  %v2794_v18 = vld [vmem:[%s3127_s10 + $0x10] sm:$0xff]  ;;  %s3270_s17 = scalar_lea.vmem [#allocation2], %s2153_s16 }
  0x1f   : > { %1625 = vmatpush.bf16.msra.mxu2 %v3132_v2  ;;  %v883_v7 = vpack.c.b16 %v867_v5, %v867_v5  ;;  %v2802_v19 = vld [vmem:[%s3127_s10 + $0x50] sm:$0xff]  ;;  %v2793_v20 = vld [vmem:[%s3127_s10 + $0x8] sm:$0xff]  ;;  %v2163_v22 = vld [vmem:[%s3163_s13] sm:$0xf] }
  0x20   : > { %1001 = vmatpush.bf16.msra.mxu0 %v2798_v6  ;;  %2808 = vmatpush.bf16.msra.mxu3 %v2798_v6  ;;  %v2693_v21 = vld [vmem:[%s3146_s8 + $0x8] sm:$0xff]  ;;  %v2792_v24 = vld [vmem:[%s3127_s10] sm:$0xff]  ;;  %v2694_v34 = vld [vmem:[%s3146_s8 + $0x10] sm:$0xff] }
  0x21   : > { %v998_v9 = vsel %vm996_vm0, %v883_v7, 0  ;;  %v2801_v23 = vld [vmem:[%s3127_s10 + $0x48] sm:$0xff]  ;;  %v2355_v26 = vld [vmem:[%s3163_s13 + $0x180] sm:$0xf]  ;;  %v2728_v31 = vld [vmem:[%s3163_s13 + $0x4] sm:$0xf] }
  0x22   : > { %1169 = vmatpush.bf16.msra.mxu1 %v998_v9  ;;  %v2729_v25 = vld [vmem:[%s3163_s13 + $0x4] sm:$0xf0]  ;;  %v2800_v30 = vld [vmem:[%s3127_s10 + $0x40] sm:$0xff]  ;;  %v2165_v32 = vld [vmem:[%s3163_s13 + $0x8] sm:$0xf0]  ;;  %s2000_s10 = sshll.u32 %s3270_s17, 4  ;;  %s2001_s10 = int_to_ptr.vmem [resolvable:$true] %s2000_s10 }
  0x23   : > { %1626 = vmatpush.bf16.msra.mxu2 %v3141_v8  ;;  %v2777_v27 = vld [vmem:[%s3163_s13 + $0x184] sm:$0xf0]  ;;  %v2164_v28 = vor.u32 %v2729_v25, %v2163_v22  ;;  %v2168_v33 = vor.u32 %v2728_v31, %v2165_v32  ;;  %v2171_v35 = vld [vmem:[%s3163_s13 + $0x10] sm:$0xf]  ;;  %v2731_v36 = vld [vmem:[%s3163_s13 + $0x14] sm:$0xf0] }
  0x24   : > { %1002 = vmatpush.bf16.msra.mxu0 %v2797_v11  ;;  %2809 = vmatpush.bf16.msra.mxu3 %v2797_v11  ;;  %v2356_v29 = vor.u32 %v2777_v27, %v2355_v26  ;;  %v2363_v37 = vld [vmem:[%s3163_s13 + $0x190] sm:$0xf]  ;;  %v2779_v38 = vld [vmem:[%s3163_s13 + $0x194] sm:$0xf0]  ;;  %v2172_v39 = vor.u32 %v2731_v36, %v2171_v35  ;;  %v2730_v41 = vld [vmem:[%s3163_s13 + $0x14] sm:$0xf] }
  0x25   : > { %v2364_v40 = vor.u32 %v2779_v38, %v2363_v37  ;;  %v2173_v42 = vld [vmem:[%s3163_s13 + $0x18] sm:$0xf0]  ;;  %v2179_v45 = vld [vmem:[%s3163_s13 + $0x20] sm:$0xf]  ;;  %v2733_v46 = vld [vmem:[%s3163_s13 + $0x24] sm:$0xf0] }
  0x26   : > { %1170 = vmatpush.bf16.msra.mxu1 %v2806_v10  ;;  %2653 = vmatmul.msk.bf16.vlgmr.msra.gmra.mxu2 %vm1522_vm1, %v2692_v12  ;;  %v2176_v43 = vor.u32 %v2730_v41, %v2173_v42  ;;  %v2695_v44 = vld [vmem:[%s3146_s8 + $0x18] sm:$0xff]  ;;  %v2371_v47 = vld [vmem:[%s3163_s13 + $0x1a0] sm:$0xf]  ;;  %v2781_v48 = vld [vmem:[%s3163_s13 + $0x1a4] sm:$0xf0]  ;;  %v2180_v49 = vor.u32 %v2733_v46, %v2179_v45 }
  0x27   : > { %v2372_v50 = vor.u32 %v2781_v48, %v2371_v47  ;;  %v2732_v51 = vld [vmem:[%s3163_s13 + $0x24] sm:$0xf]  ;;  %v2181_v52 = vld [vmem:[%s3163_s13 + $0x28] sm:$0xf0]  ;;  %v2187_v55 = vld [vmem:[%s3163_s13 + $0x30] sm:$0xf] }
  0x28   : > { %1003 = vmatpush.bf16.msra.mxu0 %v2796_v14  ;;  %2810 = vmatpush.bf16.msra.mxu3 %v2796_v14  ;;  %v2184_v53 = vor.u32 %v2732_v51, %v2181_v52  ;;  %v2696_v54 = vld [vmem:[%s3146_s8 + $0x20] sm:$0xff]  ;;  %v2735_v56 = vld [vmem:[%s3163_s13 + $0x34] sm:$0xf0]  ;;  %v2379_v57 = vld [vmem:[%s3163_s13 + $0x1b0] sm:$0xf] }
  0x29   : > { %v2783_v58 = vld [vmem:[%s3163_s13 + $0x1b4] sm:$0xf0]  ;;  %v2188_v59 = vor.u32 %v2735_v56, %v2187_v55  ;;  %v2734_v61 = vld [vmem:[%s3163_s13 + $0x34] sm:$0xf]  ;;  %v2189_v62 = vld [vmem:[%s3163_s13 + $0x38] sm:$0xf0] }
  0x2a   : > { %1171 = vmatpush.bf16.msra.mxu1 %v2805_v13  ;;  %v2380_v60 = vor.u32 %v2783_v58, %v2379_v57  ;;  %v2192_v63 = vor.u32 %v2734_v61, %v2189_v62  ;;  %v2387_v3 = vld [vmem:[%s3163_s13 + $0x1c0] sm:$0xf]  ;;  %v2785_v4 = vld [vmem:[%s3163_s13 + $0x1c4] sm:$0xf0]  ;;  %v2736_v7 = vld [vmem:[%s3163_s13 + $0x44] sm:$0xf] }
  0x2b   : > { %v2388_v6 = vor.u32 %v2785_v4, %v2387_v3  ;;  %v2203_v11 = vld [vmem:[%s3163_s13 + $0x50] sm:$0xf]  ;;  %v2739_v12 = vld [vmem:[%s3163_s13 + $0x54] sm:$0xf0]  ;;  %v2741_v22 = vld [vmem:[%s3163_s13 + $0x64] sm:$0xf0] }
  0x2c   : > { %1004 = vmatpush.bf16.msra.mxu0 %v2795_v16  ;;  %2811 = vmatpush.bf16.msra.mxu3 %v2795_v16  ;;  %v2787_v14 = vld [vmem:[%s3163_s13 + $0x1d4] sm:$0xf0]  ;;  %v2740_v27 = vld [vmem:[%s3163_s13 + $0x64] sm:$0xf]  ;;  %v2219_v31 = vld [vmem:[%s3163_s13 + $0x70] sm:$0xf] }
  0x2d   : > { %v2743_v32 = vld [vmem:[%s3163_s13 + $0x74] sm:$0xf0]  ;;  %v2742_v38 = vld [vmem:[%s3163_s13 + $0x74] sm:$0xf]  ;;  %v2701_v42 = vld [vmem:[%s3146_s8 + $0x48] sm:$0xff] }
  0x2e   : > { %1172 = vmatpush.bf16.msra.mxu1 %v2804_v15  ;;  %v2220_v35 = vor.u32 %v2743_v32, %v2219_v31  ;;  %v2776_v45 = vld [vmem:[%s3163_s13 + $0x184] sm:$0xf]  ;;  %v2357_v46 = vld [vmem:[%s3163_s13 + $0x188] sm:$0xf0]  ;;  %v3259_v56 = vld [vmem:[%s3685_s4] ss:$0 sm:$0xff] }
  0x2f   : > { %v2744_v51 = vld [vmem:[%s3163_s13 + $0x84] sm:$0xf]  ;;  %v2229_v52 = vld [vmem:[%s3163_s13 + $0x88] sm:$0xf0]  ;;  %v2702_v62 = vld [vmem:[%s3146_s8 + $0x50] sm:$0xff] }
  0x30   : > { %1005 = vmatpush.bf16.msra.mxu0 %v2794_v18  ;;  %2812 = vmatpush.bf16.msra.mxu3 %v2794_v18  ;;  %v2205_v18 = vld [vmem:[%s3163_s13 + $0x58] sm:$0xf0]  ;;  %v2778_v4 = vld [vmem:[%s3163_s13 + $0x194] sm:$0xf]  ;;  %v2373_v31 = vld [vmem:[%s3163_s13 + $0x1a8] sm:$0xf0] }
  0x32   : > { %1173 = vmatpush.bf16.msra.mxu1 %v2803_v17 }
  0x34   : > { %1006 = vmatpush.bf16.msra.mxu0 %v2793_v20  ;;  %2813 = vmatpush.bf16.msra.mxu3 %v2793_v20  ;;  %v2699_v20 = vld [vmem:[%s3146_s8 + $0x38] sm:$0xff] }
  0x36   : > { %1174 = vmatpush.bf16.msra.mxu1 %v2802_v19  ;;  %2654 = vmatmul.msk.bf16.gmra.mxu2 %vm1522_vm1, %v2693_v21  ;;  %v2211_v21 = vld [vmem:[%s3163_s13 + $0x60] sm:$0xf] }
  0x37   : > { %v2212_v25 = vor.u32 %v2741_v22, %v2211_v21 }
  0x38   : > { %1007 = vmatpush.bf16.msra.mxu0 %v2792_v24  ;;  %2814 = vmatpush.bf16.msra.mxu3 %v2792_v24  ;;  %v2789_v24 = vld [vmem:[%s3163_s13 + $0x1e4] sm:$0xf0] }
  0x3a   : > { %1175 = vmatpush.bf16.msra.mxu1 %v2801_v23 }
  0x3b   : > { %1008 = vmatmul.bf16.vlgmr.msra.gmra.mxu0 %v2164_v28  ;;  %1128 = vmatmul.bf16.vlgmr.msra.gmra.mxu3 %v2356_v29  ;;  %v2213_v28 = vld [vmem:[%s3163_s13 + $0x68] sm:$0xf0] }
  0x3c   : > { %2815 = vmatpush.bf16.msrb.mxu3 %v998_v9  ;;  %v2216_v29 = vor.u32 %v2740_v27, %v2213_v28  ;;  %v2243_v27 = vld [vmem:[%s3163_s13 + $0xa0] sm:$0xf]  ;;  %v2749_v28 = vld [vmem:[%s3163_s13 + $0xa4] sm:$0xf0] }
  0x3e   : > { %1176 = vmatpush.bf16.msra.mxu1 %v2800_v30 }
  0x40   : > { %2816 = vmatpush.bf16.msrb.mxu3 %v2806_v10  ;;  %v2698_v10 = vld [vmem:[%s3146_s8 + $0x30] sm:$0xff] }
  0x41   : > { %2477 = vmatmul.msk.bf16.vlgmr.msra.gmra.mxu1 %vm899_vm2, %v2168_v33  ;;  %v2411_v33 = vld [vmem:[%s3163_s13 + $0x1f0] sm:$0xf] }
  0x44   : > { %2817 = vmatpush.bf16.msrb.mxu3 %v2805_v13  ;;  %v2395_v13 = vld [vmem:[%s3163_s13 + $0x1d0] sm:$0xf] }
  0x45   : > { %v2396_v16 = vor.u32 %v2787_v14, %v2395_v13  ;;  %v2237_v13 = vld [vmem:[%s3163_s13 + $0x98] sm:$0xf0] }
  0x46   : > { %2655 = vmatmul.msk.bf16.gmra.mxu2 %vm1522_vm1, %v2694_v34  ;;  %v2791_v34 = vld [vmem:[%s3163_s13 + $0x1f4] sm:$0xf0] }
  0x47   : > { %v2412_v37 = vor.u32 %v2791_v34, %v2411_v33  ;;  %v2244_v34 = vor.u32 %v2749_v28, %v2243_v27 }
  0x48   : > { %2818 = vmatpush.bf16.msrb.mxu3 %v2804_v15  ;;  %v2204_v15 = vor.u32 %v2739_v12, %v2203_v11  ;;  %v2746_v12 = vld [vmem:[%s3163_s13 + $0x94] sm:$0xf] }
  0x4b   : > { %1013 = vmatmul.bf16.gmra.mxu0 %v2172_v39  ;;  %1133 = vmatmul.bf16.gmra.mxu3 %v2364_v40  ;;  %v2221_v39 = vld [vmem:[%s3163_s13 + $0x78] sm:$0xf0] }
  0x4c   : > { %2819 = vmatpush.bf16.msrb.mxu3 %v2803_v17  ;;  %v2738_v17 = vld [vmem:[%s3163_s13 + $0x54] sm:$0xf]  ;;  %v2224_v40 = vor.u32 %v2742_v38, %v2221_v39  ;;  %v2748_v38 = vld [vmem:[%s3163_s13 + $0xa4] sm:$0xf]  ;;  %v2245_v39 = vld [vmem:[%s3163_s13 + $0xa8] sm:$0xf0] }
  0x50   : > { %2820 = vmatpush.bf16.msrb.mxu3 %v2802_v19  ;;  %v2208_v19 = vor.u32 %v2738_v17, %v2205_v18 }
  0x51   : > { %2478 = vmatmul.msk.bf16.gmra.mxu1 %vm899_vm2, %v2176_v43  ;;  %v2227_v43 = vld [vmem:[%s3163_s13 + $0x80] sm:$0xf] }
  0x54   : > { %2821 = vmatpush.bf16.msrb.mxu3 %v2801_v23  ;;  %v2403_v23 = vld [vmem:[%s3163_s13 + $0x1e0] sm:$0xf] }
  0x55   : > { %v2404_v26 = vor.u32 %v2789_v24, %v2403_v23  ;;  %v2703_v24 = vld [vmem:[%s3146_s8 + $0x58] sm:$0xff] }
  0x56   : > { %2656 = vmatmul.msk.bf16.gmra.mxu2 %vm1522_vm1, %v2695_v44  ;;  %v2745_v44 = vld [vmem:[%s3163_s13 + $0x84] sm:$0xf0] }
  0x57   : > { %v2228_v47 = vor.u32 %v2745_v44, %v2227_v43 }
  0x58   : > { %2822 = vmatpush.bf16.msrb.mxu3 %v2800_v30  ;;  %v2700_v30 = vld [vmem:[%s3146_s8 + $0x40] sm:$0xff] }
  0x5b   : > { %1018 = vmatmul.bf16.gmra.mxu0 %v2180_v49  ;;  %1138 = vmatmul.bf16.gmra.mxu3 %v2372_v50  ;;  %v2360_v50 = vor.u32 %v2776_v45, %v2357_v46 }
  0x5c   : > { %2823 = vmatpush.bf16.msra.mxu3 %v3105_v0  ;;  %v2697_v0 = vld [vmem:[%s3146_s8 + $0x28] sm:$0xff] }
  0x60   : > { %2824 = vmatpush.bf16.msra.mxu3 %v3116_v1  ;;  %v2195_v1 = vld [vmem:[%s3163_s13 + $0x40] sm:$0xf] }
  0x61   : > { %2479 = vmatmul.msk.bf16.gmra.mxu1 %vm899_vm2, %v2184_v53  ;;  %v2232_v53 = vor.u32 %v2744_v51, %v2229_v52 }
  0x64   : > { %2825 = vmatpush.bf16.msra.mxu3 %v3132_v2  ;;  %v2737_v2 = vld [vmem:[%s3163_s13 + $0x44] sm:$0xf0] }
  0x65   : > { %v2196_v5 = vor.u32 %v2737_v2, %v2195_v1  ;;  %v2235_v1 = vld [vmem:[%s3163_s13 + $0x90] sm:$0xf]  ;;  %v2747_v2 = vld [vmem:[%s3163_s13 + $0x94] sm:$0xf0] }
  0x66   : > { %2657 = vmatmul.msk.bf16.gmra.mxu2 %vm1522_vm1, %v2696_v54 }
  0x68   : > { %2826 = vmatpush.bf16.msra.mxu3 %v3141_v8  ;;  %v2197_v8 = vld [vmem:[%s3163_s13 + $0x48] sm:$0xf0] }
  0x69   : > { %v2200_v9 = vor.u32 %v2736_v7, %v2197_v8  ;;  %v2236_v8 = vor.u32 %v2747_v2, %v2235_v1  ;;  %v2750_v2 = vld [vmem:[%s3163_s13 + $0xb4] sm:$0xf] }
  0x6b   : > { %1023 = vmatmul.bf16.gmra.mxu0 %v2188_v59  ;;  %1143 = vmatmul.bf16.gmra.mxu3 %v2380_v60 }
  0x71   : > { %2480 = vmatmul.msk.bf16.gmra.mxu1 %vm899_vm2, %v2192_v63 }
  0x76   : > { %2658 = vmatmul.msk.bf16.gmra.mxu2 %vm1522_vm1, %v2697_v0 }
  0x7b   : > { %1028 = vmatmul.bf16.gmra.mxu0 %v2196_v5  ;;  %1148 = vmatmul.bf16.gmra.mxu3 %v2388_v6  ;;  %v2365_v5 = vld [vmem:[%s3163_s13 + $0x198] sm:$0xf0] }
  0x7c   : > { %v2368_v11 = vor.u32 %v2778_v4, %v2365_v5 }
  0x81   : > { %2481 = vmatmul.msk.bf16.gmra.mxu1 %vm899_vm2, %v2200_v9 }
  0x86   : > { %2659 = vmatmul.msk.bf16.gmra.mxu2 %vm1522_vm1, %v2698_v10 }
  0x8b   : > { %1033 = vmatmul.bf16.gmra.mxu0 %v2204_v15  ;;  %1153 = vmatmul.bf16.gmra.mxu3 %v2396_v16  ;;  %v2240_v16 = vor.u32 %v2746_v12, %v2237_v13 }
  0x91   : > { %2482 = vmatmul.msk.bf16.gmra.mxu1 %vm899_vm2, %v2208_v19 }
  0x96   : > { %2660 = vmatmul.msk.bf16.gmra.mxu2 %vm1522_vm1, %v2699_v20 }
  0x9b   : > { %1038 = vmatmul.bf16.gmra.mxu0 %v2212_v25  ;;  %1158 = vmatmul.bf16.gmra.mxu3 %v2404_v26 }
  0xa1   : > { %2483 = vmatmul.msk.bf16.gmra.mxu1 %vm899_vm2, %v2216_v29 }
  0xa6   : > { %2661 = vmatmul.msk.bf16.gmra.mxu2 %vm1522_vm1, %v2700_v30  ;;  %v2780_v30 = vld [vmem:[%s3163_s13 + $0x1a4] sm:$0xf] }
  0xa9   : > { %v1628_v36 = vpop.f32.mrf.mxu2 }
  0xab   : > { %1043 = vmatmul.bf16.gmra.mxu0 %v2220_v35  ;;  %1163 = vmatmul.bf16.gmra.mxu3 %v2412_v37  ;;  %v2376_v37 = vor.u32 %v2780_v30, %v2373_v31  ;;  %v2752_v30 = vld [vmem:[%s3163_s13 + $0xc4] sm:$0xf]  ;;  %v2261_v31 = vld [vmem:[%s3163_s13 + $0xc8] sm:$0xf0] }
  0xb1   : > { %2484 = vmatmul.msk.bf16.gmra.mxu1 %vm899_vm2, %v2224_v40  ;;  %v1630_v41 = vpop.f32.mrf.mxu2 }
  0xb6   : > { %2662 = vmatmul.msk.bf16.gmra.mxu2 %vm1522_vm1, %v2701_v42  ;;  %v2248_v42 = vor.u32 %v2748_v38, %v2245_v39 }
  0xb8   : > { %v1009_v49 = vpop.f32.mrf.mxu0 }
  0xb9   : > { %v1633_v48 = vpop.f32.mrf.mxu2 }
  0xbb   : > { %1048 = vmatmul.bf16.gmra.mxu0 %v2228_v47  ;;  %2501 = vmatmul.msk.bf16.vlgmr.msrb.gmra.mxu3 %vm899_vm2, %v2360_v50  ;;  %v2704_v50 = vld [vmem:[%s3146_s8 + $0x60] sm:$0xff] }
  0xbe   : > { %v1178_v54 = vpop.f32.mrf.mxu1  ;;  %v3263_v58 = vpop.f32.mrf.mxu3 }
  0xbf   : > { %v1179_v55 = vadd.f32 %v1178_v54, %v1009_v49  ;;  %v2751_v54 = vld [vmem:[%s3163_s13 + $0xb4] sm:$0xf0] }
  0xc0   : > { %v1011_v60 = vpop.f32.mrf.mxu0 }
  0xc1   : > { %v1629_v57 = vadd.f32 %v1628_v36, %v1179_v55  ;;  %2485 = vmatmul.msk.bf16.gmra.mxu1 %vm899_vm2, %v2232_v53  ;;  %v1635_v59 = vpop.f32.mrf.mxu2  ;;  %v2251_v53 = vld [vmem:[%s3163_s13 + $0xb0] sm:$0xf] }
  0xc3   : > { %v1792_v61 = vadd.f32 %v3259_v56, %v1629_v57  ;;  %v2782_v57 = vld [vmem:[%s3163_s13 + $0x1b4] sm:$0xf] }
  0xc5   : > { %v1856_v63 = vmax.f32 %v1792_v61, 0.0 }
  0xc6   : > { %v1180_v0 = vpop.f32.mrf.mxu1  ;;  %2663 = vmatmul.msk.bf16.gmra.mxu2 %vm1522_vm1, %v2702_v62  ;;  %v3276_v7 = vpop.f32.mrf.mxu3  ;;  %v2252_v62 = vor.u32 %v2751_v54, %v2251_v53 }
  0xc7   : > { %1920 = vst [vmem:[%s3270_s17] sm:$0xff] %v1856_v63  ;;  %v1181_v3 = vadd.f32 %v1180_v0, %v1011_v60 }
  0xc8   : > { %v1014_v10 = vpop.f32.mrf.mxu0 }
  0xc9   : > { %v1631_v6 = vadd.f32 %v1630_v41, %v1181_v3  ;;  %v1638_v9 = vpop.f32.mrf.mxu2  ;;  %v2253_v3 = vld [vmem:[%s3163_s13 + $0xb8] sm:$0xf0] }
  0xcb   : > { %v1793_v14 = vadd.f32 %v3259_v56, %v1631_v6  ;;  %1053 = vmatmul.bf16.gmra.mxu0 %v2236_v8  ;;  %2502 = vmatmul.msk.bf16.gmra.mxu3 %vm899_vm2, %v2368_v11  ;;  %v2256_v6 = vor.u32 %v2750_v2, %v2253_v3 }
  0xcd   : > { %v1857_v15 = vmax.f32 %v1793_v14, 0.0 }
  0xce   : > { %v1183_v17 = vpop.f32.mrf.mxu1  ;;  %v3283_v20 = vpop.f32.mrf.mxu3 }
  0xcf   : > { %1921 = vst [vmem:[%s3270_s17 + $0x8] sm:$0xff] %v1857_v15  ;;  %v1184_v18 = vadd.f32 %v1183_v17, %v1014_v10  ;;  %v2705_v15 = vld [vmem:[%s3146_s8 + $0x68] sm:$0xff] }
  0xd0   : > { %v1016_v22 = vpop.f32.mrf.mxu0 }
  0xd1   : > { %v1634_v19 = vadd.f32 %v1633_v48, %v1184_v18  ;;  %2486 = vmatmul.msk.bf16.gmra.mxu1 %vm899_vm2, %v2240_v16  ;;  %v1640_v21 = vpop.f32.mrf.mxu2  ;;  %v2259_v18 = vld [vmem:[%s3163_s13 + $0xc0] sm:$0xf] }
  0xd3   : > { %v1794_v23 = vadd.f32 %v3259_v56, %v1634_v19  ;;  %v2753_v19 = vld [vmem:[%s3163_s13 + $0xc4] sm:$0xf0] }
  0xd5   : > { %v1858_v25 = vmax.f32 %v1794_v23, 0.0  ;;  %v2389_v23 = vld [vmem:[%s3163_s13 + $0x1c8] sm:$0xf0] }
  0xd6   : > { %v1185_v26 = vpop.f32.mrf.mxu1  ;;  %2664 = vmatmul.msk.bf16.gmra.mxu2 %vm1522_vm1, %v2703_v24  ;;  %v3294_v33 = vpop.f32.mrf.mxu3 }
  0xd7   : > { %1922 = vst [vmem:[%s3270_s17 + $0x10] sm:$0xff] %v1858_v25  ;;  %v1186_v29 = vadd.f32 %v1185_v26, %v1016_v22  ;;  %v2784_v22 = vld [vmem:[%s3163_s13 + $0x1c4] sm:$0xf]  ;;  %v2260_v26 = vor.u32 %v2753_v19, %v2259_v18  ;;  %v2405_v18 = vld [vmem:[%s3163_s13 + $0x1e8] sm:$0xf0] }
  0xd8   : > { %v1019_v36 = vpop.f32.mrf.mxu0 }
  0xd9   : > { %v1636_v32 = vadd.f32 %v1635_v59, %v1186_v29  ;;  %v1643_v35 = vpop.f32.mrf.mxu2  ;;  %v2381_v59 = vld [vmem:[%s3163_s13 + $0x1b8] sm:$0xf0]  ;;  %v2392_v29 = vor.u32 %v2784_v22, %v2389_v23 }
  0xda   : > { %v2384_v1 = vor.u32 %v2782_v57, %v2381_v59 }
  0xdb   : > { %v1795_v40 = vadd.f32 %v3259_v56, %v1636_v32  ;;  %1058 = vmatmul.bf16.gmra.mxu0 %v2244_v34  ;;  %2503 = vmatmul.msk.bf16.gmra.mxu3 %vm899_vm2, %v2376_v37 }
  0xdd   : > { %v1859_v41 = vmax.f32 %v1795_v40, 0.0 }
  0xde   : > { %v1188_v43 = vpop.f32.mrf.mxu1  ;;  %v3301_v46 = vpop.f32.mrf.mxu3 }
  0xdf   : > { %1923 = vst [vmem:[%s3270_s17 + $0x18] sm:$0xff] %v1859_v41  ;;  %v1189_v44 = vadd.f32 %v1188_v43, %v1019_v36  ;;  %v2706_v43 = vld [vmem:[%s3146_s8 + $0x70] sm:$0xff] }
  0xe0   : > { %v1021_v48 = vpop.f32.mrf.mxu0 }
  0xe1   : > { %v1639_v45 = vadd.f32 %v1638_v9, %v1189_v44  ;;  %2487 = vmatmul.msk.bf16.gmra.mxu1 %vm899_vm2, %v2248_v42  ;;  %v1645_v47 = vpop.f32.mrf.mxu2 }
  0xe3   : > { %v1796_v49 = vadd.f32 %v3259_v56, %v1639_v45 }
  0xe5   : > { %v1860_v51 = vmax.f32 %v1796_v49, 0.0 }
  0xe6   : > { %v1190_v52 = vpop.f32.mrf.mxu1  ;;  %2665 = vmatmul.msk.bf16.gmra.mxu2 %vm1522_vm1, %v2704_v50  ;;  %v3312_v61 = vpop.f32.mrf.mxu3  ;;  %v2786_v50 = vld [vmem:[%s3163_s13 + $0x1d4] sm:$0xf] }
  0xe7   : > { %1924 = vst [vmem:[%s3270_s17 + $0x20] sm:$0xff] %v1860_v51  ;;  %v1191_v55 = vadd.f32 %v1190_v52, %v1021_v48  ;;  %v2755_v48 = vld [vmem:[%s3163_s13 + $0xd4] sm:$0xf0]  ;;  %v2397_v51 = vld [vmem:[%s3163_s13 + $0x1d8] sm:$0xf0] }
  0xe8   : > { %v1024_v0 = vpop.f32.mrf.mxu0  ;;  %v2400_v59 = vor.u32 %v2786_v50, %v2397_v51 }
  0xe9   : > { %v1641_v60 = vadd.f32 %v1640_v21, %v1191_v55  ;;  %v1648_v63 = vpop.f32.mrf.mxu2 }
  0xeb   : > { %v1797_v4 = vadd.f32 %v3259_v56, %v1641_v60  ;;  %1063 = vmatmul.bf16.gmra.mxu0 %v2252_v62  ;;  %2504 = vmatmul.msk.bf16.gmra.mxu3 %vm899_vm2, %v2384_v1  ;;  %v2754_v60 = vld [vmem:[%s3163_s13 + $0xd4] sm:$0xf]  ;;  %v2269_v62 = vld [vmem:[%s3163_s13 + $0xd8] sm:$0xf0] }
  0xec   : > { %v2272_v1 = vor.u32 %v2754_v60, %v2269_v62  ;;  %v2285_v60 = vld [vmem:[%s3163_s13 + $0xf8] sm:$0xf0] }
  0xed   : > { %v1861_v5 = vmax.f32 %v1797_v4, 0.0 }
  0xee   : > { %v1193_v8 = vpop.f32.mrf.mxu1  ;;  %v3319_v11 = vpop.f32.mrf.mxu3 }
  0xef   : > { %1925 = vst [vmem:[%s3270_s17 + $0x28] sm:$0xff] %v1861_v5  ;;  %v1194_v9 = vadd.f32 %v1193_v8, %v1024_v0 }
  0xf0   : > { %v1026_v13 = vpop.f32.mrf.mxu0 }
  0xf1   : > { %v1644_v10 = vadd.f32 %v1643_v35, %v1194_v9  ;;  %2488 = vmatmul.msk.bf16.gmra.mxu1 %vm899_vm2, %v2256_v6  ;;  %v1650_v12 = vpop.f32.mrf.mxu2  ;;  %v2264_v35 = vor.u32 %v2752_v30, %v2261_v31 }
  0xf3   : > { %v1798_v14 = vadd.f32 %v3259_v56, %v1644_v10  ;;  %v2707_v10 = vld [vmem:[%s3146_s8 + $0x78] sm:$0xff] }
  0xf5   : > { %v1862_v16 = vmax.f32 %v1798_v14, 0.0  ;;  %v2275_v14 = vld [vmem:[%s3163_s13 + $0xe0] sm:$0xf] }
  0xf6   : > { %v1195_v17 = vpop.f32.mrf.mxu1  ;;  %2666 = vmatmul.msk.bf16.gmra.mxu2 %vm1522_vm1, %v2705_v15  ;;  %v3330_v25 = vpop.f32.mrf.mxu3  ;;  %v2757_v15 = vld [vmem:[%s3163_s13 + $0xe4] sm:$0xf0] }
  0xf7   : > { %1926 = vst [vmem:[%s3270_s17 + $0x30] sm:$0xff] %v1862_v16  ;;  %v1196_v21 = vadd.f32 %v1195_v17, %v1026_v13  ;;  %v2788_v17 = vld [vmem:[%s3163_s13 + $0x1e4] sm:$0xf]  ;;  %v2276_v22 = vor.u32 %v2757_v15, %v2275_v14  ;;  %v2291_v14 = vld [vmem:[%s3163_s13 + $0x100] sm:$0xf] }
  0xf8   : > { %v1029_v28 = vpop.f32.mrf.mxu0  ;;  %v2761_v15 = vld [vmem:[%s3163_s13 + $0x104] sm:$0xf0] }
  0xf9   : > { %v1646_v24 = vadd.f32 %v1645_v47, %v1196_v21  ;;  %v1653_v27 = vpop.f32.mrf.mxu2  ;;  %v2267_v47 = vld [vmem:[%s3163_s13 + $0xd0] sm:$0xf] }
  0xfa   : > { %v2268_v54 = vor.u32 %v2755_v48, %v2267_v47  ;;  %v2790_v48 = vld [vmem:[%s3163_s13 + $0x1f4] sm:$0xf] }
  0xfb   : > { %v1799_v32 = vadd.f32 %v3259_v56, %v1646_v24  ;;  %1068 = vmatmul.bf16.gmra.mxu0 %v2260_v26  ;;  %2505 = vmatmul.msk.bf16.gmra.mxu3 %vm899_vm2, %v2392_v29  ;;  %v2408_v26 = vor.u32 %v2788_v17, %v2405_v18 }
  0xfd   : > { %v1863_v34 = vmax.f32 %v1799_v32, 0.0 }
  0xfe   : > { %v1198_v36 = vpop.f32.mrf.mxu1  ;;  %v3337_v39 = vpop.f32.mrf.mxu3 }
  0xff   : > { %1927 = vst [vmem:[%s3270_s17 + $0x38] sm:$0xff] %v1863_v34  ;;  %v1199_v37 = vadd.f32 %v1198_v36, %v1029_v28  ;;  %v2277_v28 = vld [vmem:[%s3163_s13 + $0xe8] sm:$0xf0] }
 0x100   : > { %v1031_v41 = vpop.f32.mrf.mxu0 }
 0x101   : > { %v1649_v38 = vadd.f32 %v1648_v63, %v1199_v37  ;;  %2489 = vmatmul.msk.bf16.gmra.mxu1 %vm899_vm2, %v2264_v35  ;;  %v1655_v40 = vpop.f32.mrf.mxu2 }
 0x103   : > { %v1800_v42 = vadd.f32 %v3259_v56, %v1649_v38 }
 0x105   : > { %v1864_v44 = vmax.f32 %v1800_v42, 0.0 }
 0x106   : > { %v1200_v45 = vpop.f32.mrf.mxu1  ;;  %2667 = vmatmul.msk.bf16.gmra.mxu2 %vm1522_vm1, %v2706_v43  ;;  %v3348_v53 = vpop.f32.mrf.mxu3 }
 0x107   : > { %1928 = vst [vmem:[%s3270_s17 + $0x40] sm:$0xff] %v1864_v44  ;;  %v1201_v49 = vadd.f32 %v1200_v45, %v1031_v41  ;;  %v2708_v41 = vld [vmem:[%s3146_s8 + $0x80] sm:$0xff]  ;;  %v2283_v44 = vld [vmem:[%s3163_s13 + $0xf0] sm:$0xf]  ;;  %v2759_v45 = vld [vmem:[%s3163_s13 + $0xf4] sm:$0xf0] }
 0x108   : > { %v1034_v57 = vpop.f32.mrf.mxu0 }
 0x109   : > { %v1651_v52 = vadd.f32 %v1650_v12, %v1201_v49  ;;  %v1658_v55 = vpop.f32.mrf.mxu2  ;;  %v2413_v49 = vld [vmem:[%s3163_s13 + $0x1f8] sm:$0xf0] }
 0x10b   : > { %v1801_v63 = vadd.f32 %v3259_v56, %v1651_v52  ;;  %1073 = vmatmul.bf16.gmra.mxu0 %v2268_v54  ;;  %2506 = vmatmul.msk.bf16.gmra.mxu3 %vm899_vm2, %v2400_v59  ;;  %v2284_v52 = vor.u32 %v2759_v45, %v2283_v44  ;;  %v2758_v59 = vld [vmem:[%s3163_s13 + $0xf4] sm:$0xf]  ;;  %v2299_v44 = vld [vmem:[%s3163_s13 + $0x110] sm:$0xf]  ;;  %v2763_v45 = vld [vmem:[%s3163_s13 + $0x114] sm:$0xf0] }
 0x10d   : > { %v1865_v0 = vmax.f32 %v1801_v63, 0.0 }
 0x10e   : > { %v1203_v2 = vpop.f32.mrf.mxu1  ;;  %v3355_v5 = vpop.f32.mrf.mxu3 }
 0x10f   : > { %1929 = vst [vmem:[%s3270_s17 + $0x48] sm:$0xff] %v1865_v0  ;;  %v1204_v3 = vadd.f32 %v1203_v2, %v1034_v57  ;;  %v2416_v57 = vor.u32 %v2790_v48, %v2413_v49  ;;  %v2288_v0 = vor.u32 %v2758_v59, %v2285_v60  ;;  %v2301_v59 = vld [vmem:[%s3163_s13 + $0x118] sm:$0xf0] }
 0x110   : > { %v1036_v8 = vpop.f32.mrf.mxu0 }
 0x111   : > { %v1654_v4 = vadd.f32 %v1653_v27, %v1204_v3  ;;  %2490 = vmatmul.msk.bf16.gmra.mxu1 %vm899_vm2, %v2272_v1  ;;  %v1660_v6 = vpop.f32.mrf.mxu2  ;;  %v2756_v27 = vld [vmem:[%s3163_s13 + $0xe4] sm:$0xf] }
 0x112   : > { %v2280_v31 = vor.u32 %v2756_v27, %v2277_v28  ;;  %v2293_v27 = vld [vmem:[%s3163_s13 + $0x108] sm:$0xf0] }
 0x113   : > { %v1802_v9 = vadd.f32 %v3259_v56, %v1654_v4 }
 0x115   : > { %v1866_v12 = vmax.f32 %v1802_v9, 0.0 }
 0x116   : > { %v1205_v13 = vpop.f32.mrf.mxu1  ;;  %2668 = vmatmul.msk.bf16.gmra.mxu2 %vm1522_vm1, %v2707_v10  ;;  %v3366_v21 = vpop.f32.mrf.mxu3  ;;  %v2709_v10 = vld [vmem:[%s3146_s8 + $0x88] sm:$0xff] }
 0x117   : > { %1930 = vst [vmem:[%s3270_s17 + $0x50] sm:$0xff] %v1866_v12  ;;  %v1206_v16 = vadd.f32 %v1205_v13, %v1036_v8 }
 0x118   : > { %v1039_v24 = vpop.f32.mrf.mxu0 }
 0x119   : > { %v1656_v19 = vadd.f32 %v1655_v40, %v1206_v16  ;;  %v1663_v23 = vpop.f32.mrf.mxu2 }
 0x11b   : > { %v1803_v29 = vadd.f32 %v3259_v56, %v1656_v19  ;;  %1078 = vmatmul.bf16.gmra.mxu0 %v2276_v22  ;;  %2507 = vmatmul.msk.bf16.gmra.mxu3 %vm899_vm2, %v2408_v26  ;;  %v2292_v19 = vor.u32 %v2761_v15, %v2291_v14  ;;  %v2760_v26 = vld [vmem:[%s3163_s13 + $0x104] sm:$0xf]  ;;  %v2307_v14 = vld [vmem:[%s3163_s13 + $0x120] sm:$0xf]  ;;  %v2765_v15 = vld [vmem:[%s3163_s13 + $0x124] sm:$0xf0] }
 0x11d   : > { %v1867_v30 = vmax.f32 %v1803_v29, 0.0 }
 0x11e   : > { %v1208_v32 = vpop.f32.mrf.mxu1  ;;  %v3373_v36 = vpop.f32.mrf.mxu3 }
 0x11f   : > { %1931 = vst [vmem:[%s3270_s17 + $0x58] sm:$0xff] %v1867_v30  ;;  %v1209_v34 = vadd.f32 %v1208_v32, %v1039_v24  ;;  %v2717_v24 = vld [vmem:[%s3146_s8 + $0xc8] sm:$0xff]  ;;  %v2296_v30 = vor.u32 %v2760_v26, %v2293_v27  ;;  %v2719_v26 = vld [vmem:[%s3146_s8 + $0xd8] sm:$0xff]  ;;  %v2764_v27 = vld [vmem:[%s3163_s13 + $0x124] sm:$0xf] }
 0x120   : > { %v1041_v38 = vpop.f32.mrf.mxu0 }
 0x121   : > { %v1659_v35 = vadd.f32 %v1658_v55, %v1209_v34  ;;  %2491 = vmatmul.msk.bf16.gmra.mxu1 %vm899_vm2, %v2280_v31  ;;  %v1665_v37 = vpop.f32.mrf.mxu2 }
 0x123   : > { %v1804_v40 = vadd.f32 %v3259_v56, %v1659_v35 }
 0x125   : > { %v1868_v42 = vmax.f32 %v1804_v40, 0.0 }
 0x126   : > { %v1210_v43 = vpop.f32.mrf.mxu1  ;;  %2669 = vmatmul.msk.bf16.gmra.mxu2 %vm1522_vm1, %v2708_v41  ;;  %v3384_v51 = vpop.f32.mrf.mxu3  ;;  %v2710_v41 = vld [vmem:[%s3146_s8 + $0x90] sm:$0xff] }
 0x127   : > { %1932 = vst [vmem:[%s3270_s17 + $0x60] sm:$0xff] %v1868_v42  ;;  %v1211_v47 = vadd.f32 %v1210_v43, %v1041_v38 }
 0x128   : > { %v1044_v55 = vpop.f32.mrf.mxu0 }
 0x129   : > { %v1661_v50 = vadd.f32 %v1660_v6, %v1211_v47  ;;  %v1668_v54 = vpop.f32.mrf.mxu2 }
 0x12b   : > { %v1805_v62 = vadd.f32 %v3259_v56, %v1661_v50  ;;  %1083 = vmatmul.bf16.gmra.mxu0 %v2284_v52  ;;  %2508 = vmatmul.msk.bf16.gmra.mxu3 %vm899_vm2, %v2416_v57  ;;  %v2300_v50 = vor.u32 %v2763_v45, %v2299_v44  ;;  %v2762_v57 = vld [vmem:[%s3163_s13 + $0x114] sm:$0xf] }
 0x12d   : > { %v1869_v63 = vmax.f32 %v1805_v62, 0.0 }
 0x12e   : > { %v1213_v1 = vpop.f32.mrf.mxu1  ;;  %v3391_v4 = vpop.f32.mrf.mxu3 }
 0x12f   : > { %1933 = vst [vmem:[%s3270_s17 + $0x68] sm:$0xff] %v1869_v63  ;;  %v1214_v2 = vadd.f32 %v1213_v1, %v1044_v55  ;;  %v2718_v55 = vld [vmem:[%s3146_s8 + $0xd0] sm:$0xff]  ;;  %v2304_v63 = vor.u32 %v2762_v57, %v2301_v59 }
 0x130   : > { %v1046_v8 = vpop.f32.mrf.mxu0 }
 0x131   : > { %v1664_v3 = vadd.f32 %v1663_v23, %v1214_v2  ;;  %2492 = vmatmul.msk.bf16.gmra.mxu1 %vm899_vm2, %v2288_v0  ;;  %v1670_v6 = vpop.f32.mrf.mxu2 }
 0x133   : > { %v1806_v9 = vadd.f32 %v3259_v56, %v1664_v3 }
 0x135   : > { %v1870_v12 = vmax.f32 %v1806_v9, 0.0 }
 0x136   : > { %v1215_v13 = vpop.f32.mrf.mxu1  ;;  %2670 = vmatmul.msk.bf16.gmra.mxu2 %vm1522_vm1, %v2709_v10  ;;  %v3400_v18 = vpop.f32.mrf.mxu3  ;;  %v2711_v10 = vld [vmem:[%s3146_s8 + $0x98] sm:$0xff] }
 0x137   : > { %1934 = vst [vmem:[%s3270_s17 + $0x70] sm:$0xff] %v1870_v12  ;;  %v1216_v16 = vadd.f32 %v1215_v13, %v1046_v8 }
 0x138   : > { %v1049_v23 = vpop.f32.mrf.mxu0 }
 0x139   : > { %v1666_v17 = vadd.f32 %v1665_v37, %v1216_v16  ;;  %v1673_v22 = vpop.f32.mrf.mxu2 }
 0x13b   : > { %v1807_v28 = vadd.f32 %v3259_v56, %v1666_v17  ;;  %1088 = vmatmul.bf16.gmra.mxu0 %v2292_v19  ;;  %2678 = vmatmul.msk.bf16.vlgmr.msra.gmra.mxu3 %vm1522_vm1, %v2717_v24 }
 0x13d   : > { %v1871_v29 = vmax.f32 %v1807_v28, 0.0  ;;  %v2309_v28 = vld [vmem:[%s3163_s13 + $0x128] sm:$0xf0] }
 0x13e   : > { %v1218_v31 = vpop.f32.mrf.mxu1  ;;  %v3409_v35 = vpop.f32.mrf.mxu3 }
 0x13f   : > { %1935 = vst [vmem:[%s3270_s17 + $0x78] sm:$0xff] %v1871_v29  ;;  %v1219_v32 = vadd.f32 %v1218_v31, %v1049_v23  ;;  %v2312_v31 = vor.u32 %v2764_v27, %v2309_v28 }
 0x140   : > { %v1051_v38 = vpop.f32.mrf.mxu0 }
 0x141   : > { %v1669_v34 = vadd.f32 %v1668_v54, %v1219_v32  ;;  %2493 = vmatmul.msk.bf16.gmra.mxu1 %vm899_vm2, %v2296_v30  ;;  %v1675_v37 = vpop.f32.mrf.mxu2 }
 0x143   : > { %v1808_v40 = vadd.f32 %v3259_v56, %v1669_v34 }
 0x145   : > { %v1872_v42 = vmax.f32 %v1808_v40, 0.0 }
 0x146   : > { %v1220_v43 = vpop.f32.mrf.mxu1  ;;  %2671 = vmatmul.msk.bf16.gmra.mxu2 %vm1522_vm1, %v2710_v41  ;;  %v3417_v49 = vpop.f32.mrf.mxu3 }
 0x147   : > { %1936 = vst [vmem:[%s3270_s17 + $0x80] sm:$0xff] %v1872_v42  ;;  %v1221_v47 = vadd.f32 %v1220_v43, %v1051_v38  ;;  %v2712_v43 = vld [vmem:[%s3146_s8 + $0xa0] sm:$0xff] }
 0x148   : > { %v1054_v54 = vpop.f32.mrf.mxu0 }
 0x149   : > { %v1671_v48 = vadd.f32 %v1670_v6, %v1221_v47  ;;  %v1678_v52 = vpop.f32.mrf.mxu2  ;;  %v2315_v47 = vld [vmem:[%s3163_s13 + $0x130] sm:$0xf] }
 0x14b   : > { %v1809_v60 = vadd.f32 %v3259_v56, %v1671_v48  ;;  %1093 = vmatmul.bf16.gmra.mxu0 %v2300_v50  ;;  %2679 = vmatmul.msk.bf16.gmra.mxu3 %vm1522_vm1, %v2718_v55  ;;  %v2767_v48 = vld [vmem:[%s3163_s13 + $0x134] sm:$0xf0] }
 0x14c   : > { %v2316_v55 = vor.u32 %v2767_v48, %v2315_v47 }
 0x14d   : > { %v1873_v62 = vmax.f32 %v1809_v60, 0.0  ;;  %v2720_v60 = vld [vmem:[%s3146_s8 + $0xe0] sm:$0xff] }
 0x14e   : > { %v1223_v0 = vpop.f32.mrf.mxu1  ;;  %v3426_v3 = vpop.f32.mrf.mxu3 }
 0x14f   : > { %1937 = vst [vmem:[%s3270_s17 + $0x88] sm:$0xff] %v1873_v62  ;;  %v1224_v1 = vadd.f32 %v1223_v0, %v1054_v54  ;;  %v2766_v62 = vld [vmem:[%s3163_s13 + $0x134] sm:$0xf] }
 0x150   : > { %v1056_v8 = vpop.f32.mrf.mxu0 }
 0x151   : > { %v1674_v2 = vadd.f32 %v1673_v22, %v1224_v1  ;;  %2494 = vmatmul.msk.bf16.gmra.mxu1 %vm899_vm2, %v2304_v63  ;;  %v1680_v6 = vpop.f32.mrf.mxu2  ;;  %v2308_v22 = vor.u32 %v2765_v15, %v2307_v14  ;;  %v2317_v63 = vld [vmem:[%s3163_s13 + $0x138] sm:$0xf0]  ;;  %v2713_v15 = vld [vmem:[%s3146_s8 + $0xa8] sm:$0xff] }
 0x153   : > { %v1810_v9 = vadd.f32 %v3259_v56, %v1674_v2  ;;  %v2320_v2 = vor.u32 %v2766_v62, %v2317_v63  ;;  %v2771_v62 = vld [vmem:[%s3163_s13 + $0x154] sm:$0xf0] }
 0x155   : > { %v1874_v12 = vmax.f32 %v1810_v9, 0.0 }
 0x156   : > { %v1225_v13 = vpop.f32.mrf.mxu1  ;;  %2672 = vmatmul.msk.bf16.gmra.mxu2 %vm1522_vm1, %v2711_v10  ;;  %v3434_v19 = vpop.f32.mrf.mxu3 }
 0x157   : > { %1938 = vst [vmem:[%s3270_s17 + $0x90] sm:$0xff] %v1874_v12  ;;  %v1226_v16 = vadd.f32 %v1225_v13, %v1056_v8 }
 0x158   : > { %v1059_v24 = vpop.f32.mrf.mxu0 }
 0x159   : > { %v1676_v17 = vadd.f32 %v1675_v37, %v1226_v16  ;;  %v1683_v23 = vpop.f32.mrf.mxu2 }
 0x15b   : > { %v1811_v29 = vadd.f32 %v3259_v56, %v1676_v17  ;;  %1098 = vmatmul.bf16.gmra.mxu0 %v2308_v22  ;;  %2680 = vmatmul.msk.bf16.gmra.mxu3 %vm1522_vm1, %v2719_v26  ;;  %v2323_v22 = vld [vmem:[%s3163_s13 + $0x140] sm:$0xf] }
 0x15d   : > { %v1875_v30 = vmax.f32 %v1811_v29, 0.0 }
 0x15e   : > { %v1228_v32 = vpop.f32.mrf.mxu1  ;;  %v3443_v38 = vpop.f32.mrf.mxu3 }
 0x15f   : > { %1939 = vst [vmem:[%s3270_s17 + $0x98] sm:$0xff] %v1875_v30  ;;  %v1229_v34 = vadd.f32 %v1228_v32, %v1059_v24  ;;  %v2769_v24 = vld [vmem:[%s3163_s13 + $0x144] sm:$0xf0]  ;;  %v2768_v32 = vld [vmem:[%s3163_s13 + $0x144] sm:$0xf] }
 0x160   : > { %v1061_v41 = vpop.f32.mrf.mxu0  ;;  %v2324_v28 = vor.u32 %v2769_v24, %v2323_v22 }
 0x161   : > { %v1679_v37 = vadd.f32 %v1678_v52, %v1229_v34  ;;  %2495 = vmatmul.msk.bf16.gmra.mxu1 %vm899_vm2, %v2312_v31  ;;  %v1685_v40 = vpop.f32.mrf.mxu2  ;;  %v2721_v31 = vld [vmem:[%s3146_s8 + $0xe8] sm:$0xff] }
 0x162   : > { %v2325_v34 = vld [vmem:[%s3163_s13 + $0x148] sm:$0xf0] }
 0x163   : > { %v1812_v42 = vadd.f32 %v3259_v56, %v1679_v37 }
 0x165   : > { %v1876_v44 = vmax.f32 %v1812_v42, 0.0  ;;  %v2328_v42 = vor.u32 %v2768_v32, %v2325_v34  ;;  %v2339_v34 = vld [vmem:[%s3163_s13 + $0x160] sm:$0xf] }
 0x166   : > { %v1230_v45 = vpop.f32.mrf.mxu1  ;;  %2673 = vmatmul.msk.bf16.gmra.mxu2 %vm1522_vm1, %v2712_v43  ;;  %v3451_v54 = vpop.f32.mrf.mxu3 }
 0x167   : > { %1940 = vst [vmem:[%s3270_s17 + $0xa0] sm:$0xff] %v1876_v44  ;;  %v1231_v50 = vadd.f32 %v1230_v45, %v1061_v41 }
 0x168   : > { %v1064_v59 = vpop.f32.mrf.mxu0 }
 0x169   : > { %v1681_v52 = vadd.f32 %v1680_v6, %v1231_v50  ;;  %v1688_v57 = vpop.f32.mrf.mxu2 }
 0x16b   : > { %v1813_v0 = vadd.f32 %v3259_v56, %v1681_v52  ;;  %1103 = vmatmul.bf16.gmra.mxu0 %v2316_v55  ;;  %2681 = vmatmul.msk.bf16.gmra.mxu3 %vm1522_vm1, %v2720_v60  ;;  %v2714_v52 = vld [vmem:[%s3146_s8 + $0xb0] sm:$0xff] }
 0x16c   : > { %v2331_v60 = vld [vmem:[%s3163_s13 + $0x150] sm:$0xf] }
 0x16d   : > { %v1877_v1 = vmax.f32 %v1813_v0, 0.0 }
 0x16e   : > { %v1233_v8 = vpop.f32.mrf.mxu1  ;;  %v3460_v10 = vpop.f32.mrf.mxu3 }
 0x16f   : > { %1941 = vst [vmem:[%s3270_s17 + $0xa8] sm:$0xff] %v1877_v1  ;;  %v1234_v6 = vadd.f32 %v1233_v8, %v1064_v59  ;;  %v2332_v1 = vor.u32 %v2771_v62, %v2331_v60 }
 0x170   : > { %v1066_v13 = vpop.f32.mrf.mxu0 }
 0x171   : > { %v1684_v9 = vadd.f32 %v1683_v23, %v1234_v6  ;;  %2496 = vmatmul.msk.bf16.gmra.mxu1 %vm899_vm2, %v2320_v2  ;;  %v1690_v12 = vpop.f32.mrf.mxu2  ;;  %v2722_v6 = vld [vmem:[%s3146_s8 + $0xf0] sm:$0xff] }
 0x173   : > { %v1814_v14 = vadd.f32 %v3259_v56, %v1684_v9  ;;  %v2770_v9 = vld [vmem:[%s3163_s13 + $0x154] sm:$0xf] }
 0x175   : > { %v1878_v16 = vmax.f32 %v1814_v14, 0.0 }
 0x176   : > { %v1235_v17 = vpop.f32.mrf.mxu1  ;;  %2674 = vmatmul.msk.bf16.gmra.mxu2 %vm1522_vm1, %v2713_v15  ;;  %v3468_v27 = vpop.f32.mrf.mxu3 }
 0x177   : > { %1942 = vst [vmem:[%s3270_s17 + $0xb0] sm:$0xff] %v1878_v16  ;;  %v1236_v26 = vadd.f32 %v1235_v17, %v1066_v13  ;;  %v2333_v13 = vld [vmem:[%s3163_s13 + $0x158] sm:$0xf0] }
 0x178   : > { %v1069_v30 = vpop.f32.mrf.mxu0  ;;  %v2336_v16 = vor.u32 %v2770_v9, %v2333_v13  ;;  %v2716_v9 = vld [vmem:[%s3146_s8 + $0xc0] sm:$0xff] }
 0x179   : > { %v1686_v23 = vadd.f32 %v1685_v40, %v1236_v26  ;;  %v1693_v29 = vpop.f32.mrf.mxu2 }
 0x17b   : > { %v1815_v37 = vadd.f32 %v3259_v56, %v1686_v23  ;;  %1108 = vmatmul.bf16.gmra.mxu0 %v2324_v28  ;;  %2682 = vmatmul.msk.bf16.gmra.mxu3 %vm1522_vm1, %v2721_v31 }
 0x17d   : > { %v1879_v41 = vmax.f32 %v1815_v37, 0.0  ;;  %v2773_v37 = vld [vmem:[%s3163_s13 + $0x164] sm:$0xf0] }
 0x17e   : > { %v1238_v43 = vpop.f32.mrf.mxu1  ;;  %v3477_v45 = vpop.f32.mrf.mxu3 }
 0x17f   : > { %1943 = vst [vmem:[%s3270_s17 + $0xb8] sm:$0xff] %v1879_v41  ;;  %v1239_v40 = vadd.f32 %v1238_v43, %v1069_v30  ;;  %v2715_v30 = vld [vmem:[%s3146_s8 + $0xb8] sm:$0xff]  ;;  %v2340_v43 = vor.u32 %v2773_v37, %v2339_v34 }
 0x180   : > { %v1071_v48 = vpop.f32.mrf.mxu0 }
 0x181   : > { %v1689_v44 = vadd.f32 %v1688_v57, %v1239_v40  ;;  %2497 = vmatmul.msk.bf16.gmra.mxu1 %vm899_vm2, %v2328_v42  ;;  %v1695_v47 = vpop.f32.mrf.mxu2 }
 0x183   : > { %v1816_v50 = vadd.f32 %v3259_v56, %v1689_v44 }
 0x185   : > { %v1880_v55 = vmax.f32 %v1816_v50, 0.0  ;;  %v2772_v50 = vld [vmem:[%s3163_s13 + $0x164] sm:$0xf] }
 0x186   : > { %v1240_v59 = vpop.f32.mrf.mxu1  ;;  %2675 = vmatmul.msk.bf16.gmra.mxu2 %vm1522_vm1, %v2714_v52  ;;  %v3485_v0 = vpop.f32.mrf.mxu3  ;;  %v2341_v52 = vld [vmem:[%s3163_s13 + $0x168] sm:$0xf0] }
 0x187   : > { %1944 = vst [vmem:[%s3270_s17 + $0xc0] sm:$0xff] %v1880_v55  ;;  %v1241_v63 = vadd.f32 %v1240_v59, %v1071_v48  ;;  %v2723_v48 = vld [vmem:[%s3146_s8 + $0xf8] sm:$0xff]  ;;  %v2344_v60 = vor.u32 %v2772_v50, %v2341_v52  ;;  %s2687_s8 = sshll.u32 %s2985_s22, 7 }
 0x188   : > { %v1074_v8 = vpop.f32.mrf.mxu0  ;;  %s1997_s21 = sadd.s32 %s2687_s8, %s3108_s14 }
 0x189   : > { %v1691_v57 = vadd.f32 %v1690_v12, %v1241_v63  ;;  %v1698_v2 = vpop.f32.mrf.mxu2  ;;  %s2688_s22 = sshll.u32 %s1997_s21, 3  ;;  %s2923_s21 = scalar_lea.hbm %s3686_s5, 2048 }
 0x18a   : > { %s1999_s14 = scalar_lea.hbm %s3686_s5, %s2688_s22 }
 0x18b   : > { %v1817_v14 = vadd.f32 %v3259_v56, %v1691_v57  ;;  %1113 = vmatmul.bf16.gmra.mxu0 %v2332_v1  ;;  %2683 = vmatmul.msk.bf16.gmra.mxu3 %vm1522_vm1, %v2722_v6 }
 0x18d   : > { %v1881_v15 = vmax.f32 %v1817_v14, 0.0 }
 0x18e   : > { %v1243_v17 = vpop.f32.mrf.mxu1  ;;  %v3494_v24 = vpop.f32.mrf.mxu3 }
 0x18f   : > { %1945 = vst [vmem:[%s3270_s17 + $0xc8] sm:$0xff] %v1881_v15  ;;  %v1244_v12 = vadd.f32 %v1243_v17, %v1074_v8  ;;  %v2347_v15 = vld [vmem:[%s3163_s13 + $0x170] sm:$0xf] }
 0x190   : > { %v1076_v23 = vpop.f32.mrf.mxu0 }
 0x191   : > { %v1694_v22 = vadd.f32 %v1693_v29, %v1244_v12  ;;  %2498 = vmatmul.msk.bf16.gmra.mxu1 %vm899_vm2, %v2336_v16  ;;  %v1700_v26 = vpop.f32.mrf.mxu2  ;;  %v2775_v16 = vld [vmem:[%s3163_s13 + $0x174] sm:$0xf0] }
 0x193   : > { %v1818_v28 = vadd.f32 %v3259_v56, %v1694_v22  ;;  %v2348_v22 = vor.u32 %v2775_v16, %v2347_v15 }
 0x195   : > { %v1882_v31 = vmax.f32 %v1818_v28, 0.0 }
 0x196   : > { %v1245_v32 = vpop.f32.mrf.mxu1  ;;  %2676 = vmatmul.msk.bf16.gmra.mxu2 %vm1522_vm1, %v2715_v30  ;;  %v3502_v42 = vpop.f32.mrf.mxu3  ;;  %v2774_v30 = vld [vmem:[%s3163_s13 + $0x174] sm:$0xf] }
 0x197   : > { %1946 = vst [vmem:[%s3270_s17 + $0xd0] sm:$0xff] %v1882_v31  ;;  %v1246_v41 = vadd.f32 %v1245_v32, %v1076_v23  ;;  %v2349_v31 = vld [vmem:[%s3163_s13 + $0x178] sm:$0xf0]  ;;  %s2002_s13 = sshll.u32 %s1999_s14, 4  ;;  %s2003_s13 = int_to_ptr.hbm [resolvable:$true] %s2002_s13 }
 0x198   : > { %v1079_v44 = vpop.f32.mrf.mxu0  ;;  %v2352_v37 = vor.u32 %v2774_v30, %v2349_v31  ;;  %s2917_s16 = sshra.s32 %s2003_s13, 4  ;;  %s2918_s16 = int_to_ptr.hbm [resolvable:$true] %s2917_s16 }
 0x199   : > { %v1696_v29 = vadd.f32 %v1695_v47, %v1246_v41  ;;  %v1703_v40 = vpop.f32.mrf.mxu2  ;;  %s2919_s27 = scalar_lea.hbm %s2918_s16, 512  ;;  %p2924_p4 = scmp.lt.s32.totalorder %s2918_s16, %s3686_s5 }
 0x19a   : > { %p2920_p0 = scmp.ne.s32.totalorder %s2918_s16, %s2919_s27  ;;  %p2925_p5 = scmp.lt.s32.totalorder %s2923_s21, %s2919_s27 }
 0x19b   : > { %v1819_v55 = vadd.f32 %v3259_v56, %v1696_v29  ;;  %1118 = vmatmul.bf16.gmra.mxu0 %v2340_v43  ;;  %2684 = vmatmul.msk.bf16.gmra.mxu3 %vm1522_vm1, %v2723_v48 }
 0x19c   : > { %p2921_p1 = pnand %p2920_p0, %p3082_p3  ;;  %p2926_p6 = por %p2925_p5, %p2924_p4 }
 0x19d   : > { %v1883_v59 = vmax.f32 %v1819_v55, 0.0 }
 0x19e   : > { %v1248_v62 = vpop.f32.mrf.mxu1  ;;  %v3511_v57 = vpop.f32.mrf.mxu3  ;;  %p2922_p2 = pneg %p2921_p1 }
 0x19f   : > { %1947 = vst [vmem:[%s3270_s17 + $0xd8] sm:$0xff] %v1883_v59  ;;  %v1249_v47 = vadd.f32 %v1248_v62, %v1079_v44 }
 0x1a0   : > { %v1081_v8 = vpop.f32.mrf.mxu0  ;;  %p2927_p7 = pnand %p2926_p6, %p2922_p2 }
 0x1a1   : > { %v1699_v63 = vadd.f32 %v1698_v2, %v1249_v47  ;;  %2499 = vmatmul.msk.bf16.gmra.mxu1 %vm899_vm2, %v2344_v60  ;;  %v1705_v1 = vpop.f32.mrf.mxu2 }
 0x1a3   : > { %v1820_v6 = vadd.f32 %v3259_v56, %v1699_v63 }
 0x1a5   : > { %v1884_v13 = vmax.f32 %v1820_v6, 0.0 }
 0x1a6   : > { %v1250_v14 = vpop.f32.mrf.mxu1  ;;  %2677 = vmatmul.msk.bf16.gmra.mxu2 %vm1522_vm1, %v2716_v9  ;;  %v3519_v12 = vpop.f32.mrf.mxu3 }
 0x1a7   : > { %1948 = vst [vmem:[%s3270_s17 + $0xe0] sm:$0xff] %v1884_v13  ;;  %v1251_v17 = vadd.f32 %v1250_v14, %v1081_v8  ;;  %v1304_v13 = vadd.f32 %v3426_v3, %v3283_v20 }
 0x1a8   : > { %v1084_v28 = vpop.f32.mrf.mxu0 }
 0x1a9   : > { %v1701_v2 = vadd.f32 %v1700_v26, %v1251_v17  ;;  %v1708_v23 = vpop.f32.mrf.mxu2 }
 0x1ab   : > { %v1821_v32 = vadd.f32 %v3259_v56, %v1701_v2  ;;  %1123 = vmatmul.bf16.gmra.mxu0 %v2348_v22 }
 0x1ad   : > { %v1885_v34 = vmax.f32 %v1821_v32, 0.0 }
 0x1ae   : > { %v1253_v41 = vpop.f32.mrf.mxu1  ;;  %v3526_v26 = vpop.f32.mrf.mxu3 }
 0x1af   : > { %1949 = vst [vmem:[%s3270_s17 + $0xe8] sm:$0xff] %v1885_v34  ;;  %v1254_v29 = vadd.f32 %v1253_v41, %v1084_v28  ;;  %v1306_v34 = vadd.f32 %v3434_v19, %v3294_v33 }
 0x1b0   : > { %v1086_v48 = vpop.f32.mrf.mxu0 }
 0x1b1   : > { %v1704_v43 = vadd.f32 %v1703_v40, %v1254_v29  ;;  %2500 = vmatmul.msk.bf16.gmra.mxu1 %vm899_vm2, %v2352_v37  ;;  %v1710_v44 = vpop.f32.mrf.mxu2 }
 0x1b3   : > { %v1822_v50 = vadd.f32 %v3259_v56, %v1704_v43 }
 0x1b5   : > { %v1886_v52 = vmax.f32 %v1822_v50, 0.0 }
 0x1b6   : > { %v1255_v55 = vpop.f32.mrf.mxu1  ;;  %v3530_v62 = vpop.f32.mrf.mxu3 }
 0x1b7   : > { %1950 = vst [vmem:[%s3270_s17 + $0xf0] sm:$0xff] %v1886_v52  ;;  %v1256_v59 = vadd.f32 %v1255_v55, %v1086_v48 }
 0x1b8   : > { %v1089_v63 = vpop.f32.mrf.mxu0 }
 0x1b9   : > { %v1706_v60 = vadd.f32 %v1705_v1, %v1256_v59  ;;  %v1713_v47 = vpop.f32.mrf.mxu2  ;;  %v1309_v59 = vadd.f32 %v3443_v38, %v3301_v46 }
 0x1bb   : > { %v1823_v40 = vadd.f32 %v3259_v56, %v1706_v60 }
 0x1bd   : > { %v1887_v8 = vmax.f32 %v1823_v40, 0.0 }
 0x1be   : > { %v1258_v6 = vpop.f32.mrf.mxu1  ;;  %v1753_v15 = vpop.f32.mrf.mxu3 }
 0x1bf   : > { %1951 = vst [vmem:[%s3270_s17 + $0xf8] sm:$0xff] %v1887_v8  ;;  %v1259_v9 = vadd.f32 %v1258_v6, %v1089_v63  ;;  %v1754_v16 = vadd.f32 %v1753_v15, %v1304_v13 }
 0x1c0   : > { %v1091_v1 = vpop.f32.mrf.mxu0 }
 0x1c1   : > { %v1709_v14 = vadd.f32 %v1708_v23, %v1259_v9  ;;  %v1715_v17 = vpop.f32.mrf.mxu2  ;;  %v1842_v22 = vadd.f32 %v3259_v56, %v1754_v16 }
 0x1c3   : > { %v1824_v2 = vadd.f32 %v3259_v56, %v1709_v14  ;;  %v1906_v30 = vmax.f32 %v1842_v22, 0.0 }
 0x1c5   : > { %v1888_v28 = vmax.f32 %v1824_v2, 0.0  ;;  %1970 = vst [vmem:[%s3270_s17 + $0x190] sm:$0xff] %v1906_v30 }
 0x1c6   : > { %v1260_v31 = vpop.f32.mrf.mxu1  ;;  %v1755_v3 = vpop.f32.mrf.mxu3 }
 0x1c7   : > { %1952 = vst [vmem:[%s3270_s17 + $0x100] sm:$0xff] %v1888_v28  ;;  %v1261_v32 = vadd.f32 %v1260_v31, %v1091_v1  ;;  %v1756_v23 = vadd.f32 %v1755_v3, %v1306_v34 }
 0x1c8   : > { %v1094_v41 = vpop.f32.mrf.mxu0 }
 0x1c9   : > { %v1711_v20 = vadd.f32 %v1710_v44, %v1261_v32  ;;  %v1718_v37 = vpop.f32.mrf.mxu2  ;;  %v1843_v43 = vadd.f32 %v3259_v56, %v1756_v23 }
 0x1cb   : > { %v1825_v29 = vadd.f32 %v3259_v56, %v1711_v20  ;;  %v1907_v50 = vmax.f32 %v1843_v43, 0.0  ;;  %v3551_v56 = vld [vmem:[%s3685_s4] ss:$0 sm:$0xff] }
 0x1cd   : > { %v1889_v48 = vmax.f32 %v1825_v29, 0.0  ;;  %1971 = vst [vmem:[%s3270_s17 + $0x198] sm:$0xff] %v1907_v50 }
 0x1ce   : > { %v1263_v52 = vpop.f32.mrf.mxu1  ;;  %v1758_v19 = vpop.f32.mrf.mxu3 }
 0x1cf   : > { %1953 = vst [vmem:[%s3270_s17 + $0x108] sm:$0xff] %v1889_v48  ;;  %v1264_v55 = vadd.f32 %v1263_v52, %v1094_v41  ;;  %v1759_v44 = vadd.f32 %v1758_v19, %v1309_v59 }
 0x1d0   : > { %v1096_v63 = vpop.f32.mrf.mxu0 }
 0x1d1   : > { %v1714_v33 = vadd.f32 %v1713_v47, %v1264_v55  ;;  %v1720_v60 = vpop.f32.mrf.mxu2  ;;  %v1844_v8 = vadd.f32 %v3551_v56, %v1759_v44  ;;  %v1311_v47 = vadd.f32 %v3451_v54, %v3312_v61  ;;  %v1314_v61 = vadd.f32 %v3460_v10, %v3319_v11 }
 0x1d2   : > { %v1316_v11 = vadd.f32 %v3468_v27, %v3330_v25  ;;  %v1319_v25 = vadd.f32 %v3477_v45, %v3337_v39  ;;  %v1321_v39 = vadd.f32 %v3485_v0, %v3348_v53  ;;  %v1324_v53 = vadd.f32 %v3494_v24, %v3355_v5 }
 0x1d3   : > { %v1826_v40 = vadd.f32 %v3551_v56, %v1714_v33  ;;  %v1908_v9 = vmax.f32 %v1844_v8, 0.0  ;;  %v1326_v5 = vadd.f32 %v3502_v42, %v3366_v21  ;;  %v1329_v21 = vadd.f32 %v3511_v57, %v3373_v36 }
 0x1d4   : > { %v1331_v36 = vadd.f32 %v3519_v12, %v3384_v51  ;;  %v1334_v51 = vadd.f32 %v3526_v26, %v3391_v4  ;;  %v1299_v4 = vadd.f32 %v3409_v35, %v3263_v58 }
 0x1d5   : > { %v1890_v6 = vmax.f32 %v1826_v40, 0.0  ;;  %1972 = vst [vmem:[%s3270_s17 + $0x1a0] sm:$0xff] %v1908_v9 }
 0x1d6   : > { %v1265_v46 = vpop.f32.mrf.mxu1  ;;  %v1760_v14 = vpop.f32.mrf.mxu3 }
 0x1d7   : > { %1954 = vst [vmem:[%s3270_s17 + $0x110] sm:$0xff] %v1890_v6  ;;  %v1266_v38 = vadd.f32 %v1265_v46, %v1096_v63  ;;  %v1761_v15 = vadd.f32 %v1760_v14, %v1311_v47 }
 0x1d8   : > { %v1099_v1 = vpop.f32.mrf.mxu0 }
 0x1d9   : > { %v1716_v13 = vadd.f32 %v1715_v17, %v1266_v38  ;;  %v1723_v16 = vpop.f32.mrf.mxu2  ;;  %v1845_v22 = vadd.f32 %v3551_v56, %v1761_v15 }
 0x1db   : > { %v1827_v2 = vadd.f32 %v3551_v56, %v1716_v13  ;;  %v1909_v30 = vmax.f32 %v1845_v22, 0.0 }
 0x1dd   : > { %v1891_v28 = vmax.f32 %v1827_v2, 0.0  ;;  %1973 = vst [vmem:[%s3270_s17 + $0x1a8] sm:$0xff] %v1909_v30 }
 0x1de   : > { %v1268_v31 = vpop.f32.mrf.mxu1  ;;  %v1763_v17 = vpop.f32.mrf.mxu3 }
 0x1df   : > { %1955 = vst [vmem:[%s3270_s17 + $0x118] sm:$0xff] %v1891_v28  ;;  %v1269_v32 = vadd.f32 %v1268_v31, %v1099_v1  ;;  %v1764_v34 = vadd.f32 %v1763_v17, %v1314_v61 }
 0x1e0   : > { %v1101_v3 = vpop.f32.mrf.mxu0 }
 0x1e1   : > { %v1719_v54 = vadd.f32 %v1718_v37, %v1269_v32  ;;  %v1725_v20 = vpop.f32.mrf.mxu2  ;;  %v1846_v41 = vadd.f32 %v3551_v56, %v1764_v34 }
 0x1e3   : > { %v1828_v23 = vadd.f32 %v3551_v56, %v1719_v54  ;;  %v1910_v43 = vmax.f32 %v1846_v41, 0.0 }
 0x1e5   : > { %v1892_v29 = vmax.f32 %v1828_v23, 0.0  ;;  %1974 = vst [vmem:[%s3270_s17 + $0x1b0] sm:$0xff] %v1910_v43 }
 0x1e6   : > { %v1270_v48 = vpop.f32.mrf.mxu1  ;;  %v1765_v37 = vpop.f32.mrf.mxu3 }
 0x1e7   : > { %1956 = vst [vmem:[%s3270_s17 + $0x120] sm:$0xff] %v1892_v29  ;;  %v1271_v50 = vadd.f32 %v1270_v48, %v1101_v3  ;;  %v1766_v52 = vadd.f32 %v1765_v37, %v1316_v11 }
 0x1e8   : > { %v1104_v59 = vpop.f32.mrf.mxu0 }
 0x1e9   : > { %v1721_v10 = vadd.f32 %v1720_v60, %v1271_v50  ;;  %v1728_v55 = vpop.f32.mrf.mxu2  ;;  %v1847_v19 = vadd.f32 %v3551_v56, %v1766_v52 }
 0x1eb   : > { %v1829_v33 = vadd.f32 %v3551_v56, %v1721_v10  ;;  %v1911_v63 = vmax.f32 %v1847_v19, 0.0 }
 0x1ed   : > { %v1893_v44 = vmax.f32 %v1829_v33, 0.0  ;;  %1975 = vst [vmem:[%s3270_s17 + $0x1b8] sm:$0xff] %v1911_v63 }
 0x1ee   : > { %v1273_v40 = vpop.f32.mrf.mxu1  ;;  %v1768_v60 = vpop.f32.mrf.mxu3 }
 0x1ef   : > { %1957 = vst [vmem:[%s3270_s17 + $0x128] sm:$0xff] %v1893_v44  ;;  %v1274_v8 = vadd.f32 %v1273_v40, %v1104_v59  ;;  %v1769_v6 = vadd.f32 %v1768_v60, %v1319_v25 }
 0x1f0   : > { %v1106_v46 = vpop.f32.mrf.mxu0 }
 0x1f1   : > { %v1724_v27 = vadd.f32 %v1723_v16, %v1274_v8  ;;  %v1730_v9 = vpop.f32.mrf.mxu2  ;;  %v1848_v47 = vadd.f32 %v3551_v56, %v1769_v6 }
 0x1f3   : > { %v1830_v38 = vadd.f32 %v3551_v56, %v1724_v27  ;;  %v1912_v14 = vmax.f32 %v1848_v47, 0.0 }
 0x1f5   : > { %v1894_v13 = vmax.f32 %v1830_v38, 0.0  ;;  %1976 = vst [vmem:[%s3270_s17 + $0x1c0] sm:$0xff] %v1912_v14 }
 0x1f6   : > { %v1275_v15 = vpop.f32.mrf.mxu1  ;;  %v1770_v16 = vpop.f32.mrf.mxu3 }
 0x1f7   : > { %1958 = vst [vmem:[%s3270_s17 + $0x130] sm:$0xff] %v1894_v13  ;;  %v1276_v1 = vadd.f32 %v1275_v15, %v1106_v46  ;;  %v1771_v2 = vadd.f32 %v1770_v16, %v1321_v39 }
 0x1f8   : > { %v1109_v28 = vpop.f32.mrf.mxu0 }
 0x1f9   : > { %v1726_v45 = vadd.f32 %v1725_v20, %v1276_v1  ;;  %v1733_v22 = vpop.f32.mrf.mxu2  ;;  %v1849_v31 = vadd.f32 %v3551_v56, %v1771_v2 }
 0x1fb   : > { %v1831_v30 = vadd.f32 %v3551_v56, %v1726_v45  ;;  %v1913_v61 = vmax.f32 %v1849_v31, 0.0 }
 0x1fd   : > { %v1895_v32 = vmax.f32 %v1831_v30, 0.0  ;;  %1977 = vst [vmem:[%s3270_s17 + $0x1c8] sm:$0xff] %v1913_v61 }
 0x1fe   : > { %v1278_v54 = vpop.f32.mrf.mxu1  ;;  %v1773_v34 = vpop.f32.mrf.mxu3 }
 0x1ff   : > { %1959 = vst [vmem:[%s3270_s17 + $0x138] sm:$0xff] %v1895_v32  ;;  %v1279_v17 = vadd.f32 %v1278_v54, %v1109_v28  ;;  %v1774_v20 = vadd.f32 %v1773_v34, %v1324_v53 }
 0x200   : > { %v1111_v23 = vpop.f32.mrf.mxu0 }
 0x201   : > { %v1729_v0 = vadd.f32 %v1728_v55, %v1279_v17  ;;  %v1735_v3 = vpop.f32.mrf.mxu2  ;;  %v1850_v29 = vadd.f32 %v3551_v56, %v1774_v20 }
 0x203   : > { %v1832_v41 = vadd.f32 %v3551_v56, %v1729_v0  ;;  %v1914_v48 = vmax.f32 %v1850_v29, 0.0 }
 0x205   : > { %v1896_v43 = vmax.f32 %v1832_v41, 0.0  ;;  %1978 = vst [vmem:[%s3270_s17 + $0x1d0] sm:$0xff] %v1914_v48 }
 0x206   : > { %v1280_v50 = vpop.f32.mrf.mxu1  ;;  %v1775_v10 = vpop.f32.mrf.mxu3 }
 0x207   : > { %1960 = vst [vmem:[%s3270_s17 + $0x140] sm:$0xff] %v1896_v43  ;;  %v1281_v11 = vadd.f32 %v1280_v50, %v1111_v23  ;;  %v1776_v37 = vadd.f32 %v1775_v10, %v1326_v5  ;;  %v1336_v23 = vadd.f32 %v3530_v62, %v3400_v18 }
 0x208   : > { %v1114_v55 = vpop.f32.mrf.mxu0 }
 0x209   : > { %v1731_v24 = vadd.f32 %v1730_v9, %v1281_v11  ;;  %v1738_v52 = vpop.f32.mrf.mxu2  ;;  %v1851_v33 = vadd.f32 %v3551_v56, %v1776_v37  ;;  %v1301_v37 = vadd.f32 %v3417_v49, %v3276_v7 }
 0x20b   : > { %v1833_v59 = vadd.f32 %v3551_v56, %v1731_v24  ;;  %v1915_v44 = vmax.f32 %v1851_v33, 0.0 }
 0x20d   : > { %v1897_v19 = vmax.f32 %v1833_v59, 0.0  ;;  %1979 = vst [vmem:[%s3270_s17 + $0x1d8] sm:$0xff] %v1915_v44 }
 0x20e   : > { %v1283_v63 = vpop.f32.mrf.mxu1  ;;  %v1778_v8 = vpop.f32.mrf.mxu3 }
 0x20f   : > { %1961 = vst [vmem:[%s3270_s17 + $0x148] sm:$0xff] %v1897_v19  ;;  %v1284_v40 = vadd.f32 %v1283_v63, %v1114_v55  ;;  %v1779_v25 = vadd.f32 %v1778_v8, %v1329_v21 }
 0x210   : > { %v1116_v60 = vpop.f32.mrf.mxu0 }
 0x211   : > { %v1734_v42 = vadd.f32 %v1733_v22, %v1284_v40  ;;  %v1740_v27 = vpop.f32.mrf.mxu2  ;;  %v1852_v9 = vadd.f32 %v3551_v56, %v1779_v25 }
 0x213   : > { %v1834_v6 = vadd.f32 %v3551_v56, %v1734_v42  ;;  %v1916_v38 = vmax.f32 %v1852_v9, 0.0 }
 0x215   : > { %v1898_v46 = vmax.f32 %v1834_v6, 0.0  ;;  %1980 = vst [vmem:[%s3270_s17 + $0x1e0] sm:$0xff] %v1916_v38 }
 0x216   : > { %v1285_v47 = vpop.f32.mrf.mxu1  ;;  %v1780_v14 = vpop.f32.mrf.mxu3 }
 0x217   : > { %1962 = vst [vmem:[%s3270_s17 + $0x150] sm:$0xff] %v1898_v46  ;;  %v1286_v13 = vadd.f32 %v1285_v47, %v1116_v60  ;;  %v1781_v15 = vadd.f32 %v1780_v14, %v1331_v36 }
 0x218   : > { %v1119_v39 = vpop.f32.mrf.mxu0 }
 0x219   : > { %v1736_v57 = vadd.f32 %v1735_v3, %v1286_v13  ;;  %v1743_v1 = vpop.f32.mrf.mxu2  ;;  %v1853_v16 = vadd.f32 %v3551_v56, %v1781_v15 }
 0x21b   : > { %v1835_v45 = vadd.f32 %v3551_v56, %v1736_v57  ;;  %v1917_v22 = vmax.f32 %v1853_v16, 0.0 }
 0x21d   : > { %v1899_v2 = vmax.f32 %v1835_v45, 0.0  ;;  %1981 = vst [vmem:[%s3270_s17 + $0x1e8] sm:$0xff] %v1917_v22 }
 0x21e   : > { %v1288_v28 = vpop.f32.mrf.mxu1  ;;  %v1783_v31 = vpop.f32.mrf.mxu3 }
 0x21f   : > { %1963 = vst [vmem:[%s3270_s17 + $0x158] sm:$0xff] %v1899_v2  ;;  %v1289_v30 = vadd.f32 %v1288_v28, %v1119_v39  ;;  %v1784_v32 = vadd.f32 %v1783_v31, %v1334_v51 }
 0x220   : > { %v1121_v54 = vpop.f32.mrf.mxu0 }
 0x221   : > { %v1739_v12 = vadd.f32 %v1738_v52, %v1289_v30  ;;  %v1745_v61 = vpop.f32.mrf.mxu2  ;;  %v1854_v53 = vadd.f32 %v3551_v56, %v1784_v32 }
 0x223   : > { %v1836_v17 = vadd.f32 %v3551_v56, %v1739_v12  ;;  %v1918_v34 = vmax.f32 %v1854_v53, 0.0 }
 0x225   : > { %v1900_v0 = vmax.f32 %v1836_v17, 0.0  ;;  %1982 = vst [vmem:[%s3270_s17 + $0x1f0] sm:$0xff] %v1918_v34 }
 0x226   : > { %v1290_v20 = vpop.f32.mrf.mxu1  ;;  %v1785_v41 = vpop.f32.mrf.mxu3 }
 0x227   : > { %1964 = vst [vmem:[%s3270_s17 + $0x160] sm:$0xff] %v1900_v0  ;;  %v1291_v3 = vadd.f32 %v1290_v20, %v1121_v54  ;;  %v1786_v29 = vadd.f32 %v1785_v41, %v1336_v23 }
 0x228   : > { %v1124_v5 = vpop.f32.mrf.mxu0 }
 0x229   : > { %v1741_v26 = vadd.f32 %v1740_v27, %v1291_v3  ;;  %v1748_v43 = vpop.f32.mrf.mxu2  ;;  %v1855_v11 = vadd.f32 %v3551_v56, %v1786_v29 }
 0x22a   : > { %v1749_v50 = vadd.f32 %v1748_v43, %v1299_v4 }
 0x22b   : > { %v1837_v48 = vadd.f32 %v3551_v56, %v1741_v26  ;;  %v1919_v24 = vmax.f32 %v1855_v11, 0.0 }
 0x22c   : > { %v1840_v62 = vadd.f32 %v3551_v56, %v1749_v50 }
 0x22d   : > { %v1901_v18 = vmax.f32 %v1837_v48, 0.0  ;;  %1983 = vst [vmem:[%s3270_s17 + $0x1f8] sm:$0xff] %v1919_v24 }
 0x22e   : > { %v1293_v10 = vpop.f32.mrf.mxu1  ;;  %v1904_v58 = vmax.f32 %v1840_v62, 0.0 }
 0x22f   : > { %1965 = vst [vmem:[%s3270_s17 + $0x168] sm:$0xff] %v1901_v18  ;;  %v1294_v35 = vadd.f32 %v1293_v10, %v1124_v5 }
 0x230   : > { %1968 = vst [vmem:[%s3270_s17 + $0x180] sm:$0xff] %v1904_v58  ;;  %v1126_v63 = vpop.f32.mrf.mxu0 }
 0x231   : > { %v1744_v52 = vadd.f32 %v1743_v1, %v1294_v35  ;;  %v1750_v55 = vpop.f32.mrf.mxu2 }
 0x232   : > { %v1751_v33 = vadd.f32 %v1750_v55, %v1301_v37 }
 0x233   : > { %v1838_v59 = vadd.f32 %v3551_v56, %v1744_v52 }
 0x234   : > { %v1841_v44 = vadd.f32 %v3551_v56, %v1751_v33 }
 0x235   : > { %v1902_v19 = vmax.f32 %v1838_v59, 0.0 }
 0x236   : > { %v1295_v7 = vpop.f32.mrf.mxu1  ;;  %v1905_v49 = vmax.f32 %v1841_v44, 0.0 }
 0x237   : > { %1966 = vst [vmem:[%s3270_s17 + $0x170] sm:$0xff] %v1902_v19  ;;  %v1296_v40 = vadd.f32 %v1295_v7, %v1126_v63 }
 0x238   : > { %1969 = vst [vmem:[%s3270_s17 + $0x188] sm:$0xff] %v1905_v49 }
 0x239   : > { %v1746_v21 = vadd.f32 %v1745_v61, %v1296_v40 }
 0x23b   : > { %v1839_v42 = vadd.f32 %v3551_v56, %v1746_v21 }
 0x23d   : > { %v1903_v8 = vmax.f32 %v1839_v42, 0.0 }
 0x23f   : > { %1967 = vst [vmem:[%s3270_s17 + $0x178] sm:$0xff] %v1903_v8 }
 0x240   : > { %2930 = shalt.err (!%p2927_p7)
}
 0x241   : > { %s2999_s26 = smov 128   ;;  %s3000_s17 = smov 8  }
 0x242   : > { %2828 = dma.vmem_to_hbm [thread:$0]  (%p3082_p3), %s2001_s10, 8192, %s2003_s13, %s1985_s15, %s2999_s26, %s2999_s26, %s3000_s17  }
 0x243 PF: > { %p2834_p9 = scmp.ge.s32.totalorder %s2997_s25, 2  ;;  %s2017_s12 = sand.u32 1, %s2969_s18  }
 0x244   : > { %s2018_s14 = scalar_lea.sflag [#allocation3], %s2017_s12 }
 0x245   : > { %p2831_p10 = pnand %p2834_p9, %p3091_p8 }
 0x247   : > { %p2832_p11 = pneg %p2831_p10 }
 0x249   : > { %2964 = dma.done.wait (%p2832_p11), %s2018_s14, 8192  }
 0x24a   : > { %2966 = vsyncadd (%p2832_p11), %s2018_s14, 4294959104  ;;  %s18_s25 = sadd.s32 1, %s2997_s25   ;;  %s3689_s18 = smov %s2973_s19 }
 0x24b   : > { %p15_p12 = scmp.ge.s32.totalorder %s18_s25, 6   ;;  %s3690_s19 = smov %s2977_s20 }
 0x24c   : > { %s3691_s20 = smov %s3100_s11  ;;  %s3692_s21 = smov %s2989_s23 }
 0x24d   : > { %s3693_s22 = smov %s2993_s24  ;;  %s3694_s23 = smov %s3697_s28 }
 0x24e   : > { %s3695_s24 = smov %s3701_s29  ;;  %17 = sbr.rel (!%p15_p12) target bundleno = 5 (0x5), region = 87 }
 0x253   :  { %2024 = vsyncpa [#allocation3], 1 }
 0x254   :  { %2026 = vsyncpa [#allocation3 + $0x1], 1 }

// kernel: psp_forward.2
= control target key start
LH: loop header
LB: loop body
LE: loop exit
PB: predicated region body
PF: predicated region fallthrough
CT: control target
= control target key end

     0   :  { %8 = vsyncpa [#allocation3], 0  ;;  %s10664_s12 = smov 0   ;;  %s12609_s0 = inlined_call_operand.hbm [shape: bf16[4,248,1024], index: 0, kind: input, shape index: {}]   ;;  %s12610_s1 = inlined_call_operand.vmem [shape: bf16[2,1024,64], index: 1, kind: input, shape index: {}]   ;;  %s12611_s2 = inlined_call_operand.vmem [shape: bf16[4,64,128], index: 2, kind: input, shape index: {}]   ;;  %s12612_s3 = inlined_call_operand.vmem [shape: bf16[2,248,128], index: 3, kind: output, shape index: {}]  }
   0x1 LB: > { %s124_s15 = sshll.u32 %s12609_s0, 4  ;;  %s7459_s16 = sadd.s32 4294967295, %s10639_s12   ;;  %s10639_s12 = sphi %s10664_s12, %s14_s12   ;;  %s125_s15 = int_to_ptr.hbm [resolvable:$true] %s124_s15 }
   0x2   : > { %p7461_p0 = scmp.ge.s32.totalorder %s10639_s12, 1  ;;  %p113_p1 = scmp.lt.s32.totalorder %s10639_s12, 3 }
   0x3   : > { %p10458_p2 = scmp.eq.s32.totalorder %s7459_s16, 0  ;;  %s10641_s17 = smov [#allocation2]  }
   0x4   : > { %p114_p3 = pnand %p7461_p0, %p113_p1  ;;  %s126_s18 = sshll.u32 %s10641_s17, 4  ;;  %s127_s18 = int_to_ptr.vmem [resolvable:$true] %s126_s18 }
   0x5   : > { %s10642_s19 = smov 512   ;;  %s10643_s20 = smov 32  }
   0x6   : > { %p10454_p4 = pneg %p114_p3  ;;  %153 = sbr.rel (%p114_p3) target bundleno = 2761 (0xac9), region = 32 }
   0x8   : > { %p10455_p5 = pnand %p10458_p2, %p10454_p4 }
   0xa   : > { %10457 = dma.hbm_to_vmem [thread:$0]  (!%p10455_p5), %s125_s15, 63488, %s127_s18, [#allocation3], %s10642_s19, %s10642_s19, %s10643_s20  }
   0xb   : > { %10634 = dma.done.wait (%p10458_p2), [#allocation3], 63488  }
   0xc   : > { %10636 = vsyncadd (%p10458_p2), [#allocation3], 4294903808  ;;  %p178_p6 = scmp.lt.s32.totalorder %s7459_s16, 1  ;;  %v7471_v32 = vld [vmem:[#allocation2] sm:$0xf]  ;;  %vm3687_vm0 = vcmask 523264  }
   0xd   : > { %v9868_v33 = vld [vmem:[#allocation2 + $0x1c] sm:$0xf0]  ;;  %v9864_v34 = vld [vmem:[#allocation2 + $0x4] sm:$0xf]  ;;  %v7479_v36 = vld [vmem:[#allocation2 + $0x8] sm:$0xf] }
   0xe   : > { %s12884_s16 = smov (!%p178_p6, %s7459_s16), 1  ;;  %v7473_v35 = vld [vmem:[#allocation2 + $0x20] sm:$0xf0]  ;;  %v9869_v37 = vld [vmem:[#allocation2 + $0x24] sm:$0xf0]  ;;  %v7472_v42 = vor.u32 %v9868_v33, %v7471_v32 }
   0xf   : > { %s9799_s21 = sshll.u32 %s12884_s16, 9  ;;  %v9865_v38 = vld [vmem:[#allocation2 + $0xc] sm:$0xf]  ;;  %v7476_v43 = vor.u32 %v9864_v34, %v7473_v35  ;;  %v7480_v44 = vor.u32 %v9869_v37, %v7479_v36  ;;  %v7503_v48 = vld [vmem:[#allocation2 + $0x40] sm:$0xf]  ;;  %s10449_s5 = smul.u32 124, %s12884_s16 }
  0x10   : > { %s10681_s24 = scalar_lea.vmem %s12610_s1, %s9799_s21  ;;  %v7481_v39 = vld [vmem:[#allocation2 + $0x28] sm:$0xf0]  ;;  %v9876_v49 = vld [vmem:[#allocation2 + $0x5c] sm:$0xf0]  ;;  %v9872_v50 = vld [vmem:[#allocation2 + $0x44] sm:$0xf] }
  0x11   : > { %v10684_v0 = vld [vmem:[%s10681_s24 + $0x38] sm:$0xff]  ;;  %v10698_v4 = vld [vmem:[%s10681_s24 + $0x30] sm:$0xff]  ;;  %v10714_v8 = vld [vmem:[%s10681_s24 + $0x28] sm:$0xff]  ;;  %v7484_v45 = vor.u32 %v9865_v38, %v7481_v39  ;;  %v7504_v56 = vor.u32 %v9876_v49, %v7503_v48  ;;  %s12541_s8 = scalar_lea.vmem %s12612_s3, %s10449_s5 }
  0x12   : > { %v10687_v1 = vld [vmem:[%s10681_s24 + $0x78] sm:$0xff]  ;;  %1453 = vmatpush.bf16.msra.mxu0 %v10684_v0  ;;  %v10701_v5 = vld [vmem:[%s10681_s24 + $0x70] sm:$0xff]  ;;  %v10717_v9 = vld [vmem:[%s10681_s24 + $0x68] sm:$0xff] }
  0x13   : > { %v10690_v2 = vld [vmem:[%s10681_s24 + $0xb8] sm:$0xff]  ;;  %1541 = vmatpush.bf16.msra.mxu1 %v10687_v1  ;;  %v10706_v6 = vld [vmem:[%s10681_s24 + $0xb0] sm:$0xff]  ;;  %v10722_v10 = vld [vmem:[%s10681_s24 + $0xa8] sm:$0xff] }
  0x14   : > { %v10693_v3 = vld [vmem:[%s10681_s24 + $0xf8] sm:$0xff]  ;;  %1629 = vmatpush.bf16.msra.mxu2 %v10690_v2  ;;  %v10709_v7 = vld [vmem:[%s10681_s24 + $0xf0] sm:$0xff]  ;;  %v10725_v11 = vld [vmem:[%s10681_s24 + $0xe8] sm:$0xff] }
  0x15   : > { %1717 = vmatpush.bf16.msra.mxu3 %v10693_v3  ;;  %v10730_v12 = vld [vmem:[%s10681_s24 + $0x20] sm:$0xff]  ;;  %v10746_v16 = vld [vmem:[%s10681_s24 + $0x18] sm:$0xff]  ;;  %v10762_v20 = vld [vmem:[%s10681_s24 + $0x10] sm:$0xff] }
  0x16   : > { %1454 = vmatpush.bf16.msra.mxu0 %v10698_v4  ;;  %v10733_v13 = vld [vmem:[%s10681_s24 + $0x60] sm:$0xff]  ;;  %v10749_v17 = vld [vmem:[%s10681_s24 + $0x58] sm:$0xff]  ;;  %v10765_v21 = vld [vmem:[%s10681_s24 + $0x50] sm:$0xff] }
  0x17   : > { %1542 = vmatpush.bf16.msra.mxu1 %v10701_v5  ;;  %v10738_v14 = vld [vmem:[%s10681_s24 + $0xa0] sm:$0xff]  ;;  %v10754_v18 = vld [vmem:[%s10681_s24 + $0x98] sm:$0xff]  ;;  %v10770_v22 = vld [vmem:[%s10681_s24 + $0x90] sm:$0xff] }
  0x18   : > { %1630 = vmatpush.bf16.msra.mxu2 %v10706_v6  ;;  %v10741_v15 = vld [vmem:[%s10681_s24 + $0xe0] sm:$0xff]  ;;  %v10757_v19 = vld [vmem:[%s10681_s24 + $0xd8] sm:$0xff]  ;;  %v10773_v23 = vld [vmem:[%s10681_s24 + $0xd0] sm:$0xff] }
  0x19   : > { %1718 = vmatpush.bf16.msra.mxu3 %v10709_v7  ;;  %v10778_v24 = vld [vmem:[%s10681_s24 + $0x8] sm:$0xff]  ;;  %v10792_v28 = vld [vmem:[%s10681_s24] sm:$0xff]  ;;  %v10808_v40 = vld [vmem:[%s10681_s24 + $0x138] sm:$0xff] }
  0x1a   : > { %1455 = vmatpush.bf16.msra.mxu0 %v10714_v8  ;;  %v10781_v25 = vld [vmem:[%s10681_s24 + $0x48] sm:$0xff]  ;;  %v10795_v29 = vld [vmem:[%s10681_s24 + $0x40] sm:$0xff]  ;;  %v10811_v41 = vld [vmem:[%s10681_s24 + $0x178] sm:$0xff] }
  0x1b   : > { %1543 = vmatpush.bf16.msra.mxu1 %v10717_v9  ;;  %v10786_v26 = vld [vmem:[%s10681_s24 + $0x88] sm:$0xff]  ;;  %v10798_v30 = vld [vmem:[%s10681_s24 + $0x80] sm:$0xff]  ;;  %v10820_v46 = vld [vmem:[%s10681_s24 + $0x130] sm:$0xff] }
  0x1c   : > { %1631 = vmatpush.bf16.msra.mxu2 %v10722_v10  ;;  %v10789_v27 = vld [vmem:[%s10681_s24 + $0xc8] sm:$0xff]  ;;  %v10801_v31 = vld [vmem:[%s10681_s24 + $0xc0] sm:$0xff]  ;;  %v10823_v47 = vld [vmem:[%s10681_s24 + $0x170] sm:$0xff] }
  0x1d   : > { %1719 = vmatpush.bf16.msra.mxu3 %v10725_v11  ;;  %v7505_v51 = vld [vmem:[#allocation2 + $0x60] sm:$0xf0]  ;;  %v7511_v52 = vld [vmem:[#allocation2 + $0x48] sm:$0xf]  ;;  %v9873_v54 = vld [vmem:[#allocation2 + $0x4c] sm:$0xf] }
  0x1e   : > { %1456 = vmatpush.bf16.msra.mxu0 %v10730_v12  ;;  %v9877_v53 = vld [vmem:[#allocation2 + $0x64] sm:$0xf0]  ;;  %v7513_v55 = vld [vmem:[#allocation2 + $0x68] sm:$0xf0]  ;;  %v7508_v57 = vor.u32 %v9872_v50, %v7505_v51  ;;  %v7535_v60 = vld [vmem:[#allocation2 + $0x80] sm:$0xf] }
  0x1f   : > { %1544 = vmatpush.bf16.msra.mxu1 %v10733_v13  ;;  %v7512_v58 = vor.u32 %v9877_v53, %v7511_v52  ;;  %v7516_v59 = vor.u32 %v9873_v54, %v7513_v55  ;;  %v9884_v61 = vld [vmem:[#allocation2 + $0x9c] sm:$0xf0]  ;;  %v9880_v62 = vld [vmem:[#allocation2 + $0x84] sm:$0xf]  ;;  %v7543_v32 = vld [vmem:[#allocation2 + $0x88] sm:$0xf] }
  0x20   : > { %1632 = vmatpush.bf16.msra.mxu2 %v10738_v14  ;;  %v7537_v63 = vld [vmem:[#allocation2 + $0xa0] sm:$0xf0]  ;;  %v9885_v33 = vld [vmem:[#allocation2 + $0xa4] sm:$0xf0]  ;;  %v9881_v34 = vld [vmem:[#allocation2 + $0x8c] sm:$0xf]  ;;  %v7536_v36 = vor.u32 %v9884_v61, %v7535_v60 }
  0x21   : > { %1720 = vmatpush.bf16.msra.mxu3 %v10741_v15  ;;  %v7545_v35 = vld [vmem:[#allocation2 + $0xa8] sm:$0xf0]  ;;  %v7540_v37 = vor.u32 %v9880_v62, %v7537_v63  ;;  %v7544_v38 = vor.u32 %v9885_v33, %v7543_v32  ;;  %v9888_v48 = vld [vmem:[#allocation2 + $0xc4] sm:$0xf]  ;;  %v7575_v50 = vld [vmem:[#allocation2 + $0xc8] sm:$0xf] }
  0x22   : > { %1457 = vmatpush.bf16.msra.mxu0 %v10746_v16  ;;  %v7548_v39 = vor.u32 %v9881_v34, %v7545_v35  ;;  %v7569_v49 = vld [vmem:[#allocation2 + $0xe0] sm:$0xf0]  ;;  %v9893_v51 = vld [vmem:[#allocation2 + $0xe4] sm:$0xf0]  ;;  %v9889_v52 = vld [vmem:[#allocation2 + $0xcc] sm:$0xf] }
  0x23   : > { %1545 = vmatpush.bf16.msra.mxu1 %v10749_v17  ;;  %v7577_v53 = vld [vmem:[#allocation2 + $0xe8] sm:$0xf0]  ;;  %v7572_v55 = vor.u32 %v9888_v48, %v7569_v49  ;;  %v9896_v60 = vld [vmem:[#allocation2 + $0x104] sm:$0xf]  ;;  %v7607_v62 = vld [vmem:[#allocation2 + $0x108] sm:$0xf] }
  0x24   : > { %1633 = vmatpush.bf16.msra.mxu2 %v10754_v18  ;;  %v7601_v61 = vld [vmem:[#allocation2 + $0x120] sm:$0xf0]  ;;  %v9901_v63 = vld [vmem:[#allocation2 + $0x124] sm:$0xf0]  ;;  %v9897_v32 = vld [vmem:[#allocation2 + $0x10c] sm:$0xf] }
  0x25   : > { %1721 = vmatpush.bf16.msra.mxu3 %v10757_v19  ;;  %v7609_v33 = vld [vmem:[#allocation2 + $0x128] sm:$0xf0]  ;;  %v7604_v35 = vor.u32 %v9896_v60, %v7601_v61  ;;  %v9908_v48 = vld [vmem:[#allocation2 + $0x15c] sm:$0xf0]  ;;  %v9904_v49 = vld [vmem:[#allocation2 + $0x144] sm:$0xf] }
  0x26   : > { %1458 = vmatpush.bf16.msra.mxu0 %v10762_v20  ;;  %v7663_v60 = vld [vmem:[#allocation2 + $0x180] sm:$0xf] }
  0x27   : > { %1546 = vmatpush.bf16.msra.mxu1 %v10765_v21  ;;  %v9916_v61 = vld [vmem:[#allocation2 + $0x19c] sm:$0xf0] }
  0x28   : > { %1634 = vmatpush.bf16.msra.mxu2 %v10770_v22 }
  0x29   : > { %1722 = vmatpush.bf16.msra.mxu3 %v10773_v23 }
  0x2a   : > { %1459 = vmatpush.bf16.msra.mxu0 %v10778_v24 }
  0x2b   : > { %1547 = vmatpush.bf16.msra.mxu1 %v10781_v25 }
  0x2c   : > { %1635 = vmatpush.bf16.msra.mxu2 %v10786_v26 }
  0x2d   : > { %1723 = vmatpush.bf16.msra.mxu3 %v10789_v27 }
  0x2e   : > { %1460 = vmatpush.bf16.msra.mxu0 %v10792_v28 }
  0x2f   : > { %1548 = vmatpush.bf16.msra.mxu1 %v10795_v29 }
  0x30   : > { %1636 = vmatpush.bf16.msra.mxu2 %v10798_v30 }
  0x31   : > { %1724 = vmatpush.bf16.msra.mxu3 %v10801_v31  ;;  %1461 = vmatmul.bf16.vlgmr.msra.gmra.mxu0 %v7472_v42  ;;  %v10828_v42 = vld [vmem:[%s10681_s24 + $0x128] sm:$0xff] }
  0x32   : > { %1805 = vmatpush.bf16.msrb.mxu0 %v10808_v40  ;;  %1549 = vmatmul.bf16.vlgmr.msra.gmra.mxu1 %v7476_v43  ;;  %v10831_v43 = vld [vmem:[%s10681_s24 + $0x168] sm:$0xff] }
  0x33   : > { %1893 = vmatpush.bf16.msrb.mxu1 %v10811_v41  ;;  %1637 = vmatmul.bf16.vlgmr.msra.gmra.mxu2 %v7480_v44  ;;  %v7567_v44 = vld [vmem:[#allocation2 + $0xc0] sm:$0xf] }
  0x34   : > { %1725 = vmatmul.bf16.vlgmr.msra.gmra.mxu3 %v7484_v45  ;;  %v9892_v45 = vld [vmem:[#allocation2 + $0xdc] sm:$0xf0] }
  0x35   : > { %v7568_v54 = vor.u32 %v9892_v45, %v7567_v44  ;;  %v10842_v44 = vld [vmem:[%s10681_s24 + $0x1b8] sm:$0xff]  ;;  %v7631_v45 = vld [vmem:[#allocation2 + $0x140] sm:$0xf] }
  0x36   : > { %1806 = vmatpush.bf16.msrb.mxu0 %v10820_v46  ;;  %1981 = vmatpush.bf16.msrb.mxu2 %v10842_v44 }
  0x37   : > { %1894 = vmatpush.bf16.msrb.mxu1 %v10823_v47 }
  0x3a   : > { %1807 = vmatpush.bf16.msrb.mxu0 %v10828_v42 }
  0x3b   : > { %1895 = vmatpush.bf16.msrb.mxu1 %v10831_v43 }
  0x41   : > { %1466 = vmatmul.bf16.gmra.mxu0 %v7504_v56  ;;  %v7576_v56 = vor.u32 %v9893_v51, %v7575_v50  ;;  %v7633_v50 = vld [vmem:[#allocation2 + $0x160] sm:$0xf0]  ;;  %v7639_v51 = vld [vmem:[#allocation2 + $0x148] sm:$0xf] }
  0x42   : > { %1554 = vmatmul.bf16.gmra.mxu1 %v7508_v57  ;;  %v7580_v57 = vor.u32 %v9889_v52, %v7577_v53  ;;  %v9909_v52 = vld [vmem:[#allocation2 + $0x164] sm:$0xf0]  ;;  %v9905_v53 = vld [vmem:[#allocation2 + $0x14c] sm:$0xf] }
  0x43   : > { %1642 = vmatmul.bf16.gmra.mxu2 %v7512_v58  ;;  %v7599_v58 = vld [vmem:[#allocation2 + $0x100] sm:$0xf] }
  0x44   : > { %1730 = vmatmul.bf16.gmra.mxu3 %v7516_v59  ;;  %v9900_v59 = vld [vmem:[#allocation2 + $0x11c] sm:$0xf0] }
  0x45   : > { %v7600_v34 = vor.u32 %v9900_v59, %v7599_v58  ;;  %v10848_v59 = vld [vmem:[%s10681_s24 + $0x1f8] sm:$0xff] }
  0x46   : > { %2069 = vmatpush.bf16.msrb.mxu3 %v10848_v59 }
  0x51   : > { %1471 = vmatmul.bf16.gmra.mxu0 %v7536_v36  ;;  %v7608_v36 = vor.u32 %v9901_v63, %v7607_v62  ;;  %v9912_v62 = vld [vmem:[#allocation2 + $0x184] sm:$0xf] }
  0x52   : > { %1559 = vmatmul.bf16.gmra.mxu1 %v7540_v37  ;;  %v7612_v37 = vor.u32 %v9897_v32, %v7609_v33  ;;  %v7665_v63 = vld [vmem:[#allocation2 + $0x1a0] sm:$0xf0]  ;;  %v7671_v32 = vld [vmem:[#allocation2 + $0x188] sm:$0xf] }
  0x53   : > { %1647 = vmatmul.bf16.gmra.mxu2 %v7544_v38  ;;  %v10836_v38 = vld [vmem:[%s10681_s24 + $0x120] sm:$0xff]  ;;  %v9917_v33 = vld [vmem:[#allocation2 + $0x1a4] sm:$0xf0] }
  0x54   : > { %1735 = vmatmul.bf16.gmra.mxu3 %v7548_v39  ;;  %12644 = vst [vmem:[#allocation5_spill] sm:$0xff] %v10836_v38  ;;  %v10839_v39 = vld [vmem:[%s10681_s24 + $0x160] sm:$0xff]  ;;  %1808 = vmatpush.bf16.msrb.mxu0 %v10836_v38  ;;  %v10883_v38 = vld [vmem:[%s10681_s24 + $0x1e8] sm:$0xff] }
  0x55   : > { %12645 = vst [vmem:[#allocation6_spill] sm:$0xff] %v10839_v39  ;;  %1896 = vmatpush.bf16.msrb.mxu1 %v10839_v39 }
  0x56   : > { %12653 = vst [vmem:[#allocation14_spill] sm:$0xff] %v10883_v38 }
  0x61   : > { %1476 = vmatmul.bf16.gmra.mxu0 %v7568_v54  ;;  %v7641_v54 = vld [vmem:[#allocation2 + $0x168] sm:$0xf0] }
  0x62   : > { %1564 = vmatmul.bf16.gmra.mxu1 %v7572_v55  ;;  %v7632_v55 = vor.u32 %v9908_v48, %v7631_v45  ;;  %v7644_v58 = vor.u32 %v9905_v53, %v7641_v54  ;;  %v7672_v45 = vor.u32 %v9917_v33, %v7671_v32  ;;  %v9920_v53 = vld [vmem:[#allocation2 + $0x1c4] sm:$0xf]  ;;  %v10860_v32 = vld [vmem:[%s10681_s24 + $0x1b0] sm:$0xff] }
  0x63   : > { %1652 = vmatmul.bf16.gmra.mxu2 %v7576_v56  ;;  %v7636_v56 = vor.u32 %v9904_v49, %v7633_v50  ;;  %v10852_v49 = vld [vmem:[%s10681_s24 + $0x118] sm:$0xff]  ;;  %v7697_v54 = vld [vmem:[#allocation2 + $0x1e0] sm:$0xf0]  ;;  %v10863_v33 = vld [vmem:[%s10681_s24 + $0x1f0] sm:$0xff] }
  0x64   : > { %1740 = vmatmul.bf16.gmra.mxu3 %v7580_v57  ;;  %v7640_v57 = vor.u32 %v9909_v52, %v7639_v51  ;;  %12646 = vst [vmem:[#allocation7_spill] sm:$0xff] %v10852_v49  ;;  %v10855_v50 = vld [vmem:[%s10681_s24 + $0x158] sm:$0xff]  ;;  %1809 = vmatpush.bf16.msrb.mxu0 %v10852_v49  ;;  %v7695_v51 = vld [vmem:[#allocation2 + $0x1c0] sm:$0xf] }
  0x65   : > { %12647 = vst [vmem:[#allocation8_spill] sm:$0xff] %v10855_v50  ;;  %1897 = vmatpush.bf16.msrb.mxu1 %v10855_v50  ;;  %v9924_v52 = vld [vmem:[#allocation2 + $0x1dc] sm:$0xf0]  ;;  %1982 = vmatpush.bf16.msrb.mxu2 %v10860_v32 }
  0x66   : > { %2070 = vmatpush.bf16.msrb.mxu3 %v10863_v33 }
  0x6a   : > { %2071 = vmatpush.bf16.msrb.mxu3 %v10883_v38 }
  0x71   : > { %1481 = vmatmul.bf16.gmra.mxu0 %v7600_v34  ;;  %v9913_v34 = vld [vmem:[#allocation2 + $0x18c] sm:$0xf] }
  0x72   : > { %1569 = vmatmul.bf16.gmra.mxu1 %v7604_v35  ;;  %v7673_v35 = vld [vmem:[#allocation2 + $0x1a8] sm:$0xf0] }
  0x73   : > { %1657 = vmatmul.bf16.gmra.mxu2 %v7608_v36  ;;  %v7664_v36 = vor.u32 %v9916_v61, %v7663_v60  ;;  %v7676_v48 = vor.u32 %v9913_v34, %v7673_v35  ;;  %v7696_v60 = vor.u32 %v9924_v52, %v7695_v51  ;;  %v7700_v61 = vor.u32 %v9920_v53, %v7697_v54  ;;  %v7727_v34 = vld [vmem:[#allocation2 + $0x200] sm:$0xf]  ;;  %v9929_v51 = vld [vmem:[#allocation2 + $0x20c] sm:$0xf] }
  0x74   : > { %1745 = vmatmul.bf16.gmra.mxu3 %v7612_v37  ;;  %v7668_v37 = vor.u32 %v9912_v62, %v7665_v63  ;;  %v9932_v35 = vld [vmem:[#allocation2 + $0x21c] sm:$0xf0]  ;;  %v7737_v52 = vld [vmem:[#allocation2 + $0x228] sm:$0xf0] }
  0x75   : > { %v7728_v53 = vor.u32 %v9932_v35, %v7727_v34 }
  0x81   : > { %1486 = vmatmul.bf16.gmra.mxu0 %v7632_v55  ;;  %v7703_v55 = vld [vmem:[#allocation2 + $0x1c8] sm:$0xf] }
  0x82   : > { %1574 = vmatmul.bf16.gmra.mxu1 %v7636_v56  ;;  %v9925_v56 = vld [vmem:[#allocation2 + $0x1e4] sm:$0xf0] }
  0x83   : > { %1662 = vmatmul.bf16.gmra.mxu2 %v7640_v57  ;;  %v9921_v57 = vld [vmem:[#allocation2 + $0x1cc] sm:$0xf]  ;;  %v7704_v62 = vor.u32 %v9925_v56, %v7703_v55 }
  0x84   : > { %1750 = vmatmul.bf16.gmra.mxu3 %v7644_v58  ;;  %v7705_v58 = vld [vmem:[#allocation2 + $0x1e8] sm:$0xf0] }
  0x85   : > { %v7708_v63 = vor.u32 %v9921_v57, %v7705_v58  ;;  %v7740_v58 = vor.u32 %v9929_v51, %v7737_v52  ;;  %v7759_v51 = vld [vmem:[#allocation2 + $0x240] sm:$0xf] }
  0x86   : > { %v9940_v52 = vld [vmem:[#allocation2 + $0x25c] sm:$0xf0] }
  0x87   : > { %v7760_v50 = vor.u32 %v9940_v52, %v7759_v51 }
  0x91   : > { %1491 = vmatmul.bf16.gmra.mxu0 %v7664_v36  ;;  %v9928_v36 = vld [vmem:[#allocation2 + $0x204] sm:$0xf] }
  0x92   : > { %1579 = vmatmul.bf16.gmra.mxu1 %v7668_v37  ;;  %v7729_v37 = vld [vmem:[#allocation2 + $0x220] sm:$0xf0] }
  0x93   : > { %1667 = vmatmul.bf16.gmra.mxu2 %v7672_v45  ;;  %v7735_v45 = vld [vmem:[#allocation2 + $0x208] sm:$0xf]  ;;  %v7732_v54 = vor.u32 %v9928_v36, %v7729_v37 }
  0x94   : > { %1755 = vmatmul.bf16.gmra.mxu3 %v7676_v48  ;;  %v9933_v48 = vld [vmem:[#allocation2 + $0x224] sm:$0xf0] }
  0x95   : > { %v7736_v57 = vor.u32 %v9933_v48, %v7735_v45 }
  0xa1   : > { %1496 = vmatmul.bf16.gmra.mxu0 %v7696_v60 }
  0xa2   : > { %1584 = vmatmul.bf16.gmra.mxu1 %v7700_v61  ;;  %v10868_v61 = vld [vmem:[%s10681_s24 + $0x110] sm:$0xff] }
  0xa3   : > { %1672 = vmatmul.bf16.gmra.mxu2 %v7704_v62  ;;  %12648 = vst [vmem:[#allocation9_spill] sm:$0xff] %v10868_v61  ;;  %v10871_v62 = vld [vmem:[%s10681_s24 + $0x150] sm:$0xff]  ;;  %1810 = vmatpush.bf16.msrb.mxu0 %v10868_v61 }
  0xa4   : > { %1760 = vmatmul.bf16.gmra.mxu3 %v7708_v63  ;;  %12649 = vst [vmem:[#allocation10_spill] sm:$0xff] %v10871_v62  ;;  %1898 = vmatpush.bf16.msrb.mxu1 %v10871_v62 }
  0xae   : > { %v1462_v55 = vpop.f32.mrf.mxu0 }
  0xaf   : > { %v1550_v56 = vpop.f32.mrf.mxu1 }
  0xb0   : > { %v1551_v60 = vadd.f32 %v1550_v56, %v1462_v55  ;;  %v7767_v55 = vld [vmem:[#allocation2 + $0x248] sm:$0xf] }
  0xb1   : > { %1501 = vmatmul.bf16.gmra.mxu0 %v7728_v53  ;;  %v9936_v53 = vld [vmem:[#allocation2 + $0x244] sm:$0xf]  ;;  %v9941_v56 = vld [vmem:[#allocation2 + $0x264] sm:$0xf0] }
  0xb2   : > { %1589 = vmatmul.bf16.gmra.mxu1 %v7732_v54  ;;  %v7761_v54 = vld [vmem:[#allocation2 + $0x260] sm:$0xf0] }
  0xb3   : > { %1677 = vmatmul.bf16.gmra.mxu2 %v7736_v57  ;;  %v9937_v57 = vld [vmem:[#allocation2 + $0x24c] sm:$0xf]  ;;  %v7764_v49 = vor.u32 %v9936_v53, %v7761_v54  ;;  %v7791_v54 = vld [vmem:[#allocation2 + $0x280] sm:$0xf] }
  0xb4   : > { %1765 = vmatmul.bf16.gmra.mxu3 %v7740_v58  ;;  %v7769_v58 = vld [vmem:[#allocation2 + $0x268] sm:$0xf0] }
  0xb6   : > { %v1638_v63 = vpop.f32.mrf.mxu2  ;;  %v1464_v36 = vpop.f32.mrf.mxu0 }
  0xb7   : > { %v1726_v34 = vpop.f32.mrf.mxu3  ;;  %v1639_v35 = vadd.f32 %v1638_v63, %v1551_v60  ;;  %v1552_v37 = vpop.f32.mrf.mxu1 }
  0xb8   : > { %v1553_v45 = vadd.f32 %v1552_v37, %v1464_v36  ;;  %v7768_v36 = vor.u32 %v9941_v56, %v7767_v55  ;;  %v9948_v55 = vld [vmem:[#allocation2 + $0x29c] sm:$0xf0]  ;;  %v7799_v56 = vld [vmem:[#allocation2 + $0x288] sm:$0xf] }
  0xb9   : > { %v10875_v48 = vadd.f32 %v1726_v34, %v1639_v35  ;;  %v7772_v34 = vor.u32 %v9937_v57, %v7769_v58  ;;  %v9949_v57 = vld [vmem:[#allocation2 + $0x2a4] sm:$0xf0]  ;;  %v9945_v58 = vld [vmem:[#allocation2 + $0x28c] sm:$0xf] }
  0xbb   : > { %12650 = vst [vmem:[#allocation11_spill] sm:$0xff] %v10875_v48  ;;  %v10880_v48 = vld [vmem:[%s10681_s24 + $0x1a8] sm:$0xff] }
  0xbc   : > { %12652 = vst [vmem:[#allocation13_spill] sm:$0xff] %v10880_v48  ;;  %1983 = vmatpush.bf16.msrb.mxu2 %v10880_v48  ;;  %v10895_v48 = vld [vmem:[%s10681_s24 + $0x148] sm:$0xff] }
  0xbd   : > { %12657 = vst [vmem:[#allocation18_spill] sm:$0xff] %v10895_v48  ;;  %1899 = vmatpush.bf16.msrb.mxu1 %v10895_v48 }
  0xbe   : > { %v1640_v61 = vpop.f32.mrf.mxu2  ;;  %v1467_v63 = vpop.f32.mrf.mxu0 }
  0xbf   : > { %v1728_v62 = vpop.f32.mrf.mxu3  ;;  %v1641_v60 = vadd.f32 %v1640_v61, %v1553_v45  ;;  %v1555_v39 = vpop.f32.mrf.mxu1 }
  0xc0   : > { %v1556_v35 = vadd.f32 %v1555_v39, %v1467_v63 }
  0xc1   : > { %v10877_v37 = vadd.f32 %v1728_v62, %v1641_v60  ;;  %1506 = vmatmul.bf16.gmra.mxu0 %v7760_v50  ;;  %v9944_v50 = vld [vmem:[#allocation2 + $0x284] sm:$0xf]  ;;  %v7801_v60 = vld [vmem:[#allocation2 + $0x2a8] sm:$0xf0] }
  0xc2   : > { %1594 = vmatmul.bf16.gmra.mxu1 %v7764_v49  ;;  %v7793_v49 = vld [vmem:[#allocation2 + $0x2a0] sm:$0xf0] }
  0xc3   : > { %12651 = vst [vmem:[#allocation12_spill] sm:$0xff] %v10877_v37  ;;  %1682 = vmatmul.bf16.gmra.mxu2 %v7768_v36  ;;  %v7796_v37 = vor.u32 %v9944_v50, %v7793_v49 }
  0xc4   : > { %1770 = vmatmul.bf16.gmra.mxu3 %v7772_v34  ;;  %v7792_v34 = vor.u32 %v9948_v55, %v7791_v54 }
  0xc6   : > { %v1643_v61 = vpop.f32.mrf.mxu2  ;;  %v1469_v52 = vpop.f32.mrf.mxu0 }
  0xc7   : > { %v1731_v45 = vpop.f32.mrf.mxu3  ;;  %v1644_v51 = vadd.f32 %v1643_v61, %v1556_v35  ;;  %v1557_v53 = vpop.f32.mrf.mxu1 }
  0xc8   : > { %v1558_v39 = vadd.f32 %v1557_v53, %v1469_v52  ;;  %v7800_v52 = vor.u32 %v9949_v57, %v7799_v56  ;;  %v7823_v57 = vld [vmem:[#allocation2 + $0x2c0] sm:$0xf] }
  0xc9   : > { %v10887_v62 = vadd.f32 %v1731_v45, %v1644_v51  ;;  %v7804_v45 = vor.u32 %v9945_v58, %v7801_v60  ;;  %v9952_v58 = vld [vmem:[#allocation2 + $0x2c4] sm:$0xf] }
  0xca   : > { %v7825_v60 = vld [vmem:[#allocation2 + $0x2e0] sm:$0xf0] }
  0xcb   : > { %12654 = vst [vmem:[#allocation15_spill] sm:$0xff] %v10887_v62  ;;  %v10892_v62 = vld [vmem:[%s10681_s24 + $0x108] sm:$0xff] }
  0xcc   : > { %12656 = vst [vmem:[#allocation17_spill] sm:$0xff] %v10892_v62  ;;  %1811 = vmatpush.bf16.msrb.mxu0 %v10892_v62  ;;  %v10907_v62 = vld [vmem:[%s10681_s24 + $0x1e0] sm:$0xff] }
  0xcd   : > { %12661 = vst [vmem:[#allocation22_spill] sm:$0xff] %v10907_v62  ;;  %2072 = vmatpush.bf16.msrb.mxu3 %v10907_v62 }
  0xce   : > { %v1645_v63 = vpop.f32.mrf.mxu2  ;;  %v1472_v61 = vpop.f32.mrf.mxu0 }
  0xcf   : > { %v1733_v36 = vpop.f32.mrf.mxu3  ;;  %v1646_v35 = vadd.f32 %v1645_v63, %v1558_v39  ;;  %v1560_v38 = vpop.f32.mrf.mxu1  ;;  %v7831_v63 = vld [vmem:[#allocation2 + $0x2c8] sm:$0xf] }
  0xd0   : > { %v1561_v51 = vadd.f32 %v1560_v38, %v1472_v61 }
  0xd1   : > { %v10889_v53 = vadd.f32 %v1733_v36, %v1646_v35  ;;  %1511 = vmatmul.bf16.gmra.mxu0 %v7792_v34  ;;  %v9957_v36 = vld [vmem:[#allocation2 + $0x2e4] sm:$0xf0]  ;;  %v9953_v34 = vld [vmem:[#allocation2 + $0x2cc] sm:$0xf] }
  0xd2   : > { %1599 = vmatmul.bf16.gmra.mxu1 %v7796_v37  ;;  %v9956_v37 = vld [vmem:[#allocation2 + $0x2dc] sm:$0xf0]  ;;  %v7833_v35 = vld [vmem:[#allocation2 + $0x2e8] sm:$0xf0] }
  0xd3   : > { %12655 = vst [vmem:[#allocation16_spill] sm:$0xff] %v10889_v53  ;;  %1687 = vmatmul.bf16.gmra.mxu2 %v7800_v52  ;;  %v7828_v53 = vor.u32 %v9952_v58, %v7825_v60 }
  0xd4   : > { %1775 = vmatmul.bf16.gmra.mxu3 %v7804_v45  ;;  %v7824_v45 = vor.u32 %v9956_v37, %v7823_v57 }
  0xd6   : > { %v1648_v39 = vpop.f32.mrf.mxu2  ;;  %v1474_v50 = vpop.f32.mrf.mxu0 }
  0xd7   : > { %v1736_v54 = vpop.f32.mrf.mxu3  ;;  %v1649_v55 = vadd.f32 %v1648_v39, %v1561_v51  ;;  %v1562_v49 = vpop.f32.mrf.mxu1 }
  0xd8   : > { %v1563_v38 = vadd.f32 %v1562_v49, %v1474_v50  ;;  %v7832_v50 = vor.u32 %v9957_v36, %v7831_v63  ;;  %v7855_v36 = vld [vmem:[#allocation2 + $0x300] sm:$0xf] }
  0xd9   : > { %v10899_v56 = vadd.f32 %v1736_v54, %v1649_v55  ;;  %v7836_v54 = vor.u32 %v9953_v34, %v7833_v35  ;;  %v9964_v34 = vld [vmem:[#allocation2 + $0x31c] sm:$0xf0]  ;;  %v9960_v35 = vld [vmem:[#allocation2 + $0x304] sm:$0xf] }
  0xdb   : > { %12658 = vst [vmem:[#allocation19_spill] sm:$0xff] %v10899_v56  ;;  %v10904_v56 = vld [vmem:[%s10681_s24 + $0x1a0] sm:$0xff] }
  0xdc   : > { %12660 = vst [vmem:[#allocation21_spill] sm:$0xff] %v10904_v56  ;;  %1984 = vmatpush.bf16.msrb.mxu2 %v10904_v56  ;;  %v10919_v56 = vld [vmem:[%s10681_s24 + $0x140] sm:$0xff] }
  0xdd   : > { %1900 = vmatpush.bf16.msrb.mxu1 %v10919_v56 }
  0xde   : > { %v1650_v61 = vpop.f32.mrf.mxu2  ;;  %v1477_v39 = vpop.f32.mrf.mxu0 }
  0xdf   : > { %v1738_v52 = vpop.f32.mrf.mxu3  ;;  %v1651_v51 = vadd.f32 %v1650_v61, %v1563_v38  ;;  %v1565_v48 = vpop.f32.mrf.mxu1  ;;  %v7863_v61 = vld [vmem:[#allocation2 + $0x308] sm:$0xf] }
  0xe0   : > { %v1566_v55 = vadd.f32 %v1565_v48, %v1477_v39 }
  0xe1   : > { %v10901_v49 = vadd.f32 %v1738_v52, %v1651_v51  ;;  %1516 = vmatmul.bf16.gmra.mxu0 %v7824_v45  ;;  %v9965_v52 = vld [vmem:[#allocation2 + $0x324] sm:$0xf0]  ;;  %v9961_v45 = vld [vmem:[#allocation2 + $0x30c] sm:$0xf]  ;;  %3022 = vmatpush.bf16.msra.mxu1 %v10687_v1 }
  0xe2   : > { %1604 = vmatmul.bf16.gmra.mxu1 %v7828_v53  ;;  %v7857_v53 = vld [vmem:[#allocation2 + $0x320] sm:$0xf0]  ;;  %v7865_v51 = vld [vmem:[#allocation2 + $0x328] sm:$0xf0] }
  0xe3   : > { %12659 = vst [vmem:[#allocation20_spill] sm:$0xff] %v10901_v49  ;;  %1692 = vmatmul.bf16.gmra.mxu2 %v7832_v50  ;;  %v7860_v49 = vor.u32 %v9960_v35, %v7857_v53 }
  0xe4   : > { %1780 = vmatmul.bf16.gmra.mxu3 %v7836_v54  ;;  %v7856_v54 = vor.u32 %v9964_v34, %v7855_v36 }
  0xe5   : > { %3023 = vmatpush.bf16.msra.mxu1 %v10701_v5 }
  0xe6   : > { %v1653_v38 = vpop.f32.mrf.mxu2  ;;  %v1479_v58 = vpop.f32.mrf.mxu0 }
  0xe7   : > { %v1741_v57 = vpop.f32.mrf.mxu3  ;;  %v1654_v37 = vadd.f32 %v1653_v38, %v1566_v55  ;;  %v1567_v60 = vpop.f32.mrf.mxu1 }
  0xe8   : > { %v1568_v48 = vadd.f32 %v1567_v60, %v1479_v58  ;;  %v7864_v58 = vor.u32 %v9965_v52, %v7863_v61  ;;  %v7887_v61 = vld [vmem:[#allocation2 + $0x340] sm:$0xf] }
  0xe9   : > { %v10911_v63 = vadd.f32 %v1741_v57, %v1654_v37  ;;  %v7868_v57 = vor.u32 %v9961_v45, %v7865_v51  ;;  %v9972_v52 = vld [vmem:[#allocation2 + $0x35c] sm:$0xf0]  ;;  %v9968_v45 = vld [vmem:[#allocation2 + $0x344] sm:$0xf]  ;;  %3024 = vmatpush.bf16.msra.mxu1 %v10717_v9 }
  0xea   : > { %v7889_v51 = vld [vmem:[#allocation2 + $0x360] sm:$0xf0] }
  0xeb   : > { %12662 = vst [vmem:[#allocation23_spill] sm:$0xff] %v10911_v63  ;;  %v10916_v63 = vld [vmem:[%s10681_s24 + $0x100] sm:$0xff] }
  0xec   : > { %1812 = vmatpush.bf16.msrb.mxu0 %v10916_v63 }
  0xed   : > { %3025 = vmatpush.bf16.msra.mxu1 %v10733_v13  ;;  %v7919_v13 = vld [vmem:[#allocation2 + $0x380] sm:$0xf] }
  0xee   : > { %v1655_v39 = vpop.f32.mrf.mxu2  ;;  %v1482_v38 = vpop.f32.mrf.mxu0 }
  0xef   : > { %v1743_v50 = vpop.f32.mrf.mxu3  ;;  %v1656_v55 = vadd.f32 %v1655_v39, %v1568_v48  ;;  %v1570_v62 = vpop.f32.mrf.mxu1  ;;  %v7895_v39 = vld [vmem:[#allocation2 + $0x348] sm:$0xf] }
  0xf0   : > { %v1571_v37 = vadd.f32 %v1570_v62, %v1482_v38  ;;  %2934 = vmatpush.bf16.msra.mxu0 %v10684_v0  ;;  %v9969_v0 = vld [vmem:[#allocation2 + $0x34c] sm:$0xf]  ;;  %v7888_v38 = vor.u32 %v9972_v52, %v7887_v61 }
  0xf1   : > { %v10913_v60 = vadd.f32 %v1743_v50, %v1656_v55  ;;  %1521 = vmatmul.bf16.gmra.mxu0 %v7856_v54  ;;  %v9973_v50 = vld [vmem:[#allocation2 + $0x364] sm:$0xf0]  ;;  %v7897_v54 = vld [vmem:[#allocation2 + $0x368] sm:$0xf0]  ;;  %3026 = vmatpush.bf16.msra.mxu1 %v10749_v17 }
  0xf2   : > { %1609 = vmatmul.bf16.gmra.mxu1 %v7860_v49  ;;  %v7896_v5 = vor.u32 %v9973_v50, %v7895_v39  ;;  %v10948_v39 = vld [vmem:[%s10681_s24 + $0x1d0] sm:$0xff]  ;;  %v10954_v50 = vld [vmem:[%s10681_s24 + $0x188] sm:$0xff] }
  0xf3   : > { %1697 = vmatmul.bf16.gmra.mxu2 %v7864_v58  ;;  %v7892_v58 = vor.u32 %v9968_v45, %v7889_v51 }
  0xf4   : > { %1785 = vmatmul.bf16.gmra.mxu3 %v7868_v57  ;;  %2935 = vmatpush.bf16.msra.mxu0 %v10698_v4 }
  0xf5   : > { %3027 = vmatpush.bf16.msra.mxu1 %v10765_v21 }
  0xf6   : > { %v1658_v48 = vpop.f32.mrf.mxu2  ;;  %v1484_v34 = vpop.f32.mrf.mxu0 }
  0xf7   : > { %v1746_v36 = vpop.f32.mrf.mxu3  ;;  %v1659_v62 = vadd.f32 %v1658_v48, %v1571_v37  ;;  %v1572_v35 = vpop.f32.mrf.mxu1  ;;  %v7900_v48 = vor.u32 %v9969_v0, %v7897_v54  ;;  %v9980_v0 = vld [vmem:[#allocation2 + $0x39c] sm:$0xf0]  ;;  %v9976_v54 = vld [vmem:[#allocation2 + $0x384] sm:$0xf] }
  0xf8   : > { %v1573_v49 = vadd.f32 %v1572_v35, %v1484_v34  ;;  %2936 = vmatpush.bf16.msra.mxu0 %v10714_v8  ;;  %v10934_v34 = vld [vmem:[%s10681_s24 + $0x198] sm:$0xff] }
  0xf9   : > { %v10925_v53 = vadd.f32 %v1746_v36, %v1659_v62  ;;  %v10937_v35 = vld [vmem:[%s10681_s24 + $0x1d8] sm:$0xff]  ;;  %1985 = vmatpush.bf16.msrb.mxu2 %v10934_v34  ;;  %3028 = vmatpush.bf16.msra.mxu1 %v10781_v25  ;;  %v437_v25 = vld [vmem:[#allocation2 + $0x3c0] sm:$0xff] }
  0xfa   : > { %2073 = vmatpush.bf16.msrb.mxu3 %v10937_v35 }
  0xfc   : > { %2937 = vmatpush.bf16.msra.mxu0 %v10730_v12 }
  0xfd   : > { %3029 = vmatpush.bf16.msra.mxu1 %v10795_v29 }
  0xfe   : > { %v1660_v1 = vpop.f32.mrf.mxu2  ;;  %v1487_v4 = vpop.f32.mrf.mxu0  ;;  %2074 = vmatpush.bf16.msrb.mxu3 %v10948_v39 }
  0xff   : > { %v1748_v55 = vpop.f32.mrf.mxu3  ;;  %v1661_v57 = vadd.f32 %v1660_v1, %v1573_v49  ;;  %v1575_v37 = vpop.f32.mrf.mxu1  ;;  %v10944_v49 = vld [vmem:[%s10681_s24 + $0x190] sm:$0xff]  ;;  %v7921_v1 = vld [vmem:[#allocation2 + $0x3a0] sm:$0xf0] }
 0x100   : > { %v1576_v36 = vadd.f32 %v1575_v37, %v1487_v4  ;;  %1986 = vmatpush.bf16.msrb.mxu2 %v10944_v49  ;;  %2938 = vmatpush.bf16.msra.mxu0 %v10746_v16  ;;  %v10960_v16 = vld [vmem:[%s10681_s24 + $0x1c8] sm:$0xff]  ;;  %v7920_v37 = vor.u32 %v9980_v0, %v7919_v13 }
 0x101   : > { %v10931_v62 = vadd.f32 %v1748_v55, %v1661_v57  ;;  %1526 = vmatmul.bf16.gmra.mxu0 %v7888_v38  ;;  %v7927_v55 = vld [vmem:[#allocation2 + $0x388] sm:$0xf]  ;;  %v7929_v57 = vld [vmem:[#allocation2 + $0x3a8] sm:$0xf0] }
 0x102   : > { %1614 = vmatmul.bf16.gmra.mxu1 %v7892_v58  ;;  %v9981_v38 = vld [vmem:[#allocation2 + $0x3a4] sm:$0xf0]  ;;  %v9977_v58 = vld [vmem:[#allocation2 + $0x38c] sm:$0xf]  ;;  %2075 = vmatpush.bf16.msrb.mxu3 %v10960_v16 }
 0x103   : > { %1702 = vmatmul.bf16.gmra.mxu2 %v7896_v5  ;;  %v7924_v5 = vor.u32 %v9976_v54, %v7921_v1  ;;  %v438_v54 = vld [vmem:[#allocation2 + $0x3c8] sm:$0xff] }
 0x104   : > { %1790 = vmatmul.bf16.gmra.mxu3 %v7900_v48  ;;  %1987 = vmatpush.bf16.msrb.mxu2 %v10954_v50  ;;  %v10966_v48 = vld [vmem:[%s10681_s24 + $0x180] sm:$0xff] }
 0x105   : > { %2939 = vmatpush.bf16.msra.mxu0 %v10762_v20 }
 0x106   : > { %v1663_v8 = vpop.f32.mrf.mxu2  ;;  %v1489_v52 = vpop.f32.mrf.mxu0 }
 0x107   : > { %v1751_v9 = vpop.f32.mrf.mxu3  ;;  %v1664_v61 = vadd.f32 %v1663_v8, %v1576_v36  ;;  %v1577_v45 = vpop.f32.mrf.mxu1 }
 0x108   : > { %v1578_v51 = vadd.f32 %v1577_v45, %v1489_v52  ;;  %v7932_v52 = vor.u32 %v9977_v58, %v7929_v57  ;;  %1988 = vmatpush.bf16.msrb.mxu2 %v10966_v48 }
 0x109   : > { %v10951_v12 = vadd.f32 %v1751_v9, %v1664_v61  ;;  %v7928_v61 = vor.u32 %v9981_v38, %v7927_v55  ;;  %2940 = vmatpush.bf16.msra.mxu0 %v10778_v24  ;;  %v807_v55 = vunpack.c.l.b16 %v438_v54 }
 0x10b   : > { %12663 = vst [vmem:[#allocation24_spill] sm:$0xff] %v10951_v12  ;;  %v10970_v12 = vld [vmem:[%s10681_s24 + $0x1c0] sm:$0xff] }
 0x10c   : > { %3110 = vmatpush.bf16.msra.mxu2 %v10690_v2  ;;  %2076 = vmatpush.bf16.msrb.mxu3 %v10970_v12 }
 0x10d   : > { %2941 = vmatpush.bf16.msra.mxu0 %v10792_v28  ;;  %v805_v28 = vunpack.c.l.b16 %v437_v25 }
 0x10e   : > { %v1665_v17 = vpop.f32.mrf.mxu2  ;;  %v1492_v8 = vpop.f32.mrf.mxu0 }
 0x10f   : > { %v1753_v4 = vpop.f32.mrf.mxu3  ;;  %v1666_v36 = vadd.f32 %v1665_v17, %v1578_v51  ;;  %v1580_v9 = vpop.f32.mrf.mxu1  ;;  %v933_v58 = vpack.c.b16 %v805_v28, %v805_v28 }
 0x110   : > { %v1581_v45 = vadd.f32 %v1580_v9, %v1492_v8  ;;  %3198 = vmatpush.bf16.msra.mxu3 %v10693_v3  ;;  %3111 = vmatpush.bf16.msra.mxu2 %v10706_v6  ;;  %v806_v3 = vunpack.c.h.b16 %v437_v25  ;;  %v808_v6 = vunpack.c.h.b16 %v438_v54 }
 0x111   : > { %v10973_v20 = vadd.f32 %v1753_v4, %v1666_v36  ;;  %1531 = vmatmul.bf16.gmra.mxu0 %v7920_v37 }
 0x112   : > { %1619 = vmatmul.bf16.gmra.mxu1 %v7924_v5  ;;  %v934_v57 = vpack.c.b16 %v806_v3, %v806_v3  ;;  %v935_v5 = vpack.c.b16 %v807_v55, %v807_v55  ;;  %v936_v36 = vpack.c.b16 %v808_v6, %v808_v6 }
 0x113   : > { %1707 = vmatmul.bf16.gmra.mxu2 %v7928_v61 }
 0x114   : > { %1795 = vmatmul.bf16.gmra.mxu3 %v7932_v52  ;;  %3112 = vmatpush.bf16.msra.mxu2 %v10722_v10 }
 0x115   : > { %3199 = vmatpush.bf16.msra.mxu3 %v10709_v7 }
 0x116   : > { %v1668_v21 = vpop.f32.mrf.mxu2  ;;  %v1494_v2 = vpop.f32.mrf.mxu0 }
 0x117   : > { %v1756_v24 = vpop.f32.mrf.mxu3  ;;  %v1669_v51 = vadd.f32 %v1668_v21, %v1581_v45  ;;  %v1582_v13 = vpop.f32.mrf.mxu1  ;;  %v9866_v21 = vld [vmem:[#allocation2 + $0x14] sm:$0xf] }
 0x118   : > { %v1583_v0 = vadd.f32 %v1582_v13, %v1494_v2  ;;  %3113 = vmatpush.bf16.msra.mxu2 %v10738_v14  ;;  %v9867_v2 = vld [vmem:[#allocation2 + $0x1c] sm:$0xf] }
 0x119   : > { %v10982_v1 = vadd.f32 %v1756_v24, %v1669_v51  ;;  %3200 = vmatpush.bf16.msra.mxu3 %v10725_v11  ;;  %v7489_v24 = vld [vmem:[#allocation2 + $0x30] sm:$0xf0]  ;;  %v7495_v51 = vld [vmem:[#allocation2 + $0x18] sm:$0xf] }
 0x11a   : > { %v7492_v54 = vor.u32 %v9866_v21, %v7489_v24  ;;  %v12667_v21 = vld [vmem:[#allocation6_spill] sm:$0xff] }
 0x11b   : > { %v12669_v24 = vld [vmem:[#allocation22_spill] sm:$0xff] }
 0x11c   : > { %3114 = vmatpush.bf16.msra.mxu2 %v10754_v18  ;;  %v9870_v18 = vld [vmem:[#allocation2 + $0x2c] sm:$0xf0] }
 0x11d   : > { %3201 = vmatpush.bf16.msra.mxu3 %v10741_v15  ;;  %v7487_v15 = vld [vmem:[#allocation2 + $0x10] sm:$0xf] }
 0x11e   : > { %v1670_v29 = vpop.f32.mrf.mxu2  ;;  %v1497_v4 = vpop.f32.mrf.mxu0 }
 0x11f   : > { %v1758_v38 = vpop.f32.mrf.mxu3  ;;  %v1671_v17 = vadd.f32 %v1670_v29, %v1583_v0  ;;  %v1585_v37 = vpop.f32.mrf.mxu1  ;;  %v7488_v0 = vor.u32 %v9870_v18, %v7487_v15  ;;  %v12666_v18 = vld [vmem:[#allocation5_spill] sm:$0xff] }
 0x120   : > { %v1586_v7 = vadd.f32 %v1585_v37, %v1497_v4  ;;  %3115 = vmatpush.bf16.msra.mxu2 %v10770_v22  ;;  %v7497_v22 = vld [vmem:[#allocation2 + $0x38] sm:$0xf0]  ;;  %v7527_v4 = vld [vmem:[#allocation2 + $0x58] sm:$0xf] }
 0x121   : > { %v10988_v8 = vadd.f32 %v1758_v38, %v1671_v17  ;;  %1536 = vmatmul.bf16.gmra.mxu0 %v933_v58  ;;  %3202 = vmatpush.bf16.msra.mxu3 %v10757_v19  ;;  %v9871_v19 = vld [vmem:[#allocation2 + $0x34] sm:$0xf0]  ;;  %v7500_v55 = vor.u32 %v9867_v2, %v7497_v22 }
 0x122   : > { %1624 = vmatmul.bf16.gmra.mxu1 %v934_v57  ;;  %v9879_v37 = vld [vmem:[#allocation2 + $0x74] sm:$0xf0] }
 0x123   : > { %1712 = vmatmul.bf16.gmra.mxu2 %v935_v5  ;;  %v9875_v5 = vld [vmem:[#allocation2 + $0x5c] sm:$0xf] }
 0x124   : > { %1800 = vmatmul.bf16.gmra.mxu3 %v936_v36  ;;  %3116 = vmatpush.bf16.msra.mxu2 %v10786_v26  ;;  %v7496_v26 = vor.u32 %v9871_v19, %v7495_v51  ;;  %v7529_v36 = vld [vmem:[#allocation2 + $0x78] sm:$0xf0]  ;;  %v12670_v51 = vld [vmem:[#allocation7_spill] sm:$0xff] }
 0x125   : > { %3203 = vmatpush.bf16.msra.mxu3 %v10773_v23  ;;  %v12671_v19 = vld [vmem:[#allocation8_spill] sm:$0xff] }
 0x126   : > { %v1673_v10 = vpop.f32.mrf.mxu2  ;;  %v1499_v9 = vpop.f32.mrf.mxu0 }
 0x127   : > { %v1761_v11 = vpop.f32.mrf.mxu3  ;;  %v1674_v14 = vadd.f32 %v1673_v10, %v1586_v7  ;;  %v1587_v61 = vpop.f32.mrf.mxu1 }
 0x128   : > { %v1588_v52 = vadd.f32 %v1587_v61, %v1499_v9  ;;  %3117 = vmatpush.bf16.msra.mxu2 %v10798_v30  ;;  %v7528_v61 = vor.u32 %v9879_v37, %v7527_v4 }
 0x129   : > { %v10994_v45 = vadd.f32 %v1761_v11, %v1674_v14  ;;  %3204 = vmatpush.bf16.msra.mxu3 %v10789_v27 }
 0x12d   : > { %3205 = vmatpush.bf16.msra.mxu3 %v10801_v31 }
 0x12e   : > { %v1675_v13 = vpop.f32.mrf.mxu2  ;;  %v1502_v23 = vpop.f32.mrf.mxu0 }
 0x12f   : > { %v1763_v25 = vpop.f32.mrf.mxu3  ;;  %v1676_v28 = vadd.f32 %v1675_v13, %v1588_v52  ;;  %v1590_v3 = vpop.f32.mrf.mxu1  ;;  %v7532_v52 = vor.u32 %v9875_v5, %v7529_v36 }
 0x130   : > { %v1591_v6 = vadd.f32 %v1590_v3, %v1502_v23  ;;  %v12673_v23 = vld [vmem:[#allocation10_spill] sm:$0xff] }
 0x131   : > { %v11000_v29 = vadd.f32 %v1763_v25, %v1676_v28  ;;  %1813 = vmatmul.bf16.vlgmr.msrb.gmra.mxu0 %v7488_v0  ;;  %v12672_v28 = vld [vmem:[#allocation9_spill] sm:$0xff] }
 0x132   : > { %1901 = vmatmul.bf16.vlgmr.msrb.gmra.mxu1 %v7492_v54  ;;  %3286 = vmatpush.bf16.msrb.mxu0 %v10808_v40  ;;  %v7519_v40 = vld [vmem:[#allocation2 + $0x50] sm:$0xf] }
 0x133   : > { %1989 = vmatmul.bf16.vlgmr.msrb.gmra.mxu2 %v7496_v26  ;;  %3374 = vmatpush.bf16.msrb.mxu1 %v10811_v41  ;;  %v9878_v41 = vld [vmem:[#allocation2 + $0x6c] sm:$0xf0] }
 0x134   : > { %2077 = vmatmul.bf16.vlgmr.msrb.gmra.mxu3 %v7500_v55  ;;  %3462 = vmatpush.bf16.msrb.mxu2 %v10842_v44  ;;  %v9874_v44 = vld [vmem:[#allocation2 + $0x54] sm:$0xf]  ;;  %v7520_v10 = vor.u32 %v9878_v41, %v7519_v40  ;;  %v7551_v26 = vld [vmem:[#allocation2 + $0x90] sm:$0xf] }
 0x135   : > { %3550 = vmatpush.bf16.msrb.mxu3 %v10848_v59  ;;  %v7521_v59 = vld [vmem:[#allocation2 + $0x70] sm:$0xf0] }
 0x136   : > { %v1678_v27 = vpop.f32.mrf.mxu2  ;;  %v1504_v58 = vpop.f32.mrf.mxu0  ;;  %3287 = vmatpush.bf16.msrb.mxu0 %v10820_v46  ;;  %v12664_v46 = vld [vmem:[#allocation13_spill] sm:$0xff]  ;;  %v9882_v55 = vld [vmem:[#allocation2 + $0x94] sm:$0xf] }
 0x137   : > { %v1766_v30 = vpop.f32.mrf.mxu3  ;;  %v1679_v38 = vadd.f32 %v1678_v27, %v1591_v6  ;;  %v1592_v57 = vpop.f32.mrf.mxu1  ;;  %3375 = vmatpush.bf16.msrb.mxu1 %v10823_v47  ;;  %v12665_v47 = vld [vmem:[#allocation14_spill] sm:$0xff]  ;;  %v7559_v6 = vld [vmem:[#allocation2 + $0x98] sm:$0xf] }
 0x138   : > { %v1593_v17 = vadd.f32 %v1592_v57, %v1504_v58  ;;  %3463 = vmatpush.bf16.msrb.mxu2 %v10860_v32  ;;  %v9887_v27 = vld [vmem:[#allocation2 + $0xb4] sm:$0xf0]  ;;  %v12674_v58 = vld [vmem:[#allocation17_spill] sm:$0xff]  ;;  %v12675_v57 = vld [vmem:[#allocation18_spill] sm:$0xff] }
 0x139   : > { %v11009_v31 = vadd.f32 %v1766_v30, %v1679_v38  ;;  %3551 = vmatpush.bf16.msrb.mxu3 %v10863_v33  ;;  %v7524_v33 = vor.u32 %v9874_v44, %v7521_v59  ;;  %v9883_v30 = vld [vmem:[#allocation2 + $0x9c] sm:$0xf]  ;;  %v7560_v4 = vor.u32 %v9887_v27, %v7559_v6  ;;  %v7617_v6 = vld [vmem:[#allocation2 + $0x130] sm:$0xf0]  ;;  %v7623_v27 = vld [vmem:[#allocation2 + $0x118] sm:$0xf] }
 0x13a   : > { %3288 = vmatpush.bf16.msrb.mxu0 %v10828_v42  ;;  %v7561_v38 = vld [vmem:[#allocation2 + $0xb8] sm:$0xf0] }
 0x13b   : > { %3376 = vmatpush.bf16.msrb.mxu1 %v10831_v43  ;;  %v12668_v43 = vld [vmem:[#allocation21_spill] sm:$0xff]  ;;  %v7564_v37 = vor.u32 %v9883_v30, %v7561_v38  ;;  %v9903_v30 = vld [vmem:[#allocation2 + $0x134] sm:$0xf0]  ;;  %v9899_v38 = vld [vmem:[#allocation2 + $0x11c] sm:$0xf] }
 0x13c   : > { %3464 = vmatpush.bf16.msrb.mxu2 %v12664_v46 }
 0x13d   : > { %3552 = vmatpush.bf16.msrb.mxu3 %v12665_v47 }
 0x13e   : > { %v1680_v7 = vpop.f32.mrf.mxu2  ;;  %v1507_v14 = vpop.f32.mrf.mxu0  ;;  %3289 = vmatpush.bf16.msrb.mxu0 %v12666_v18 }
 0x13f   : > { %v1768_v32 = vpop.f32.mrf.mxu3  ;;  %v1681_v11 = vadd.f32 %v1680_v7, %v1593_v17  ;;  %v1595_v9 = vpop.f32.mrf.mxu1  ;;  %3377 = vmatpush.bf16.msrb.mxu1 %v12667_v21 }
 0x140   : > { %v1596_v15 = vadd.f32 %v1595_v9, %v1507_v14  ;;  %3465 = vmatpush.bf16.msrb.mxu2 %v12668_v43  ;;  %v7591_v14 = vld [vmem:[#allocation2 + $0xd8] sm:$0xf]  ;;  %v9891_v9 = vld [vmem:[#allocation2 + $0xdc] sm:$0xf] }
 0x141   : > { %v11019_v42 = vadd.f32 %v1768_v32, %v1681_v11  ;;  %3553 = vmatpush.bf16.msrb.mxu3 %v12669_v24  ;;  %1818 = vmatmul.bf16.gmra.mxu0 %v7520_v10  ;;  %v7585_v11 = vld [vmem:[#allocation2 + $0xf0] sm:$0xf0] }
 0x142   : > { %1906 = vmatmul.bf16.gmra.mxu1 %v7524_v33  ;;  %3290 = vmatpush.bf16.msrb.mxu0 %v12670_v51  ;;  %v9890_v33 = vld [vmem:[#allocation2 + $0xd4] sm:$0xf] }
 0x143   : > { %1994 = vmatmul.bf16.gmra.mxu2 %v7528_v61  ;;  %3378 = vmatpush.bf16.msrb.mxu1 %v12671_v19  ;;  %v7588_v18 = vor.u32 %v9890_v33, %v7585_v11  ;;  %v9910_v33 = vld [vmem:[#allocation2 + $0x16c] sm:$0xf0]  ;;  %v9906_v11 = vld [vmem:[#allocation2 + $0x154] sm:$0xf] }
 0x144   : > { %2082 = vmatmul.bf16.gmra.mxu3 %v7532_v52  ;;  %3466 = vmatpush.bf16.msrb.mxu2 %v10934_v34  ;;  %v9886_v34 = vld [vmem:[#allocation2 + $0xac] sm:$0xf0] }
 0x145   : > { %3554 = vmatpush.bf16.msrb.mxu3 %v10937_v35  ;;  %v7553_v35 = vld [vmem:[#allocation2 + $0xb0] sm:$0xf0]  ;;  %v7552_v40 = vor.u32 %v9886_v34, %v7551_v26  ;;  %v7615_v34 = vld [vmem:[#allocation2 + $0x110] sm:$0xf] }
 0x146   : > { %v1683_v2 = vpop.f32.mrf.mxu2  ;;  %v1509_v25 = vpop.f32.mrf.mxu0  ;;  %3291 = vmatpush.bf16.msrb.mxu0 %v12672_v28 }
 0x147   : > { %v1771_v22 = vpop.f32.mrf.mxu3  ;;  %v1684_v13 = vadd.f32 %v1683_v2, %v1596_v15  ;;  %v1597_v0 = vpop.f32.mrf.mxu1  ;;  %3379 = vmatpush.bf16.msrb.mxu1 %v12673_v23 }
 0x148   : > { %v1598_v54 = vadd.f32 %v1597_v0, %v1509_v25  ;;  %3467 = vmatpush.bf16.msrb.mxu2 %v10944_v49 }
 0x149   : > { %v11029_v3 = vadd.f32 %v1771_v22, %v1684_v13  ;;  %3555 = vmatpush.bf16.msrb.mxu3 %v10948_v39  ;;  %v7556_v39 = vor.u32 %v9882_v55, %v7553_v35  ;;  %v9902_v55 = vld [vmem:[#allocation2 + $0x12c] sm:$0xf0]  ;;  %v9898_v35 = vld [vmem:[#allocation2 + $0x114] sm:$0xf] }
 0x14a   : > { %3292 = vmatpush.bf16.msrb.mxu0 %v12674_v58  ;;  %v7625_v58 = vld [vmem:[#allocation2 + $0x138] sm:$0xf0] }
 0x14b   : > { %3380 = vmatpush.bf16.msrb.mxu1 %v12675_v57 }
 0x14c   : > { %3468 = vmatpush.bf16.msrb.mxu2 %v10954_v50 }
 0x14d   : > { %3556 = vmatpush.bf16.msrb.mxu3 %v10960_v16 }
 0x14e   : > { %v1685_v17 = vpop.f32.mrf.mxu2  ;;  %v1512_v44 = vpop.f32.mrf.mxu0  ;;  %3293 = vmatpush.bf16.msrb.mxu0 %v10916_v63  ;;  %v7583_v63 = vld [vmem:[#allocation2 + $0xd0] sm:$0xf] }
 0x14f   : > { %v1773_v49 = vpop.f32.mrf.mxu3  ;;  %v1686_v41 = vadd.f32 %v1685_v17, %v1598_v54  ;;  %v1600_v59 = vpop.f32.mrf.mxu1  ;;  %3381 = vmatpush.bf16.msrb.mxu1 %v10919_v56  ;;  %v9894_v56 = vld [vmem:[#allocation2 + $0xec] sm:$0xf0] }
 0x150   : > { %v1601_v5 = vadd.f32 %v1600_v59, %v1512_v44  ;;  %3469 = vmatpush.bf16.msrb.mxu2 %v10966_v48  ;;  %v9895_v48 = vld [vmem:[#allocation2 + $0xf4] sm:$0xf0]  ;;  %v7584_v15 = vor.u32 %v9894_v56, %v7583_v63  ;;  %v7624_v59 = vor.u32 %v9903_v30, %v7623_v27  ;;  %v7647_v56 = vld [vmem:[#allocation2 + $0x150] sm:$0xf]  ;;  %v9914_v30 = vld [vmem:[#allocation2 + $0x194] sm:$0xf] }
 0x151   : > { %v11039_v36 = vadd.f32 %v1773_v49, %v1686_v41  ;;  %3557 = vmatpush.bf16.msrb.mxu3 %v10970_v12  ;;  %1823 = vmatmul.bf16.gmra.mxu0 %v7552_v40  ;;  %v7593_v12 = vld [vmem:[#allocation2 + $0xf8] sm:$0xf0]  ;;  %v7592_v51 = vor.u32 %v9895_v48, %v7591_v14  ;;  %v7616_v49 = vor.u32 %v9902_v55, %v7615_v34  ;;  %v7649_v14 = vld [vmem:[#allocation2 + $0x170] sm:$0xf0]  ;;  %v7655_v48 = vld [vmem:[#allocation2 + $0x158] sm:$0xf] }
 0x152   : > { %1911 = vmatmul.bf16.gmra.mxu1 %v7556_v39  ;;  %v7596_v19 = vor.u32 %v9891_v9, %v7593_v12  ;;  %v7620_v40 = vor.u32 %v9898_v35, %v7617_v6  ;;  %v9911_v9 = vld [vmem:[#allocation2 + $0x174] sm:$0xf0]  ;;  %v9907_v12 = vld [vmem:[#allocation2 + $0x15c] sm:$0xf]  ;;  %v7679_v6 = vld [vmem:[#allocation2 + $0x190] sm:$0xf] }
 0x153   : > { %1999 = vmatmul.bf16.gmra.mxu2 %v7560_v4  ;;  %v7628_v4 = vor.u32 %v9899_v38, %v7625_v58  ;;  %v9918_v27 = vld [vmem:[#allocation2 + $0x1ac] sm:$0xf0]  ;;  %v7681_v38 = vld [vmem:[#allocation2 + $0x1b0] sm:$0xf0]  ;;  %v7687_v58 = vld [vmem:[#allocation2 + $0x198] sm:$0xf] }
 0x154   : > { %2087 = vmatmul.bf16.gmra.mxu3 %v7564_v37 }
 0x156   : > { %v1688_v50 = vpop.f32.mrf.mxu2  ;;  %v1514_v47 = vpop.f32.mrf.mxu0 }
 0x157   : > { %v1776_v16 = vpop.f32.mrf.mxu3  ;;  %v1689_v46 = vadd.f32 %v1688_v50, %v1601_v5  ;;  %v1602_v7 = vpop.f32.mrf.mxu1 }
 0x158   : > { %v1603_v32 = vadd.f32 %v1602_v7, %v1514_v47 }
 0x159   : > { %v11043_v10 = vadd.f32 %v1776_v16, %v1689_v46 }
 0x15e   : > { %v1690_v61 = vpop.f32.mrf.mxu2  ;;  %v1517_v43 = vpop.f32.mrf.mxu0 }
 0x15f   : > { %v1778_v52 = vpop.f32.mrf.mxu3  ;;  %v1691_v21 = vadd.f32 %v1690_v61, %v1603_v32  ;;  %v1605_v24 = vpop.f32.mrf.mxu1  ;;  %v7657_v61 = vld [vmem:[#allocation2 + $0x178] sm:$0xf0] }
 0x160   : > { %v1606_v2 = vadd.f32 %v1605_v24, %v1517_v43 }
 0x161   : > { %v11045_v22 = vadd.f32 %v1778_v52, %v1691_v21  ;;  %1828 = vmatmul.bf16.gmra.mxu0 %v7584_v15  ;;  %v7652_v21 = vor.u32 %v9906_v11, %v7649_v14 }
 0x162   : > { %1916 = vmatmul.bf16.gmra.mxu1 %v7588_v18  ;;  %v7648_v18 = vor.u32 %v9910_v33, %v7647_v56 }
 0x163   : > { %2004 = vmatmul.bf16.gmra.mxu2 %v7592_v51 }
 0x164   : > { %2092 = vmatmul.bf16.gmra.mxu3 %v7596_v19  ;;  %v7656_v19 = vor.u32 %v9911_v9, %v7655_v48  ;;  %v7711_v9 = vld [vmem:[#allocation2 + $0x1d0] sm:$0xf] }
 0x166   : > { %v1693_v13 = vpop.f32.mrf.mxu2  ;;  %v1519_v54 = vpop.f32.mrf.mxu0 }
 0x167   : > { %v1781_v25 = vpop.f32.mrf.mxu3  ;;  %v1694_v0 = vadd.f32 %v1693_v13, %v1606_v2  ;;  %v1607_v28 = vpop.f32.mrf.mxu1  ;;  %v7660_v2 = vor.u32 %v9907_v12, %v7657_v61  ;;  %v9926_v12 = vld [vmem:[#allocation2 + $0x1ec] sm:$0xf0]  ;;  %v9922_v61 = vld [vmem:[#allocation2 + $0x1d4] sm:$0xf] }
 0x168   : > { %v1608_v23 = vadd.f32 %v1607_v28, %v1519_v54 }
 0x169   : > { %v11047_v26 = vadd.f32 %v1781_v25, %v1694_v0 }
 0x16e   : > { %v1695_v57 = vpop.f32.mrf.mxu2  ;;  %v1522_v41 = vpop.f32.mrf.mxu0 }
 0x16f   : > { %v1783_v17 = vpop.f32.mrf.mxu3  ;;  %v1696_v39 = vadd.f32 %v1695_v57, %v1608_v23  ;;  %v1610_v44 = vpop.f32.mrf.mxu1  ;;  %v9919_v57 = vld [vmem:[#allocation2 + $0x1b4] sm:$0xf0] }
 0x170   : > { %v1611_v37 = vadd.f32 %v1610_v44, %v1522_v41  ;;  %v7680_v41 = vor.u32 %v9918_v27, %v7679_v6  ;;  %v7684_v44 = vor.u32 %v9914_v30, %v7681_v38 }
 0x171   : > { %v11049_v5 = vadd.f32 %v1783_v17, %v1696_v39  ;;  %1833 = vmatmul.bf16.gmra.mxu0 %v7616_v49  ;;  %v9915_v17 = vld [vmem:[#allocation2 + $0x19c] sm:$0xf] }
 0x172   : > { %1921 = vmatmul.bf16.gmra.mxu1 %v7620_v40  ;;  %v7689_v49 = vld [vmem:[#allocation2 + $0x1b8] sm:$0xf0] }
 0x173   : > { %2009 = vmatmul.bf16.gmra.mxu2 %v7624_v59 }
 0x174   : > { %2097 = vmatmul.bf16.gmra.mxu3 %v7628_v4 }
 0x176   : > { %v1698_v50 = vpop.f32.mrf.mxu2  ;;  %v1524_v47 = vpop.f32.mrf.mxu0 }
 0x177   : > { %v1786_v16 = vpop.f32.mrf.mxu3  ;;  %v1699_v46 = vadd.f32 %v1698_v50, %v1611_v37  ;;  %v1612_v7 = vpop.f32.mrf.mxu1  ;;  %v7688_v50 = vor.u32 %v9919_v57, %v7687_v58 }
 0x178   : > { %v1613_v32 = vadd.f32 %v1612_v7, %v1524_v47 }
 0x179   : > { %v11051_v63 = vadd.f32 %v1786_v16, %v1699_v46  ;;  %v7692_v16 = vor.u32 %v9915_v17, %v7689_v49  ;;  %v7743_v17 = vld [vmem:[#allocation2 + $0x210] sm:$0xf] }
 0x17a   : > { %v9934_v49 = vld [vmem:[#allocation2 + $0x22c] sm:$0xf0] }
 0x17e   : > { %v1700_v52 = vpop.f32.mrf.mxu2  ;;  %v1527_v24 = vpop.f32.mrf.mxu0 }
 0x17f   : > { %v1788_v15 = vpop.f32.mrf.mxu3  ;;  %v1701_v43 = vadd.f32 %v1700_v52, %v1613_v32  ;;  %v1615_v51 = vpop.f32.mrf.mxu1  ;;  %v7713_v52 = vld [vmem:[#allocation2 + $0x1f0] sm:$0xf0] }
 0x180   : > { %v1616_v13 = vadd.f32 %v1615_v51, %v1527_v24 }
 0x181   : > { %v11053_v25 = vadd.f32 %v1788_v15, %v1701_v43  ;;  %1838 = vmatmul.bf16.gmra.mxu0 %v7648_v18  ;;  %v7719_v15 = vld [vmem:[#allocation2 + $0x1d8] sm:$0xf]  ;;  %v7721_v43 = vld [vmem:[#allocation2 + $0x1f8] sm:$0xf0] }
 0x182   : > { %1926 = vmatmul.bf16.gmra.mxu1 %v7652_v21  ;;  %v9927_v18 = vld [vmem:[#allocation2 + $0x1f4] sm:$0xf0]  ;;  %v9923_v21 = vld [vmem:[#allocation2 + $0x1dc] sm:$0xf] }
 0x183   : > { %2014 = vmatmul.bf16.gmra.mxu2 %v7656_v19  ;;  %v7712_v19 = vor.u32 %v9926_v12, %v7711_v9 }
 0x184   : > { %2102 = vmatmul.bf16.gmra.mxu3 %v7660_v2  ;;  %v7716_v2 = vor.u32 %v9922_v61, %v7713_v52 }
 0x186   : > { %v1703_v0 = vpop.f32.mrf.mxu2  ;;  %v1529_v23 = vpop.f32.mrf.mxu0 }
 0x187   : > { %v1791_v54 = vpop.f32.mrf.mxu3  ;;  %v1704_v28 = vadd.f32 %v1703_v0, %v1616_v13  ;;  %v1617_v34 = vpop.f32.mrf.mxu1 }
 0x188   : > { %v1618_v55 = vadd.f32 %v1617_v34, %v1529_v23  ;;  %v7724_v23 = vor.u32 %v9923_v21, %v7721_v43  ;;  %v12677_v21 = vld [vmem:[#allocation12_spill] sm:$0xff] }
 0x189   : > { %v11055_v35 = vadd.f32 %v1791_v54, %v1704_v28  ;;  %v7720_v28 = vor.u32 %v9927_v18, %v7719_v15 }
 0x18e   : > { %v1705_v40 = vpop.f32.mrf.mxu2  ;;  %v1532_v4 = vpop.f32.mrf.mxu0 }
 0x18f   : > { %v1793_v39 = vpop.f32.mrf.mxu3  ;;  %v1706_v59 = vadd.f32 %v1705_v40, %v1618_v55  ;;  %v1620_v37 = vpop.f32.mrf.mxu1  ;;  %v9930_v40 = vld [vmem:[#allocation2 + $0x214] sm:$0xf] }
 0x190   : > { %v1621_v46 = vadd.f32 %v1620_v37, %v1532_v4  ;;  %v7753_v4 = vld [vmem:[#allocation2 + $0x238] sm:$0xf0] }
 0x191   : > { %v11057_v47 = vadd.f32 %v1793_v39, %v1706_v59  ;;  %1843 = vmatmul.bf16.gmra.mxu0 %v7680_v41  ;;  %v7745_v39 = vld [vmem:[#allocation2 + $0x230] sm:$0xf0]  ;;  %v7751_v41 = vld [vmem:[#allocation2 + $0x218] sm:$0xf]  ;;  %v9931_v59 = vld [vmem:[#allocation2 + $0x21c] sm:$0xf] }
 0x192   : > { %1931 = vmatmul.bf16.gmra.mxu1 %v7684_v44  ;;  %v9935_v44 = vld [vmem:[#allocation2 + $0x234] sm:$0xf0] }
 0x193   : > { %2019 = vmatmul.bf16.gmra.mxu2 %v7688_v50 }
 0x194   : > { %2107 = vmatmul.bf16.gmra.mxu3 %v7692_v16  ;;  %v7744_v16 = vor.u32 %v9934_v49, %v7743_v17 }
 0x196   : > { %v1708_v7 = vpop.f32.mrf.mxu2  ;;  %v1534_v33 = vpop.f32.mrf.mxu0 }
 0x197   : > { %v1796_v32 = vpop.f32.mrf.mxu3  ;;  %v1709_v56 = vadd.f32 %v1708_v7, %v1621_v46  ;;  %v1622_v11 = vpop.f32.mrf.mxu1  ;;  %v7748_v46 = vor.u32 %v9930_v40, %v7745_v39 }
 0x198   : > { %v1623_v14 = vadd.f32 %v1622_v11, %v1534_v33  ;;  %v7756_v33 = vor.u32 %v9931_v59, %v7753_v4  ;;  %v12676_v11 = vld [vmem:[#allocation11_spill] sm:$0xff] }
 0x199   : > { %v11059_v48 = vadd.f32 %v1796_v32, %v1709_v56  ;;  %v7752_v56 = vor.u32 %v9935_v44, %v7751_v41  ;;  %v12678_v41 = vld [vmem:[#allocation15_spill] sm:$0xff] }
 0x19e   : > { %v1710_v24 = vpop.f32.mrf.mxu2  ;;  %v1537_v0 = vpop.f32.mrf.mxu0 }
 0x19f   : > { %v1798_v51 = vpop.f32.mrf.mxu3  ;;  %v1711_v13 = vadd.f32 %v1710_v24, %v1623_v14  ;;  %v1625_v54 = vpop.f32.mrf.mxu1 }
 0x1a0   : > { %v1626_v34 = vadd.f32 %v1625_v54, %v1537_v0  ;;  %v7777_v0 = vld [vmem:[#allocation2 + $0x270] sm:$0xf0]  ;;  %v7783_v54 = vld [vmem:[#allocation2 + $0x258] sm:$0xf] }
 0x1a1   : > { %v11061_v55 = vadd.f32 %v1798_v51, %v1711_v13  ;;  %1848 = vmatmul.bf16.gmra.mxu0 %v7712_v19  ;;  %v7775_v19 = vld [vmem:[#allocation2 + $0x250] sm:$0xf]  ;;  %v9938_v13 = vld [vmem:[#allocation2 + $0x254] sm:$0xf] }
 0x1a2   : > { %1936 = vmatmul.bf16.gmra.mxu1 %v7716_v2  ;;  %v9942_v2 = vld [vmem:[#allocation2 + $0x26c] sm:$0xf0] }
 0x1a3   : > { %2024 = vmatmul.bf16.gmra.mxu2 %v7720_v28  ;;  %v9943_v28 = vld [vmem:[#allocation2 + $0x274] sm:$0xf0] }
 0x1a4   : > { %2112 = vmatmul.bf16.gmra.mxu3 %v7724_v23  ;;  %v9939_v23 = vld [vmem:[#allocation2 + $0x25c] sm:$0xf]  ;;  %v7784_v40 = vor.u32 %v9943_v28, %v7783_v54 }
 0x1a6   : > { %v1713_v6 = vpop.f32.mrf.mxu2  ;;  %v1539_v38 = vpop.f32.mrf.mxu0 }
 0x1a7   : > { %v1801_v27 = vpop.f32.mrf.mxu3  ;;  %v1714_v30 = vadd.f32 %v1713_v6, %v1626_v34  ;;  %v1627_v58 = vpop.f32.mrf.mxu1  ;;  %v7785_v34 = vld [vmem:[#allocation2 + $0x278] sm:$0xf0]  ;;  %v7780_v38 = vor.u32 %v9938_v13, %v7777_v0 }
 0x1a8   : > { %v7788_v39 = vor.u32 %v9939_v23, %v7785_v34 }
 0x1a9   : > { %v11063_v57 = vadd.f32 %v1801_v27, %v1714_v30  ;;  %v7776_v30 = vor.u32 %v9942_v2, %v7775_v19 }
 0x1ae   : > { %v1715_v37 = vpop.f32.mrf.mxu2  ;;  %v1814_v7 = vpop.f32.mrf.mxu0 }
 0x1af   : > { %v1803_v50 = vpop.f32.mrf.mxu3  ;;  %v1902_v32 = vpop.f32.mrf.mxu1  ;;  %v1815_v14 = vadd.f32 %v1814_v7, %v12676_v11 }
 0x1b1   : > { %v1903_v9 = vadd.f32 %v1902_v32, %v1815_v14  ;;  %1853 = vmatmul.bf16.gmra.mxu0 %v7744_v16 }
 0x1b2   : > { %1941 = vmatmul.bf16.gmra.mxu1 %v7748_v46 }
 0x1b3   : > { %2029 = vmatmul.bf16.gmra.mxu2 %v7752_v56  ;;  %v12679_v56 = vld [vmem:[#allocation16_spill] sm:$0xff] }
 0x1b4   : > { %2117 = vmatmul.bf16.gmra.mxu3 %v7756_v33 }
 0x1b6   : > { %v1990_v12 = vpop.f32.mrf.mxu2  ;;  %v1816_v15 = vpop.f32.mrf.mxu0 }
 0x1b7   : > { %v2078_v61 = vpop.f32.mrf.mxu3  ;;  %v1991_v52 = vadd.f32 %v1990_v12, %v1903_v9  ;;  %v1904_v18 = vpop.f32.mrf.mxu1  ;;  %v1817_v43 = vadd.f32 %v1816_v15, %v12677_v21  ;;  %v7807_v9 = vld [vmem:[#allocation2 + $0x290] sm:$0xf]  ;;  %v7815_v15 = vld [vmem:[#allocation2 + $0x298] sm:$0xf]  ;;  %v9947_v21 = vld [vmem:[#allocation2 + $0x29c] sm:$0xf] }
 0x1b8   : > { %v9950_v12 = vld [vmem:[#allocation2 + $0x2ac] sm:$0xf0] }
 0x1b9   : > { %v11067_v24 = vadd.f32 %v2078_v61, %v1991_v52  ;;  %v1905_v51 = vadd.f32 %v1904_v18, %v1817_v43  ;;  %v9946_v61 = vld [vmem:[#allocation2 + $0x294] sm:$0xf]  ;;  %v9951_v18 = vld [vmem:[#allocation2 + $0x2b4] sm:$0xf0]  ;;  %v7817_v43 = vld [vmem:[#allocation2 + $0x2b8] sm:$0xf0]  ;;  %v7808_v2 = vor.u32 %v9950_v12, %v7807_v9 }
 0x1ba   : > { %v7809_v52 = vld [vmem:[#allocation2 + $0x2b0] sm:$0xf0]  ;;  %v7816_v23 = vor.u32 %v9951_v18, %v7815_v15  ;;  %v7820_v34 = vor.u32 %v9947_v21, %v7817_v43  ;;  %v9955_v9 = vld [vmem:[#allocation2 + $0x2dc] sm:$0xf] }
 0x1bb   : > { %v7812_v13 = vor.u32 %v9946_v61, %v7809_v52  ;;  %v7849_v12 = vld [vmem:[#allocation2 + $0x2f8] sm:$0xf0] }
 0x1be   : > { %v1992_v6 = vpop.f32.mrf.mxu2  ;;  %v1819_v17 = vpop.f32.mrf.mxu0 }
 0x1bf   : > { %v2080_v27 = vpop.f32.mrf.mxu3  ;;  %v1993_v58 = vadd.f32 %v1992_v6, %v1905_v51  ;;  %v1907_v49 = vpop.f32.mrf.mxu1  ;;  %v1820_v44 = vadd.f32 %v1819_v17, %v12678_v41  ;;  %v12680_v6 = vld [vmem:[#allocation19_spill] sm:$0xff] }
 0x1c1   : > { %v11070_v59 = vadd.f32 %v2080_v27, %v1993_v58  ;;  %v1908_v4 = vadd.f32 %v1907_v49, %v1820_v44  ;;  %1858 = vmatmul.bf16.gmra.mxu0 %v7776_v30  ;;  %v12681_v44 = vld [vmem:[#allocation20_spill] sm:$0xff] }
 0x1c2   : > { %1946 = vmatmul.bf16.gmra.mxu1 %v7780_v38 }
 0x1c3   : > { %2034 = vmatmul.bf16.gmra.mxu2 %v7784_v40 }
 0x1c4   : > { %2122 = vmatmul.bf16.gmra.mxu3 %v7788_v39 }
 0x1c6   : > { %v1995_v50 = vpop.f32.mrf.mxu2  ;;  %v1821_v7 = vpop.f32.mrf.mxu0 }
 0x1c7   : > { %v2083_v16 = vpop.f32.mrf.mxu3  ;;  %v1996_v46 = vadd.f32 %v1995_v50, %v1908_v4  ;;  %v1909_v32 = vpop.f32.mrf.mxu1  ;;  %v1822_v33 = vadd.f32 %v1821_v7, %v12679_v56  ;;  %v9958_v7 = vld [vmem:[#allocation2 + $0x2ec] sm:$0xf0]  ;;  %v7841_v56 = vld [vmem:[#allocation2 + $0x2f0] sm:$0xf0] }
 0x1c9   : > { %v11075_v11 = vadd.f32 %v2083_v16, %v1996_v46  ;;  %v1910_v14 = vadd.f32 %v1909_v32, %v1822_v33  ;;  %v7839_v46 = vld [vmem:[#allocation2 + $0x2d0] sm:$0xf]  ;;  %v9954_v32 = vld [vmem:[#allocation2 + $0x2d4] sm:$0xf]  ;;  %v7847_v33 = vld [vmem:[#allocation2 + $0x2d8] sm:$0xf] }
 0x1ca   : > { %v7840_v15 = vor.u32 %v9958_v7, %v7839_v46  ;;  %v7844_v18 = vor.u32 %v9954_v32, %v7841_v56  ;;  %v7879_v46 = vld [vmem:[#allocation2 + $0x318] sm:$0xf]  ;;  %v9963_v32 = vld [vmem:[#allocation2 + $0x31c] sm:$0xf] }
 0x1cb   : > { %v9967_v7 = vld [vmem:[#allocation2 + $0x334] sm:$0xf0]  ;;  %v7881_v56 = vld [vmem:[#allocation2 + $0x338] sm:$0xf0] }
 0x1ce   : > { %v1997_v51 = vpop.f32.mrf.mxu2  ;;  %v1824_v54 = vpop.f32.mrf.mxu0 }
 0x1cf   : > { %v2085_v19 = vpop.f32.mrf.mxu3  ;;  %v1998_v0 = vadd.f32 %v1997_v51, %v1910_v14  ;;  %v1912_v28 = vpop.f32.mrf.mxu1  ;;  %v1825_v27 = vadd.f32 %v1824_v54, %v12680_v6  ;;  %v9959_v14 = vld [vmem:[#allocation2 + $0x2f4] sm:$0xf0] }
 0x1d1   : > { %v11078_v30 = vadd.f32 %v2085_v19, %v1998_v0  ;;  %v1913_v38 = vadd.f32 %v1912_v28, %v1825_v27  ;;  %1863 = vmatmul.bf16.gmra.mxu0 %v7808_v2  ;;  %v7848_v19 = vor.u32 %v9959_v14, %v7847_v33  ;;  %v7852_v2 = vor.u32 %v9955_v9, %v7849_v12 }
 0x1d2   : > { %1951 = vmatmul.bf16.gmra.mxu1 %v7812_v13  ;;  %v12682_v13 = vld [vmem:[#allocation23_spill] sm:$0xff] }
 0x1d3   : > { %2039 = vmatmul.bf16.gmra.mxu2 %v7816_v23 }
 0x1d4   : > { %2127 = vmatmul.bf16.gmra.mxu3 %v7820_v34 }
 0x1d6   : > { %v2000_v17 = vpop.f32.mrf.mxu2  ;;  %v1826_v39 = vpop.f32.mrf.mxu0 }
 0x1d7   : > { %v2088_v49 = vpop.f32.mrf.mxu3  ;;  %v2001_v40 = vadd.f32 %v2000_v17, %v1913_v38  ;;  %v1914_v41 = vpop.f32.mrf.mxu1  ;;  %v1827_v4 = vadd.f32 %v1826_v39, %v12681_v44  ;;  %v9966_v44 = vld [vmem:[#allocation2 + $0x32c] sm:$0xf0] }
 0x1d9   : > { %v11083_v50 = vadd.f32 %v2088_v49, %v2001_v40  ;;  %v1915_v16 = vadd.f32 %v1914_v41, %v1827_v4  ;;  %v7871_v41 = vld [vmem:[#allocation2 + $0x310] sm:$0xf]  ;;  %v9962_v4 = vld [vmem:[#allocation2 + $0x314] sm:$0xf] }
 0x1da   : > { %v7872_v9 = vor.u32 %v9966_v44, %v7871_v41  ;;  %v7911_v41 = vld [vmem:[#allocation2 + $0x358] sm:$0xf] }
 0x1db   : > { %v9975_v44 = vld [vmem:[#allocation2 + $0x374] sm:$0xf0] }
 0x1de   : > { %v2002_v61 = vpop.f32.mrf.mxu2  ;;  %v1829_v43 = vpop.f32.mrf.mxu0 }
 0x1df   : > { %v2090_v52 = vpop.f32.mrf.mxu3  ;;  %v2003_v21 = vadd.f32 %v2002_v61, %v1915_v16  ;;  %v1917_v51 = vpop.f32.mrf.mxu1  ;;  %v1830_v0 = vadd.f32 %v1829_v43, %v12682_v13  ;;  %v7873_v16 = vld [vmem:[#allocation2 + $0x330] sm:$0xf0] }
 0x1e0   : > { %v7876_v12 = vor.u32 %v9962_v4, %v7873_v16  ;;  %v9971_v4 = vld [vmem:[#allocation2 + $0x35c] sm:$0xf] }
 0x1e1   : > { %v11086_v54 = vadd.f32 %v2090_v52, %v2003_v21  ;;  %v1918_v28 = vadd.f32 %v1917_v51, %v1830_v0  ;;  %1868 = vmatmul.bf16.gmra.mxu0 %v7840_v15  ;;  %v7913_v16 = vld [vmem:[#allocation2 + $0x378] sm:$0xf0] }
 0x1e2   : > { %1956 = vmatmul.bf16.gmra.mxu1 %v7844_v18  ;;  %v7880_v18 = vor.u32 %v9967_v7, %v7879_v46 }
 0x1e3   : > { %2044 = vmatmul.bf16.gmra.mxu2 %v7848_v19 }
 0x1e4   : > { %2132 = vmatmul.bf16.gmra.mxu3 %v7852_v2 }
 0x1e6   : > { %v2005_v34 = vpop.f32.mrf.mxu2  ;;  %v1831_v38 = vpop.f32.mrf.mxu0 }
 0x1e7   : > { %v2093_v6 = vpop.f32.mrf.mxu3  ;;  %v2006_v27 = vadd.f32 %v2005_v34, %v1918_v28  ;;  %v1919_v17 = vpop.f32.mrf.mxu1  ;;  %v1832_v49 = vadd.f32 %v1831_v38, %v10913_v60  ;;  %v7884_v60 = vor.u32 %v9963_v32, %v7881_v56  ;;  %v7903_v38 = vld [vmem:[#allocation2 + $0x350] sm:$0xf] }
 0x1e9   : > { %v11091_v40 = vadd.f32 %v2093_v6, %v2006_v27  ;;  %v1920_v39 = vadd.f32 %v1919_v17, %v1832_v49  ;;  %v9974_v17 = vld [vmem:[#allocation2 + $0x36c] sm:$0xf0]  ;;  %v9970_v49 = vld [vmem:[#allocation2 + $0x354] sm:$0xf] }
 0x1ea   : > { %v7904_v32 = vor.u32 %v9974_v17, %v7903_v38  ;;  %v9982_v38 = vld [vmem:[#allocation2 + $0x3ac] sm:$0xf0]  ;;  %v9978_v17 = vld [vmem:[#allocation2 + $0x394] sm:$0xf] }
 0x1ee   : > { %v2007_v33 = vpop.f32.mrf.mxu2  ;;  %v1834_v52 = vpop.f32.mrf.mxu0 }
 0x1ef   : > { %v2095_v14 = vpop.f32.mrf.mxu3  ;;  %v2008_v61 = vadd.f32 %v2007_v33, %v1920_v39  ;;  %v1922_v15 = vpop.f32.mrf.mxu1  ;;  %v1835_v21 = vadd.f32 %v1834_v52, %v10925_v53  ;;  %v7905_v39 = vld [vmem:[#allocation2 + $0x370] sm:$0xf0] }
 0x1f0   : > { %v7908_v56 = vor.u32 %v9970_v49, %v7905_v39  ;;  %v7937_v49 = vld [vmem:[#allocation2 + $0x3b0] sm:$0xf0]  ;;  %v7943_v39 = vld [vmem:[#allocation2 + $0x398] sm:$0xf] }
 0x1f1   : > { %v11094_v43 = vadd.f32 %v2095_v14, %v2008_v61  ;;  %v1923_v51 = vadd.f32 %v1922_v15, %v1835_v21  ;;  %1873 = vmatmul.bf16.gmra.mxu0 %v7872_v9  ;;  %v12683_v61 = vld [vmem:[#allocation24_spill] sm:$0xff] }
 0x1f2   : > { %1961 = vmatmul.bf16.gmra.mxu1 %v7876_v12  ;;  %v7912_v12 = vor.u32 %v9975_v44, %v7911_v41  ;;  %v9983_v41 = vld [vmem:[#allocation2 + $0x3b4] sm:$0xf0]  ;;  %v9979_v44 = vld [vmem:[#allocation2 + $0x39c] sm:$0xf] }
 0x1f3   : > { %2049 = vmatmul.bf16.gmra.mxu2 %v7880_v18 }
 0x1f4   : > { %2137 = vmatmul.bf16.gmra.mxu3 %v7884_v60 }
 0x1f6   : > { %v2010_v2 = vpop.f32.mrf.mxu2  ;;  %v1836_v28 = vpop.f32.mrf.mxu0 }
 0x1f7   : > { %v2098_v13 = vpop.f32.mrf.mxu3  ;;  %v2011_v0 = vadd.f32 %v2010_v2, %v1923_v51  ;;  %v1924_v34 = vpop.f32.mrf.mxu1  ;;  %v1837_v6 = vadd.f32 %v1836_v28, %v10931_v62  ;;  %v7916_v62 = vor.u32 %v9971_v4, %v7913_v16  ;;  %v7945_v4 = vld [vmem:[#allocation2 + $0x3b8] sm:$0xf0] }
 0x1f9   : > { %v11099_v27 = vadd.f32 %v2098_v13, %v2011_v0  ;;  %v1925_v53 = vadd.f32 %v1924_v34, %v1837_v6 }
 0x1fe   : > { %v2012_v46 = vpop.f32.mrf.mxu2  ;;  %v1839_v14 = vpop.f32.mrf.mxu0 }
 0x1ff   : > { %v2100_v7 = vpop.f32.mrf.mxu3  ;;  %v2013_v33 = vadd.f32 %v2012_v46, %v1925_v53  ;;  %v1927_v9 = vpop.f32.mrf.mxu1  ;;  %v1840_v52 = vadd.f32 %v1839_v14, %v12683_v61  ;;  %v7935_v53 = vld [vmem:[#allocation2 + $0x390] sm:$0xf] }
 0x201   : > { %v11102_v15 = vadd.f32 %v2100_v7, %v2013_v33  ;;  %v1928_v18 = vadd.f32 %v1927_v9, %v1840_v52  ;;  %1878 = vmatmul.bf16.gmra.mxu0 %v7904_v32  ;;  %v7936_v7 = vor.u32 %v9982_v38, %v7935_v53  ;;  %v7940_v32 = vor.u32 %v9978_v17, %v7937_v49 }
 0x202   : > { %1966 = vmatmul.bf16.gmra.mxu1 %v7908_v56  ;;  %v7944_v9 = vor.u32 %v9983_v41, %v7943_v39 }
 0x203   : > { %2054 = vmatmul.bf16.gmra.mxu2 %v7912_v12 }
 0x204   : > { %2142 = vmatmul.bf16.gmra.mxu3 %v7916_v62 }
 0x206   : > { %v2015_v21 = vpop.f32.mrf.mxu2  ;;  %v1841_v13 = vpop.f32.mrf.mxu0 }
 0x207   : > { %v2103_v51 = vpop.f32.mrf.mxu3  ;;  %v2016_v2 = vadd.f32 %v2015_v21, %v1928_v18  ;;  %v1929_v0 = vpop.f32.mrf.mxu1  ;;  %v1842_v28 = vadd.f32 %v1841_v13, %v10973_v20  ;;  %v7948_v20 = vor.u32 %v9979_v44, %v7945_v4 }
 0x209   : > { %v11107_v34 = vadd.f32 %v2103_v51, %v2016_v2  ;;  %v1930_v6 = vadd.f32 %v1929_v0, %v1842_v28  ;;  %v439_v0 = vld [vmem:[#allocation2 + $0x3d0] sm:$0xff] }
 0x20a   : > { %v809_v38 = vunpack.c.l.b16 %v439_v0  ;;  %v810_v17 = vunpack.c.h.b16 %v439_v0  ;;  %v8207_v0 = vld [vmem:[#allocation2 + $0x3e0] sm:$0xf] }
 0x20b   : > { %12684 = vst [vmem:[#allocation13_spill] sm:$0xff] %v11107_v34 }
 0x20c   : > { %v937_v4 = vpack.c.b16 %v809_v38, %v809_v38  ;;  %v8215_v38 = vld [vmem:[#allocation2 + $0x3e8] sm:$0xf] }
 0x20e   : > { %v2017_v16 = vpop.f32.mrf.mxu2  ;;  %v1844_v33 = vpop.f32.mrf.mxu0 }
 0x20f   : > { %v2105_v46 = vpop.f32.mrf.mxu3  ;;  %v2018_v56 = vadd.f32 %v2017_v16, %v1930_v6  ;;  %v1932_v14 = vpop.f32.mrf.mxu1  ;;  %v1845_v12 = vadd.f32 %v1844_v33, %v10982_v1  ;;  %v440_v6 = vld [vmem:[#allocation2 + $0x3d8] sm:$0xff]  ;;  %v938_v16 = vpack.c.b16 %v810_v17, %v810_v17  ;;  %v9993_v17 = vld [vmem:[#allocation2 + $0x404] sm:$0xf0] }
 0x210   : > { %v811_v49 = vunpack.c.l.b16 %v440_v6  ;;  %v812_v39 = vunpack.c.h.b16 %v440_v6  ;;  %v9988_v6 = vld [vmem:[#allocation2 + $0x3e4] sm:$0xf] }
 0x211   : > { %v11110_v62 = vadd.f32 %v2105_v46, %v2018_v56  ;;  %v1933_v61 = vadd.f32 %v1932_v14, %v1845_v12  ;;  %1883 = vmatmul.bf16.gmra.mxu0 %v7936_v7 }
 0x212   : > { %1971 = vmatmul.bf16.gmra.mxu1 %v7940_v32  ;;  %v939_v56 = vpack.c.b16 %v811_v49, %v811_v49  ;;  %v940_v33 = vpack.c.b16 %v812_v39, %v812_v39  ;;  %v9989_v49 = vld [vmem:[#allocation2 + $0x3ec] sm:$0xf] }
 0x213   : > { %2059 = vmatmul.bf16.gmra.mxu2 %v7944_v9  ;;  %v8217_v39 = vld [vmem:[#allocation2 + $0x408] sm:$0xf0] }
 0x214   : > { %2147 = vmatmul.bf16.gmra.mxu3 %v7948_v20 }
 0x216   : > { %v2020_v18 = vpop.f32.mrf.mxu2  ;;  %v1846_v2 = vpop.f32.mrf.mxu0 }
 0x217   : > { %v2108_v21 = vpop.f32.mrf.mxu3  ;;  %v2021_v51 = vadd.f32 %v2020_v18, %v1933_v61  ;;  %v1934_v13 = vpop.f32.mrf.mxu1  ;;  %v1847_v28 = vadd.f32 %v1846_v2, %v10988_v8 }
 0x219   : > { %v11115_v1 = vadd.f32 %v2108_v21, %v2021_v51  ;;  %v1935_v53 = vadd.f32 %v1934_v13, %v1847_v28  ;;  %v9992_v28 = vld [vmem:[#allocation2 + $0x3fc] sm:$0xf0] }
 0x21b   : > { %12685 = vst [vmem:[#allocation14_spill] sm:$0xff] %v11115_v1 }
 0x21e   : > { %v2022_v41 = vpop.f32.mrf.mxu2  ;;  %v1849_v7 = vpop.f32.mrf.mxu0 }
 0x21f   : > { %v2110_v44 = vpop.f32.mrf.mxu3  ;;  %v2023_v46 = vadd.f32 %v2022_v41, %v1935_v53  ;;  %v1937_v32 = vpop.f32.mrf.mxu1  ;;  %v1850_v14 = vadd.f32 %v1849_v7, %v10994_v45  ;;  %v8209_v53 = vld [vmem:[#allocation2 + $0x400] sm:$0xf0] }
 0x221   : > { %v11118_v8 = vadd.f32 %v2110_v44, %v2023_v46  ;;  %v1938_v9 = vadd.f32 %v1937_v32, %v1850_v14  ;;  %1888 = vmatmul.bf16.gmra.mxu0 %v937_v4  ;;  %v8208_v4 = vor.u32 %v9992_v28, %v8207_v0  ;;  %v8216_v32 = vor.u32 %v9993_v17, %v8215_v38  ;;  %v10473_v28 = vld [vmem:[%s10681_s24 + $0x30] sm:$0xff]  ;;  %v8239_v17 = vld [vmem:[#allocation2 + $0x420] sm:$0xf] }
 0x222   : > { %1976 = vmatmul.bf16.gmra.mxu1 %v938_v16  ;;  %v8212_v16 = vor.u32 %v9988_v6, %v8209_v53  ;;  %v10474_v6 = vld [vmem:[%s10681_s24 + $0x70] sm:$0xff] }
 0x223   : > { %12686 = vst [vmem:[#allocation5_spill] sm:$0xff] %v11118_v8  ;;  %2064 = vmatmul.bf16.gmra.mxu2 %v939_v56  ;;  %v8220_v56 = vor.u32 %v9989_v49, %v8217_v39  ;;  %v10000_v49 = vld [vmem:[#allocation2 + $0x43c] sm:$0xf0]  ;;  %v9996_v39 = vld [vmem:[#allocation2 + $0x424] sm:$0xf] }
 0x224   : > { %2152 = vmatmul.bf16.gmra.mxu3 %v940_v33 }
 0x226   : > { %v2025_v12 = vpop.f32.mrf.mxu2  ;;  %v1851_v21 = vpop.f32.mrf.mxu0 }
 0x227   : > { %v2113_v61 = vpop.f32.mrf.mxu3  ;;  %v2026_v18 = vadd.f32 %v2025_v12, %v1938_v9  ;;  %v1939_v51 = vpop.f32.mrf.mxu1  ;;  %v1852_v2 = vadd.f32 %v1851_v21, %v11000_v29 }
 0x229   : > { %v11123_v13 = vadd.f32 %v2113_v61, %v2026_v18  ;;  %v1940_v45 = vadd.f32 %v1939_v51, %v1852_v2  ;;  %v10471_v61 = vld [vmem:[%s10681_s24 + $0x38] sm:$0xff] }
 0x22a   : > { %v10472_v18 = vld [vmem:[%s10681_s24 + $0x78] sm:$0xff] }
 0x22b   : > { %12687 = vst [vmem:[#allocation6_spill] sm:$0xff] %v11123_v13 }
 0x22e   : > { %v2027_v41 = vpop.f32.mrf.mxu2  ;;  %v1854_v7 = vpop.f32.mrf.mxu0 }
 0x22f   : > { %v2115_v44 = vpop.f32.mrf.mxu3  ;;  %v2028_v46 = vadd.f32 %v2027_v41, %v1940_v45  ;;  %v1942_v29 = vpop.f32.mrf.mxu1  ;;  %v1855_v33 = vadd.f32 %v1854_v7, %v11009_v31  ;;  %v8241_v41 = vld [vmem:[#allocation2 + $0x440] sm:$0xf0]  ;;  %v10475_v7 = vld [vmem:[%s10681_s24 + $0x28] sm:$0xff] }
 0x231   : > { %v11126_v14 = vadd.f32 %v2115_v44, %v2028_v46  ;;  %v1943_v9 = vadd.f32 %v1942_v29, %v1855_v33  ;;  %2942 = vmatmul.bf16.vlgmr.msra.gmra.mxu0 %v8208_v4  ;;  %v8247_v44 = vld [vmem:[#allocation2 + $0x428] sm:$0xf]  ;;  %v8249_v46 = vld [vmem:[#allocation2 + $0x448] sm:$0xf0]  ;;  %v8244_v33 = vor.u32 %v9996_v39, %v8241_v41 }
 0x232   : > { %3030 = vmatmul.bf16.vlgmr.msra.gmra.mxu1 %v8212_v16  ;;  %v10001_v4 = vld [vmem:[#allocation2 + $0x444] sm:$0xf0]  ;;  %v9997_v16 = vld [vmem:[#allocation2 + $0x42c] sm:$0xf] }
 0x233   : > { %12688 = vst [vmem:[#allocation21_spill] sm:$0xff] %v11126_v14  ;;  %3118 = vmatmul.bf16.vlgmr.msra.gmra.mxu2 %v8216_v32 }
 0x234   : > { %3206 = vmatmul.bf16.vlgmr.msra.gmra.mxu3 %v8220_v56  ;;  %4737 = vmatpush.bf16.msra.mxu2 %v10471_v61  ;;  %v8240_v56 = vor.u32 %v10000_v49, %v8239_v17  ;;  %v10480_v17 = vld [vmem:[%s10681_s24 + $0x58] sm:$0xff] }
 0x235   : > { %4825 = vmatpush.bf16.msra.mxu3 %v10472_v18 }
 0x236   : > { %v2030_v21 = vpop.f32.mrf.mxu2  ;;  %v1856_v31 = vpop.f32.mrf.mxu0 }
 0x237   : > { %v2118_v51 = vpop.f32.mrf.mxu3  ;;  %v2031_v2 = vadd.f32 %v2030_v21, %v1943_v9  ;;  %v1944_v45 = vpop.f32.mrf.mxu1  ;;  %v1857_v0 = vadd.f32 %v1856_v31, %v11019_v42  ;;  %v10476_v42 = vld [vmem:[%s10681_s24 + $0x68] sm:$0xff]  ;;  %v8248_v21 = vor.u32 %v10001_v4, %v8247_v44  ;;  %v10477_v31 = vld [vmem:[%s10681_s24 + $0x20] sm:$0xff] }
 0x238   : > { %4738 = vmatpush.bf16.msra.mxu2 %v10473_v28 }
 0x239   : > { %4826 = vmatpush.bf16.msra.mxu3 %v10474_v6  ;;  %v11135_v53 = vadd.f32 %v2118_v51, %v2031_v2  ;;  %v1945_v38 = vadd.f32 %v1944_v45, %v1857_v0  ;;  %v8252_v51 = vor.u32 %v9997_v16, %v8249_v46  ;;  %v10478_v45 = vld [vmem:[%s10681_s24 + $0x60] sm:$0xff]  ;;  %v10481_v16 = vld [vmem:[%s10681_s24 + $0x10] sm:$0xff] }
 0x23a   : > { %v10482_v46 = vld [vmem:[%s10681_s24 + $0x50] sm:$0xff] }
 0x23b   : > { %12689 = vst [vmem:[#allocation22_spill] sm:$0xff] %v11135_v53 }
 0x23c   : > { %4739 = vmatpush.bf16.msra.mxu2 %v10475_v7 }
 0x23d   : > { %4827 = vmatpush.bf16.msra.mxu3 %v10476_v42 }
 0x23e   : > { %v2032_v29 = vpop.f32.mrf.mxu2  ;;  %v1859_v61 = vpop.f32.mrf.mxu0 }
 0x23f   : > { %v2120_v32 = vpop.f32.mrf.mxu3  ;;  %v2033_v9 = vadd.f32 %v2032_v29, %v1945_v38  ;;  %v1947_v18 = vpop.f32.mrf.mxu1  ;;  %v1860_v2 = vadd.f32 %v1859_v61, %v11029_v3  ;;  %v10479_v38 = vld [vmem:[%s10681_s24 + $0x18] sm:$0xff]  ;;  %v8271_v29 = vld [vmem:[#allocation2 + $0x460] sm:$0xf]  ;;  %v10009_v61 = vld [vmem:[#allocation2 + $0x484] sm:$0xf0] }
 0x240   : > { %4740 = vmatpush.bf16.msra.mxu2 %v10477_v31 }
 0x241   : > { %4828 = vmatpush.bf16.msra.mxu3 %v10478_v45  ;;  %v11142_v0 = vadd.f32 %v2120_v32, %v2033_v9  ;;  %v1948_v28 = vadd.f32 %v1947_v18, %v1860_v2  ;;  %2947 = vmatmul.bf16.gmra.mxu0 %v8240_v56  ;;  %v10008_v32 = vld [vmem:[#allocation2 + $0x47c] sm:$0xf0]  ;;  %v10004_v56 = vld [vmem:[#allocation2 + $0x464] sm:$0xf]  ;;  %v8279_v9 = vld [vmem:[#allocation2 + $0x468] sm:$0xf] }
 0x242   : > { %3035 = vmatmul.bf16.gmra.mxu1 %v8244_v33  ;;  %v8273_v33 = vld [vmem:[#allocation2 + $0x480] sm:$0xf0]  ;;  %v10005_v18 = vld [vmem:[#allocation2 + $0x46c] sm:$0xf]  ;;  %v8272_v45 = vor.u32 %v10008_v32, %v8271_v29 }
 0x243   : > { %12690 = vst [vmem:[#allocation7_spill] sm:$0xff] %v11142_v0  ;;  %3123 = vmatmul.bf16.gmra.mxu2 %v8248_v21  ;;  %v8281_v21 = vld [vmem:[#allocation2 + $0x488] sm:$0xf0] }
 0x244   : > { %3211 = vmatmul.bf16.gmra.mxu3 %v8252_v51  ;;  %4741 = vmatpush.bf16.msra.mxu2 %v10479_v38  ;;  %v10483_v51 = vld [vmem:[%s10681_s24 + $0x8] sm:$0xff] }
 0x245   : > { %4829 = vmatpush.bf16.msra.mxu3 %v10480_v17 }
 0x246   : > { %v2035_v3 = vpop.f32.mrf.mxu2  ;;  %v1861_v41 = vpop.f32.mrf.mxu0 }
 0x247   : > { %v2123_v49 = vpop.f32.mrf.mxu3  ;;  %v2036_v39 = vadd.f32 %v2035_v3, %v1948_v28  ;;  %v1949_v44 = vpop.f32.mrf.mxu1  ;;  %v1862_v4 = vadd.f32 %v1861_v41, %v11039_v36  ;;  %v10484_v36 = vld [vmem:[%s10681_s24 + $0x48] sm:$0xff]  ;;  %v8276_v28 = vor.u32 %v10004_v56, %v8273_v33 }
 0x248   : > { %4742 = vmatpush.bf16.msra.mxu2 %v10481_v16 }
 0x249   : > { %4830 = vmatpush.bf16.msra.mxu3 %v10482_v46  ;;  %v11151_v7 = vadd.f32 %v2123_v49, %v2036_v39  ;;  %v1950_v42 = vadd.f32 %v1949_v44, %v1862_v4  ;;  %v8280_v49 = vor.u32 %v10009_v61, %v8279_v9  ;;  %v8284_v39 = vor.u32 %v10005_v18, %v8281_v21  ;;  %v10485_v44 = vld [vmem:[%s10681_s24] sm:$0xff] }
 0x24a   : > { %v10486_v4 = vld [vmem:[%s10681_s24 + $0x40] sm:$0xff] }
 0x24b   : > { %12691 = vst [vmem:[#allocation8_spill] sm:$0xff] %v11151_v7  ;;  %v8303_v21 = vld [vmem:[#allocation2 + $0x4a0] sm:$0xf] }
 0x24c   : > { %4743 = vmatpush.bf16.msra.mxu2 %v10483_v51  ;;  %v10016_v51 = vld [vmem:[#allocation2 + $0x4bc] sm:$0xf0] }
 0x24d   : > { %4831 = vmatpush.bf16.msra.mxu3 %v10484_v36  ;;  %v10012_v36 = vld [vmem:[#allocation2 + $0x4a4] sm:$0xf] }
 0x24e   : > { %v2037_v2 = vpop.f32.mrf.mxu2  ;;  %v1864_v17 = vpop.f32.mrf.mxu0 }
 0x24f   : > { %v2125_v31 = vpop.f32.mrf.mxu3  ;;  %v2038_v38 = vadd.f32 %v2037_v2, %v1950_v42  ;;  %v1952_v3 = vpop.f32.mrf.mxu1  ;;  %v1865_v41 = vadd.f32 %v1864_v17, %v11043_v10  ;;  %v8305_v2 = vld [vmem:[#allocation2 + $0x4c0] sm:$0xf0] }
 0x250   : > { %4744 = vmatpush.bf16.msra.mxu2 %v10485_v44 }
 0x251   : > { %4832 = vmatpush.bf16.msra.mxu3 %v10486_v4  ;;  %v11158_v16 = vadd.f32 %v2125_v31, %v2038_v38  ;;  %v1953_v46 = vadd.f32 %v1952_v3, %v1865_v41  ;;  %2952 = vmatmul.bf16.gmra.mxu0 %v8272_v45  ;;  %v8311_v31 = vld [vmem:[#allocation2 + $0x4a8] sm:$0xf]  ;;  %v8313_v38 = vld [vmem:[#allocation2 + $0x4c8] sm:$0xf0] }
 0x252   : > { %3040 = vmatmul.bf16.gmra.mxu1 %v8276_v28  ;;  %v10017_v45 = vld [vmem:[#allocation2 + $0x4c4] sm:$0xf0]  ;;  %v10013_v28 = vld [vmem:[#allocation2 + $0x4ac] sm:$0xf] }
 0x253   : > { %12692 = vst [vmem:[#allocation9_spill] sm:$0xff] %v11158_v16  ;;  %3128 = vmatmul.bf16.gmra.mxu2 %v8280_v49  ;;  %v8304_v49 = vor.u32 %v10016_v51, %v8303_v21 }
 0x254   : > { %3216 = vmatmul.bf16.gmra.mxu3 %v8284_v39  ;;  %v8308_v39 = vor.u32 %v10012_v36, %v8305_v2 }
 0x256   : > { %v2040_v42 = vpop.f32.mrf.mxu2  ;;  %v1866_v33 = vpop.f32.mrf.mxu0 }
 0x257   : > { %v2128_v32 = vpop.f32.mrf.mxu3  ;;  %v2041_v56 = vadd.f32 %v2040_v42, %v1953_v46  ;;  %v1954_v9 = vpop.f32.mrf.mxu1  ;;  %v1867_v10 = vadd.f32 %v1866_v33, %v11045_v22  ;;  %v8312_v46 = vor.u32 %v10017_v45, %v8311_v31  ;;  %v8316_v22 = vor.u32 %v10013_v28, %v8313_v38  ;;  %v8335_v31 = vld [vmem:[#allocation2 + $0x4e0] sm:$0xf]  ;;  %v10020_v28 = vld [vmem:[#allocation2 + $0x4e4] sm:$0xf] }
 0x258   : > { %v10024_v45 = vld [vmem:[#allocation2 + $0x4fc] sm:$0xf0]  ;;  %v8337_v38 = vld [vmem:[#allocation2 + $0x500] sm:$0xf0] }
 0x259   : > { %v11163_v61 = vadd.f32 %v2128_v32, %v2041_v56  ;;  %v1955_v18 = vadd.f32 %v1954_v9, %v1867_v10 }
 0x25b   : > { %12693 = vst [vmem:[#allocation10_spill] sm:$0xff] %v11163_v61 }
 0x25e   : > { %v2042_v17 = vpop.f32.mrf.mxu2  ;;  %v1869_v44 = vpop.f32.mrf.mxu0 }
 0x25f   : > { %v2130_v3 = vpop.f32.mrf.mxu3  ;;  %v2043_v41 = vadd.f32 %v2042_v17, %v1955_v18  ;;  %v1957_v4 = vpop.f32.mrf.mxu1  ;;  %v1870_v42 = vadd.f32 %v1869_v44, %v11047_v26  ;;  %v8343_v17 = vld [vmem:[#allocation2 + $0x4e8] sm:$0xf] }
 0x261   : > { %v11166_v32 = vadd.f32 %v2130_v3, %v2043_v41  ;;  %v1958_v56 = vadd.f32 %v1957_v4, %v1870_v42  ;;  %2957 = vmatmul.bf16.gmra.mxu0 %v8304_v49  ;;  %v10025_v3 = vld [vmem:[#allocation2 + $0x504] sm:$0xf0]  ;;  %v10021_v49 = vld [vmem:[#allocation2 + $0x4ec] sm:$0xf]  ;;  %v8336_v4 = vor.u32 %v10024_v45, %v8335_v31 }
 0x262   : > { %3045 = vmatmul.bf16.gmra.mxu1 %v8308_v39  ;;  %v8345_v39 = vld [vmem:[#allocation2 + $0x508] sm:$0xf0] }
 0x263   : > { %12694 = vst [vmem:[#allocation17_spill] sm:$0xff] %v11166_v32  ;;  %3133 = vmatmul.bf16.gmra.mxu2 %v8312_v46  ;;  %v8340_v46 = vor.u32 %v10020_v28, %v8337_v38 }
 0x264   : > { %3221 = vmatmul.bf16.gmra.mxu3 %v8316_v22 }
 0x266   : > { %v2045_v9 = vpop.f32.mrf.mxu2  ;;  %v1871_v18 = vpop.f32.mrf.mxu0 }
 0x267   : > { %v2133_v10 = vpop.f32.mrf.mxu3  ;;  %v2046_v21 = vadd.f32 %v2045_v9, %v1958_v56  ;;  %v1959_v51 = vpop.f32.mrf.mxu1  ;;  %v1872_v36 = vadd.f32 %v1871_v18, %v11049_v5  ;;  %v8344_v9 = vor.u32 %v10025_v3, %v8343_v17  ;;  %v8348_v5 = vor.u32 %v10021_v49, %v8345_v39  ;;  %v8367_v3 = vld [vmem:[#allocation2 + $0x520] sm:$0xf]  ;;  %v10028_v39 = vld [vmem:[#allocation2 + $0x524] sm:$0xf] }
 0x268   : > { %v10032_v49 = vld [vmem:[#allocation2 + $0x53c] sm:$0xf0] }
 0x269   : > { %v11171_v2 = vadd.f32 %v2133_v10, %v2046_v21  ;;  %v1960_v26 = vadd.f32 %v1959_v51, %v1872_v36 }
 0x26b   : > { %12695 = vst [vmem:[#allocation18_spill] sm:$0xff] %v11171_v2  ;;  %v10501_v2 = vld [vmem:[%s10681_s24 + $0x100] sm:$0xff] }
 0x26e   : > { %v2047_v41 = vpop.f32.mrf.mxu2  ;;  %v1874_v42 = vpop.f32.mrf.mxu0 }
 0x26f   : > { %v2135_v44 = vpop.f32.mrf.mxu3  ;;  %v2048_v22 = vadd.f32 %v2047_v41, %v1960_v26  ;;  %v1962_v56 = vpop.f32.mrf.mxu1  ;;  %v1875_v10 = vadd.f32 %v1874_v42, %v11051_v63  ;;  %v8369_v41 = vld [vmem:[#allocation2 + $0x540] sm:$0xf0] }
 0x271   : > { %v11174_v21 = vadd.f32 %v2135_v44, %v2048_v22  ;;  %v1963_v18 = vadd.f32 %v1962_v56, %v1875_v10  ;;  %2962 = vmatmul.bf16.gmra.mxu0 %v8336_v4  ;;  %v8375_v44 = vld [vmem:[#allocation2 + $0x528] sm:$0xf]  ;;  %v8377_v22 = vld [vmem:[#allocation2 + $0x548] sm:$0xf0] }
 0x272   : > { %3050 = vmatmul.bf16.gmra.mxu1 %v8340_v46  ;;  %v10033_v4 = vld [vmem:[#allocation2 + $0x544] sm:$0xf0]  ;;  %v10029_v46 = vld [vmem:[#allocation2 + $0x52c] sm:$0xf] }
 0x273   : > { %12696 = vst [vmem:[#allocation11_spill] sm:$0xff] %v11174_v21  ;;  %3138 = vmatmul.bf16.gmra.mxu2 %v8344_v9  ;;  %v8368_v9 = vor.u32 %v10032_v49, %v8367_v3  ;;  %v8376_v51 = vor.u32 %v10033_v4, %v8375_v44  ;;  %v8399_v4 = vld [vmem:[#allocation2 + $0x560] sm:$0xf] }
 0x274   : > { %3226 = vmatmul.bf16.gmra.mxu3 %v8348_v5  ;;  %v8372_v5 = vor.u32 %v10028_v39, %v8369_v41  ;;  %v10502_v21 = vld [vmem:[%s10681_s24 + $0x140] sm:$0xff] }
 0x276   : > { %v2050_v36 = vpop.f32.mrf.mxu2  ;;  %v1876_v26 = vpop.f32.mrf.mxu0 }
 0x277   : > { %v2138_v31 = vpop.f32.mrf.mxu3  ;;  %v2051_v45 = vadd.f32 %v2050_v36, %v1963_v18  ;;  %v1964_v28 = vpop.f32.mrf.mxu1  ;;  %v1877_v38 = vadd.f32 %v1876_v26, %v11053_v25  ;;  %v8380_v25 = vor.u32 %v10029_v46, %v8377_v22  ;;  %v10040_v46 = vld [vmem:[#allocation2 + $0x57c] sm:$0xf0]  ;;  %v10036_v22 = vld [vmem:[#allocation2 + $0x564] sm:$0xf] }
 0x279   : > { %v11179_v17 = vadd.f32 %v2138_v31, %v2051_v45  ;;  %v1965_v63 = vadd.f32 %v1964_v28, %v1877_v38 }
 0x27b   : > { %12697 = vst [vmem:[#allocation12_spill] sm:$0xff] %v11179_v17  ;;  %v10493_v17 = vld [vmem:[%s10681_s24 + $0x120] sm:$0xff] }
 0x27e   : > { %v2052_v42 = vpop.f32.mrf.mxu2  ;;  %v1879_v18 = vpop.f32.mrf.mxu0 }
 0x27f   : > { %v2140_v56 = vpop.f32.mrf.mxu3  ;;  %v2053_v10 = vadd.f32 %v2052_v42, %v1965_v63  ;;  %v1967_v36 = vpop.f32.mrf.mxu1  ;;  %v1880_v31 = vadd.f32 %v1879_v18, %v11055_v35  ;;  %v8401_v42 = vld [vmem:[#allocation2 + $0x580] sm:$0xf0] }
 0x281   : > { %v11182_v45 = vadd.f32 %v2140_v56, %v2053_v10  ;;  %v1968_v26 = vadd.f32 %v1967_v36, %v1880_v31  ;;  %2967 = vmatmul.bf16.gmra.mxu0 %v8368_v9  ;;  %v8407_v56 = vld [vmem:[#allocation2 + $0x568] sm:$0xf]  ;;  %v8409_v10 = vld [vmem:[#allocation2 + $0x588] sm:$0xf0]  ;;  %v8400_v36 = vor.u32 %v10040_v46, %v8399_v4 }
 0x282   : > { %3055 = vmatmul.bf16.gmra.mxu1 %v8372_v5  ;;  %v10041_v9 = vld [vmem:[#allocation2 + $0x584] sm:$0xf0]  ;;  %v10037_v5 = vld [vmem:[#allocation2 + $0x56c] sm:$0xf] }
 0x283   : > { %12698 = vst [vmem:[#allocation15_spill] sm:$0xff] %v11182_v45  ;;  %3143 = vmatmul.bf16.gmra.mxu2 %v8376_v51  ;;  %v8408_v28 = vor.u32 %v10041_v9, %v8407_v56  ;;  %v8431_v9 = vld [vmem:[#allocation2 + $0x5a0] sm:$0xf] }
 0x284   : > { %3231 = vmatmul.bf16.gmra.mxu3 %v8380_v25  ;;  %v8404_v25 = vor.u32 %v10036_v22, %v8401_v42  ;;  %v10494_v45 = vld [vmem:[%s10681_s24 + $0x160] sm:$0xff] }
 0x286   : > { %v2055_v38 = vpop.f32.mrf.mxu2  ;;  %v1881_v63 = vpop.f32.mrf.mxu0 }
 0x287   : > { %v2143_v3 = vpop.f32.mrf.mxu3  ;;  %v2056_v49 = vadd.f32 %v2055_v38, %v1968_v26  ;;  %v1969_v39 = vpop.f32.mrf.mxu1  ;;  %v1882_v41 = vadd.f32 %v1881_v63, %v11057_v47  ;;  %v8412_v47 = vor.u32 %v10037_v5, %v8409_v10  ;;  %v10048_v5 = vld [vmem:[#allocation2 + $0x5bc] sm:$0xf0]  ;;  %v10044_v10 = vld [vmem:[#allocation2 + $0x5a4] sm:$0xf] }
 0x289   : > { %v11187_v44 = vadd.f32 %v2143_v3, %v2056_v49  ;;  %v1970_v35 = vadd.f32 %v1969_v39, %v1882_v41 }
 0x28b   : > { %12699 = vst [vmem:[#allocation16_spill] sm:$0xff] %v11187_v44  ;;  %v10488_v44 = vld [vmem:[%s10681_s24 + $0x178] sm:$0xff] }
 0x28e   : > { %v2057_v51 = vpop.f32.mrf.mxu2  ;;  %v1884_v26 = vpop.f32.mrf.mxu0 }
 0x28f   : > { %v2145_v18 = vpop.f32.mrf.mxu3  ;;  %v2058_v31 = vadd.f32 %v2057_v51, %v1970_v35  ;;  %v1972_v38 = vpop.f32.mrf.mxu1  ;;  %v1885_v3 = vadd.f32 %v1884_v26, %v11059_v48  ;;  %v8433_v51 = vld [vmem:[#allocation2 + $0x5c0] sm:$0xf0] }
 0x291   : > { %v11190_v49 = vadd.f32 %v2145_v18, %v2058_v31  ;;  %v1973_v63 = vadd.f32 %v1972_v38, %v1885_v3  ;;  %2972 = vmatmul.bf16.gmra.mxu0 %v8400_v36  ;;  %v8439_v18 = vld [vmem:[#allocation2 + $0x5a8] sm:$0xf]  ;;  %v8441_v31 = vld [vmem:[#allocation2 + $0x5c8] sm:$0xf0]  ;;  %v8432_v38 = vor.u32 %v10048_v5, %v8431_v9 }
 0x292   : > { %3060 = vmatmul.bf16.gmra.mxu1 %v8404_v25  ;;  %v10049_v36 = vld [vmem:[#allocation2 + $0x5c4] sm:$0xf0]  ;;  %v10045_v25 = vld [vmem:[#allocation2 + $0x5ac] sm:$0xf] }
 0x293   : > { %12700 = vst [vmem:[#allocation19_spill] sm:$0xff] %v11190_v49  ;;  %3148 = vmatmul.bf16.gmra.mxu2 %v8408_v28  ;;  %v8440_v39 = vor.u32 %v10049_v36, %v8439_v18  ;;  %v8463_v18 = vld [vmem:[#allocation2 + $0x5e0] sm:$0xf] }
 0x294   : > { %3236 = vmatmul.bf16.gmra.mxu3 %v8412_v47  ;;  %v8436_v47 = vor.u32 %v10044_v10, %v8433_v51  ;;  %v10056_v36 = vld [vmem:[#allocation2 + $0x5fc] sm:$0xf0] }
 0x296   : > { %v2060_v41 = vpop.f32.mrf.mxu2  ;;  %v1886_v35 = vpop.f32.mrf.mxu0 }
 0x297   : > { %v2148_v4 = vpop.f32.mrf.mxu3  ;;  %v2061_v46 = vadd.f32 %v2060_v41, %v1973_v63  ;;  %v1974_v22 = vpop.f32.mrf.mxu1  ;;  %v1887_v42 = vadd.f32 %v1886_v35, %v11061_v55  ;;  %v8444_v55 = vor.u32 %v10045_v25, %v8441_v31  ;;  %v8465_v25 = vld [vmem:[#allocation2 + $0x600] sm:$0xf0]  ;;  %v8471_v31 = vld [vmem:[#allocation2 + $0x5e8] sm:$0xf] }
 0x299   : > { %v11195_v56 = vadd.f32 %v2148_v4, %v2061_v46  ;;  %v1975_v48 = vadd.f32 %v1974_v22, %v1887_v42 }
 0x29b   : > { %12701 = vst [vmem:[#allocation20_spill] sm:$0xff] %v11195_v56 }
 0x29e   : > { %v2062_v28 = vpop.f32.mrf.mxu2  ;;  %v1889_v63 = vpop.f32.mrf.mxu0 }
 0x29f   : > { %v2150_v26 = vpop.f32.mrf.mxu3  ;;  %v2063_v3 = vadd.f32 %v2062_v28, %v1975_v48  ;;  %v1977_v41 = vpop.f32.mrf.mxu1  ;;  %v1890_v4 = vadd.f32 %v1889_v63, %v11063_v57  ;;  %v10052_v57 = vld [vmem:[#allocation2 + $0x5e4] sm:$0xf]  ;;  %v10057_v28 = vld [vmem:[#allocation2 + $0x604] sm:$0xf0]  ;;  %v8464_v63 = vor.u32 %v10056_v36, %v8463_v18  ;;  %v10064_v18 = vld [vmem:[#allocation2 + $0x63c] sm:$0xf0] }
 0x2a0   : > { %v10060_v36 = vld [vmem:[#allocation2 + $0x624] sm:$0xf] }
 0x2a1   : > { %v11198_v46 = vadd.f32 %v2150_v26, %v2063_v3  ;;  %v1978_v35 = vadd.f32 %v1977_v41, %v1890_v4  ;;  %2977 = vmatmul.bf16.gmra.mxu0 %v8432_v38  ;;  %v10053_v26 = vld [vmem:[#allocation2 + $0x5ec] sm:$0xf]  ;;  %v8472_v4 = vor.u32 %v10057_v28, %v8471_v31  ;;  %v10065_v31 = vld [vmem:[#allocation2 + $0x644] sm:$0xf0] }
 0x2a2   : > { %3065 = vmatmul.bf16.gmra.mxu1 %v8436_v47  ;;  %v8473_v38 = vld [vmem:[#allocation2 + $0x608] sm:$0xf0] }
 0x2a3   : > { %12702 = vst [vmem:[#allocation23_spill] sm:$0xff] %v11198_v46  ;;  %3153 = vmatmul.bf16.gmra.mxu2 %v8440_v39  ;;  %v8468_v39 = vor.u32 %v10052_v57, %v8465_v25  ;;  %v8497_v57 = vld [vmem:[#allocation2 + $0x640] sm:$0xf0]  ;;  %v8503_v25 = vld [vmem:[#allocation2 + $0x628] sm:$0xf]  ;;  %v10487_v46 = vld [vmem:[%s10681_s24 + $0x138] sm:$0xff] }
 0x2a4   : > { %3241 = vmatmul.bf16.gmra.mxu3 %v8444_v55  ;;  %v10061_v28 = vld [vmem:[#allocation2 + $0x62c] sm:$0xf] }
 0x2a6   : > { %v2065_v42 = vpop.f32.mrf.mxu2  ;;  %v1891_v48 = vpop.f32.mrf.mxu0 }
 0x2a7   : > { %v2153_v9 = vpop.f32.mrf.mxu3  ;;  %v2066_v5 = vadd.f32 %v2065_v42, %v1978_v35  ;;  %v1979_v10 = vpop.f32.mrf.mxu1  ;;  %v8476_v35 = vor.u32 %v10053_v26, %v8473_v38  ;;  %v8505_v26 = vld [vmem:[#allocation2 + $0x648] sm:$0xf0] }
 0x2a9   : > { %v11202_v51 = vadd.f32 %v2153_v9, %v2066_v5 }
 0x2ab   : > { %12703 = vst [vmem:[#allocation24_spill] sm:$0xff] %v11202_v51 }
 0x2ae   : > { %v2067_v47 = vpop.f32.mrf.mxu2  ;;  %v2943_v41 = vpop.f32.mrf.mxu0 }
 0x2af   : > { %v2155_v3 = vpop.f32.mrf.mxu3  ;;  %v3031_v55 = vpop.f32.mrf.mxu1  ;;  %v8495_v47 = vld [vmem:[#allocation2 + $0x620] sm:$0xf] }
 0x2b0   : > { %v3032_v42 = vadd.f32 %v3031_v55, %v2943_v41 }
 0x2b1   : > { %2982 = vmatmul.bf16.gmra.mxu0 %v8464_v63  ;;  %v8496_v63 = vor.u32 %v10064_v18, %v8495_v47  ;;  %v10072_v18 = vld [vmem:[#allocation2 + $0x67c] sm:$0xf0] }
 0x2b2   : > { %3070 = vmatmul.bf16.gmra.mxu1 %v8468_v39  ;;  %v8500_v39 = vor.u32 %v10060_v36, %v8497_v57  ;;  %v10068_v36 = vld [vmem:[#allocation2 + $0x664] sm:$0xf] }
 0x2b3   : > { %3158 = vmatmul.bf16.gmra.mxu2 %v8472_v4  ;;  %v8529_v57 = vld [vmem:[#allocation2 + $0x680] sm:$0xf0] }
 0x2b4   : > { %3246 = vmatmul.bf16.gmra.mxu3 %v8476_v35  ;;  %v8504_v35 = vor.u32 %v10065_v31, %v8503_v25  ;;  %v8535_v25 = vld [vmem:[#allocation2 + $0x668] sm:$0xf] }
 0x2b5   : > { %v10073_v31 = vld [vmem:[#allocation2 + $0x684] sm:$0xf0] }
 0x2b6   : > { %v3119_v9 = vpop.f32.mrf.mxu2  ;;  %v2945_v10 = vpop.f32.mrf.mxu0 }
 0x2b7   : > { %v3207_v5 = vpop.f32.mrf.mxu3  ;;  %v3120_v48 = vadd.f32 %v3119_v9, %v3032_v42  ;;  %v3033_v22 = vpop.f32.mrf.mxu1  ;;  %v8508_v42 = vor.u32 %v10061_v28, %v8505_v26  ;;  %v10069_v28 = vld [vmem:[#allocation2 + $0x66c] sm:$0xf] }
 0x2b8   : > { %v3034_v33 = vadd.f32 %v3033_v22, %v2945_v10  ;;  %v8537_v26 = vld [vmem:[#allocation2 + $0x688] sm:$0xf0] }
 0x2b9   : > { %v11204_v29 = vadd.f32 %v3207_v5, %v3120_v48 }
 0x2be   : > { %v3121_v38 = vpop.f32.mrf.mxu2  ;;  %v2948_v55 = vpop.f32.mrf.mxu0 }
 0x2bf   : > { %v3209_v3 = vpop.f32.mrf.mxu3  ;;  %v3122_v41 = vadd.f32 %v3121_v38, %v3034_v33  ;;  %v3036_v4 = vpop.f32.mrf.mxu1  ;;  %v8527_v33 = vld [vmem:[#allocation2 + $0x660] sm:$0xf] }
 0x2c0   : > { %v3037_v22 = vadd.f32 %v3036_v4, %v2948_v55 }
 0x2c1   : > { %v11206_v9 = vadd.f32 %v3209_v3, %v3122_v41  ;;  %2987 = vmatmul.bf16.gmra.mxu0 %v8496_v63  ;;  %v8528_v63 = vor.u32 %v10072_v18, %v8527_v33  ;;  %v10080_v18 = vld [vmem:[#allocation2 + $0x6bc] sm:$0xf0] }
 0x2c2   : > { %3075 = vmatmul.bf16.gmra.mxu1 %v8500_v39  ;;  %v8532_v39 = vor.u32 %v10068_v36, %v8529_v57  ;;  %v10076_v36 = vld [vmem:[#allocation2 + $0x6a4] sm:$0xf] }
 0x2c3   : > { %3163 = vmatmul.bf16.gmra.mxu2 %v8504_v35  ;;  %v8536_v35 = vor.u32 %v10073_v31, %v8535_v25  ;;  %v8561_v57 = vld [vmem:[#allocation2 + $0x6c0] sm:$0xf0]  ;;  %v8567_v25 = vld [vmem:[#allocation2 + $0x6a8] sm:$0xf] }
 0x2c4   : > { %3251 = vmatmul.bf16.gmra.mxu3 %v8508_v42  ;;  %v8540_v42 = vor.u32 %v10069_v28, %v8537_v26  ;;  %v10081_v31 = vld [vmem:[#allocation2 + $0x6c4] sm:$0xf0]  ;;  %v10077_v28 = vld [vmem:[#allocation2 + $0x6ac] sm:$0xf] }
 0x2c5   : > { %v8569_v26 = vld [vmem:[#allocation2 + $0x6c8] sm:$0xf0] }
 0x2c6   : > { %v3124_v5 = vpop.f32.mrf.mxu2  ;;  %v2950_v6 = vpop.f32.mrf.mxu0 }
 0x2c7   : > { %v3212_v48 = vpop.f32.mrf.mxu3  ;;  %v3125_v10 = vadd.f32 %v3124_v5, %v3037_v22  ;;  %v3038_v12 = vpop.f32.mrf.mxu1 }
 0x2c8   : > { %v3039_v20 = vadd.f32 %v3038_v12, %v2950_v6 }
 0x2c9   : > { %v11208_v47 = vadd.f32 %v3212_v48, %v3125_v10 }
 0x2ce   : > { %v3126_v38 = vpop.f32.mrf.mxu2  ;;  %v2953_v55 = vpop.f32.mrf.mxu0 }
 0x2cf   : > { %v3214_v3 = vpop.f32.mrf.mxu3  ;;  %v3127_v41 = vadd.f32 %v3126_v38, %v3039_v20  ;;  %v3041_v4 = vpop.f32.mrf.mxu1  ;;  %v8559_v20 = vld [vmem:[#allocation2 + $0x6a0] sm:$0xf] }
 0x2d0   : > { %v3042_v12 = vadd.f32 %v3041_v4, %v2953_v55 }
 0x2d1   : > { %v11210_v6 = vadd.f32 %v3214_v3, %v3127_v41  ;;  %2992 = vmatmul.bf16.gmra.mxu0 %v8528_v63  ;;  %v8560_v63 = vor.u32 %v10080_v18, %v8559_v20  ;;  %v10088_v18 = vld [vmem:[#allocation2 + $0x6fc] sm:$0xf0] }
 0x2d2   : > { %3080 = vmatmul.bf16.gmra.mxu1 %v8532_v39  ;;  %v8564_v39 = vor.u32 %v10076_v36, %v8561_v57  ;;  %v10084_v36 = vld [vmem:[#allocation2 + $0x6e4] sm:$0xf] }
 0x2d3   : > { %3168 = vmatmul.bf16.gmra.mxu2 %v8536_v35  ;;  %v8568_v35 = vor.u32 %v10081_v31, %v8567_v25  ;;  %v8593_v57 = vld [vmem:[#allocation2 + $0x700] sm:$0xf0]  ;;  %v8599_v25 = vld [vmem:[#allocation2 + $0x6e8] sm:$0xf] }
 0x2d4   : > { %3256 = vmatmul.bf16.gmra.mxu3 %v8540_v42  ;;  %v8572_v42 = vor.u32 %v10077_v28, %v8569_v26  ;;  %v10089_v31 = vld [vmem:[#allocation2 + $0x704] sm:$0xf0]  ;;  %v10085_v28 = vld [vmem:[#allocation2 + $0x6ec] sm:$0xf] }
 0x2d5   : > { %v8601_v26 = vld [vmem:[#allocation2 + $0x708] sm:$0xf0] }
 0x2d6   : > { %v3129_v22 = vpop.f32.mrf.mxu2  ;;  %v2955_v10 = vpop.f32.mrf.mxu0 }
 0x2d7   : > { %v3217_v5 = vpop.f32.mrf.mxu3  ;;  %v3130_v48 = vadd.f32 %v3129_v22, %v3042_v12  ;;  %v3043_v52 = vpop.f32.mrf.mxu1 }
 0x2d8   : > { %v3044_v60 = vadd.f32 %v3043_v52, %v2955_v10 }
 0x2d9   : > { %v11212_v33 = vadd.f32 %v3217_v5, %v3130_v48 }
 0x2de   : > { %v3131_v38 = vpop.f32.mrf.mxu2  ;;  %v2958_v55 = vpop.f32.mrf.mxu0 }
 0x2df   : > { %v3219_v3 = vpop.f32.mrf.mxu3  ;;  %v3132_v41 = vadd.f32 %v3131_v38, %v3044_v60  ;;  %v3046_v4 = vpop.f32.mrf.mxu1  ;;  %v8591_v60 = vld [vmem:[#allocation2 + $0x6e0] sm:$0xf] }
 0x2e0   : > { %v3047_v52 = vadd.f32 %v3046_v4, %v2958_v55 }
 0x2e1   : > { %v11214_v12 = vadd.f32 %v3219_v3, %v3132_v41  ;;  %2997 = vmatmul.bf16.gmra.mxu0 %v8560_v63  ;;  %v8592_v63 = vor.u32 %v10088_v18, %v8591_v60  ;;  %v10096_v18 = vld [vmem:[#allocation2 + $0x73c] sm:$0xf0] }
 0x2e2   : > { %3085 = vmatmul.bf16.gmra.mxu1 %v8564_v39  ;;  %v8596_v39 = vor.u32 %v10084_v36, %v8593_v57  ;;  %v10092_v36 = vld [vmem:[#allocation2 + $0x724] sm:$0xf] }
 0x2e3   : > { %3173 = vmatmul.bf16.gmra.mxu2 %v8568_v35  ;;  %v8600_v35 = vor.u32 %v10089_v31, %v8599_v25  ;;  %v8625_v57 = vld [vmem:[#allocation2 + $0x740] sm:$0xf0]  ;;  %v8631_v25 = vld [vmem:[#allocation2 + $0x728] sm:$0xf] }
 0x2e4   : > { %3261 = vmatmul.bf16.gmra.mxu3 %v8572_v42  ;;  %v8604_v42 = vor.u32 %v10085_v28, %v8601_v26  ;;  %v10097_v31 = vld [vmem:[#allocation2 + $0x744] sm:$0xf0]  ;;  %v10093_v28 = vld [vmem:[#allocation2 + $0x72c] sm:$0xf] }
 0x2e5   : > { %v8633_v26 = vld [vmem:[#allocation2 + $0x748] sm:$0xf0] }
 0x2e6   : > { %v3134_v22 = vpop.f32.mrf.mxu2  ;;  %v2960_v10 = vpop.f32.mrf.mxu0 }
 0x2e7   : > { %v3222_v5 = vpop.f32.mrf.mxu3  ;;  %v3135_v48 = vadd.f32 %v3134_v22, %v3047_v52  ;;  %v3048_v19 = vpop.f32.mrf.mxu1 }
 0x2e8   : > { %v3049_v23 = vadd.f32 %v3048_v19, %v2960_v10 }
 0x2e9   : > { %v11216_v20 = vadd.f32 %v3222_v5, %v3135_v48 }
 0x2ee   : > { %v3136_v38 = vpop.f32.mrf.mxu2  ;;  %v2963_v55 = vpop.f32.mrf.mxu0 }
 0x2ef   : > { %v3224_v3 = vpop.f32.mrf.mxu3  ;;  %v3137_v41 = vadd.f32 %v3136_v38, %v3049_v23  ;;  %v3051_v4 = vpop.f32.mrf.mxu1  ;;  %v8623_v23 = vld [vmem:[#allocation2 + $0x720] sm:$0xf] }
 0x2f0   : > { %v3052_v19 = vadd.f32 %v3051_v4, %v2963_v55 }
 0x2f1   : > { %v11218_v52 = vadd.f32 %v3224_v3, %v3137_v41  ;;  %3002 = vmatmul.bf16.gmra.mxu0 %v8592_v63  ;;  %v8624_v63 = vor.u32 %v10096_v18, %v8623_v23  ;;  %v10104_v18 = vld [vmem:[#allocation2 + $0x77c] sm:$0xf0] }
 0x2f2   : > { %3090 = vmatmul.bf16.gmra.mxu1 %v8596_v39  ;;  %v8628_v39 = vor.u32 %v10092_v36, %v8625_v57  ;;  %v10100_v36 = vld [vmem:[#allocation2 + $0x764] sm:$0xf] }
 0x2f3   : > { %3178 = vmatmul.bf16.gmra.mxu2 %v8600_v35  ;;  %v8632_v35 = vor.u32 %v10097_v31, %v8631_v25  ;;  %v8657_v57 = vld [vmem:[#allocation2 + $0x780] sm:$0xf0]  ;;  %v8663_v25 = vld [vmem:[#allocation2 + $0x768] sm:$0xf] }
 0x2f4   : > { %3266 = vmatmul.bf16.gmra.mxu3 %v8604_v42  ;;  %v8636_v42 = vor.u32 %v10093_v28, %v8633_v26  ;;  %v10105_v31 = vld [vmem:[#allocation2 + $0x784] sm:$0xf0]  ;;  %v10101_v28 = vld [vmem:[#allocation2 + $0x76c] sm:$0xf] }
 0x2f5   : > { %v8665_v26 = vld [vmem:[#allocation2 + $0x788] sm:$0xf0] }
 0x2f6   : > { %v3139_v22 = vpop.f32.mrf.mxu2  ;;  %v2965_v10 = vpop.f32.mrf.mxu0 }
 0x2f7   : > { %v3227_v5 = vpop.f32.mrf.mxu3  ;;  %v3140_v48 = vadd.f32 %v3139_v22, %v3052_v19  ;;  %v3053_v58 = vpop.f32.mrf.mxu1 }
 0x2f8   : > { %v3054_v37 = vadd.f32 %v3053_v58, %v2965_v10 }
 0x2f9   : > { %v11220_v60 = vadd.f32 %v3227_v5, %v3140_v48 }
 0x2fe   : > { %v3141_v38 = vpop.f32.mrf.mxu2  ;;  %v2968_v55 = vpop.f32.mrf.mxu0 }
 0x2ff   : > { %v3229_v3 = vpop.f32.mrf.mxu3  ;;  %v3142_v41 = vadd.f32 %v3141_v38, %v3054_v37  ;;  %v3056_v4 = vpop.f32.mrf.mxu1  ;;  %v8655_v37 = vld [vmem:[#allocation2 + $0x760] sm:$0xf] }
 0x300   : > { %v3057_v58 = vadd.f32 %v3056_v4, %v2968_v55 }
 0x301   : > { %v11222_v19 = vadd.f32 %v3229_v3, %v3142_v41  ;;  %3007 = vmatmul.bf16.gmra.mxu0 %v8624_v63  ;;  %v8656_v63 = vor.u32 %v10104_v18, %v8655_v37 }
 0x302   : > { %3095 = vmatmul.bf16.gmra.mxu1 %v8628_v39  ;;  %v8660_v39 = vor.u32 %v10100_v36, %v8657_v57  ;;  %v2302_v36 = vld [vmem:[#allocation2 + $0x7a0] sm:$0xff] }
 0x303   : > { %3183 = vmatmul.bf16.gmra.mxu2 %v8632_v35  ;;  %v8664_v35 = vor.u32 %v10105_v31, %v8663_v25  ;;  %v2303_v25 = vld [vmem:[#allocation2 + $0x7a8] sm:$0xff] }
 0x304   : > { %3271 = vmatmul.bf16.gmra.mxu3 %v8636_v42  ;;  %v8668_v42 = vor.u32 %v10101_v28, %v8665_v26  ;;  %v2670_v28 = vunpack.c.l.b16 %v2302_v36  ;;  %v2671_v26 = vunpack.c.h.b16 %v2302_v36 }
 0x306   : > { %v3144_v22 = vpop.f32.mrf.mxu2  ;;  %v2970_v10 = vpop.f32.mrf.mxu0 }
 0x307   : > { %v3232_v5 = vpop.f32.mrf.mxu3  ;;  %v3145_v48 = vadd.f32 %v3144_v22, %v3057_v58  ;;  %v3058_v51 = vpop.f32.mrf.mxu1  ;;  %v10111_v22 = vld [vmem:[%s12611_s2 + $0x38] sm:$0xff] }
 0x308   : > { %v3059_v56 = vadd.f32 %v3058_v51, %v2970_v10  ;;  %3740 = vmatpush.bf16.msra.mxu0 %v10111_v22 }
 0x309   : > { %v11224_v23 = vadd.f32 %v3232_v5, %v3145_v48  ;;  %v9987_v5 = vld [vmem:[%s12611_s2 + $0x18] sm:$0xff] }
 0x30a   : > { %3900 = vmatpush.bf16.msra.mxu1 %v9987_v5 }
 0x30e   : > { %v3146_v38 = vpop.f32.mrf.mxu2  ;;  %v2973_v55 = vpop.f32.mrf.mxu0 }
 0x30f   : > { %v3234_v3 = vpop.f32.mrf.mxu3  ;;  %v3147_v41 = vadd.f32 %v3146_v38, %v3059_v56  ;;  %v3061_v4 = vpop.f32.mrf.mxu1  ;;  %v2672_v38 = vunpack.c.l.b16 %v2303_v25 }
 0x310   : > { %v3062_v51 = vadd.f32 %v3061_v4, %v2973_v55  ;;  %v2799_v55 = vpack.c.b16 %v2671_v26, %v2671_v26  ;;  %v9994_v26 = vld [vmem:[#allocation2 + $0x40c] sm:$0xf0] }
 0x311   : > { %v11226_v58 = vadd.f32 %v3234_v3, %v3147_v41  ;;  %3012 = vmatmul.bf16.gmra.mxu0 %v8656_v63  ;;  %v2673_v3 = vunpack.c.h.b16 %v2303_v25  ;;  %v2798_v41 = vpack.c.b16 %v2670_v28, %v2670_v28  ;;  %v2800_v22 = vpack.c.b16 %v2672_v38, %v2672_v38  ;;  %v8225_v38 = vld [vmem:[#allocation2 + $0x410] sm:$0xf0] }
 0x312   : > { %3100 = vmatmul.bf16.gmra.mxu1 %v8660_v39 }
 0x313   : > { %3188 = vmatmul.bf16.gmra.mxu2 %v8664_v35 }
 0x314   : > { %3276 = vmatmul.bf16.gmra.mxu3 %v8668_v42 }
 0x316   : > { %v3149_v56 = vpop.f32.mrf.mxu2  ;;  %v2975_v37 = vpop.f32.mrf.mxu0 }
 0x317   : > { %v3237_v48 = vpop.f32.mrf.mxu3  ;;  %v3150_v10 = vadd.f32 %v3149_v56, %v3062_v51  ;;  %v3063_v18 = vpop.f32.mrf.mxu1  ;;  %v2801_v51 = vpack.c.b16 %v2673_v3, %v2673_v3  ;;  %v8231_v3 = vld [vmem:[#allocation2 + $0x3f8] sm:$0xf] }
 0x318   : > { %v3064_v57 = vadd.f32 %v3063_v18, %v2975_v37 }
 0x319   : > { %v11234_v31 = vadd.f32 %v3237_v48, %v3150_v10 }
 0x31e   : > { %v3151_v63 = vpop.f32.mrf.mxu2  ;;  %v2978_v35 = vpop.f32.mrf.mxu0 }
 0x31f   : > { %v3239_v39 = vpop.f32.mrf.mxu3  ;;  %v3152_v4 = vadd.f32 %v3151_v63, %v3064_v57  ;;  %v3066_v42 = vpop.f32.mrf.mxu1  ;;  %v8223_v57 = vld [vmem:[#allocation2 + $0x3f0] sm:$0xf]  ;;  %v9990_v63 = vld [vmem:[#allocation2 + $0x3f4] sm:$0xf] }
 0x320   : > { %v3067_v5 = vadd.f32 %v3066_v42, %v2978_v35  ;;  %v9995_v35 = vld [vmem:[#allocation2 + $0x414] sm:$0xf0]  ;;  %v8224_v42 = vor.u32 %v9994_v26, %v8223_v57 }
 0x321   : > { %v11236_v56 = vadd.f32 %v3239_v39, %v3152_v4  ;;  %3017 = vmatmul.bf16.gmra.mxu0 %v2798_v41  ;;  %v9991_v39 = vld [vmem:[#allocation2 + $0x3fc] sm:$0xf] }
 0x322   : > { %3105 = vmatmul.bf16.gmra.mxu1 %v2799_v55  ;;  %v8233_v4 = vld [vmem:[#allocation2 + $0x418] sm:$0xf0] }
 0x323   : > { %3193 = vmatmul.bf16.gmra.mxu2 %v2800_v22  ;;  %v8228_v22 = vor.u32 %v9990_v63, %v8225_v38 }
 0x324   : > { %3281 = vmatmul.bf16.gmra.mxu3 %v2801_v51 }
 0x326   : > { %v3154_v48 = vpop.f32.mrf.mxu2  ;;  %v2980_v18 = vpop.f32.mrf.mxu0 }
 0x327   : > { %v3242_v10 = vpop.f32.mrf.mxu3  ;;  %v3155_v37 = vadd.f32 %v3154_v48, %v3067_v5  ;;  %v3068_v36 = vpop.f32.mrf.mxu1 }
 0x328   : > { %v3069_v25 = vadd.f32 %v3068_v36, %v2980_v18  ;;  %v8232_v18 = vor.u32 %v9995_v35, %v8231_v3  ;;  %v10489_v35 = vld [vmem:[%s10681_s24 + $0x130] sm:$0xff] }
 0x329   : > { %v11238_v28 = vadd.f32 %v3242_v10, %v3155_v37  ;;  %v8236_v10 = vor.u32 %v9991_v39, %v8233_v4  ;;  %v10490_v39 = vld [vmem:[%s10681_s24 + $0x170] sm:$0xff] }
 0x32e   : > { %v3156_v41 = vpop.f32.mrf.mxu2  ;;  %v2983_v5 = vpop.f32.mrf.mxu0 }
 0x32f   : > { %v3244_v55 = vpop.f32.mrf.mxu3  ;;  %v3157_v51 = vadd.f32 %v3156_v41, %v3069_v25  ;;  %v3071_v48 = vpop.f32.mrf.mxu1  ;;  %v8255_v41 = vld [vmem:[#allocation2 + $0x430] sm:$0xf] }
 0x330   : > { %v3072_v37 = vadd.f32 %v3071_v48, %v2983_v5  ;;  %v8265_v5 = vld [vmem:[#allocation2 + $0x458] sm:$0xf0]  ;;  %v10491_v48 = vld [vmem:[%s10681_s24 + $0x128] sm:$0xff] }
 0x331   : > { %v11240_v36 = vadd.f32 %v3244_v55, %v3157_v51  ;;  %3294 = vmatmul.bf16.vlgmr.msrb.gmra.mxu0 %v8224_v42  ;;  %v10002_v55 = vld [vmem:[#allocation2 + $0x44c] sm:$0xf0]  ;;  %v9998_v42 = vld [vmem:[#allocation2 + $0x434] sm:$0xf]  ;;  %v9999_v51 = vld [vmem:[#allocation2 + $0x43c] sm:$0xf] }
 0x332   : > { %3382 = vmatmul.bf16.vlgmr.msrb.gmra.mxu1 %v8228_v22  ;;  %v8263_v22 = vld [vmem:[#allocation2 + $0x438] sm:$0xf] }
 0x333   : > { %3470 = vmatmul.bf16.vlgmr.msrb.gmra.mxu2 %v8232_v18  ;;  %v10492_v18 = vld [vmem:[%s10681_s24 + $0x168] sm:$0xff] }
 0x334   : > { %3558 = vmatmul.bf16.vlgmr.msrb.gmra.mxu3 %v8236_v10  ;;  %5089 = vmatpush.bf16.msrb.mxu2 %v10487_v46  ;;  %v8257_v46 = vld [vmem:[#allocation2 + $0x450] sm:$0xf0] }
 0x335   : > { %5177 = vmatpush.bf16.msrb.mxu3 %v10488_v44  ;;  %v10003_v44 = vld [vmem:[#allocation2 + $0x454] sm:$0xf0] }
 0x336   : > { %v3159_v57 = vpop.f32.mrf.mxu2  ;;  %v2985_v63 = vpop.f32.mrf.mxu0 }
 0x337   : > { %v3247_v26 = vpop.f32.mrf.mxu3  ;;  %v3160_v25 = vadd.f32 %v3159_v57, %v3072_v37  ;;  %v3073_v38 = vpop.f32.mrf.mxu1  ;;  %v8256_v57 = vor.u32 %v10002_v55, %v8255_v41  ;;  %v10495_v41 = vld [vmem:[%s10681_s24 + $0x118] sm:$0xff] }
 0x338   : > { %v3074_v3 = vadd.f32 %v3073_v38, %v2985_v63  ;;  %5090 = vmatpush.bf16.msrb.mxu2 %v10489_v35  ;;  %v8260_v63 = vor.u32 %v9998_v42, %v8257_v46  ;;  %v8264_v35 = vor.u32 %v10003_v44, %v8263_v22 }
 0x339   : > { %5178 = vmatpush.bf16.msrb.mxu3 %v10490_v39  ;;  %v11246_v4 = vadd.f32 %v3247_v26, %v3160_v25  ;;  %v8268_v39 = vor.u32 %v9999_v51, %v8265_v5  ;;  %v10498_v51 = vld [vmem:[%s10681_s24 + $0x150] sm:$0xff] }
 0x33c   : > { %5091 = vmatpush.bf16.msrb.mxu2 %v10491_v48 }
 0x33d   : > { %5179 = vmatpush.bf16.msrb.mxu3 %v10492_v18  ;;  %v8287_v18 = vld [vmem:[#allocation2 + $0x470] sm:$0xf] }
 0x33e   : > { %v3161_v10 = vpop.f32.mrf.mxu2  ;;  %v2988_v25 = vpop.f32.mrf.mxu0 }
 0x33f   : > { %v3249_v37 = vpop.f32.mrf.mxu3  ;;  %v3162_v26 = vadd.f32 %v3161_v10, %v3074_v3  ;;  %v3076_v38 = vpop.f32.mrf.mxu1  ;;  %v10496_v3 = vld [vmem:[%s10681_s24 + $0x158] sm:$0xff]  ;;  %v10010_v10 = vld [vmem:[#allocation2 + $0x48c] sm:$0xf0] }
 0x340   : > { %v3077_v49 = vadd.f32 %v3076_v38, %v2988_v25  ;;  %5092 = vmatpush.bf16.msrb.mxu2 %v10493_v17  ;;  %v10007_v25 = vld [vmem:[#allocation2 + $0x47c] sm:$0xf]  ;;  %v10499_v38 = vld [vmem:[%s10681_s24 + $0x108] sm:$0xff] }
 0x341   : > { %5180 = vmatpush.bf16.msrb.mxu3 %v10494_v45  ;;  %v11252_v48 = vadd.f32 %v3249_v37, %v3162_v26  ;;  %3299 = vmatmul.bf16.gmra.mxu0 %v8256_v57  ;;  %v10497_v45 = vld [vmem:[%s10681_s24 + $0x110] sm:$0xff]  ;;  %v10011_v26 = vld [vmem:[#allocation2 + $0x494] sm:$0xf0] }
 0x342   : > { %3387 = vmatmul.bf16.gmra.mxu1 %v8260_v63  ;;  %v10006_v37 = vld [vmem:[#allocation2 + $0x474] sm:$0xf]  ;;  %v8295_v63 = vld [vmem:[#allocation2 + $0x478] sm:$0xf] }
 0x343   : > { %3475 = vmatmul.bf16.gmra.mxu2 %v8264_v35  ;;  %v8289_v57 = vld [vmem:[#allocation2 + $0x490] sm:$0xf0]  ;;  %v10500_v35 = vld [vmem:[%s10681_s24 + $0x148] sm:$0xff] }
 0x344   : > { %3563 = vmatmul.bf16.gmra.mxu3 %v8268_v39  ;;  %5093 = vmatpush.bf16.msrb.mxu2 %v10495_v41 }
 0x345   : > { %5181 = vmatpush.bf16.msrb.mxu3 %v10496_v3  ;;  %v8288_v3 = vor.u32 %v10010_v10, %v8287_v18  ;;  %v10110_v18 = vld [vmem:[%s12611_s2 + $0x30] sm:$0xff] }
 0x346   : > { %v3164_v55 = vpop.f32.mrf.mxu2  ;;  %v2990_v22 = vpop.f32.mrf.mxu0  ;;  %3741 = vmatpush.bf16.msra.mxu0 %v10110_v18 }
 0x347   : > { %v3252_v42 = vpop.f32.mrf.mxu3  ;;  %v3165_v46 = vadd.f32 %v3164_v55, %v3077_v49  ;;  %v3078_v17 = vpop.f32.mrf.mxu1  ;;  %v8297_v49 = vld [vmem:[#allocation2 + $0x498] sm:$0xf0]  ;;  %v8292_v55 = vor.u32 %v10006_v37, %v8289_v57 }
 0x348   : > { %v3079_v44 = vadd.f32 %v3078_v17, %v2990_v22  ;;  %5094 = vmatpush.bf16.msrb.mxu2 %v10497_v45  ;;  %v8296_v17 = vor.u32 %v10011_v26, %v8295_v63  ;;  %v8300_v45 = vor.u32 %v10007_v25, %v8297_v49  ;;  %v8319_v25 = vld [vmem:[#allocation2 + $0x4b0] sm:$0xf] }
 0x349   : > { %5182 = vmatpush.bf16.msrb.mxu3 %v10498_v51  ;;  %v11258_v5 = vadd.f32 %v3252_v42, %v3165_v46  ;;  %v10018_v49 = vld [vmem:[#allocation2 + $0x4cc] sm:$0xf0] }
 0x34c   : > { %5095 = vmatpush.bf16.msrb.mxu2 %v10499_v38  ;;  %v10014_v38 = vld [vmem:[#allocation2 + $0x4b4] sm:$0xf] }
 0x34d   : > { %5183 = vmatpush.bf16.msrb.mxu3 %v10500_v35  ;;  %v8321_v35 = vld [vmem:[#allocation2 + $0x4d0] sm:$0xf0] }
 0x34e   : > { %v3166_v39 = vpop.f32.mrf.mxu2  ;;  %v2993_v46 = vpop.f32.mrf.mxu0 }
 0x34f   : > { %v3254_v41 = vpop.f32.mrf.mxu3  ;;  %v3167_v42 = vadd.f32 %v3166_v39, %v3079_v44  ;;  %v3081_v22 = vpop.f32.mrf.mxu1  ;;  %v9986_v44 = vld [vmem:[%s12611_s2 + $0x10] sm:$0xff]  ;;  %v8327_v39 = vld [vmem:[#allocation2 + $0x4b8] sm:$0xf] }
 0x350   : > { %v3082_v51 = vadd.f32 %v3081_v22, %v2993_v46  ;;  %5096 = vmatpush.bf16.msrb.mxu2 %v10501_v2  ;;  %3901 = vmatpush.bf16.msra.mxu1 %v9986_v44  ;;  %v8320_v22 = vor.u32 %v10018_v49, %v8319_v25  ;;  %v10026_v49 = vld [vmem:[#allocation2 + $0x50c] sm:$0xf0] }
 0x351   : > { %5184 = vmatpush.bf16.msrb.mxu3 %v10502_v21  ;;  %v11264_v61 = vadd.f32 %v3254_v41, %v3167_v42  ;;  %3304 = vmatmul.bf16.gmra.mxu0 %v8288_v3  ;;  %v10019_v41 = vld [vmem:[#allocation2 + $0x4d4] sm:$0xf0]  ;;  %v10015_v3 = vld [vmem:[#allocation2 + $0x4bc] sm:$0xf] }
 0x352   : > { %3392 = vmatmul.bf16.gmra.mxu1 %v8292_v55  ;;  %v8329_v55 = vld [vmem:[#allocation2 + $0x4d8] sm:$0xf0]  ;;  %v8328_v44 = vor.u32 %v10019_v41, %v8327_v39  ;;  %v8359_v39 = vld [vmem:[#allocation2 + $0x4f8] sm:$0xf] }
 0x353   : > { %3480 = vmatmul.bf16.gmra.mxu2 %v8296_v17  ;;  %v8324_v17 = vor.u32 %v10014_v38, %v8321_v35  ;;  %v10022_v38 = vld [vmem:[#allocation2 + $0x4f4] sm:$0xf]  ;;  %v10027_v41 = vld [vmem:[#allocation2 + $0x514] sm:$0xf0] }
 0x354   : > { %3568 = vmatmul.bf16.gmra.mxu3 %v8300_v45  ;;  %v8353_v35 = vld [vmem:[#allocation2 + $0x510] sm:$0xf0] }
 0x356   : > { %v3169_v10 = vpop.f32.mrf.mxu2  ;;  %v2995_v21 = vpop.f32.mrf.mxu0 }
 0x357   : > { %v3257_v2 = vpop.f32.mrf.mxu3  ;;  %v3170_v37 = vadd.f32 %v3169_v10, %v3082_v51  ;;  %v3083_v57 = vpop.f32.mrf.mxu1  ;;  %v8332_v10 = vor.u32 %v10015_v3, %v8329_v55  ;;  %v10023_v3 = vld [vmem:[#allocation2 + $0x4fc] sm:$0xf] }
 0x358   : > { %v3084_v63 = vadd.f32 %v3083_v57, %v2995_v21  ;;  %v8361_v55 = vld [vmem:[#allocation2 + $0x518] sm:$0xf0] }
 0x359   : > { %v11272_v26 = vadd.f32 %v3257_v2, %v3170_v37 }
 0x35e   : > { %v3171_v42 = vpop.f32.mrf.mxu2  ;;  %v2998_v18 = vpop.f32.mrf.mxu0 }
 0x35f   : > { %v3259_v46 = vpop.f32.mrf.mxu3  ;;  %v3172_v45 = vadd.f32 %v3171_v42, %v3084_v63  ;;  %v3086_v51 = vpop.f32.mrf.mxu1  ;;  %v8351_v63 = vld [vmem:[#allocation2 + $0x4f0] sm:$0xf] }
 0x360   : > { %v3087_v21 = vadd.f32 %v3086_v51, %v2998_v18 }
 0x361   : > { %v11274_v2 = vadd.f32 %v3259_v46, %v3172_v45  ;;  %3309 = vmatmul.bf16.gmra.mxu0 %v8320_v22  ;;  %v8352_v22 = vor.u32 %v10026_v49, %v8351_v63  ;;  %v10034_v49 = vld [vmem:[#allocation2 + $0x54c] sm:$0xf0] }
 0x362   : > { %3397 = vmatmul.bf16.gmra.mxu1 %v8324_v17  ;;  %v8356_v17 = vor.u32 %v10022_v38, %v8353_v35  ;;  %v10030_v38 = vld [vmem:[#allocation2 + $0x534] sm:$0xf] }
 0x363   : > { %3485 = vmatmul.bf16.gmra.mxu2 %v8328_v44  ;;  %v8360_v44 = vor.u32 %v10027_v41, %v8359_v39  ;;  %v8385_v35 = vld [vmem:[#allocation2 + $0x550] sm:$0xf0]  ;;  %v8391_v39 = vld [vmem:[#allocation2 + $0x538] sm:$0xf] }
 0x364   : > { %3573 = vmatmul.bf16.gmra.mxu3 %v8332_v10  ;;  %v8364_v10 = vor.u32 %v10023_v3, %v8361_v55  ;;  %v10035_v41 = vld [vmem:[#allocation2 + $0x554] sm:$0xf0]  ;;  %v10031_v3 = vld [vmem:[#allocation2 + $0x53c] sm:$0xf] }
 0x365   : > { %v8393_v55 = vld [vmem:[#allocation2 + $0x558] sm:$0xf0] }
 0x366   : > { %v3174_v37 = vpop.f32.mrf.mxu2  ;;  %v3000_v7 = vpop.f32.mrf.mxu0 }
 0x367   : > { %v3262_v57 = vpop.f32.mrf.mxu3  ;;  %v3175_v32 = vadd.f32 %v3174_v37, %v3087_v21  ;;  %v3088_v16 = vpop.f32.mrf.mxu1 }
 0x368   : > { %v3089_v53 = vadd.f32 %v3088_v16, %v3000_v7 }
 0x369   : > { %v11276_v25 = vadd.f32 %v3262_v57, %v3175_v32 }
 0x36e   : > { %v3176_v42 = vpop.f32.mrf.mxu2  ;;  %v3003_v18 = vpop.f32.mrf.mxu0 }
 0x36f   : > { %v3264_v46 = vpop.f32.mrf.mxu3  ;;  %v3177_v45 = vadd.f32 %v3176_v42, %v3089_v53  ;;  %v3091_v51 = vpop.f32.mrf.mxu1  ;;  %v8383_v53 = vld [vmem:[#allocation2 + $0x530] sm:$0xf] }
 0x370   : > { %v3092_v7 = vadd.f32 %v3091_v51, %v3003_v18 }
 0x371   : > { %v11278_v16 = vadd.f32 %v3264_v46, %v3177_v45  ;;  %3314 = vmatmul.bf16.gmra.mxu0 %v8352_v22  ;;  %v8384_v22 = vor.u32 %v10034_v49, %v8383_v53  ;;  %v10042_v49 = vld [vmem:[#allocation2 + $0x58c] sm:$0xf0] }
 0x372   : > { %3402 = vmatmul.bf16.gmra.mxu1 %v8356_v17  ;;  %v8388_v17 = vor.u32 %v10030_v38, %v8385_v35  ;;  %v10038_v38 = vld [vmem:[#allocation2 + $0x574] sm:$0xf] }
 0x373   : > { %3490 = vmatmul.bf16.gmra.mxu2 %v8360_v44  ;;  %v8392_v44 = vor.u32 %v10035_v41, %v8391_v39  ;;  %v8417_v35 = vld [vmem:[#allocation2 + $0x590] sm:$0xf0]  ;;  %v8423_v39 = vld [vmem:[#allocation2 + $0x578] sm:$0xf] }
 0x374   : > { %3578 = vmatmul.bf16.gmra.mxu3 %v8364_v10  ;;  %v8396_v10 = vor.u32 %v10031_v3, %v8393_v55  ;;  %v10043_v41 = vld [vmem:[#allocation2 + $0x594] sm:$0xf0]  ;;  %v10039_v3 = vld [vmem:[#allocation2 + $0x57c] sm:$0xf] }
 0x375   : > { %v8425_v55 = vld [vmem:[#allocation2 + $0x598] sm:$0xf0] }
 0x376   : > { %v3179_v32 = vpop.f32.mrf.mxu2  ;;  %v3005_v57 = vpop.f32.mrf.mxu0 }
 0x377   : > { %v3267_v21 = vpop.f32.mrf.mxu3  ;;  %v3180_v37 = vadd.f32 %v3179_v32, %v3092_v7  ;;  %v3093_v0 = vpop.f32.mrf.mxu1 }
 0x378   : > { %v3094_v13 = vadd.f32 %v3093_v0, %v3005_v57 }
 0x379   : > { %v11280_v63 = vadd.f32 %v3267_v21, %v3180_v37 }
 0x37e   : > { %v3181_v42 = vpop.f32.mrf.mxu2  ;;  %v3008_v18 = vpop.f32.mrf.mxu0 }
 0x37f   : > { %v3269_v46 = vpop.f32.mrf.mxu3  ;;  %v3182_v45 = vadd.f32 %v3181_v42, %v3094_v13  ;;  %v3096_v51 = vpop.f32.mrf.mxu1  ;;  %v8415_v13 = vld [vmem:[#allocation2 + $0x570] sm:$0xf] }
 0x380   : > { %v3097_v0 = vadd.f32 %v3096_v51, %v3008_v18 }
 0x381   : > { %v11282_v7 = vadd.f32 %v3269_v46, %v3182_v45  ;;  %3319 = vmatmul.bf16.gmra.mxu0 %v8384_v22  ;;  %v8416_v22 = vor.u32 %v10042_v49, %v8415_v13 }
 0x382   : > { %3407 = vmatmul.bf16.gmra.mxu1 %v8388_v17  ;;  %v8420_v17 = vor.u32 %v10038_v38, %v8417_v35 }
 0x383   : > { %3495 = vmatmul.bf16.gmra.mxu2 %v8392_v44  ;;  %v8424_v44 = vor.u32 %v10043_v41, %v8423_v39  ;;  %v8447_v39 = vld [vmem:[#allocation2 + $0x5b0] sm:$0xf] }
 0x384   : > { %3583 = vmatmul.bf16.gmra.mxu3 %v8396_v10  ;;  %v8428_v10 = vor.u32 %v10039_v3, %v8425_v55  ;;  %v10050_v41 = vld [vmem:[#allocation2 + $0x5cc] sm:$0xf0]  ;;  %v10046_v3 = vld [vmem:[#allocation2 + $0x5b4] sm:$0xf] }
 0x385   : > { %v8449_v55 = vld [vmem:[#allocation2 + $0x5d0] sm:$0xf0] }
 0x386   : > { %v3184_v32 = vpop.f32.mrf.mxu2  ;;  %v3010_v57 = vpop.f32.mrf.mxu0 }
 0x387   : > { %v3272_v21 = vpop.f32.mrf.mxu3  ;;  %v3185_v37 = vadd.f32 %v3184_v32, %v3097_v0  ;;  %v3098_v14 = vpop.f32.mrf.mxu1  ;;  %v10109_v32 = vld [vmem:[%s12611_s2 + $0x28] sm:$0xff] }
 0x388   : > { %v3099_v1 = vadd.f32 %v3098_v14, %v3010_v57  ;;  %3742 = vmatpush.bf16.msra.mxu0 %v10109_v32 }
 0x389   : > { %v11284_v53 = vadd.f32 %v3272_v21, %v3185_v37  ;;  %v9985_v21 = vld [vmem:[%s12611_s2 + $0x8] sm:$0xff] }
 0x38a   : > { %3902 = vmatpush.bf16.msra.mxu1 %v9985_v21 }
 0x38e   : > { %v3186_v42 = vpop.f32.mrf.mxu2  ;;  %v3013_v18 = vpop.f32.mrf.mxu0 }
 0x38f   : > { %v3274_v46 = vpop.f32.mrf.mxu3  ;;  %v3187_v45 = vadd.f32 %v3186_v42, %v3099_v1  ;;  %v3101_v51 = vpop.f32.mrf.mxu1  ;;  %v8455_v42 = vld [vmem:[#allocation2 + $0x5b8] sm:$0xf] }
 0x390   : > { %v3102_v14 = vadd.f32 %v3101_v51, %v3013_v18  ;;  %v8448_v51 = vor.u32 %v10050_v41, %v8447_v39  ;;  %v8479_v39 = vld [vmem:[#allocation2 + $0x5f0] sm:$0xf]  ;;  %v10054_v41 = vld [vmem:[#allocation2 + $0x5f4] sm:$0xf] }
 0x391   : > { %v11286_v0 = vadd.f32 %v3274_v46, %v3187_v45  ;;  %3324 = vmatmul.bf16.gmra.mxu0 %v8416_v22  ;;  %v10051_v46 = vld [vmem:[#allocation2 + $0x5d4] sm:$0xf0]  ;;  %v10047_v22 = vld [vmem:[#allocation2 + $0x5bc] sm:$0xf] }
 0x392   : > { %3412 = vmatmul.bf16.gmra.mxu1 %v8420_v17  ;;  %v8457_v17 = vld [vmem:[#allocation2 + $0x5d8] sm:$0xf0]  ;;  %v8456_v21 = vor.u32 %v10051_v46, %v8455_v42  ;;  %v10059_v42 = vld [vmem:[#allocation2 + $0x614] sm:$0xf0] }
 0x393   : > { %12704 = vst [vmem:[#allocation25_spill] sm:$0xff] %v11286_v0  ;;  %3500 = vmatmul.bf16.gmra.mxu2 %v8424_v44  ;;  %v8452_v44 = vor.u32 %v10046_v3, %v8449_v55  ;;  %v8481_v3 = vld [vmem:[#allocation2 + $0x610] sm:$0xf0]  ;;  %v8487_v55 = vld [vmem:[#allocation2 + $0x5f8] sm:$0xf] }
 0x394   : > { %3588 = vmatmul.bf16.gmra.mxu3 %v8428_v10  ;;  %v10055_v46 = vld [vmem:[#allocation2 + $0x5fc] sm:$0xf] }
 0x396   : > { %v3189_v1 = vpop.f32.mrf.mxu2  ;;  %v3015_v13 = vpop.f32.mrf.mxu0 }
 0x397   : > { %v3277_v37 = vpop.f32.mrf.mxu3  ;;  %v3190_v57 = vadd.f32 %v3189_v1, %v3102_v14  ;;  %v3103_v49 = vpop.f32.mrf.mxu1  ;;  %v8460_v1 = vor.u32 %v10047_v22, %v8457_v17  ;;  %v8489_v22 = vld [vmem:[#allocation2 + $0x618] sm:$0xf0] }
 0x398   : > { %v3104_v38 = vadd.f32 %v3103_v49, %v3015_v13 }
 0x399   : > { %v11294_v35 = vadd.f32 %v3277_v37, %v3190_v57 }
 0x39b   : > { %12705 = vst [vmem:[#allocation26_spill] sm:$0xff] %v11294_v35 }
 0x39e   : > { %v3191_v45 = vpop.f32.mrf.mxu2  ;;  %v3018_v32 = vpop.f32.mrf.mxu0 }
 0x39f   : > { %v3279_v18 = vpop.f32.mrf.mxu3  ;;  %v3192_v10 = vadd.f32 %v3191_v45, %v3104_v38  ;;  %v3106_v14 = vpop.f32.mrf.mxu1  ;;  %v10058_v38 = vld [vmem:[#allocation2 + $0x60c] sm:$0xf0] }
 0x3a0   : > { %v3107_v13 = vadd.f32 %v3106_v14, %v3018_v32  ;;  %v8488_v32 = vor.u32 %v10059_v42, %v8487_v55  ;;  %v8492_v14 = vor.u32 %v10055_v46, %v8489_v22  ;;  %v10062_v55 = vld [vmem:[#allocation2 + $0x634] sm:$0xf]  ;;  %v10067_v46 = vld [vmem:[#allocation2 + $0x654] sm:$0xf0]  ;;  %v10063_v22 = vld [vmem:[#allocation2 + $0x63c] sm:$0xf] }
 0x3a1   : > { %v11296_v37 = vadd.f32 %v3279_v18, %v3192_v10  ;;  %3329 = vmatmul.bf16.gmra.mxu0 %v8448_v51  ;;  %v8480_v18 = vor.u32 %v10058_v38, %v8479_v39  ;;  %v8484_v51 = vor.u32 %v10054_v41, %v8481_v3  ;;  %v8511_v41 = vld [vmem:[#allocation2 + $0x630] sm:$0xf]  ;;  %v8513_v42 = vld [vmem:[#allocation2 + $0x650] sm:$0xf0] }
 0x3a2   : > { %3417 = vmatmul.bf16.gmra.mxu1 %v8452_v44  ;;  %v10066_v3 = vld [vmem:[#allocation2 + $0x64c] sm:$0xf0] }
 0x3a3   : > { %3505 = vmatmul.bf16.gmra.mxu2 %v8456_v21 }
 0x3a4   : > { %3593 = vmatmul.bf16.gmra.mxu3 %v8460_v1 }
 0x3a6   : > { %v3194_v57 = vpop.f32.mrf.mxu2  ;;  %v3020_v35 = vpop.f32.mrf.mxu0 }
 0x3a7   : > { %v3282_v49 = vpop.f32.mrf.mxu3  ;;  %v3195_v8 = vadd.f32 %v3194_v57, %v3107_v13  ;;  %v3108_v0 = vpop.f32.mrf.mxu1 }
 0x3a9   : > { %v11298_v34 = vadd.f32 %v3282_v49, %v3195_v8 }
 0x3ae   : > { %v3196_v17 = vpop.f32.mrf.mxu2  ;;  %v3295_v44 = vpop.f32.mrf.mxu0 }
 0x3af   : > { %v3284_v45 = vpop.f32.mrf.mxu3  ;;  %v3383_v10 = vpop.f32.mrf.mxu1  ;;  %v3296_v0 = vadd.f32 %v3295_v44, %v11204_v29  ;;  %v8519_v29 = vld [vmem:[#allocation2 + $0x638] sm:$0xf]  ;;  %v8521_v17 = vld [vmem:[#allocation2 + $0x658] sm:$0xf0]  ;;  %v8516_v44 = vor.u32 %v10062_v55, %v8513_v42  ;;  %v8543_v42 = vld [vmem:[#allocation2 + $0x670] sm:$0xf] }
 0x3b1   : > { %v3384_v8 = vadd.f32 %v3383_v10, %v3296_v0  ;;  %3334 = vmatmul.bf16.gmra.mxu0 %v8480_v18  ;;  %v8520_v0 = vor.u32 %v10067_v46, %v8519_v29  ;;  %v10074_v29 = vld [vmem:[#allocation2 + $0x68c] sm:$0xf0]  ;;  %v10070_v46 = vld [vmem:[#allocation2 + $0x674] sm:$0xf] }
 0x3b2   : > { %3422 = vmatmul.bf16.gmra.mxu1 %v8484_v51  ;;  %v8512_v51 = vor.u32 %v10066_v3, %v8511_v41 }
 0x3b3   : > { %3510 = vmatmul.bf16.gmra.mxu2 %v8488_v32 }
 0x3b4   : > { %3598 = vmatmul.bf16.gmra.mxu3 %v8492_v14 }
 0x3b6   : > { %v3471_v35 = vpop.f32.mrf.mxu2  ;;  %v3297_v13 = vpop.f32.mrf.mxu0 }
 0x3b7   : > { %v3559_v21 = vpop.f32.mrf.mxu3  ;;  %v3472_v1 = vadd.f32 %v3471_v35, %v3384_v8  ;;  %v3385_v57 = vpop.f32.mrf.mxu1  ;;  %v3298_v49 = vadd.f32 %v3297_v13, %v11206_v9  ;;  %v8524_v9 = vor.u32 %v10063_v22, %v8521_v17  ;;  %v8545_v22 = vld [vmem:[#allocation2 + $0x690] sm:$0xf0]  ;;  %v8551_v17 = vld [vmem:[#allocation2 + $0x678] sm:$0xf] }
 0x3b9   : > { %v11302_v39 = vadd.f32 %v3559_v21, %v3472_v1  ;;  %v3386_v38 = vadd.f32 %v3385_v57, %v3298_v49 }
 0x3be   : > { %v3473_v45 = vpop.f32.mrf.mxu2  ;;  %v3300_v32 = vpop.f32.mrf.mxu0 }
 0x3bf   : > { %v3561_v18 = vpop.f32.mrf.mxu3  ;;  %v3474_v10 = vadd.f32 %v3473_v45, %v3386_v38  ;;  %v3388_v14 = vpop.f32.mrf.mxu1  ;;  %v3301_v8 = vadd.f32 %v3300_v32, %v11208_v47  ;;  %v10075_v45 = vld [vmem:[#allocation2 + $0x694] sm:$0xf0]  ;;  %v8544_v32 = vor.u32 %v10074_v29, %v8543_v42 }
 0x3c0   : > { %v10503_v42 = vld [vmem:[%s10681_s24 + $0xb8] sm:$0xff] }
 0x3c1   : > { %v11305_v35 = vadd.f32 %v3561_v18, %v3474_v10  ;;  %v3389_v21 = vadd.f32 %v3388_v14, %v3301_v8  ;;  %3339 = vmatmul.bf16.gmra.mxu0 %v8512_v51  ;;  %v10071_v18 = vld [vmem:[#allocation2 + $0x67c] sm:$0xf]  ;;  %v8548_v14 = vor.u32 %v10070_v46, %v8545_v22 }
 0x3c2   : > { %3427 = vmatmul.bf16.gmra.mxu1 %v8516_v44  ;;  %v8553_v51 = vld [vmem:[#allocation2 + $0x698] sm:$0xf0] }
 0x3c3   : > { %v3638_v1 = vpack.c.bf16 %v11305_v35, %v11302_v39  ;;  %3515 = vmatmul.bf16.gmra.mxu2 %v8520_v0  ;;  %v10504_v29 = vld [vmem:[%s10681_s24 + $0xf8] sm:$0xff] }
 0x3c4   : > { %3603 = vmatmul.bf16.gmra.mxu3 %v8524_v9  ;;  %v10521_v39 = vld [vmem:[%s10681_s24 + $0x38] sm:$0xff] }
 0x3c6   : > { %v3476_v13 = vpop.f32.mrf.mxu2  ;;  %v3302_v38 = vpop.f32.mrf.mxu0 }
 0x3c7   : > { %v3564_v57 = vpop.f32.mrf.mxu3  ;;  %v3477_v49 = vadd.f32 %v3476_v13, %v3389_v21  ;;  %v3390_v41 = vpop.f32.mrf.mxu1  ;;  %v3303_v3 = vadd.f32 %v3302_v38, %v11210_v6  ;;  %v8552_v21 = vor.u32 %v10075_v45, %v8551_v17  ;;  %v8556_v6 = vor.u32 %v10071_v18, %v8553_v51 }
 0x3c9   : > { %v11310_v55 = vadd.f32 %v3564_v57, %v3477_v49  ;;  %v3391_v47 = vadd.f32 %v3390_v41, %v3303_v3  ;;  %v10108_v41 = vld [vmem:[%s12611_s2 + $0x20] sm:$0xff] }
 0x3ca   : > { %v9984_v3 = vld [vmem:[%s12611_s2] sm:$0xff]  ;;  %3743 = vmatpush.bf16.msra.mxu0 %v10108_v41 }
 0x3cb   : > { %3903 = vmatpush.bf16.msra.mxu1 %v9984_v3 }
 0x3ce   : > { %v3478_v44 = vpop.f32.mrf.mxu2  ;;  %v3305_v9 = vpop.f32.mrf.mxu0  ;;  %4913 = vmatpush.bf16.msrb.mxu0 %v10503_v42 }
 0x3cf   : > { %v3566_v10 = vpop.f32.mrf.mxu3  ;;  %v3479_v0 = vadd.f32 %v3478_v44, %v3391_v47  ;;  %v3393_v8 = vpop.f32.mrf.mxu1  ;;  %v3306_v13 = vadd.f32 %v3305_v9, %v11212_v33  ;;  %5001 = vmatpush.bf16.msrb.mxu1 %v10504_v29  ;;  %v8575_v44 = vld [vmem:[#allocation2 + $0x6b0] sm:$0xf]  ;;  %v8577_v9 = vld [vmem:[#allocation2 + $0x6d0] sm:$0xf0] }
 0x3d1   : > { %v11313_v57 = vadd.f32 %v3566_v10, %v3479_v0  ;;  %v3394_v49 = vadd.f32 %v3393_v8, %v3306_v13  ;;  %3344 = vmatmul.bf16.gmra.mxu0 %v8544_v32  ;;  %v10082_v10 = vld [vmem:[#allocation2 + $0x6cc] sm:$0xf0]  ;;  %v10078_v0 = vld [vmem:[#allocation2 + $0x6b4] sm:$0xf]  ;;  %v8583_v8 = vld [vmem:[#allocation2 + $0x6b8] sm:$0xf] }
 0x3d2   : > { %3432 = vmatmul.bf16.gmra.mxu1 %v8548_v14  ;;  %v10505_v32 = vld [vmem:[%s10681_s24 + $0xb0] sm:$0xff]  ;;  %v8585_v13 = vld [vmem:[#allocation2 + $0x6d8] sm:$0xf0]  ;;  %v8580_v3 = vor.u32 %v10078_v0, %v8577_v9 }
 0x3d3   : > { %v3639_v38 = vpack.c.bf16 %v11313_v57, %v11310_v55  ;;  %3520 = vmatmul.bf16.gmra.mxu2 %v8552_v21  ;;  %4914 = vmatpush.bf16.msrb.mxu0 %v10505_v32  ;;  %v10506_v14 = vld [vmem:[%s10681_s24 + $0xf0] sm:$0xff]  ;;  %v10083_v21 = vld [vmem:[#allocation2 + $0x6d4] sm:$0xf0] }
 0x3d4   : > { %3608 = vmatmul.bf16.gmra.mxu3 %v8556_v6  ;;  %5002 = vmatpush.bf16.msrb.mxu1 %v10506_v14  ;;  %v10079_v6 = vld [vmem:[#allocation2 + $0x6bc] sm:$0xf] }
 0x3d5   : > { %v10533_v55 = vld [vmem:[%s10681_s24 + $0x18] sm:$0xff] }
 0x3d6   : > { %v3481_v33 = vpop.f32.mrf.mxu2  ;;  %v3307_v22 = vpop.f32.mrf.mxu0 }
 0x3d7   : > { %v3569_v47 = vpop.f32.mrf.mxu3  ;;  %v3482_v46 = vadd.f32 %v3481_v33, %v3394_v49  ;;  %v3395_v17 = vpop.f32.mrf.mxu1  ;;  %v3308_v45 = vadd.f32 %v3307_v22, %v11214_v12  ;;  %v8576_v12 = vor.u32 %v10082_v10, %v8575_v44  ;;  %v10507_v33 = vld [vmem:[%s10681_s24 + $0xa8] sm:$0xff]  ;;  %v8584_v22 = vor.u32 %v10083_v21, %v8583_v8  ;;  %v10509_v10 = vld [vmem:[%s10681_s24 + $0xa0] sm:$0xff] }
 0x3d8   : > { %4915 = vmatpush.bf16.msrb.mxu0 %v10507_v33  ;;  %v10090_v33 = vld [vmem:[#allocation2 + $0x70c] sm:$0xf0]  ;;  %v10516_v44 = vld [vmem:[%s10681_s24 + $0xc8] sm:$0xff] }
 0x3d9   : > { %v11326_v18 = vadd.f32 %v3569_v47, %v3482_v46  ;;  %v3396_v51 = vadd.f32 %v3395_v17, %v3308_v45  ;;  %v10508_v47 = vld [vmem:[%s10681_s24 + $0xe8] sm:$0xff]  ;;  %v8588_v17 = vor.u32 %v10079_v6, %v8585_v13  ;;  %v10511_v13 = vld [vmem:[%s10681_s24 + $0x98] sm:$0xff] }
 0x3da   : > { %5003 = vmatpush.bf16.msrb.mxu1 %v10508_v47  ;;  %v10086_v47 = vld [vmem:[#allocation2 + $0x6f4] sm:$0xf] }
 0x3dc   : > { %4916 = vmatpush.bf16.msrb.mxu0 %v10509_v10 }
 0x3de   : > { %v3483_v49 = vpop.f32.mrf.mxu2  ;;  %v3310_v29 = vpop.f32.mrf.mxu0 }
 0x3df   : > { %v3571_v41 = vpop.f32.mrf.mxu3  ;;  %v3484_v42 = vadd.f32 %v3483_v49, %v3396_v51  ;;  %v3398_v46 = vpop.f32.mrf.mxu1  ;;  %v3311_v45 = vadd.f32 %v3310_v29, %v11216_v20  ;;  %v10510_v51 = vld [vmem:[%s10681_s24 + $0xe0] sm:$0xff]  ;;  %v10512_v49 = vld [vmem:[%s10681_s24 + $0xd8] sm:$0xff] }
 0x3e0   : > { %5004 = vmatpush.bf16.msrb.mxu1 %v10510_v51  ;;  %4917 = vmatpush.bf16.msrb.mxu0 %v10511_v13  ;;  %v8615_v29 = vld [vmem:[#allocation2 + $0x6f8] sm:$0xf] }
 0x3e1   : > { %v11333_v32 = vadd.f32 %v3571_v41, %v3484_v42  ;;  %v3399_v14 = vadd.f32 %v3398_v46, %v3311_v45  ;;  %3349 = vmatmul.bf16.gmra.mxu0 %v8576_v12  ;;  %v8609_v42 = vld [vmem:[#allocation2 + $0x710] sm:$0xf0]  ;;  %v10091_v46 = vld [vmem:[#allocation2 + $0x714] sm:$0xf0] }
 0x3e2   : > { %3437 = vmatmul.bf16.gmra.mxu1 %v8580_v3  ;;  %v8607_v3 = vld [vmem:[#allocation2 + $0x6f0] sm:$0xf] }
 0x3e3   : > { %3525 = vmatmul.bf16.gmra.mxu2 %v8584_v22  ;;  %v10087_v22 = vld [vmem:[#allocation2 + $0x6fc] sm:$0xf]  ;;  %v10513_v45 = vld [vmem:[%s10681_s24 + $0x90] sm:$0xff]  ;;  %v8608_v51 = vor.u32 %v10090_v33, %v8607_v3  ;;  %v10517_v3 = vld [vmem:[%s10681_s24 + $0x80] sm:$0xff] }
 0x3e4   : > { %3613 = vmatmul.bf16.gmra.mxu3 %v8588_v17  ;;  %5005 = vmatpush.bf16.msrb.mxu1 %v10512_v49  ;;  %v8617_v17 = vld [vmem:[#allocation2 + $0x718] sm:$0xf0]  ;;  %v10515_v49 = vld [vmem:[%s10681_s24 + $0x88] sm:$0xff]  ;;  %v10518_v33 = vld [vmem:[%s10681_s24 + $0xc0] sm:$0xff] }
 0x3e5   : > { %4918 = vmatpush.bf16.msrb.mxu0 %v10513_v45 }
 0x3e6   : > { %v3486_v0 = vpop.f32.mrf.mxu2  ;;  %v3312_v20 = vpop.f32.mrf.mxu0 }
 0x3e7   : > { %v3574_v9 = vpop.f32.mrf.mxu3  ;;  %v3487_v8 = vadd.f32 %v3486_v0, %v3399_v14  ;;  %v3400_v21 = vpop.f32.mrf.mxu1  ;;  %v3313_v6 = vadd.f32 %v3312_v20, %v11218_v52  ;;  %v10514_v52 = vld [vmem:[%s10681_s24 + $0xd0] sm:$0xff]  ;;  %v8612_v0 = vor.u32 %v10086_v47, %v8609_v42 }
 0x3e8   : > { %5006 = vmatpush.bf16.msrb.mxu1 %v10514_v52 }
 0x3e9   : > { %v11342_v41 = vadd.f32 %v3574_v9, %v3487_v8  ;;  %v3401_v12 = vadd.f32 %v3400_v21, %v3313_v6  ;;  %v8616_v21 = vor.u32 %v10091_v46, %v8615_v29  ;;  %v8620_v6 = vor.u32 %v10087_v22, %v8617_v17  ;;  %4919 = vmatpush.bf16.msrb.mxu0 %v10515_v49 }
 0x3ec   : > { %5007 = vmatpush.bf16.msrb.mxu1 %v10516_v44 }
 0x3ed   : > { %4920 = vmatpush.bf16.msrb.mxu0 %v10517_v3 }
 0x3ee   : > { %v3488_v14 = vpop.f32.mrf.mxu2  ;;  %v3315_v8 = vpop.f32.mrf.mxu0 }
 0x3ef   : > { %v3576_v10 = vpop.f32.mrf.mxu3  ;;  %v3489_v9 = vadd.f32 %v3488_v14, %v3401_v12  ;;  %v3403_v20 = vpop.f32.mrf.mxu1  ;;  %v3316_v13 = vadd.f32 %v3315_v8, %v11220_v60  ;;  %v8639_v14 = vld [vmem:[#allocation2 + $0x730] sm:$0xf]  ;;  %v10099_v8 = vld [vmem:[#allocation2 + $0x754] sm:$0xf0] }
 0x3f0   : > { %5008 = vmatpush.bf16.msrb.mxu1 %v10518_v33 }
 0x3f1   : > { %v11349_v45 = vadd.f32 %v3576_v10, %v3489_v9  ;;  %v3404_v52 = vadd.f32 %v3403_v20, %v3316_v13  ;;  %3354 = vmatmul.bf16.gmra.mxu0 %v8608_v51  ;;  %v10098_v10 = vld [vmem:[#allocation2 + $0x74c] sm:$0xf0]  ;;  %v10094_v51 = vld [vmem:[#allocation2 + $0x734] sm:$0xf]  ;;  %v8647_v9 = vld [vmem:[#allocation2 + $0x738] sm:$0xf] }
 0x3f2   : > { %3442 = vmatmul.bf16.gmra.mxu1 %v8612_v0  ;;  %v8641_v0 = vld [vmem:[#allocation2 + $0x750] sm:$0xf0]  ;;  %v10095_v20 = vld [vmem:[#allocation2 + $0x73c] sm:$0xf]  ;;  %v8640_v49 = vor.u32 %v10098_v10, %v8639_v14  ;;  %v8648_v12 = vor.u32 %v10099_v8, %v8647_v9  ;;  %v8671_v8 = vld [vmem:[#allocation2 + $0x770] sm:$0xf] }
 0x3f3   : > { %3530 = vmatmul.bf16.gmra.mxu2 %v8616_v21  ;;  %v8649_v21 = vld [vmem:[#allocation2 + $0x758] sm:$0xf0]  ;;  %v8644_v3 = vor.u32 %v10094_v51, %v8641_v0 }
 0x3f4   : > { %3618 = vmatmul.bf16.gmra.mxu3 %v8620_v6 }
 0x3f6   : > { %v3491_v47 = vpop.f32.mrf.mxu2  ;;  %v3317_v29 = vpop.f32.mrf.mxu0 }
 0x3f7   : > { %v3579_v60 = vpop.f32.mrf.mxu3  ;;  %v3492_v42 = vadd.f32 %v3491_v47, %v3404_v52  ;;  %v3405_v46 = vpop.f32.mrf.mxu1  ;;  %v3318_v44 = vadd.f32 %v3317_v29, %v11222_v19  ;;  %v8652_v19 = vor.u32 %v10095_v20, %v8649_v21  ;;  %v10106_v20 = vld [vmem:[#allocation2 + $0x78c] sm:$0xf0]  ;;  %v10102_v21 = vld [vmem:[#allocation2 + $0x774] sm:$0xf] }
 0x3f9   : > { %v11356_v22 = vadd.f32 %v3579_v60, %v3492_v42  ;;  %v3406_v17 = vadd.f32 %v3405_v46, %v3318_v44 }
 0x3fe   : > { %v3493_v6 = vpop.f32.mrf.mxu2  ;;  %v3320_v33 = vpop.f32.mrf.mxu0 }
 0x3ff   : > { %v3581_v13 = vpop.f32.mrf.mxu3  ;;  %v3494_v52 = vadd.f32 %v3493_v6, %v3406_v17  ;;  %v3408_v47 = vpop.f32.mrf.mxu1  ;;  %v3321_v60 = vadd.f32 %v3320_v33, %v11224_v23  ;;  %v8673_v6 = vld [vmem:[#allocation2 + $0x790] sm:$0xf0] }
 0x401   : > { %v11359_v42 = vadd.f32 %v3581_v13, %v3494_v52  ;;  %v3409_v29 = vadd.f32 %v3408_v47, %v3321_v60  ;;  %3359 = vmatmul.bf16.gmra.mxu0 %v8640_v49  ;;  %v8679_v13 = vld [vmem:[#allocation2 + $0x778] sm:$0xf]  ;;  %v8681_v52 = vld [vmem:[#allocation2 + $0x798] sm:$0xf0]  ;;  %v8672_v47 = vor.u32 %v10106_v20, %v8671_v8 }
 0x402   : > { %3447 = vmatmul.bf16.gmra.mxu1 %v8644_v3  ;;  %v10107_v49 = vld [vmem:[#allocation2 + $0x794] sm:$0xf0]  ;;  %v10103_v3 = vld [vmem:[#allocation2 + $0x77c] sm:$0xf] }
 0x403   : > { %3535 = vmatmul.bf16.gmra.mxu2 %v8648_v12  ;;  %v8680_v46 = vor.u32 %v10107_v49, %v8679_v13  ;;  %v2305_v49 = vld [vmem:[#allocation2 + $0x7b8] sm:$0xff] }
 0x404   : > { %3623 = vmatmul.bf16.gmra.mxu3 %v8652_v19  ;;  %v8676_v19 = vor.u32 %v10102_v21, %v8673_v6  ;;  %v2304_v6 = vld [vmem:[#allocation2 + $0x7b0] sm:$0xff] }
 0x406   : > { %v3496_v44 = vpop.f32.mrf.mxu2  ;;  %v3322_v17 = vpop.f32.mrf.mxu0 }
 0x407   : > { %v3584_v14 = vpop.f32.mrf.mxu3  ;;  %v3497_v10 = vadd.f32 %v3496_v44, %v3409_v29  ;;  %v3410_v51 = vpop.f32.mrf.mxu1  ;;  %v3323_v0 = vadd.f32 %v3322_v17, %v11226_v58  ;;  %v8684_v58 = vor.u32 %v10103_v3, %v8681_v52  ;;  %v2674_v52 = vunpack.c.l.b16 %v2304_v6 }
 0x409   : > { %v11364_v9 = vadd.f32 %v3584_v14, %v3497_v10  ;;  %v3411_v23 = vadd.f32 %v3410_v51, %v3323_v0 }
 0x40e   : > { %v3498_v12 = vpop.f32.mrf.mxu2  ;;  %v3325_v29 = vpop.f32.mrf.mxu0 }
 0x40f   : > { %v3586_v33 = vpop.f32.mrf.mxu3  ;;  %v3499_v60 = vadd.f32 %v3498_v12, %v3411_v23  ;;  %v3413_v44 = vpop.f32.mrf.mxu1  ;;  %v3326_v14 = vadd.f32 %v3325_v29, %v11234_v31  ;;  %v2675_v12 = vunpack.c.h.b16 %v2304_v6 }
 0x411   : > { %v11367_v10 = vadd.f32 %v3586_v33, %v3499_v60  ;;  %v3414_v17 = vadd.f32 %v3413_v44, %v3326_v14  ;;  %3364 = vmatmul.bf16.gmra.mxu0 %v8672_v47  ;;  %v2676_v33 = vunpack.c.l.b16 %v2305_v49  ;;  %v2677_v47 = vunpack.c.h.b16 %v2305_v49 }
 0x412   : > { %3452 = vmatmul.bf16.gmra.mxu1 %v8676_v19  ;;  %v2803_v29 = vpack.c.b16 %v2675_v12, %v2675_v12  ;;  %v8759_v12 = vld [vmem:[#allocation2 + $0x7c0] sm:$0xf] }
 0x413   : > { %3540 = vmatmul.bf16.gmra.mxu2 %v8680_v46  ;;  %v2802_v46 = vpack.c.b16 %v2674_v52, %v2674_v52 }
 0x414   : > { %3628 = vmatmul.bf16.gmra.mxu3 %v8684_v58 }
 0x416   : > { %v3501_v0 = vpop.f32.mrf.mxu2  ;;  %v3327_v23 = vpop.f32.mrf.mxu0 }
 0x417   : > { %v3589_v8 = vpop.f32.mrf.mxu3  ;;  %v3502_v20 = vadd.f32 %v3501_v0, %v3414_v17  ;;  %v3415_v21 = vpop.f32.mrf.mxu1  ;;  %v3328_v13 = vadd.f32 %v3327_v23, %v11236_v56  ;;  %v2804_v17 = vpack.c.b16 %v2676_v33, %v2676_v33  ;;  %v2805_v0 = vpack.c.b16 %v2677_v47, %v2677_v47  ;;  %v10116_v33 = vld [vmem:[#allocation2 + $0x7dc] sm:$0xf0]  ;;  %v8761_v47 = vld [vmem:[#allocation2 + $0x7e0] sm:$0xf0] }
 0x419   : > { %v11372_v31 = vadd.f32 %v3589_v8, %v3502_v20  ;;  %v3416_v3 = vadd.f32 %v3415_v21, %v3328_v13 }
 0x41e   : > { %v3503_v19 = vpop.f32.mrf.mxu2  ;;  %v3330_v58 = vpop.f32.mrf.mxu0 }
 0x41f   : > { %v3591_v60 = vpop.f32.mrf.mxu3  ;;  %v3504_v44 = vadd.f32 %v3503_v19, %v3416_v3  ;;  %v3418_v14 = vpop.f32.mrf.mxu1  ;;  %v3331_v51 = vadd.f32 %v3330_v58, %v11238_v28  ;;  %v8760_v58 = vor.u32 %v10116_v33, %v8759_v12  ;;  %v10524_v12 = vld [vmem:[%s10681_s24 + $0x30] sm:$0xff] }
 0x421   : > { %v11375_v56 = vadd.f32 %v3591_v60, %v3504_v44  ;;  %v3419_v8 = vadd.f32 %v3418_v14, %v3331_v51  ;;  %3369 = vmatmul.bf16.gmra.mxu0 %v2802_v46  ;;  %v10112_v51 = vld [vmem:[#allocation2 + $0x7c4] sm:$0xf] }
 0x422   : > { %3457 = vmatmul.bf16.gmra.mxu1 %v2803_v29  ;;  %v8764_v14 = vor.u32 %v10112_v51, %v8761_v47  ;;  %v8791_v51 = vld [vmem:[#allocation2 + $0x800] sm:$0xf] }
 0x423   : > { %v3644_v20 = vpack.c.bf16 %v11375_v56, %v11372_v31  ;;  %3545 = vmatmul.bf16.gmra.mxu2 %v2804_v17  ;;  %v10124_v47 = vld [vmem:[#allocation2 + $0x81c] sm:$0xf0] }
 0x424   : > { %3633 = vmatmul.bf16.gmra.mxu3 %v2805_v0 }
 0x426   : > { %v3506_v23 = vpop.f32.mrf.mxu2  ;;  %v3332_v13 = vpop.f32.mrf.mxu0 }
 0x427   : > { %v3594_v21 = vpop.f32.mrf.mxu3  ;;  %v3507_v6 = vadd.f32 %v3506_v23, %v3419_v8  ;;  %v3420_v49 = vpop.f32.mrf.mxu1  ;;  %v3333_v3 = vadd.f32 %v3332_v13, %v11240_v36  ;;  %v12706_v8 = vpack.c.bf16 %v11070_v59, %v11067_v24 }
 0x429   : > { %v11380_v52 = vadd.f32 %v3594_v21, %v3507_v6  ;;  %v3421_v28 = vadd.f32 %v3420_v49, %v3333_v3  ;;  %v10520_v21 = vld [vmem:[%s10681_s24 + $0x1f8] sm:$0xff]  ;;  %v10522_v49 = vld [vmem:[%s10681_s24 + $0x1b0] sm:$0xff] }
 0x42a   : > { %v10523_v3 = vld [vmem:[%s10681_s24 + $0x1f0] sm:$0xff] }
 0x42e   : > { %v3508_v19 = vpop.f32.mrf.mxu2  ;;  %v3335_v29 = vpop.f32.mrf.mxu0 }
 0x42f   : > { %v3596_v60 = vpop.f32.mrf.mxu3  ;;  %v3509_v46 = vadd.f32 %v3508_v19, %v3421_v28  ;;  %v3423_v44 = vpop.f32.mrf.mxu1  ;;  %v3336_v36 = vadd.f32 %v3335_v29, %v11246_v4  ;;  %v10519_v4 = vld [vmem:[%s10681_s24 + $0x1b8] sm:$0xff]  ;;  %v10120_v19 = vld [vmem:[#allocation2 + $0x804] sm:$0xf]  ;;  %v10526_v29 = vld [vmem:[%s10681_s24 + $0x1e8] sm:$0xff] }
 0x431   : > { %v11383_v17 = vadd.f32 %v3596_v60, %v3509_v46  ;;  %v3424_v0 = vadd.f32 %v3423_v44, %v3336_v36  ;;  %8709 = vmatmul.msk.bf16.vlgmr.msra.gmra.mxu0 %vm3687_vm0, %v3638_v1  ;;  %v8793_v60 = vld [vmem:[#allocation2 + $0x820] sm:$0xf0]  ;;  %v10525_v46 = vld [vmem:[%s10681_s24 + $0x1a8] sm:$0xff] }
 0x432   : > { %8741 = vmatmul.msk.bf16.vlgmr.msra.gmra.mxu1 %vm3687_vm0, %v12706_v8  ;;  %5265 = vmatpush.bf16.msra.mxu0 %v10519_v4  ;;  %v8792_v8 = vor.u32 %v10124_v47, %v8791_v51  ;;  %v8796_v4 = vor.u32 %v10120_v19, %v8793_v60  ;;  %v10535_v51 = vld [vmem:[%s10681_s24 + $0x1d0] sm:$0xff] }
 0x433   : > { %v3645_v23 = vpack.c.bf16 %v11383_v17, %v11380_v52  ;;  %4745 = vmatmul.bf16.vlgmr.msra.gmra.mxu2 %v8760_v58  ;;  %5353 = vmatpush.bf16.msra.mxu1 %v10520_v21  ;;  %v10536_v19 = vld [vmem:[%s10681_s24 + $0x10] sm:$0xff]  ;;  %v9015_v52 = vld [vmem:[#allocation2 + $0x9c0] sm:$0xf] }
 0x434   : > { %4833 = vmatmul.bf16.vlgmr.msra.gmra.mxu3 %v8764_v14  ;;  %v10180_v17 = vld [vmem:[#allocation2 + $0x9dc] sm:$0xf0] }
 0x435   : > { %6410 = vmatpush.bf16.msra.mxu3 %v10521_v39  ;;  %v10528_v39 = vld [vmem:[%s10681_s24 + $0x1a0] sm:$0xff] }
 0x436   : > { %v3511_v35 = vpop.f32.mrf.mxu2  ;;  %v3337_v24 = vpop.f32.mrf.mxu0  ;;  %5266 = vmatpush.bf16.msra.mxu0 %v10522_v49  ;;  %v10532_v49 = vld [vmem:[%s10681_s24 + $0x1d8] sm:$0xff] }
 0x437   : > { %v3599_v1 = vpop.f32.mrf.mxu3  ;;  %v3512_v6 = vadd.f32 %v3511_v35, %v3424_v0  ;;  %v3425_v59 = vpop.f32.mrf.mxu1  ;;  %v3338_v13 = vadd.f32 %v3337_v24, %v11252_v48  ;;  %5354 = vmatpush.bf16.msra.mxu1 %v10523_v3  ;;  %v10527_v48 = vld [vmem:[%s10681_s24 + $0x28] sm:$0xff]  ;;  %v10529_v35 = vld [vmem:[%s10681_s24 + $0x1e0] sm:$0xff] }
 0x439   : > { %v11401_v28 = vadd.f32 %v3599_v1, %v3512_v6  ;;  %6411 = vmatpush.bf16.msra.mxu3 %v10524_v12  ;;  %v3426_v33 = vadd.f32 %v3425_v59, %v3338_v13  ;;  %v10530_v6 = vld [vmem:[%s10681_s24 + $0x20] sm:$0xff]  ;;  %v12707_v59 = vpack.c.bf16 %v11078_v30, %v11075_v11  ;;  %v10531_v13 = vld [vmem:[%s10681_s24 + $0x198] sm:$0xff] }
 0x43a   : > { %5267 = vmatpush.bf16.msra.mxu0 %v10525_v46  ;;  %v8823_v46 = vld [vmem:[#allocation2 + $0x840] sm:$0xf] }
 0x43b   : > { %5355 = vmatpush.bf16.msra.mxu1 %v10526_v29  ;;  %v10132_v29 = vld [vmem:[#allocation2 + $0x85c] sm:$0xf0] }
 0x43d   : > { %6412 = vmatpush.bf16.msra.mxu3 %v10527_v48  ;;  %v10128_v48 = vld [vmem:[#allocation2 + $0x844] sm:$0xf] }
 0x43e   : > { %v3513_v44 = vpop.f32.mrf.mxu2  ;;  %v3340_v36 = vpop.f32.mrf.mxu0  ;;  %5268 = vmatpush.bf16.msra.mxu0 %v10528_v39  ;;  %v8824_v39 = vor.u32 %v10132_v29, %v8823_v46 }
 0x43f   : > { %v3601_v58 = vpop.f32.mrf.mxu3  ;;  %v3514_v14 = vadd.f32 %v3513_v44, %v3426_v33  ;;  %v3428_v0 = vpop.f32.mrf.mxu1  ;;  %v3341_v21 = vadd.f32 %v3340_v36, %v11258_v5  ;;  %5356 = vmatpush.bf16.msra.mxu1 %v10529_v35  ;;  %v10534_v33 = vld [vmem:[%s10681_s24 + $0x190] sm:$0xff]  ;;  %v8825_v44 = vld [vmem:[#allocation2 + $0x860] sm:$0xf0] }
 0x440   : > { %v8828_v35 = vor.u32 %v10128_v48, %v8825_v44 }
 0x441   : > { %v11410_v1 = vadd.f32 %v3601_v58, %v3514_v14  ;;  %6413 = vmatpush.bf16.msra.mxu3 %v10530_v6  ;;  %v3429_v24 = vadd.f32 %v3428_v0, %v3341_v21  ;;  %8710 = vmatmul.msk.bf16.gmra.mxu0 %vm3687_vm0, %v3639_v38  ;;  %v10537_v58 = vld [vmem:[%s10681_s24 + $0x188] sm:$0xff] }
 0x442   : > { %8742 = vmatmul.msk.bf16.gmra.mxu1 %vm3687_vm0, %v12707_v59  ;;  %5269 = vmatpush.bf16.msra.mxu0 %v10531_v13  ;;  %v10538_v14 = vld [vmem:[%s10681_s24 + $0x1c8] sm:$0xff]  ;;  %v10541_v59 = vld [vmem:[%s10681_s24 + $0x1c0] sm:$0xff] }
 0x443   : > { %v3646_v5 = vpack.c.bf16 %v11410_v1, %v11401_v28  ;;  %4750 = vmatmul.bf16.gmra.mxu2 %v8792_v8  ;;  %5357 = vmatpush.bf16.msra.mxu1 %v10532_v49  ;;  %v10542_v49 = vld [vmem:[%s10681_s24] sm:$0xff] }
 0x444   : > { %4838 = vmatmul.bf16.gmra.mxu3 %v8796_v4  ;;  %v10184_v28 = vld [vmem:[#allocation2 + $0xa04] sm:$0xf] }
 0x445   : > { %6414 = vmatpush.bf16.msra.mxu3 %v10533_v55  ;;  %v9049_v1 = vld [vmem:[#allocation2 + $0xa20] sm:$0xf0] }
 0x446   : > { %v3516_v57 = vpop.f32.mrf.mxu2  ;;  %v3342_v11 = vpop.f32.mrf.mxu0  ;;  %5270 = vmatpush.bf16.msra.mxu0 %v10534_v33 }
 0x447   : > { %v3604_v38 = vpop.f32.mrf.mxu3  ;;  %v3517_v3 = vadd.f32 %v3516_v57, %v3429_v24  ;;  %v3430_v30 = vpop.f32.mrf.mxu1  ;;  %v3343_v12 = vadd.f32 %v3342_v11, %v11264_v61  ;;  %5358 = vmatpush.bf16.msra.mxu1 %v10535_v51  ;;  %v10539_v61 = vld [vmem:[%s10681_s24 + $0x8] sm:$0xff]  ;;  %v10540_v24 = vld [vmem:[%s10681_s24 + $0x180] sm:$0xff]  ;;  %v12708_v57 = vpack.c.bf16 %v11333_v32, %v11326_v18 }
 0x449   : > { %v11429_v47 = vadd.f32 %v3604_v38, %v3517_v3  ;;  %6415 = vmatpush.bf16.msra.mxu3 %v10536_v19  ;;  %v3431_v60 = vadd.f32 %v3430_v30, %v3343_v12  ;;  %v12709_v38 = vpack.c.bf16 %v11086_v54, %v11083_v50  ;;  %v8855_v19 = vld [vmem:[#allocation2 + $0x880] sm:$0xf]  ;;  %v10136_v50 = vld [vmem:[#allocation2 + $0x884] sm:$0xf] }
 0x44a   : > { %5271 = vmatpush.bf16.msra.mxu0 %v10537_v58  ;;  %v8857_v54 = vld [vmem:[#allocation2 + $0x8a0] sm:$0xf0] }
 0x44b   : > { %5359 = vmatpush.bf16.msra.mxu1 %v10538_v14 }
 0x44d   : > { %6416 = vmatpush.bf16.msra.mxu3 %v10539_v61  ;;  %v8860_v61 = vor.u32 %v10136_v50, %v8857_v54 }
 0x44e   : > { %v3518_v36 = vpop.f32.mrf.mxu2  ;;  %v3345_v4 = vpop.f32.mrf.mxu0  ;;  %5272 = vmatpush.bf16.msra.mxu0 %v10540_v24 }
 0x44f   : > { %v3606_v0 = vpop.f32.mrf.mxu3  ;;  %v3519_v8 = vadd.f32 %v3518_v36, %v3431_v60  ;;  %v3433_v21 = vpop.f32.mrf.mxu1  ;;  %v3346_v6 = vadd.f32 %v3345_v4, %v11272_v26  ;;  %5360 = vmatpush.bf16.msra.mxu1 %v10541_v59  ;;  %v10140_v60 = vld [vmem:[#allocation2 + $0x89c] sm:$0xf0]  ;;  %v12711_v4 = vpack.c.bf16 %v11094_v43, %v11091_v40  ;;  %v10144_v40 = vld [vmem:[#allocation2 + $0x8c4] sm:$0xf] }
 0x450   : > { %v8856_v14 = vor.u32 %v10140_v60, %v8855_v19  ;;  %v8889_v43 = vld [vmem:[#allocation2 + $0x8e0] sm:$0xf0]  ;;  %v12713_v60 = vpack.c.bf16 %v11102_v15, %v11099_v27 }
 0x451   : > { %v11438_v13 = vadd.f32 %v3606_v0, %v3519_v8  ;;  %6417 = vmatpush.bf16.msra.mxu3 %v10542_v49  ;;  %v3434_v55 = vadd.f32 %v3433_v21, %v3346_v6  ;;  %8711 = vmatmul.msk.bf16.gmra.mxu0 %vm3687_vm0, %v12708_v57  ;;  %v8887_v49 = vld [vmem:[#allocation2 + $0x8c0] sm:$0xf]  ;;  %v10152_v27 = vld [vmem:[#allocation2 + $0x904] sm:$0xf] }
 0x452   : > { %8743 = vmatmul.msk.bf16.gmra.mxu1 %vm3687_vm0, %v12709_v38  ;;  %v8921_v15 = vld [vmem:[#allocation2 + $0x920] sm:$0xf0] }
 0x453   : > { %v3647_v26 = vpack.c.bf16 %v11438_v13, %v11429_v47  ;;  %4755 = vmatmul.bf16.gmra.mxu2 %v8824_v39  ;;  %v10192_v47 = vld [vmem:[#allocation2 + $0xa44] sm:$0xf] }
 0x454   : > { %4843 = vmatmul.bf16.gmra.mxu3 %v8828_v35  ;;  %v9081_v13 = vld [vmem:[#allocation2 + $0xa60] sm:$0xf0] }
 0x456   : > { %v3521_v3 = vpop.f32.mrf.mxu2  ;;  %v3347_v12 = vpop.f32.mrf.mxu0 }
 0x457   : > { %v3609_v11 = vpop.f32.mrf.mxu3  ;;  %v3522_v30 = vadd.f32 %v3521_v3, %v3434_v55  ;;  %v3435_v33 = vpop.f32.mrf.mxu1  ;;  %v3348_v51 = vadd.f32 %v3347_v12, %v11274_v2  ;;  %v12710_v2 = vpack.c.bf16 %v11349_v45, %v11342_v41  ;;  %v10148_v55 = vld [vmem:[#allocation2 + $0x8dc] sm:$0xf0] }
 0x458   : > { %v8888_v12 = vor.u32 %v10148_v55, %v8887_v49 }
 0x459   : > { %v11452_v18 = vadd.f32 %v3609_v11, %v3522_v30  ;;  %v3436_v32 = vadd.f32 %v3435_v33, %v3348_v51  ;;  %v8892_v33 = vor.u32 %v10144_v40, %v8889_v43 }
 0x45e   : > { %v3523_v46 = vpop.f32.mrf.mxu2  ;;  %v3350_v44 = vpop.f32.mrf.mxu0 }
 0x45f   : > { %v3611_v29 = vpop.f32.mrf.mxu3  ;;  %v3524_v48 = vadd.f32 %v3523_v46, %v3436_v32  ;;  %v3438_v58 = vpop.f32.mrf.mxu1  ;;  %v3351_v36 = vadd.f32 %v3350_v44, %v11276_v25 }
 0x461   : > { %v11455_v0 = vadd.f32 %v3611_v29, %v3524_v48  ;;  %v3439_v8 = vadd.f32 %v3438_v58, %v3351_v36  ;;  %8712 = vmatmul.msk.bf16.gmra.mxu0 %vm3687_vm0, %v12710_v2  ;;  %v8919_v58 = vld [vmem:[#allocation2 + $0x900] sm:$0xf] }
 0x462   : > { %8744 = vmatmul.msk.bf16.gmra.mxu1 %vm3687_vm0, %v12711_v4 }
 0x463   : > { %v3648_v21 = vpack.c.bf16 %v11455_v0, %v11452_v18  ;;  %4760 = vmatmul.bf16.gmra.mxu2 %v8856_v14  ;;  %v10156_v14 = vld [vmem:[#allocation2 + $0x91c] sm:$0xf0]  ;;  %v10200_v18 = vld [vmem:[#allocation2 + $0xa84] sm:$0xf] }
 0x464   : > { %4848 = vmatmul.bf16.gmra.mxu3 %v8860_v61  ;;  %v9113_v0 = vld [vmem:[#allocation2 + $0xaa0] sm:$0xf0] }
 0x466   : > { %v3526_v39 = vpop.f32.mrf.mxu2  ;;  %v3352_v6 = vpop.f32.mrf.mxu0 }
 0x467   : > { %v3614_v25 = vpop.f32.mrf.mxu3  ;;  %v3527_v35 = vadd.f32 %v3526_v39, %v3439_v8  ;;  %v3440_v24 = vpop.f32.mrf.mxu1  ;;  %v3353_v59 = vadd.f32 %v3352_v6, %v11278_v16  ;;  %v12712_v16 = vpack.c.bf16 %v11359_v42, %v11356_v22  ;;  %v8920_v39 = vor.u32 %v10156_v14, %v8919_v58  ;;  %v12720_v58 = vld [vmem:[#allocation14_spill] sm:$0xff] }
 0x469   : > { %v11468_v41 = vadd.f32 %v3614_v25, %v3527_v35  ;;  %v3441_v45 = vadd.f32 %v3440_v24, %v3353_v59  ;;  %v8924_v25 = vor.u32 %v10152_v27, %v8921_v15  ;;  %v12715_v59 = vld [vmem:[#allocation13_spill] sm:$0xff] }
 0x46e   : > { %v3528_v57 = vpop.f32.mrf.mxu2  ;;  %v3355_v11 = vpop.f32.mrf.mxu0 }
 0x46f   : > { %v3616_v38 = vpop.f32.mrf.mxu3  ;;  %v3529_v3 = vadd.f32 %v3528_v57, %v3441_v45  ;;  %v3443_v30 = vpop.f32.mrf.mxu1  ;;  %v3356_v51 = vadd.f32 %v3355_v11, %v11280_v63  ;;  %v12716_v45 = vpack.c.bf16 %v11110_v62, %v12715_v59  ;;  %v8951_v11 = vld [vmem:[#allocation2 + $0x940] sm:$0xf]  ;;  %v10160_v62 = vld [vmem:[#allocation2 + $0x944] sm:$0xf] }
 0x471   : > { %v11471_v32 = vadd.f32 %v3616_v38, %v3529_v3  ;;  %v3444_v19 = vadd.f32 %v3443_v30, %v3356_v51  ;;  %8713 = vmatmul.msk.bf16.gmra.mxu0 %vm3687_vm0, %v12712_v16  ;;  %v12717_v38 = vld [vmem:[#allocation25_spill] sm:$0xff] }
 0x472   : > { %8745 = vmatmul.msk.bf16.gmra.mxu1 %vm3687_vm0, %v12713_v60  ;;  %v10164_v30 = vld [vmem:[#allocation2 + $0x95c] sm:$0xf0] }
 0x473   : > { %v3649_v50 = vpack.c.bf16 %v11471_v32, %v11468_v41  ;;  %4765 = vmatmul.bf16.gmra.mxu2 %v8888_v12  ;;  %v8953_v12 = vld [vmem:[#allocation2 + $0x960] sm:$0xf0] }
 0x474   : > { %4853 = vmatmul.bf16.gmra.mxu3 %v8892_v33  ;;  %v10208_v41 = vld [vmem:[#allocation2 + $0xac4] sm:$0xf] }
 0x475   : > { %v9145_v32 = vld [vmem:[#allocation2 + $0xae0] sm:$0xf0] }
 0x476   : > { %v3531_v54 = vpop.f32.mrf.mxu2  ;;  %v3357_v29 = vpop.f32.mrf.mxu0 }
 0x477   : > { %v3619_v63 = vpop.f32.mrf.mxu3  ;;  %v3532_v46 = vadd.f32 %v3531_v54, %v3444_v19  ;;  %v3445_v48 = vpop.f32.mrf.mxu1  ;;  %v3358_v44 = vadd.f32 %v3357_v29, %v11282_v7  ;;  %v12714_v7 = vpack.c.bf16 %v11367_v10, %v11364_v9  ;;  %v8952_v54 = vor.u32 %v10164_v30, %v8951_v11 }
 0x479   : > { %v11484_v22 = vadd.f32 %v3619_v63, %v3532_v46  ;;  %v3446_v42 = vadd.f32 %v3445_v48, %v3358_v44  ;;  %v8956_v63 = vor.u32 %v10160_v62, %v8953_v12  ;;  %v12718_v46 = vld [vmem:[#allocation26_spill] sm:$0xff] }
 0x47e   : > { %v3533_v61 = vpop.f32.mrf.mxu2  ;;  %v3360_v2 = vpop.f32.mrf.mxu0 }
 0x47f   : > { %v3621_v36 = vpop.f32.mrf.mxu3  ;;  %v3534_v8 = vadd.f32 %v3533_v61, %v3446_v42  ;;  %v3448_v4 = vpop.f32.mrf.mxu1  ;;  %v3361_v35 = vadd.f32 %v3360_v2, %v11284_v53  ;;  %v12719_v42 = vld [vmem:[#allocation5_spill] sm:$0xff] }
 0x480   : > { %v12721_v14 = vpack.c.bf16 %v12719_v42, %v12720_v58  ;;  %v12725_v42 = vld [vmem:[#allocation7_spill] sm:$0xff]  ;;  %v12726_v58 = vld [vmem:[#allocation22_spill] sm:$0xff] }
 0x481   : > { %v11487_v6 = vadd.f32 %v3621_v36, %v3534_v8  ;;  %v3449_v24 = vadd.f32 %v3448_v4, %v3361_v35  ;;  %8714 = vmatmul.msk.bf16.gmra.mxu0 %vm3687_vm0, %v12714_v7  ;;  %v8985_v35 = vld [vmem:[#allocation2 + $0x9a0] sm:$0xf0] }
 0x482   : > { %8746 = vmatmul.msk.bf16.gmra.mxu1 %vm3687_vm0, %v12716_v45 }
 0x483   : > { %v3650_v49 = vpack.c.bf16 %v11487_v6, %v11484_v22  ;;  %4770 = vmatmul.bf16.gmra.mxu2 %v8920_v39  ;;  %v10172_v39 = vld [vmem:[#allocation2 + $0x99c] sm:$0xf0]  ;;  %v10216_v22 = vld [vmem:[#allocation2 + $0xb04] sm:$0xf] }
 0x484   : > { %4858 = vmatmul.bf16.gmra.mxu3 %v8924_v25  ;;  %v10168_v25 = vld [vmem:[#allocation2 + $0x984] sm:$0xf] }
 0x485   : > { %v9177_v6 = vld [vmem:[#allocation2 + $0xb20] sm:$0xf0] }
 0x486   : > { %v3536_v55 = vpop.f32.mrf.mxu2  ;;  %v3362_v43 = vpop.f32.mrf.mxu0 }
 0x487   : > { %v3624_v53 = vpop.f32.mrf.mxu3  ;;  %v3537_v40 = vadd.f32 %v3536_v55, %v3449_v24  ;;  %v3450_v57 = vpop.f32.mrf.mxu1  ;;  %v3363_v3 = vadd.f32 %v3362_v43, %v12717_v38 }
 0x489   : > { %v11500_v9 = vadd.f32 %v3624_v53, %v3537_v40  ;;  %v3451_v10 = vadd.f32 %v3450_v57, %v3363_v3  ;;  %v8988_v40 = vor.u32 %v10168_v25, %v8985_v35  ;;  %v12723_v3 = vld [vmem:[#allocation6_spill] sm:$0xff] }
 0x48e   : > { %v3538_v33 = vpop.f32.mrf.mxu2  ;;  %v3365_v16 = vpop.f32.mrf.mxu0 }
 0x48f   : > { %v3626_v51 = vpop.f32.mrf.mxu3  ;;  %v3539_v19 = vadd.f32 %v3538_v33, %v3451_v10  ;;  %v3453_v60 = vpop.f32.mrf.mxu1  ;;  %v3366_v29 = vadd.f32 %v3365_v16, %v12718_v46  ;;  %v9016_v46 = vor.u32 %v10180_v17, %v9015_v52 }
 0x491   : > { %v11503_v48 = vadd.f32 %v3626_v51, %v3539_v19  ;;  %v3454_v44 = vadd.f32 %v3453_v60, %v3366_v29  ;;  %8715 = vmatmul.msk.bf16.gmra.mxu0 %vm3687_vm0, %v3644_v20  ;;  %v8983_v20 = vld [vmem:[#allocation2 + $0x980] sm:$0xf]  ;;  %v9017_v19 = vld [vmem:[#allocation2 + $0x9e0] sm:$0xf0] }
 0x492   : > { %8747 = vmatmul.msk.bf16.gmra.mxu1 %vm3687_vm0, %v12721_v14  ;;  %v8984_v53 = vor.u32 %v10172_v39, %v8983_v20  ;;  %v12727_v14 = vpack.c.bf16 %v12725_v42, %v12726_v58  ;;  %v10188_v20 = vld [vmem:[#allocation2 + $0xa1c] sm:$0xf0] }
 0x493   : > { %v3651_v27 = vpack.c.bf16 %v11503_v48, %v11500_v9  ;;  %4775 = vmatmul.bf16.gmra.mxu2 %v8952_v54  ;;  %v10224_v9 = vld [vmem:[#allocation2 + $0xb44] sm:$0xf] }
 0x494   : > { %4863 = vmatmul.bf16.gmra.mxu3 %v8956_v63  ;;  %v9209_v48 = vld [vmem:[#allocation2 + $0xb60] sm:$0xf0] }
 0x496   : > { %v3541_v15 = vpop.f32.mrf.mxu2  ;;  %v3367_v8 = vpop.f32.mrf.mxu0 }
 0x497   : > { %v3629_v61 = vpop.f32.mrf.mxu3  ;;  %v3542_v36 = vadd.f32 %v3541_v15, %v3454_v44  ;;  %v3455_v2 = vpop.f32.mrf.mxu1  ;;  %v3368_v4 = vadd.f32 %v3367_v8, %v11296_v37  ;;  %v12722_v37 = vld [vmem:[#allocation21_spill] sm:$0xff] }
 0x498   : > { %v12724_v10 = vpack.c.bf16 %v12722_v37, %v12723_v3 }
 0x499   : > { %v11516_v31 = vadd.f32 %v3629_v61, %v3542_v36  ;;  %v3456_v56 = vadd.f32 %v3455_v2, %v3368_v4 }
 0x49e   : > { %v3543_v24 = vpop.f32.mrf.mxu2  ;;  %v3370_v45 = vpop.f32.mrf.mxu0 }
 0x49f   : > { %v3631_v7 = vpop.f32.mrf.mxu3  ;;  %v3544_v59 = vadd.f32 %v3543_v24, %v3456_v56  ;;  %v3458_v55 = vpop.f32.mrf.mxu1  ;;  %v3371_v43 = vadd.f32 %v3370_v45, %v11298_v34  ;;  %v9047_v56 = vld [vmem:[#allocation2 + $0xa00] sm:$0xf] }
 0x4a1   : > { %v11519_v57 = vadd.f32 %v3631_v7, %v3544_v59  ;;  %v3459_v38 = vadd.f32 %v3458_v55, %v3371_v43  ;;  %8716 = vmatmul.msk.bf16.gmra.mxu0 %vm3687_vm0, %v3645_v23  ;;  %v10176_v23 = vld [vmem:[#allocation2 + $0x9c4] sm:$0xf]  ;;  %v9048_v7 = vor.u32 %v10188_v20, %v9047_v56  ;;  %v9052_v59 = vor.u32 %v10184_v28, %v9049_v1 }
 0x4a2   : > { %8748 = vmatmul.msk.bf16.gmra.mxu1 %vm3687_vm0, %v12724_v10  ;;  %v9020_v29 = vor.u32 %v10176_v23, %v9017_v19  ;;  %v12728_v55 = vld [vmem:[#allocation9_spill] sm:$0xff]  ;;  %v9084_v19 = vor.u32 %v10192_v47, %v9081_v13 }
 0x4a3   : > { %v3652_v11 = vpack.c.bf16 %v11519_v57, %v11516_v31  ;;  %4780 = vmatmul.bf16.gmra.mxu2 %v8984_v53  ;;  %v12729_v53 = vld [vmem:[#allocation8_spill] sm:$0xff] }
 0x4a4   : > { %4868 = vmatmul.bf16.gmra.mxu3 %v8988_v40  ;;  %v12730_v40 = vpack.c.bf16 %v12728_v55, %v12729_v53 }
 0x4a6   : > { %v3546_v30 = vpop.f32.mrf.mxu2  ;;  %v3372_v12 = vpop.f32.mrf.mxu0 }
 0x4a7   : > { %v3634_v34 = vpop.f32.mrf.mxu3  ;;  %v3547_v62 = vadd.f32 %v3546_v30, %v3459_v38  ;;  %v3460_v33 = vpop.f32.mrf.mxu1 }
 0x4a9   : > { %v11531_v51 = vadd.f32 %v3634_v34, %v3547_v62  ;;  %v9079_v34 = vld [vmem:[#allocation2 + $0xa40] sm:$0xf] }
 0x4aa   : > { %v10196_v62 = vld [vmem:[#allocation2 + $0xa5c] sm:$0xf0] }
 0x4ab   : > { %v9080_v23 = vor.u32 %v10196_v62, %v9079_v34 }
 0x4ae   : > { %v3548_v16 = vpop.f32.mrf.mxu2  ;;  %v3745_v54 = vpop.f32.mrf.mxu0 }
 0x4af   : > { %v3636_v60 = vpop.f32.mrf.mxu3  ;;  %v3905_v63 = vpop.f32.mrf.mxu1 }
 0x4b0   : > { %v11533_v44 = vadd.f32 %v3905_v63, %v3745_v54  ;;  %v12733_v60 = vld [vmem:[#allocation17_spill] sm:$0xff]  ;;  %v12734_v54 = vld [vmem:[#allocation10_spill] sm:$0xff] }
 0x4b1   : > { %8717 = vmatmul.msk.bf16.gmra.mxu0 %vm3687_vm0, %v3646_v5  ;;  %v12735_v63 = vpack.c.bf16 %v12733_v60, %v12734_v54 }
 0x4b2   : > { %8749 = vmatmul.msk.bf16.gmra.mxu1 %vm3687_vm0, %v12727_v14 }
 0x4b3   : > { %4785 = vmatmul.bf16.gmra.mxu2 %v9016_v46 }
 0x4b4   : > { %4873 = vmatmul.bf16.gmra.mxu3 %v9020_v29 }
 0x4b6   : > { %v4746_v15 = vpop.f32.mrf.mxu2  ;;  %v3747_v36 = vpop.f32.mrf.mxu0 }
 0x4b7   : > { %v4834_v61 = vpop.f32.mrf.mxu3  ;;  %v3907_v8 = vpop.f32.mrf.mxu1 }
 0x4b8   : > { %v11543_v2 = vadd.f32 %v4834_v61, %v4746_v15  ;;  %v11545_v4 = vadd.f32 %v3907_v8, %v3747_v36  ;;  %v9111_v61 = vld [vmem:[#allocation2 + $0xa80] sm:$0xf] }
 0x4b9   : > { %v10204_v36 = vld [vmem:[#allocation2 + $0xa9c] sm:$0xf0] }
 0x4ba   : > { %v9112_v1 = vor.u32 %v10204_v36, %v9111_v61  ;;  %v10220_v61 = vld [vmem:[#allocation2 + $0xb1c] sm:$0xf0] }
 0x4be   : > { %v4748_v5 = vpop.f32.mrf.mxu2  ;;  %v3750_v25 = vpop.f32.mrf.mxu0 }
 0x4bf   : > { %v4836_v39 = vpop.f32.mrf.mxu3  ;;  %v3910_v35 = vpop.f32.mrf.mxu1 }
 0x4c0   : > { %v11547_v24 = vadd.f32 %v4836_v39, %v4748_v5  ;;  %v11549_v45 = vadd.f32 %v3910_v35, %v3750_v25  ;;  %v9116_v5 = vor.u32 %v10200_v18, %v9113_v0  ;;  %v12738_v25 = vld [vmem:[#allocation11_spill] sm:$0xff]  ;;  %v12739_v35 = vld [vmem:[#allocation18_spill] sm:$0xff] }
 0x4c1   : > { %8718 = vmatmul.msk.bf16.gmra.mxu0 %vm3687_vm0, %v3647_v26 }
 0x4c2   : > { %8750 = vmatmul.msk.bf16.gmra.mxu1 %vm3687_vm0, %v12730_v40 }
 0x4c3   : > { %4790 = vmatmul.bf16.gmra.mxu2 %v9048_v7  ;;  %v12740_v7 = vpack.c.bf16 %v12738_v25, %v12739_v35 }
 0x4c4   : > { %4878 = vmatmul.bf16.gmra.mxu3 %v9052_v59 }
 0x4c6   : > { %v4751_v43 = vpop.f32.mrf.mxu2  ;;  %v3752_v37 = vpop.f32.mrf.mxu0 }
 0x4c7   : > { %v4839_v38 = vpop.f32.mrf.mxu3  ;;  %v3912_v3 = vpop.f32.mrf.mxu1 }
 0x4c8   : > { %v11559_v10 = vadd.f32 %v4839_v38, %v4751_v43  ;;  %v11561_v30 = vadd.f32 %v3912_v3, %v3752_v37  ;;  %v9143_v37 = vld [vmem:[#allocation2 + $0xac0] sm:$0xf] }
 0x4c9   : > { %v10212_v3 = vld [vmem:[#allocation2 + $0xadc] sm:$0xf0] }
 0x4ca   : > { %12731 = vst [vmem:[#allocation13_spill] sm:$0xff] %v11561_v30 }
 0x4ce   : > { %v4753_v26 = vpop.f32.mrf.mxu2  ;;  %v3755_v33 = vpop.f32.mrf.mxu0 }
 0x4cf   : > { %v4841_v12 = vpop.f32.mrf.mxu3  ;;  %v3915_v52 = vpop.f32.mrf.mxu1 }
 0x4d0   : > { %v11563_v17 = vadd.f32 %v4841_v12, %v4753_v26  ;;  %v11565_v16 = vadd.f32 %v3915_v52, %v3755_v33  ;;  %v9144_v26 = vor.u32 %v10212_v3, %v9143_v37  ;;  %v9148_v12 = vor.u32 %v10208_v41, %v9145_v32  ;;  %v12743_v52 = vld [vmem:[#allocation15_spill] sm:$0xff]  ;;  %v9207_v37 = vld [vmem:[#allocation2 + $0xb40] sm:$0xf] }
 0x4d1   : > { %8719 = vmatmul.msk.bf16.gmra.mxu0 %vm3687_vm0, %v3648_v21  ;;  %v10228_v3 = vld [vmem:[#allocation2 + $0xb5c] sm:$0xf0] }
 0x4d2   : > { %12732 = vst [vmem:[#allocation25_spill] sm:$0xff] %v11565_v16  ;;  %8751 = vmatmul.msk.bf16.gmra.mxu1 %vm3687_vm0, %v12735_v63 }
 0x4d3   : > { %4795 = vmatmul.bf16.gmra.mxu2 %v9080_v23  ;;  %v12744_v23 = vld [vmem:[#allocation12_spill] sm:$0xff] }
 0x4d4   : > { %4883 = vmatmul.bf16.gmra.mxu3 %v9084_v19  ;;  %v12745_v19 = vpack.c.bf16 %v12743_v52, %v12744_v23  ;;  %v12754_v52 = vld [vmem:[#allocation20_spill] sm:$0xff] }
 0x4d6   : > { %v4756_v46 = vpop.f32.mrf.mxu2  ;;  %v3757_v42 = vpop.f32.mrf.mxu0 }
 0x4d7   : > { %v4844_v29 = vpop.f32.mrf.mxu3  ;;  %v3917_v58 = vpop.f32.mrf.mxu1 }
 0x4d8   : > { %v11575_v14 = vadd.f32 %v4844_v29, %v4756_v46  ;;  %v11577_v15 = vadd.f32 %v3917_v58, %v3757_v42  ;;  %v9175_v58 = vld [vmem:[#allocation2 + $0xb00] sm:$0xf] }
 0x4da   : > { %12736 = vst [vmem:[#allocation26_spill] sm:$0xff] %v11577_v15 }
 0x4de   : > { %v4758_v21 = vpop.f32.mrf.mxu2  ;;  %v3760_v56 = vpop.f32.mrf.mxu0 }
 0x4df   : > { %v4846_v8 = vpop.f32.mrf.mxu3  ;;  %v3920_v20 = vpop.f32.mrf.mxu1 }
 0x4e0   : > { %v11579_v28 = vadd.f32 %v4846_v8, %v4758_v21  ;;  %v11581_v39 = vadd.f32 %v3920_v20, %v3760_v56  ;;  %v9176_v8 = vor.u32 %v10220_v61, %v9175_v58  ;;  %v9180_v56 = vor.u32 %v10216_v22, %v9177_v6  ;;  %v4105_v61 = vld [vmem:[#allocation2 + $0xb80] sm:$0xff] }
 0x4e1   : > { %8720 = vmatmul.msk.bf16.gmra.mxu0 %vm3687_vm0, %v3649_v50  ;;  %v4473_v22 = vunpack.c.l.b16 %v4105_v61  ;;  %v4474_v31 = vunpack.c.h.b16 %v4105_v61 }
 0x4e2   : > { %12737 = vst [vmem:[#allocation5_spill] sm:$0xff] %v11581_v39  ;;  %8752 = vmatmul.msk.bf16.gmra.mxu1 %vm3687_vm0, %v12740_v7 }
 0x4e3   : > { %4800 = vmatmul.bf16.gmra.mxu2 %v9112_v1  ;;  %v12748_v1 = vld [vmem:[#allocation19_spill] sm:$0xff] }
 0x4e4   : > { %4888 = vmatmul.bf16.gmra.mxu3 %v9116_v5  ;;  %v12749_v5 = vld [vmem:[#allocation16_spill] sm:$0xff] }
 0x4e5   : > { %v12750_v25 = vpack.c.bf16 %v12748_v1, %v12749_v5  ;;  %v3653_v1 = vpack.c.bf16 %v11531_v51, %v11531_v51  ;;  %v8769_v51 = vld [vmem:[#allocation2 + $0x7e8] sm:$0xf0] }
 0x4e6   : > { %v4761_v59 = vpop.f32.mrf.mxu2  ;;  %v3762_v53 = vpop.f32.mrf.mxu0 }
 0x4e7   : > { %v4849_v55 = vpop.f32.mrf.mxu3  ;;  %v3922_v40 = vpop.f32.mrf.mxu1 }
 0x4e8   : > { %v11591_v43 = vadd.f32 %v4849_v55, %v4761_v59  ;;  %v11593_v38 = vadd.f32 %v3922_v40, %v3762_v53 }
 0x4ea   : > { %12741 = vst [vmem:[#allocation14_spill] sm:$0xff] %v11593_v38  ;;  %v4106_v38 = vld [vmem:[#allocation2 + $0xb88] sm:$0xff] }
 0x4ee   : > { %v4763_v50 = vpop.f32.mrf.mxu2  ;;  %v3765_v62 = vpop.f32.mrf.mxu0 }
 0x4ef   : > { %v4851_v34 = vpop.f32.mrf.mxu3  ;;  %v3925_v47 = vpop.f32.mrf.mxu1 }
 0x4f0   : > { %v11595_v13 = vadd.f32 %v4851_v34, %v4763_v50  ;;  %v11597_v33 = vadd.f32 %v3925_v47, %v3765_v62  ;;  %v9208_v62 = vor.u32 %v10228_v3, %v9207_v37  ;;  %v9212_v47 = vor.u32 %v10224_v9, %v9209_v48  ;;  %v8767_v3 = vld [vmem:[#allocation2 + $0x7c8] sm:$0xf]  ;;  %v10113_v48 = vld [vmem:[#allocation2 + $0x7cc] sm:$0xf] }
 0x4f1   : > { %8721 = vmatmul.msk.bf16.gmra.mxu0 %vm3687_vm0, %v3650_v49  ;;  %v10117_v9 = vld [vmem:[#allocation2 + $0x7e4] sm:$0xf0] }
 0x4f2   : > { %12742 = vst [vmem:[#allocation21_spill] sm:$0xff] %v11597_v33  ;;  %8753 = vmatmul.msk.bf16.gmra.mxu1 %vm3687_vm0, %v12745_v19 }
 0x4f3   : > { %4805 = vmatmul.bf16.gmra.mxu2 %v9144_v26 }
 0x4f4   : > { %4893 = vmatmul.bf16.gmra.mxu3 %v9148_v12  ;;  %v12753_v12 = vld [vmem:[#allocation23_spill] sm:$0xff] }
 0x4f5   : > { %v12755_v23 = vpack.c.bf16 %v12753_v12, %v12754_v52  ;;  %v8768_v12 = vor.u32 %v10117_v9, %v8767_v3  ;;  %v8772_v52 = vor.u32 %v10113_v48, %v8769_v51  ;;  %v8801_v3 = vld [vmem:[#allocation2 + $0x828] sm:$0xf0]  ;;  %v8807_v9 = vld [vmem:[#allocation2 + $0x810] sm:$0xf]  ;;  %v10122_v51 = vld [vmem:[#allocation2 + $0x814] sm:$0xf] }
 0x4f6   : > { %v4766_v60 = vpop.f32.mrf.mxu2  ;;  %v3767_v63 = vpop.f32.mrf.mxu0  ;;  %v10126_v48 = vld [vmem:[#allocation2 + $0x82c] sm:$0xf0] }
 0x4f7   : > { %v4854_v54 = vpop.f32.mrf.mxu3  ;;  %v3927_v46 = vpop.f32.mrf.mxu1 }
 0x4f8   : > { %v11607_v29 = vadd.f32 %v4854_v54, %v4766_v60  ;;  %v11609_v42 = vadd.f32 %v3927_v46, %v3767_v63 }
 0x4fa   : > { %12746 = vst [vmem:[#allocation6_spill] sm:$0xff] %v11609_v42 }
 0x4fe   : > { %v4768_v49 = vpop.f32.mrf.mxu2  ;;  %v3770_v18 = vpop.f32.mrf.mxu0 }
 0x4ff   : > { %v4856_v36 = vpop.f32.mrf.mxu3  ;;  %v3930_v0 = vpop.f32.mrf.mxu1 }
 0x500   : > { %v11611_v21 = vadd.f32 %v4856_v36, %v4768_v49  ;;  %v11613_v20 = vadd.f32 %v3930_v0, %v3770_v18  ;;  %v4601_v18 = vpack.c.b16 %v4473_v22, %v4473_v22  ;;  %v4602_v0 = vpack.c.b16 %v4474_v31, %v4474_v31  ;;  %v10543_v22 = vld [vmem:[%s10681_s24 + $0x78] sm:$0xff] }
 0x501   : > { %8722 = vmatmul.msk.bf16.gmra.mxu0 %vm3687_vm0, %v3651_v27  ;;  %v10544_v31 = vld [vmem:[%s10681_s24 + $0xb8] sm:$0xff] }
 0x502   : > { %12747 = vst [vmem:[#allocation7_spill] sm:$0xff] %v11613_v20  ;;  %8754 = vmatmul.msk.bf16.gmra.mxu1 %vm3687_vm0, %v12750_v25 }
 0x503   : > { %4810 = vmatmul.bf16.gmra.mxu2 %v9176_v8  ;;  %v12757_v8 = vld [vmem:[#allocation24_spill] sm:$0xff] }
 0x504   : > { %4898 = vmatmul.bf16.gmra.mxu3 %v9180_v56  ;;  %v2172_v56 = vpack.c.bf16 %v12757_v8, %v12757_v8 }
 0x506   : > { %v4771_v35 = vpop.f32.mrf.mxu2  ;;  %v3772_v59 = vpop.f32.mrf.mxu0 }
 0x507   : > { %v4859_v7 = vpop.f32.mrf.mxu3  ;;  %v3932_v55 = vpop.f32.mrf.mxu1 }
 0x508   : > { %v11623_v53 = vadd.f32 %v4859_v7, %v4771_v35  ;;  %v11625_v40 = vadd.f32 %v3932_v55, %v3772_v59 }
 0x50a   : > { %12751 = vst [vmem:[#allocation22_spill] sm:$0xff] %v11625_v40 }
 0x50e   : > { %v4773_v27 = vpop.f32.mrf.mxu2  ;;  %v3775_v32 = vpop.f32.mrf.mxu0 }
 0x50f   : > { %v4861_v41 = vpop.f32.mrf.mxu3  ;;  %v3935_v50 = vpop.f32.mrf.mxu1 }
 0x510   : > { %v11627_v34 = vadd.f32 %v4861_v41, %v4773_v27  ;;  %v11629_v26 = vadd.f32 %v3935_v50, %v3775_v32  ;;  %v8775_v27 = vld [vmem:[#allocation2 + $0x7d0] sm:$0xf]  ;;  %v10114_v32 = vld [vmem:[#allocation2 + $0x7d4] sm:$0xf] }
 0x511   : > { %8723 = vmatmul.msk.bf16.gmra.mxu0 %vm3687_vm0, %v3652_v11  ;;  %v10118_v41 = vld [vmem:[#allocation2 + $0x7ec] sm:$0xf0]  ;;  %v8777_v50 = vld [vmem:[#allocation2 + $0x7f0] sm:$0xf0] }
 0x512   : > { %12752 = vst [vmem:[#allocation9_spill] sm:$0xff] %v11629_v26  ;;  %8755 = vmatmul.msk.bf16.gmra.mxu1 %vm3687_vm0, %v12755_v23 }
 0x513   : > { %4815 = vmatmul.bf16.gmra.mxu2 %v9208_v62 }
 0x514   : > { %4903 = vmatmul.bf16.gmra.mxu3 %v9212_v47 }
 0x516   : > { %v4776_v19 = vpop.f32.mrf.mxu2  ;;  %v3777_v54 = vpop.f32.mrf.mxu0 }
 0x517   : > { %v4864_v60 = vpop.f32.mrf.mxu3  ;;  %v3937_v63 = vpop.f32.mrf.mxu1 }
 0x518   : > { %v11639_v46 = vadd.f32 %v4864_v60, %v4776_v19  ;;  %v11641_v58 = vadd.f32 %v3937_v63, %v3777_v54  ;;  %v8776_v54 = vor.u32 %v10118_v41, %v8775_v27  ;;  %v8780_v63 = vor.u32 %v10114_v32, %v8777_v50  ;;  %v8809_v27 = vld [vmem:[#allocation2 + $0x830] sm:$0xf0]  ;;  %v10549_v41 = vld [vmem:[%s10681_s24 + $0x68] sm:$0xff] }
 0x519   : > { %v10550_v32 = vld [vmem:[%s10681_s24 + $0xa8] sm:$0xff] }
 0x51a   : > { %12756 = vst [vmem:[#allocation8_spill] sm:$0xff] %v11641_v58  ;;  %v10551_v50 = vld [vmem:[%s10681_s24 + $0x128] sm:$0xff] }
 0x51e   : > { %v4778_v57 = vpop.f32.mrf.mxu2  ;;  %v3780_v6 = vpop.f32.mrf.mxu0 }
 0x51f   : > { %v4866_v11 = vpop.f32.mrf.mxu3  ;;  %v3940_v49 = vpop.f32.mrf.mxu1 }
 0x520   : > { %v11643_v36 = vadd.f32 %v4866_v11, %v4778_v57  ;;  %v11649_v5 = vadd.f32 %v3940_v49, %v3780_v6  ;;  %v10545_v57 = vld [vmem:[%s10681_s24 + $0x138] sm:$0xff] }
 0x521   : > { %8724 = vmatmul.msk.bf16.gmra.mxu0 %vm3687_vm0, %v3653_v1  ;;  %v10547_v1 = vld [vmem:[%s10681_s24 + $0xb0] sm:$0xff] }
 0x522   : > { %12758 = vst [vmem:[#allocation17_spill] sm:$0xff] %v11649_v5  ;;  %8756 = vmatmul.msk.bf16.gmra.mxu1 %vm3687_vm0, %v2172_v56  ;;  %v10546_v56 = vld [vmem:[%s10681_s24 + $0x70] sm:$0xff] }
 0x523   : > { %4820 = vmatmul.bf16.gmra.mxu2 %v4601_v18 }
 0x524   : > { %4908 = vmatmul.bf16.gmra.mxu3 %v4602_v0 }
 0x526   : > { %v4781_v25 = vpop.f32.mrf.mxu2  ;;  %v3782_v7 = vpop.f32.mrf.mxu0 }
 0x527   : > { %v4869_v35 = vpop.f32.mrf.mxu3  ;;  %v3942_v59 = vpop.f32.mrf.mxu1 }
 0x528   : > { %v11653_v55 = vadd.f32 %v4869_v35, %v4781_v25  ;;  %v11655_v37 = vadd.f32 %v3942_v59, %v3782_v7  ;;  %v10548_v25 = vld [vmem:[%s10681_s24 + $0x130] sm:$0xff]  ;;  %v8799_v35 = vld [vmem:[#allocation2 + $0x808] sm:$0xf]  ;;  %v10121_v59 = vld [vmem:[#allocation2 + $0x80c] sm:$0xf] }
 0x529   : > { %v10125_v7 = vld [vmem:[#allocation2 + $0x824] sm:$0xf0] }
 0x52a   : > { %12759 = vst [vmem:[#allocation10_spill] sm:$0xff] %v11655_v37 }
 0x52e   : > { %v4783_v62 = vpop.f32.mrf.mxu2  ;;  %v3785_v23 = vpop.f32.mrf.mxu0 }
 0x52f   : > { %v4871_v47 = vpop.f32.mrf.mxu3  ;;  %v3945_v19 = vpop.f32.mrf.mxu1 }
 0x530   : > { %v11657_v60 = vadd.f32 %v4871_v47, %v4783_v62  ;;  %v11659_v61 = vadd.f32 %v3945_v19, %v3785_v23 }
 0x531   : > { %4921 = vmatmul.bf16.vlgmr.msrb.gmra.mxu0 %v8768_v12  ;;  %v8800_v12 = vor.u32 %v10125_v7, %v8799_v35 }
 0x532   : > { %12760 = vst [vmem:[#allocation11_spill] sm:$0xff] %v11659_v61  ;;  %5009 = vmatmul.bf16.vlgmr.msrb.gmra.mxu1 %v8772_v52  ;;  %6498 = vmatpush.bf16.msrb.mxu0 %v10543_v22  ;;  %v8804_v52 = vor.u32 %v10121_v59, %v8801_v3  ;;  %v8812_v22 = vor.u32 %v10122_v51, %v8809_v27  ;;  %v10560_v51 = vld [vmem:[%s10681_s24 + $0x110] sm:$0xff]  ;;  %v8831_v27 = vld [vmem:[#allocation2 + $0x848] sm:$0xf] }
 0x533   : > { %5097 = vmatmul.bf16.vlgmr.msrb.gmra.mxu2 %v8776_v54  ;;  %6586 = vmatpush.bf16.msrb.mxu1 %v10544_v31 }
 0x534   : > { %5185 = vmatmul.bf16.vlgmr.msrb.gmra.mxu3 %v8780_v63  ;;  %v8808_v63 = vor.u32 %v10126_v48, %v8807_v9  ;;  %v10558_v9 = vld [vmem:[%s10681_s24 + $0x50] sm:$0xff] }
 0x535   : > { %6762 = vmatpush.bf16.msrb.mxu3 %v10545_v57  ;;  %v10552_v57 = vld [vmem:[%s10681_s24 + $0x60] sm:$0xff]  ;;  %v10559_v48 = vld [vmem:[%s10681_s24 + $0x90] sm:$0xff] }
 0x536   : > { %v4786_v11 = vpop.f32.mrf.mxu2  ;;  %v3787_v49 = vpop.f32.mrf.mxu0  ;;  %6499 = vmatpush.bf16.msrb.mxu0 %v10546_v56  ;;  %v10557_v56 = vld [vmem:[%s10681_s24 + $0x118] sm:$0xff] }
 0x537   : > { %v4874_v6 = vpop.f32.mrf.mxu3  ;;  %v3947_v18 = vpop.f32.mrf.mxu1  ;;  %6587 = vmatpush.bf16.msrb.mxu1 %v10547_v1 }
 0x538   : > { %v11664_v0 = vadd.f32 %v4874_v6, %v4786_v11  ;;  %v11666_v8 = vadd.f32 %v3947_v18, %v3787_v49  ;;  %v10553_v11 = vld [vmem:[%s10681_s24 + $0xa0] sm:$0xff]  ;;  %v10555_v49 = vld [vmem:[%s10681_s24 + $0x58] sm:$0xff] }
 0x539   : > { %6763 = vmatpush.bf16.msrb.mxu3 %v10548_v25  ;;  %v10554_v6 = vld [vmem:[%s10681_s24 + $0x120] sm:$0xff]  ;;  %v10556_v18 = vld [vmem:[%s10681_s24 + $0x98] sm:$0xff] }
 0x53a   : > { %12761 = vst [vmem:[#allocation18_spill] sm:$0xff] %v11666_v8  ;;  %6500 = vmatpush.bf16.msrb.mxu0 %v10549_v41  ;;  %v10133_v41 = vld [vmem:[#allocation2 + $0x864] sm:$0xf0] }
 0x53b   : > { %6588 = vmatpush.bf16.msrb.mxu1 %v10550_v32  ;;  %v10129_v32 = vld [vmem:[#allocation2 + $0x84c] sm:$0xf] }
 0x53d   : > { %6764 = vmatpush.bf16.msrb.mxu3 %v10551_v50  ;;  %v8833_v50 = vld [vmem:[#allocation2 + $0x868] sm:$0xf0] }
 0x53e   : > { %v4788_v62 = vpop.f32.mrf.mxu2  ;;  %v3790_v23 = vpop.f32.mrf.mxu0  ;;  %6501 = vmatpush.bf16.msrb.mxu0 %v10552_v57 }
 0x53f   : > { %v4876_v47 = vpop.f32.mrf.mxu3  ;;  %v3950_v19 = vpop.f32.mrf.mxu1  ;;  %6589 = vmatpush.bf16.msrb.mxu1 %v10553_v11  ;;  %v8832_v11 = vor.u32 %v10133_v41, %v8831_v27 }
 0x540   : > { %v11674_v54 = vadd.f32 %v4876_v47, %v4788_v62  ;;  %v11676_v31 = vadd.f32 %v3950_v19, %v3790_v23  ;;  %v8839_v62 = vld [vmem:[#allocation2 + $0x850] sm:$0xf]  ;;  %v10561_v23 = vld [vmem:[%s10681_s24 + $0x48] sm:$0xff] }
 0x541   : > { %6765 = vmatpush.bf16.msrb.mxu3 %v10554_v6  ;;  %4926 = vmatmul.bf16.gmra.mxu0 %v8800_v12  ;;  %v10134_v47 = vld [vmem:[#allocation2 + $0x86c] sm:$0xf0]  ;;  %v10130_v12 = vld [vmem:[#allocation2 + $0x854] sm:$0xf]  ;;  %v10562_v19 = vld [vmem:[%s10681_s24 + $0x88] sm:$0xff]  ;;  %v8836_v6 = vor.u32 %v10129_v32, %v8833_v50 }
 0x542   : > { %12762 = vst [vmem:[#allocation15_spill] sm:$0xff] %v11676_v31  ;;  %5014 = vmatmul.bf16.gmra.mxu1 %v8804_v52  ;;  %6502 = vmatpush.bf16.msrb.mxu0 %v10555_v49  ;;  %v8841_v52 = vld [vmem:[#allocation2 + $0x870] sm:$0xf0] }
 0x543   : > { %5102 = vmatmul.bf16.gmra.mxu2 %v8808_v63  ;;  %6590 = vmatpush.bf16.msrb.mxu1 %v10556_v18  ;;  %v10563_v63 = vld [vmem:[%s10681_s24 + $0x108] sm:$0xff] }
 0x544   : > { %5190 = vmatmul.bf16.gmra.mxu3 %v8812_v22 }
 0x545   : > { %6766 = vmatpush.bf16.msrb.mxu3 %v10557_v56 }
 0x546   : > { %v4791_v1 = vpop.f32.mrf.mxu2  ;;  %v3792_v35 = vpop.f32.mrf.mxu0  ;;  %6503 = vmatpush.bf16.msrb.mxu0 %v10558_v9  ;;  %v10565_v9 = vld [vmem:[%s10681_s24 + $0x80] sm:$0xff] }
 0x547   : > { %v4879_v25 = vpop.f32.mrf.mxu3  ;;  %v3952_v7 = vpop.f32.mrf.mxu1  ;;  %6591 = vmatpush.bf16.msrb.mxu1 %v10559_v48  ;;  %v10566_v48 = vld [vmem:[%s10681_s24 + $0x100] sm:$0xff] }
 0x548   : > { %v11684_v59 = vadd.f32 %v4879_v25, %v4791_v1  ;;  %v11686_v3 = vadd.f32 %v3952_v7, %v3792_v35  ;;  %v8840_v1 = vor.u32 %v10134_v47, %v8839_v62  ;;  %v8844_v25 = vor.u32 %v10130_v12, %v8841_v52  ;;  %v10564_v7 = vld [vmem:[%s10681_s24 + $0x40] sm:$0xff]  ;;  %v8863_v47 = vld [vmem:[#allocation2 + $0x888] sm:$0xf]  ;;  %v10137_v52 = vld [vmem:[#allocation2 + $0x88c] sm:$0xf] }
 0x549   : > { %6767 = vmatpush.bf16.msrb.mxu3 %v10560_v51  ;;  %v10141_v12 = vld [vmem:[#allocation2 + $0x8a4] sm:$0xf0] }
 0x54a   : > { %12763 = vst [vmem:[#allocation12_spill] sm:$0xff] %v11686_v3  ;;  %6504 = vmatpush.bf16.msrb.mxu0 %v10561_v23  ;;  %v8865_v23 = vld [vmem:[#allocation2 + $0x8a8] sm:$0xf0] }
 0x54b   : > { %6592 = vmatpush.bf16.msrb.mxu1 %v10562_v19  ;;  %v8871_v19 = vld [vmem:[#allocation2 + $0x890] sm:$0xf] }
 0x54d   : > { %6768 = vmatpush.bf16.msrb.mxu3 %v10563_v63  ;;  %v10142_v63 = vld [vmem:[#allocation2 + $0x8ac] sm:$0xf0] }
 0x54e   : > { %v4793_v22 = vpop.f32.mrf.mxu2  ;;  %v3795_v49 = vpop.f32.mrf.mxu0  ;;  %6505 = vmatpush.bf16.msrb.mxu0 %v10564_v7 }
 0x54f   : > { %v4881_v57 = vpop.f32.mrf.mxu3  ;;  %v3955_v18 = vpop.f32.mrf.mxu1  ;;  %6593 = vmatpush.bf16.msrb.mxu1 %v10565_v9  ;;  %v8872_v9 = vor.u32 %v10142_v63, %v8871_v19  ;;  %v8903_v19 = vld [vmem:[#allocation2 + $0x8d0] sm:$0xf] }
 0x550   : > { %v11694_v56 = vadd.f32 %v4881_v57, %v4793_v22  ;;  %v11696_v35 = vadd.f32 %v3955_v18, %v3795_v49  ;;  %v10138_v22 = vld [vmem:[#allocation2 + $0x894] sm:$0xf]  ;;  %v8864_v49 = vor.u32 %v10141_v12, %v8863_v47  ;;  %v8868_v18 = vor.u32 %v10137_v52, %v8865_v23  ;;  %v8895_v12 = vld [vmem:[#allocation2 + $0x8c8] sm:$0xf]  ;;  %v10145_v23 = vld [vmem:[#allocation2 + $0x8cc] sm:$0xf] }
 0x551   : > { %6769 = vmatpush.bf16.msrb.mxu3 %v10566_v48  ;;  %4931 = vmatmul.bf16.gmra.mxu0 %v8832_v11  ;;  %v8873_v57 = vld [vmem:[#allocation2 + $0x8b0] sm:$0xf0]  ;;  %v10149_v52 = vld [vmem:[#allocation2 + $0x8e4] sm:$0xf0]  ;;  %v10150_v63 = vld [vmem:[#allocation2 + $0x8ec] sm:$0xf0] }
 0x552   : > { %12764 = vst [vmem:[#allocation19_spill] sm:$0xff] %v11696_v35  ;;  %5019 = vmatmul.bf16.gmra.mxu1 %v8836_v6  ;;  %v8876_v48 = vor.u32 %v10138_v22, %v8873_v57  ;;  %v10146_v22 = vld [vmem:[#allocation2 + $0x8d4] sm:$0xf] }
 0x553   : > { %5107 = vmatmul.bf16.gmra.mxu2 %v8840_v1  ;;  %v8905_v57 = vld [vmem:[#allocation2 + $0x8f0] sm:$0xf0] }
 0x554   : > { %5195 = vmatmul.bf16.gmra.mxu3 %v8844_v25 }
 0x556   : > { %v4796_v51 = vpop.f32.mrf.mxu2  ;;  %v3797_v41 = vpop.f32.mrf.mxu0 }
 0x557   : > { %v4884_v27 = vpop.f32.mrf.mxu3  ;;  %v3957_v32 = vpop.f32.mrf.mxu1 }
 0x558   : > { %v11701_v50 = vadd.f32 %v4884_v27, %v4796_v51  ;;  %v11703_v62 = vadd.f32 %v3957_v32, %v3797_v41 }
 0x55a   : > { %12765 = vst [vmem:[#allocation16_spill] sm:$0xff] %v11703_v62 }
 0x55e   : > { %v4798_v11 = vpop.f32.mrf.mxu2  ;;  %v3800_v1 = vpop.f32.mrf.mxu0 }
 0x55f   : > { %v4886_v6 = vpop.f32.mrf.mxu3  ;;  %v3960_v25 = vpop.f32.mrf.mxu1 }
 0x560   : > { %v11705_v7 = vadd.f32 %v4886_v6, %v4798_v11  ;;  %v11707_v51 = vadd.f32 %v3960_v25, %v3800_v1  ;;  %v8897_v11 = vld [vmem:[#allocation2 + $0x8e8] sm:$0xf0] }
 0x561   : > { %4936 = vmatmul.bf16.gmra.mxu0 %v8864_v49  ;;  %v8900_v1 = vor.u32 %v10145_v23, %v8897_v11  ;;  %v10157_v23 = vld [vmem:[#allocation2 + $0x924] sm:$0xf0]  ;;  %v10153_v11 = vld [vmem:[#allocation2 + $0x90c] sm:$0xf] }
 0x562   : > { %12766 = vst [vmem:[#allocation23_spill] sm:$0xff] %v11707_v51  ;;  %5024 = vmatmul.bf16.gmra.mxu1 %v8868_v18  ;;  %v8896_v18 = vor.u32 %v10149_v52, %v8895_v12  ;;  %v8927_v52 = vld [vmem:[#allocation2 + $0x908] sm:$0xf] }
 0x563   : > { %5112 = vmatmul.bf16.gmra.mxu2 %v8872_v9 }
 0x564   : > { %5200 = vmatmul.bf16.gmra.mxu3 %v8876_v48 }
 0x566   : > { %v4801_v27 = vpop.f32.mrf.mxu2  ;;  %v3802_v32 = vpop.f32.mrf.mxu0 }
 0x567   : > { %v4889_v41 = vpop.f32.mrf.mxu3  ;;  %v3962_v62 = vpop.f32.mrf.mxu1 }
 0x568   : > { %v11709_v35 = vadd.f32 %v4889_v41, %v4801_v27  ;;  %v11711_v47 = vadd.f32 %v3962_v62, %v3802_v32  ;;  %v8904_v27 = vor.u32 %v10150_v63, %v8903_v19  ;;  %v8908_v41 = vor.u32 %v10146_v22, %v8905_v57  ;;  %v8935_v19 = vld [vmem:[#allocation2 + $0x910] sm:$0xf]  ;;  %v10154_v22 = vld [vmem:[#allocation2 + $0x914] sm:$0xf] }
 0x569   : > { %v10158_v63 = vld [vmem:[#allocation2 + $0x92c] sm:$0xf0]  ;;  %v8937_v57 = vld [vmem:[#allocation2 + $0x930] sm:$0xf0] }
 0x56a   : > { %12767 = vst [vmem:[#allocation20_spill] sm:$0xff] %v11711_v47 }
 0x56e   : > { %v4803_v6 = vpop.f32.mrf.mxu2  ;;  %v3805_v25 = vpop.f32.mrf.mxu0 }
 0x56f   : > { %v4891_v49 = vpop.f32.mrf.mxu3  ;;  %v3965_v9 = vpop.f32.mrf.mxu1 }
 0x570   : > { %v11713_v48 = vadd.f32 %v4891_v49, %v4803_v6  ;;  %v11715_v62 = vadd.f32 %v3965_v9, %v3805_v25  ;;  %v8929_v6 = vld [vmem:[#allocation2 + $0x928] sm:$0xf0] }
 0x571   : > { %4941 = vmatmul.bf16.gmra.mxu0 %v8896_v18  ;;  %v8932_v25 = vor.u32 %v10153_v11, %v8929_v6  ;;  %v10165_v11 = vld [vmem:[#allocation2 + $0x964] sm:$0xf0]  ;;  %v10161_v6 = vld [vmem:[#allocation2 + $0x94c] sm:$0xf] }
 0x572   : > { %12768 = vst [vmem:[#allocation24_spill] sm:$0xff] %v11715_v62  ;;  %5029 = vmatmul.bf16.gmra.mxu1 %v8900_v1  ;;  %v8928_v1 = vor.u32 %v10157_v23, %v8927_v52  ;;  %v8959_v23 = vld [vmem:[#allocation2 + $0x948] sm:$0xf] }
 0x573   : > { %5117 = vmatmul.bf16.gmra.mxu2 %v8904_v27 }
 0x574   : > { %5205 = vmatmul.bf16.gmra.mxu3 %v8908_v41 }
 0x576   : > { %v4806_v32 = vpop.f32.mrf.mxu2  ;;  %v3807_v51 = vpop.f32.mrf.mxu0 }
 0x577   : > { %v4894_v47 = vpop.f32.mrf.mxu3  ;;  %v3967_v3 = vpop.f32.mrf.mxu1 }
 0x578   : > { %v11717_v31 = vadd.f32 %v4894_v47, %v4806_v32  ;;  %v11719_v12 = vadd.f32 %v3967_v3, %v3807_v51  ;;  %v8936_v47 = vor.u32 %v10158_v63, %v8935_v19  ;;  %v8940_v32 = vor.u32 %v10154_v22, %v8937_v57  ;;  %v8967_v19 = vld [vmem:[#allocation2 + $0x950] sm:$0xf]  ;;  %v10162_v22 = vld [vmem:[#allocation2 + $0x954] sm:$0xf] }
 0x579   : > { %v10166_v63 = vld [vmem:[#allocation2 + $0x96c] sm:$0xf0]  ;;  %v8969_v57 = vld [vmem:[#allocation2 + $0x970] sm:$0xf0] }
 0x57a   : > { %12769 = vst [vmem:[#allocation27_spill] sm:$0xff] %v11719_v12 }
 0x57e   : > { %v4808_v49 = vpop.f32.mrf.mxu2  ;;  %v3810_v9 = vpop.f32.mrf.mxu0 }
 0x57f   : > { %v4896_v18 = vpop.f32.mrf.mxu3  ;;  %v3970_v27 = vpop.f32.mrf.mxu1 }
 0x580   : > { %v11721_v41 = vadd.f32 %v4896_v18, %v4808_v49  ;;  %v11723_v3 = vadd.f32 %v3970_v27, %v3810_v9  ;;  %v8961_v49 = vld [vmem:[#allocation2 + $0x968] sm:$0xf0] }
 0x581   : > { %4946 = vmatmul.bf16.gmra.mxu0 %v8928_v1  ;;  %v8964_v9 = vor.u32 %v10161_v6, %v8961_v49  ;;  %v10173_v6 = vld [vmem:[#allocation2 + $0x9a4] sm:$0xf0]  ;;  %v10169_v49 = vld [vmem:[#allocation2 + $0x98c] sm:$0xf] }
 0x582   : > { %12770 = vst [vmem:[#allocation28_spill] sm:$0xff] %v11723_v3  ;;  %5034 = vmatmul.bf16.gmra.mxu1 %v8932_v25  ;;  %v8960_v25 = vor.u32 %v10165_v11, %v8959_v23  ;;  %v8991_v11 = vld [vmem:[#allocation2 + $0x988] sm:$0xf] }
 0x583   : > { %5122 = vmatmul.bf16.gmra.mxu2 %v8936_v47 }
 0x584   : > { %5210 = vmatmul.bf16.gmra.mxu3 %v8940_v32 }
 0x586   : > { %v4811_v51 = vpop.f32.mrf.mxu2  ;;  %v3812_v62 = vpop.f32.mrf.mxu0 }
 0x587   : > { %v4899_v12 = vpop.f32.mrf.mxu3  ;;  %v3972_v8 = vpop.f32.mrf.mxu1 }
 0x588   : > { %v11725_v61 = vadd.f32 %v4899_v12, %v4811_v51  ;;  %v11727_v52 = vadd.f32 %v3972_v8, %v3812_v62  ;;  %v8968_v12 = vor.u32 %v10166_v63, %v8967_v19  ;;  %v8972_v51 = vor.u32 %v10162_v22, %v8969_v57  ;;  %v8999_v19 = vld [vmem:[#allocation2 + $0x990] sm:$0xf]  ;;  %v10170_v22 = vld [vmem:[#allocation2 + $0x994] sm:$0xf] }
 0x589   : > { %v10174_v63 = vld [vmem:[#allocation2 + $0x9ac] sm:$0xf0]  ;;  %v9001_v57 = vld [vmem:[#allocation2 + $0x9b0] sm:$0xf0] }
 0x58a   : > { %12771 = vst [vmem:[#allocation29_spill] sm:$0xff] %v11727_v52 }
 0x58e   : > { %v4813_v18 = vpop.f32.mrf.mxu2  ;;  %v3815_v27 = vpop.f32.mrf.mxu0 }
 0x58f   : > { %v4901_v1 = vpop.f32.mrf.mxu3  ;;  %v3975_v47 = vpop.f32.mrf.mxu1 }
 0x590   : > { %v11729_v32 = vadd.f32 %v4901_v1, %v4813_v18  ;;  %v11731_v8 = vadd.f32 %v3975_v47, %v3815_v27  ;;  %v8993_v18 = vld [vmem:[#allocation2 + $0x9a8] sm:$0xf0] }
 0x591   : > { %4951 = vmatmul.bf16.gmra.mxu0 %v8960_v25  ;;  %v8996_v27 = vor.u32 %v10169_v49, %v8993_v18 }
 0x592   : > { %12772 = vst [vmem:[#allocation30_spill] sm:$0xff] %v11731_v8  ;;  %5039 = vmatmul.bf16.gmra.mxu1 %v8964_v9  ;;  %v8992_v9 = vor.u32 %v10173_v6, %v8991_v11  ;;  %v10178_v8 = vld [vmem:[#allocation2 + $0x9d4] sm:$0xf] }
 0x593   : > { %5127 = vmatmul.bf16.gmra.mxu2 %v8968_v12 }
 0x594   : > { %5215 = vmatmul.bf16.gmra.mxu3 %v8972_v51 }
 0x596   : > { %v4816_v62 = vpop.f32.mrf.mxu2  ;;  %v3817_v3 = vpop.f32.mrf.mxu0 }
 0x597   : > { %v4904_v52 = vpop.f32.mrf.mxu3  ;;  %v3977_v37 = vpop.f32.mrf.mxu1 }
 0x598   : > { %v11733_v5 = vadd.f32 %v4904_v52, %v4816_v62  ;;  %v11735_v23 = vadd.f32 %v3977_v37, %v3817_v3  ;;  %v9000_v52 = vor.u32 %v10174_v63, %v8999_v19  ;;  %v9004_v62 = vor.u32 %v10170_v22, %v9001_v57  ;;  %v10235_v37 = vld [vmem:[%s12611_s2 + $0x58] sm:$0xff]  ;;  %v10181_v19 = vld [vmem:[#allocation2 + $0x9e4] sm:$0xf0]  ;;  %v10177_v63 = vld [vmem:[#allocation2 + $0x9cc] sm:$0xf] }
 0x599   : > { %5542 = vmatpush.bf16.msra.mxu2 %v10235_v37  ;;  %v9025_v22 = vld [vmem:[#allocation2 + $0x9e8] sm:$0xf0]  ;;  %v9031_v57 = vld [vmem:[#allocation2 + $0x9d0] sm:$0xf] }
 0x59a   : > { %12773 = vst [vmem:[#allocation31_spill] sm:$0xff] %v11735_v23 }
 0x59e   : > { %v4818_v1 = vpop.f32.mrf.mxu2  ;;  %v3820_v47 = vpop.f32.mrf.mxu0 }
 0x59f   : > { %v4906_v25 = vpop.f32.mrf.mxu3  ;;  %v3980_v12 = vpop.f32.mrf.mxu1 }
 0x5a0   : > { %v11737_v51 = vadd.f32 %v4906_v25, %v4818_v1  ;;  %v11742_v3 = vadd.f32 %v3980_v12, %v3820_v47  ;;  %v9023_v1 = vld [vmem:[#allocation2 + $0x9c8] sm:$0xf]  ;;  %v10182_v25 = vld [vmem:[#allocation2 + $0x9ec] sm:$0xf0]  ;;  %v9033_v47 = vld [vmem:[#allocation2 + $0x9f0] sm:$0xf0] }
 0x5a1   : > { %4956 = vmatmul.bf16.gmra.mxu0 %v8992_v9  ;;  %v9024_v9 = vor.u32 %v10181_v19, %v9023_v1  ;;  %v9036_v58 = vor.u32 %v10178_v8, %v9033_v47  ;;  %v10185_v8 = vld [vmem:[#allocation2 + $0xa0c] sm:$0xf]  ;;  %v10186_v47 = vld [vmem:[#allocation2 + $0xa14] sm:$0xf] }
 0x5a2   : > { %12774 = vst [vmem:[#allocation32_spill] sm:$0xff] %v11742_v3  ;;  %5044 = vmatmul.bf16.gmra.mxu1 %v8996_v27  ;;  %v9028_v27 = vor.u32 %v10177_v63, %v9025_v22  ;;  %v9032_v3 = vor.u32 %v10182_v25, %v9031_v57  ;;  %v9055_v63 = vld [vmem:[#allocation2 + $0xa08] sm:$0xf]  ;;  %v9057_v57 = vld [vmem:[#allocation2 + $0xa28] sm:$0xf0] }
 0x5a3   : > { %5132 = vmatmul.bf16.gmra.mxu2 %v9000_v52  ;;  %v10189_v22 = vld [vmem:[#allocation2 + $0xa24] sm:$0xf0]  ;;  %v10190_v25 = vld [vmem:[#allocation2 + $0xa2c] sm:$0xf0] }
 0x5a4   : > { %5220 = vmatmul.bf16.gmra.mxu3 %v9004_v62 }
 0x5a6   : > { %v4821_v23 = vpop.f32.mrf.mxu2  ;;  %v3822_v6 = vpop.f32.mrf.mxu0 }
 0x5a7   : > { %v4909_v11 = vpop.f32.mrf.mxu3  ;;  %v3982_v49 = vpop.f32.mrf.mxu1 }
 0x5a8   : > { %v11744_v18 = vadd.f32 %v4909_v11, %v4821_v23 }
 0x5ae   : > { %v4823_v12 = vpop.f32.mrf.mxu2  ;;  %v4922_v52 = vpop.f32.mrf.mxu0 }
 0x5af   : > { %v4911_v37 = vpop.f32.mrf.mxu3  ;;  %v5010_v62 = vpop.f32.mrf.mxu1  ;;  %v4923_v6 = vadd.f32 %v4922_v52, %v11543_v2  ;;  %v9063_v2 = vld [vmem:[#allocation2 + $0xa10] sm:$0xf] }
 0x5b0   : > { %v9065_v37 = vld [vmem:[#allocation2 + $0xa30] sm:$0xf0] }
 0x5b1   : > { %v5011_v23 = vadd.f32 %v5010_v62, %v4923_v6  ;;  %4961 = vmatmul.bf16.gmra.mxu0 %v9024_v9  ;;  %v9056_v9 = vor.u32 %v10189_v22, %v9055_v63 }
 0x5b2   : > { %5049 = vmatmul.bf16.gmra.mxu1 %v9028_v27  ;;  %v9060_v27 = vor.u32 %v10185_v8, %v9057_v57  ;;  %v9087_v57 = vld [vmem:[#allocation2 + $0xa48] sm:$0xf] }
 0x5b3   : > { %5137 = vmatmul.bf16.gmra.mxu2 %v9032_v3 }
 0x5b4   : > { %5225 = vmatmul.bf16.gmra.mxu3 %v9036_v58 }
 0x5b6   : > { %v5098_v11 = vpop.f32.mrf.mxu2  ;;  %v4924_v40 = vpop.f32.mrf.mxu0 }
 0x5b7   : > { %v5186_v49 = vpop.f32.mrf.mxu3  ;;  %v5099_v26 = vadd.f32 %v5098_v11, %v5011_v23  ;;  %v5012_v20 = vpop.f32.mrf.mxu1  ;;  %v4925_v12 = vadd.f32 %v4924_v40, %v11547_v24  ;;  %v9064_v23 = vor.u32 %v10190_v25, %v9063_v2  ;;  %v9068_v24 = vor.u32 %v10186_v47, %v9065_v37  ;;  %v10197_v2 = vld [vmem:[#allocation2 + $0xa64] sm:$0xf0]  ;;  %v9089_v25 = vld [vmem:[#allocation2 + $0xa68] sm:$0xf0]  ;;  %v9095_v47 = vld [vmem:[#allocation2 + $0xa50] sm:$0xf] }
 0x5b8   : > { %v10198_v37 = vld [vmem:[#allocation2 + $0xa6c] sm:$0xf0] }
 0x5b9   : > { %v11748_v1 = vadd.f32 %v5186_v49, %v5099_v26  ;;  %v5013_v19 = vadd.f32 %v5012_v20, %v4925_v12 }
 0x5be   : > { %v5100_v3 = vpop.f32.mrf.mxu2  ;;  %v4927_v62 = vpop.f32.mrf.mxu0 }
 0x5bf   : > { %v5188_v58 = vpop.f32.mrf.mxu3  ;;  %v5101_v52 = vadd.f32 %v5100_v3, %v5013_v19  ;;  %v5015_v6 = vpop.f32.mrf.mxu1  ;;  %v4928_v40 = vadd.f32 %v4927_v62, %v11559_v10  ;;  %v10193_v10 = vld [vmem:[#allocation2 + $0xa4c] sm:$0xf]  ;;  %v10194_v3 = vld [vmem:[#allocation2 + $0xa54] sm:$0xf] }
 0x5c0   : > { %v9092_v62 = vor.u32 %v10193_v10, %v9089_v25  ;;  %v9119_v25 = vld [vmem:[#allocation2 + $0xa88] sm:$0xf] }
 0x5c1   : > { %v11751_v20 = vadd.f32 %v5188_v58, %v5101_v52  ;;  %v5016_v26 = vadd.f32 %v5015_v6, %v4928_v40  ;;  %4966 = vmatmul.bf16.gmra.mxu0 %v9056_v9  ;;  %v9097_v58 = vld [vmem:[#allocation2 + $0xa70] sm:$0xf0]  ;;  %v9088_v52 = vor.u32 %v10197_v2, %v9087_v57  ;;  %v9096_v40 = vor.u32 %v10198_v37, %v9095_v47  ;;  %v10205_v47 = vld [vmem:[#allocation2 + $0xaa4] sm:$0xf0]  ;;  %v9121_v37 = vld [vmem:[#allocation2 + $0xaa8] sm:$0xf0] }
 0x5c2   : > { %5054 = vmatmul.bf16.gmra.mxu1 %v9060_v27 }
 0x5c3   : > { %5142 = vmatmul.bf16.gmra.mxu2 %v9064_v23 }
 0x5c4   : > { %5230 = vmatmul.bf16.gmra.mxu3 %v9068_v24 }
 0x5c6   : > { %v5103_v11 = vpop.f32.mrf.mxu2  ;;  %v4929_v42 = vpop.f32.mrf.mxu0 }
 0x5c7   : > { %v5191_v49 = vpop.f32.mrf.mxu3  ;;  %v5104_v12 = vadd.f32 %v5103_v11, %v5016_v26  ;;  %v5017_v63 = vpop.f32.mrf.mxu1  ;;  %v4930_v19 = vadd.f32 %v4929_v42, %v11563_v17  ;;  %v9100_v17 = vor.u32 %v10194_v3, %v9097_v58  ;;  %v9127_v3 = vld [vmem:[#allocation2 + $0xa90] sm:$0xf] }
 0x5c8   : > { %v10206_v58 = vld [vmem:[#allocation2 + $0xaac] sm:$0xf0] }
 0x5c9   : > { %v11754_v22 = vadd.f32 %v5191_v49, %v5104_v12  ;;  %v5018_v8 = vadd.f32 %v5017_v63, %v4930_v19 }
 0x5ce   : > { %v5105_v9 = vpop.f32.mrf.mxu2  ;;  %v4932_v23 = vpop.f32.mrf.mxu0 }
 0x5cf   : > { %v5193_v27 = vpop.f32.mrf.mxu3  ;;  %v5106_v6 = vadd.f32 %v5105_v9, %v5018_v8  ;;  %v5020_v24 = vpop.f32.mrf.mxu1  ;;  %v4933_v42 = vadd.f32 %v4932_v23, %v11575_v14  ;;  %v10201_v14 = vld [vmem:[#allocation2 + $0xa8c] sm:$0xf]  ;;  %v10202_v9 = vld [vmem:[#allocation2 + $0xa94] sm:$0xf] }
 0x5d0   : > { %v9124_v23 = vor.u32 %v10201_v14, %v9121_v37 }
 0x5d1   : > { %v11757_v26 = vadd.f32 %v5193_v27, %v5106_v6  ;;  %v5021_v11 = vadd.f32 %v5020_v24, %v4933_v42  ;;  %4971 = vmatmul.bf16.gmra.mxu0 %v9088_v52  ;;  %v9129_v27 = vld [vmem:[#allocation2 + $0xab0] sm:$0xf0]  ;;  %v9120_v6 = vor.u32 %v10205_v47, %v9119_v25  ;;  %v9128_v42 = vor.u32 %v10206_v58, %v9127_v3  ;;  %v9151_v3 = vld [vmem:[#allocation2 + $0xac8] sm:$0xf]  ;;  %v10209_v58 = vld [vmem:[#allocation2 + $0xacc] sm:$0xf] }
 0x5d2   : > { %5059 = vmatmul.bf16.gmra.mxu1 %v9092_v62 }
 0x5d3   : > { %5147 = vmatmul.bf16.gmra.mxu2 %v9096_v40 }
 0x5d4   : > { %5235 = vmatmul.bf16.gmra.mxu3 %v9100_v17 }
 0x5d6   : > { %v5108_v49 = vpop.f32.mrf.mxu2  ;;  %v4934_v19 = vpop.f32.mrf.mxu0 }
 0x5d7   : > { %v5196_v12 = vpop.f32.mrf.mxu3  ;;  %v5109_v63 = vadd.f32 %v5108_v49, %v5021_v11  ;;  %v5022_v57 = vpop.f32.mrf.mxu1  ;;  %v4935_v8 = vadd.f32 %v4934_v19, %v11579_v28  ;;  %v9132_v28 = vor.u32 %v10202_v9, %v9129_v27  ;;  %v10234_v11 = vld [vmem:[%s12611_s2 + $0x50] sm:$0xff]  ;;  %v9153_v9 = vld [vmem:[#allocation2 + $0xae8] sm:$0xf0] }
 0x5d8   : > { %5543 = vmatpush.bf16.msra.mxu2 %v10234_v11  ;;  %v9159_v27 = vld [vmem:[#allocation2 + $0xad0] sm:$0xf] }
 0x5d9   : > { %v11760_v2 = vadd.f32 %v5196_v12, %v5109_v63  ;;  %v5023_v10 = vadd.f32 %v5022_v57, %v4935_v8 }
 0x5de   : > { %v5110_v52 = vpop.f32.mrf.mxu2  ;;  %v4937_v40 = vpop.f32.mrf.mxu0 }
 0x5df   : > { %v5198_v62 = vpop.f32.mrf.mxu3  ;;  %v5111_v24 = vadd.f32 %v5110_v52, %v5023_v10  ;;  %v5025_v17 = vpop.f32.mrf.mxu1  ;;  %v4938_v49 = vadd.f32 %v4937_v40, %v11591_v43  ;;  %v10213_v43 = vld [vmem:[#allocation2 + $0xae4] sm:$0xf0]  ;;  %v10214_v52 = vld [vmem:[#allocation2 + $0xaec] sm:$0xf0] }
 0x5e0   : > { %v9152_v40 = vor.u32 %v10213_v43, %v9151_v3 }
 0x5e1   : > { %v11766_v12 = vadd.f32 %v5198_v62, %v5111_v24  ;;  %v5026_v63 = vadd.f32 %v5025_v17, %v4938_v49  ;;  %4976 = vmatmul.bf16.gmra.mxu0 %v9120_v6  ;;  %v10210_v62 = vld [vmem:[#allocation2 + $0xad4] sm:$0xf]  ;;  %v9156_v17 = vor.u32 %v10209_v58, %v9153_v9  ;;  %v9160_v49 = vor.u32 %v10214_v52, %v9159_v27  ;;  %v9183_v9 = vld [vmem:[#allocation2 + $0xb08] sm:$0xf]  ;;  %v10217_v27 = vld [vmem:[#allocation2 + $0xb0c] sm:$0xf] }
 0x5e2   : > { %5064 = vmatmul.bf16.gmra.mxu1 %v9124_v23  ;;  %v9161_v6 = vld [vmem:[#allocation2 + $0xaf0] sm:$0xf0]  ;;  %v9185_v52 = vld [vmem:[#allocation2 + $0xb28] sm:$0xf0] }
 0x5e3   : > { %5152 = vmatmul.bf16.gmra.mxu2 %v9128_v42 }
 0x5e4   : > { %5240 = vmatmul.bf16.gmra.mxu3 %v9132_v28 }
 0x5e6   : > { %v5113_v19 = vpop.f32.mrf.mxu2  ;;  %v4939_v10 = vpop.f32.mrf.mxu0 }
 0x5e7   : > { %v5201_v57 = vpop.f32.mrf.mxu3  ;;  %v5114_v8 = vadd.f32 %v5113_v19, %v5026_v63  ;;  %v5027_v25 = vpop.f32.mrf.mxu1  ;;  %v4940_v47 = vadd.f32 %v4939_v10, %v11595_v13  ;;  %v9164_v13 = vor.u32 %v10210_v62, %v9161_v6  ;;  %v9191_v62 = vld [vmem:[#allocation2 + $0xb10] sm:$0xf] }
 0x5e8   : > { %v10222_v6 = vld [vmem:[#allocation2 + $0xb2c] sm:$0xf0] }
 0x5e9   : > { %v11769_v14 = vadd.f32 %v5201_v57, %v5114_v8  ;;  %v5028_v37 = vadd.f32 %v5027_v25, %v4940_v47 }
 0x5ee   : > { %v5115_v23 = vpop.f32.mrf.mxu2  ;;  %v4942_v28 = vpop.f32.mrf.mxu0 }
 0x5ef   : > { %v5203_v24 = vpop.f32.mrf.mxu3  ;;  %v5116_v42 = vadd.f32 %v5115_v23, %v5028_v37  ;;  %v5030_v11 = vpop.f32.mrf.mxu1  ;;  %v4943_v63 = vadd.f32 %v4942_v28, %v11607_v29  ;;  %v10221_v29 = vld [vmem:[#allocation2 + $0xb24] sm:$0xf0]  ;;  %v10218_v23 = vld [vmem:[#allocation2 + $0xb14] sm:$0xf]  ;;  %v9188_v28 = vor.u32 %v10217_v27, %v9185_v52 }
 0x5f0   : > { %v9215_v27 = vld [vmem:[#allocation2 + $0xb48] sm:$0xf] }
 0x5f1   : > { %v11772_v19 = vadd.f32 %v5203_v24, %v5116_v42  ;;  %v5031_v57 = vadd.f32 %v5030_v11, %v4943_v63  ;;  %4981 = vmatmul.bf16.gmra.mxu0 %v9152_v40  ;;  %v9193_v24 = vld [vmem:[#allocation2 + $0xb30] sm:$0xf0]  ;;  %v9184_v42 = vor.u32 %v10221_v29, %v9183_v9  ;;  %v10229_v52 = vld [vmem:[#allocation2 + $0xb64] sm:$0xf0] }
 0x5f2   : > { %5069 = vmatmul.bf16.gmra.mxu1 %v9156_v17 }
 0x5f3   : > { %5157 = vmatmul.bf16.gmra.mxu2 %v9160_v49  ;;  %v9192_v49 = vor.u32 %v10222_v6, %v9191_v62  ;;  %v10225_v62 = vld [vmem:[#allocation2 + $0xb4c] sm:$0xf]  ;;  %v9223_v6 = vld [vmem:[#allocation2 + $0xb50] sm:$0xf] }
 0x5f4   : > { %5245 = vmatmul.bf16.gmra.mxu3 %v9164_v13  ;;  %v9196_v13 = vor.u32 %v10218_v23, %v9193_v24  ;;  %v10230_v23 = vld [vmem:[#allocation2 + $0xb6c] sm:$0xf0]  ;;  %v10226_v24 = vld [vmem:[#allocation2 + $0xb54] sm:$0xf] }
 0x5f6   : > { %v5118_v8 = vpop.f32.mrf.mxu2  ;;  %v4944_v47 = vpop.f32.mrf.mxu0 }
 0x5f7   : > { %v5206_v10 = vpop.f32.mrf.mxu3  ;;  %v5119_v25 = vadd.f32 %v5118_v8, %v5031_v57  ;;  %v5032_v3 = vpop.f32.mrf.mxu1  ;;  %v4945_v37 = vadd.f32 %v4944_v47, %v11611_v21 }
 0x5f9   : > { %v11775_v43 = vadd.f32 %v5206_v10, %v5119_v25  ;;  %v11777_v58 = vadd.f32 %v5032_v3, %v4945_v37 }
 0x5fe   : > { %v11779_v40 = vpop.f32.mrf.mxu2  ;;  %v4947_v11 = vpop.f32.mrf.mxu0 }
 0x5ff   : > { %v11781_v17 = vpop.f32.mrf.mxu3  ;;  %v5035_v21 = vpop.f32.mrf.mxu1  ;;  %v4948_v63 = vadd.f32 %v4947_v11, %v11623_v53  ;;  %v9217_v53 = vld [vmem:[#allocation2 + $0xb68] sm:$0xf0] }
 0x601   : > { %v5036_v57 = vadd.f32 %v5035_v21, %v4948_v63  ;;  %4986 = vmatmul.bf16.gmra.mxu0 %v9184_v42  ;;  %v9225_v42 = vld [vmem:[#allocation2 + $0xb70] sm:$0xf0]  ;;  %v9216_v21 = vor.u32 %v10229_v52, %v9215_v27  ;;  %v9224_v63 = vor.u32 %v10230_v23, %v9223_v6  ;;  %v4475_v6 = vunpack.c.l.b16 %v4106_v38 }
 0x602   : > { %5074 = vmatmul.bf16.gmra.mxu1 %v9188_v28  ;;  %v4107_v52 = vld [vmem:[#allocation2 + $0xb90] sm:$0xff] }
 0x603   : > { %5162 = vmatmul.bf16.gmra.mxu2 %v9192_v49  ;;  %v9220_v49 = vor.u32 %v10225_v62, %v9217_v53  ;;  %v4477_v23 = vunpack.c.l.b16 %v4107_v52 }
 0x604   : > { %5250 = vmatmul.bf16.gmra.mxu3 %v9196_v13 }
 0x606   : > { %v5123_v8 = vpop.f32.mrf.mxu2  ;;  %v4949_v47 = vpop.f32.mrf.mxu0 }
 0x607   : > { %v5211_v10 = vpop.f32.mrf.mxu3  ;;  %v5124_v25 = vadd.f32 %v5123_v8, %v5036_v57  ;;  %v5037_v3 = vpop.f32.mrf.mxu1  ;;  %v4950_v37 = vadd.f32 %v4949_v47, %v11627_v34  ;;  %v9228_v57 = vor.u32 %v10226_v24, %v9225_v42  ;;  %v4478_v24 = vunpack.c.h.b16 %v4107_v52 }
 0x609   : > { %v11785_v9 = vadd.f32 %v5211_v10, %v5124_v25  ;;  %v11787_v29 = vadd.f32 %v5037_v3, %v4950_v37 }
 0x60e   : > { %v11789_v28 = vpop.f32.mrf.mxu2  ;;  %v4952_v13 = vpop.f32.mrf.mxu0 }
 0x60f   : > { %v11791_v11 = vpop.f32.mrf.mxu3  ;;  %v5040_v34 = vpop.f32.mrf.mxu1  ;;  %v4953_v8 = vadd.f32 %v4952_v13, %v11639_v46  ;;  %v4476_v46 = vunpack.c.h.b16 %v4106_v38 }
 0x611   : > { %v5041_v10 = vadd.f32 %v5040_v34, %v4953_v8  ;;  %4991 = vmatmul.bf16.gmra.mxu0 %v9216_v21  ;;  %v4604_v13 = vpack.c.b16 %v4476_v46, %v4476_v46  ;;  %v4606_v8 = vpack.c.b16 %v4478_v24, %v4478_v24  ;;  %v8783_v46 = vld [vmem:[#allocation2 + $0x7d8] sm:$0xf]  ;;  %v8785_v24 = vld [vmem:[#allocation2 + $0x7f8] sm:$0xf0] }
 0x612   : > { %5079 = vmatmul.bf16.gmra.mxu1 %v9220_v49  ;;  %v4603_v49 = vpack.c.b16 %v4475_v6, %v4475_v6 }
 0x613   : > { %5167 = vmatmul.bf16.gmra.mxu2 %v9224_v63 }
 0x614   : > { %5255 = vmatmul.bf16.gmra.mxu3 %v9228_v57  ;;  %v4605_v57 = vpack.c.b16 %v4477_v23, %v4477_v23  ;;  %v10115_v23 = vld [vmem:[#allocation2 + $0x7dc] sm:$0xf] }
 0x616   : > { %v5128_v25 = vpop.f32.mrf.mxu2  ;;  %v4954_v37 = vpop.f32.mrf.mxu0 }
 0x617   : > { %v5216_v47 = vpop.f32.mrf.mxu3  ;;  %v5129_v3 = vadd.f32 %v5128_v25, %v5041_v10  ;;  %v5042_v33 = vpop.f32.mrf.mxu1  ;;  %v4955_v27 = vadd.f32 %v4954_v37, %v11643_v36  ;;  %v10233_v36 = vld [vmem:[%s12611_s2 + $0x48] sm:$0xff] }
 0x618   : > { %5544 = vmatpush.bf16.msra.mxu2 %v10233_v36 }
 0x619   : > { %v11795_v62 = vadd.f32 %v5216_v47, %v5129_v3  ;;  %v11797_v53 = vadd.f32 %v5042_v33, %v4955_v27 }
 0x61e   : > { %v11799_v42 = vpop.f32.mrf.mxu2  ;;  %v4957_v34 = vpop.f32.mrf.mxu0 }
 0x61f   : > { %v11801_v21 = vpop.f32.mrf.mxu3  ;;  %v5045_v63 = vpop.f32.mrf.mxu1  ;;  %v4958_v33 = vadd.f32 %v4957_v34, %v11653_v55  ;;  %v10119_v55 = vld [vmem:[#allocation2 + $0x7f4] sm:$0xf0] }
 0x620   : > { %v8784_v34 = vor.u32 %v10119_v55, %v8783_v46  ;;  %v10570_v46 = vld [vmem:[%s10681_s24 + $0x1b0] sm:$0xff] }
 0x621   : > { %v5046_v38 = vadd.f32 %v5045_v63, %v4958_v33  ;;  %4996 = vmatmul.bf16.gmra.mxu0 %v4603_v49  ;;  %v8788_v63 = vor.u32 %v10115_v23, %v8785_v24  ;;  %v10567_v33 = vld [vmem:[%s10681_s24 + $0x178] sm:$0xff] }
 0x622   : > { %5084 = vmatmul.bf16.gmra.mxu1 %v4604_v13  ;;  %v8815_v24 = vld [vmem:[#allocation2 + $0x818] sm:$0xf] }
 0x623   : > { %5172 = vmatmul.bf16.gmra.mxu2 %v4605_v57 }
 0x624   : > { %5260 = vmatmul.bf16.gmra.mxu3 %v4606_v8 }
 0x626   : > { %v5133_v10 = vpop.f32.mrf.mxu2  ;;  %v4959_v3 = vpop.f32.mrf.mxu0 }
 0x627   : > { %v5221_v25 = vpop.f32.mrf.mxu3  ;;  %v5134_v47 = vadd.f32 %v5133_v10, %v5046_v38  ;;  %v5047_v37 = vpop.f32.mrf.mxu1  ;;  %v4960_v27 = vadd.f32 %v4959_v3, %v11657_v60  ;;  %v10568_v38 = vld [vmem:[%s10681_s24 + $0x1b8] sm:$0xff] }
 0x629   : > { %v11808_v52 = vadd.f32 %v5221_v25, %v5134_v47  ;;  %v11810_v6 = vadd.f32 %v5047_v37, %v4960_v27  ;;  %v10569_v27 = vld [vmem:[%s10681_s24 + $0x170] sm:$0xff] }
 0x62e   : > { %v11812_v49 = vpop.f32.mrf.mxu2  ;;  %v4962_v57 = vpop.f32.mrf.mxu0 }
 0x62f   : > { %v11814_v13 = vpop.f32.mrf.mxu3  ;;  %v5050_v8 = vpop.f32.mrf.mxu1  ;;  %v4963_v60 = vadd.f32 %v4962_v57, %v11664_v0  ;;  %v8817_v57 = vld [vmem:[#allocation2 + $0x838] sm:$0xf0] }
 0x631   : > { %v5051_v36 = vadd.f32 %v5050_v8, %v4963_v60  ;;  %5273 = vmatmul.bf16.vlgmr.msra.gmra.mxu0 %v8784_v34  ;;  %v10127_v34 = vld [vmem:[#allocation2 + $0x834] sm:$0xf0]  ;;  %v10571_v8 = vld [vmem:[%s10681_s24 + $0x168] sm:$0xff] }
 0x632   : > { %5361 = vmatmul.bf16.vlgmr.msra.gmra.mxu1 %v8788_v63  ;;  %6850 = vmatpush.bf16.msra.mxu0 %v10567_v33  ;;  %v10123_v63 = vld [vmem:[#allocation2 + $0x81c] sm:$0xf]  ;;  %v10572_v60 = vld [vmem:[%s10681_s24 + $0x1a8] sm:$0xff] }
 0x633   : > { %6938 = vmatpush.bf16.msra.mxu1 %v10568_v38  ;;  %v8820_v38 = vor.u32 %v10123_v63, %v8817_v57 }
 0x636   : > { %v5138_v10 = vpop.f32.mrf.mxu2  ;;  %v4964_v3 = vpop.f32.mrf.mxu0  ;;  %6851 = vmatpush.bf16.msra.mxu0 %v10569_v27 }
 0x637   : > { %v5226_v25 = vpop.f32.mrf.mxu3  ;;  %v5139_v47 = vadd.f32 %v5138_v10, %v5051_v36  ;;  %v5052_v37 = vpop.f32.mrf.mxu1  ;;  %6939 = vmatpush.bf16.msra.mxu1 %v10570_v46  ;;  %v4965_v0 = vadd.f32 %v4964_v3, %v11674_v54  ;;  %v8816_v54 = vor.u32 %v10127_v34, %v8815_v24  ;;  %v10574_v3 = vld [vmem:[%s10681_s24 + $0x1a0] sm:$0xff]  ;;  %v10575_v46 = vld [vmem:[%s10681_s24 + $0x158] sm:$0xff] }
 0x639   : > { %v11822_v55 = vadd.f32 %v5226_v25, %v5139_v47  ;;  %v11824_v23 = vadd.f32 %v5052_v37, %v4965_v0  ;;  %v10573_v47 = vld [vmem:[%s10681_s24 + $0x160] sm:$0xff]  ;;  %v10576_v0 = vld [vmem:[%s10681_s24 + $0x198] sm:$0xff] }
 0x63a   : > { %6852 = vmatpush.bf16.msra.mxu0 %v10571_v8 }
 0x63b   : > { %6940 = vmatpush.bf16.msra.mxu1 %v10572_v60  ;;  %v10577_v60 = vld [vmem:[%s10681_s24 + $0x150] sm:$0xff] }
 0x63e   : > { %v11828_v36 = vpop.f32.mrf.mxu2  ;;  %v4967_v10 = vpop.f32.mrf.mxu0  ;;  %6853 = vmatpush.bf16.msra.mxu0 %v10573_v47  ;;  %v10578_v47 = vld [vmem:[%s10681_s24 + $0x190] sm:$0xff] }
 0x63f   : > { %v11830_v33 = vpop.f32.mrf.mxu3  ;;  %v5055_v25 = vpop.f32.mrf.mxu1  ;;  %6941 = vmatpush.bf16.msra.mxu1 %v10574_v3  ;;  %v4968_v37 = vadd.f32 %v4967_v10, %v11684_v59  ;;  %v10131_v3 = vld [vmem:[#allocation2 + $0x85c] sm:$0xf] }
 0x641   : > { %v5056_v27 = vadd.f32 %v5055_v25, %v4968_v37  ;;  %5278 = vmatmul.bf16.gmra.mxu0 %v8816_v54  ;;  %v10135_v25 = vld [vmem:[#allocation2 + $0x874] sm:$0xf0]  ;;  %v8849_v37 = vld [vmem:[#allocation2 + $0x878] sm:$0xf0] }
 0x642   : > { %5366 = vmatmul.bf16.gmra.mxu1 %v8820_v38  ;;  %6854 = vmatpush.bf16.msra.mxu0 %v10575_v46  ;;  %v8847_v38 = vld [vmem:[#allocation2 + $0x858] sm:$0xf]  ;;  %v10580_v46 = vld [vmem:[%s10681_s24 + $0x188] sm:$0xff] }
 0x643   : > { %6942 = vmatpush.bf16.msra.mxu1 %v10576_v0 }
 0x646   : > { %v5143_v8 = vpop.f32.mrf.mxu2  ;;  %v4969_v63 = vpop.f32.mrf.mxu0  ;;  %6855 = vmatpush.bf16.msra.mxu0 %v10577_v60  ;;  %v8848_v60 = vor.u32 %v10135_v25, %v8847_v38 }
 0x647   : > { %v5231_v24 = vpop.f32.mrf.mxu3  ;;  %v5144_v34 = vadd.f32 %v5143_v8, %v5056_v27  ;;  %v5057_v57 = vpop.f32.mrf.mxu1  ;;  %6943 = vmatpush.bf16.msra.mxu1 %v10578_v47  ;;  %v4970_v59 = vadd.f32 %v4969_v63, %v11694_v56  ;;  %v10579_v27 = vld [vmem:[%s10681_s24 + $0x148] sm:$0xff]  ;;  %v8852_v56 = vor.u32 %v10131_v3, %v8849_v37  ;;  %v10581_v63 = vld [vmem:[%s10681_s24 + $0x140] sm:$0xff]  ;;  %v8879_v3 = vld [vmem:[#allocation2 + $0x898] sm:$0xf] }
 0x648   : > { %v10143_v37 = vld [vmem:[#allocation2 + $0x8b4] sm:$0xf0] }
 0x649   : > { %v11840_v10 = vadd.f32 %v5231_v24, %v5144_v34  ;;  %v11842_v54 = vadd.f32 %v5057_v57, %v4970_v59  ;;  %v10582_v57 = vld [vmem:[%s10681_s24 + $0x180] sm:$0xff] }
 0x64a   : > { %6856 = vmatpush.bf16.msra.mxu0 %v10579_v27 }
 0x64b   : > { %6944 = vmatpush.bf16.msra.mxu1 %v10580_v46 }
 0x64e   : > { %v11846_v0 = vpop.f32.mrf.mxu2  ;;  %v4972_v24 = vpop.f32.mrf.mxu0  ;;  %6857 = vmatpush.bf16.msra.mxu0 %v10581_v63  ;;  %v10139_v63 = vld [vmem:[#allocation2 + $0x89c] sm:$0xf] }
 0x64f   : > { %v11848_v8 = vpop.f32.mrf.mxu3  ;;  %v5060_v34 = vpop.f32.mrf.mxu1  ;;  %6945 = vmatpush.bf16.msra.mxu1 %v10582_v57  ;;  %v4973_v47 = vadd.f32 %v4972_v24, %v11701_v50  ;;  %v8881_v57 = vld [vmem:[#allocation2 + $0x8b8] sm:$0xf0] }
 0x650   : > { %v8884_v24 = vor.u32 %v10139_v63, %v8881_v57 }
 0x651   : > { %v5061_v59 = vadd.f32 %v5060_v34, %v4973_v47  ;;  %5283 = vmatmul.bf16.gmra.mxu0 %v8848_v60 }
 0x652   : > { %5371 = vmatmul.bf16.gmra.mxu1 %v8852_v56  ;;  %v8880_v56 = vor.u32 %v10143_v37, %v8879_v3  ;;  %v10584_v37 = vld [vmem:[%s10681_s24 + $0xf0] sm:$0xff] }
 0x656   : > { %v5148_v27 = vpop.f32.mrf.mxu2  ;;  %v4974_v15 = vpop.f32.mrf.mxu0 }
 0x657   : > { %v5236_v39 = vpop.f32.mrf.mxu3  ;;  %v5149_v46 = vadd.f32 %v5148_v27, %v5061_v59  ;;  %v5062_v16 = vpop.f32.mrf.mxu1  ;;  %v4975_v30 = vadd.f32 %v4974_v15, %v11705_v7  ;;  %v10232_v15 = vld [vmem:[%s12611_s2 + $0x40] sm:$0xff] }
 0x658   : > { %5545 = vmatpush.bf16.msra.mxu2 %v10232_v15  ;;  %v10585_v15 = vld [vmem:[%s10681_s24 + $0xe8] sm:$0xff] }
 0x659   : > { %v11854_v38 = vadd.f32 %v5236_v39, %v5149_v46  ;;  %v11856_v25 = vadd.f32 %v5062_v16, %v4975_v30  ;;  %v10583_v39 = vld [vmem:[%s10681_s24 + $0xf8] sm:$0xff] }
 0x65c   : > { %6674 = vmatpush.bf16.msrb.mxu2 %v10583_v39 }
 0x65e   : > { %v11858_v50 = vpop.f32.mrf.mxu2  ;;  %v4977_v34 = vpop.f32.mrf.mxu0 }
 0x65f   : > { %v11860_v60 = vpop.f32.mrf.mxu3  ;;  %v5065_v47 = vpop.f32.mrf.mxu1  ;;  %v4978_v30 = vadd.f32 %v4977_v34, %v11709_v35  ;;  %v8911_v34 = vld [vmem:[#allocation2 + $0x8d8] sm:$0xf] }
 0x660   : > { %6675 = vmatpush.bf16.msrb.mxu2 %v10584_v37 }
 0x661   : > { %v5066_v16 = vadd.f32 %v5065_v47, %v4978_v30  ;;  %5288 = vmatmul.bf16.gmra.mxu0 %v8880_v56  ;;  %v10151_v56 = vld [vmem:[#allocation2 + $0x8f4] sm:$0xf0]  ;;  %v8913_v47 = vld [vmem:[#allocation2 + $0x8f8] sm:$0xf0] }
 0x662   : > { %5376 = vmatmul.bf16.gmra.mxu1 %v8884_v24  ;;  %v10147_v24 = vld [vmem:[#allocation2 + $0x8dc] sm:$0xf]  ;;  %v8912_v39 = vor.u32 %v10151_v56, %v8911_v34  ;;  %v10588_v34 = vld [vmem:[%s10681_s24 + $0xd0] sm:$0xff] }
 0x664   : > { %6676 = vmatpush.bf16.msrb.mxu2 %v10585_v15 }
 0x666   : > { %v5153_v7 = vpop.f32.mrf.mxu2  ;;  %v4979_v46 = vpop.f32.mrf.mxu0 }
 0x667   : > { %v5241_v59 = vpop.f32.mrf.mxu3  ;;  %v5154_v27 = vadd.f32 %v5153_v7, %v5066_v16  ;;  %v5067_v3 = vpop.f32.mrf.mxu1  ;;  %v4980_v63 = vadd.f32 %v4979_v46, %v11713_v48  ;;  %v8916_v7 = vor.u32 %v10147_v24, %v8913_v47 }
 0x669   : > { %v11869_v57 = vadd.f32 %v5241_v59, %v5154_v27  ;;  %v11871_v35 = vadd.f32 %v5067_v3, %v4980_v63  ;;  %v10586_v59 = vld [vmem:[%s10681_s24 + $0xe0] sm:$0xff]  ;;  %v10587_v3 = vld [vmem:[%s10681_s24 + $0xd8] sm:$0xff] }
 0x66a   : > { %6677 = vmatpush.bf16.msrb.mxu2 %v10586_v59 }
 0x66b   : > { %12775 = vst [vmem:[#allocation33_spill] sm:$0xff] %v11869_v57 }
 0x66c   : > { %12776 = vst [vmem:[#allocation34_spill] sm:$0xff] %v11871_v35  ;;  %v10590_v35 = vld [vmem:[%s10681_s24 + $0xc0] sm:$0xff] }
 0x66e   : > { %v11874_v30 = vpop.f32.mrf.mxu2  ;;  %v4982_v37 = vpop.f32.mrf.mxu0  ;;  %6678 = vmatpush.bf16.msrb.mxu2 %v10587_v3 }
 0x66f   : > { %12777 = vst [vmem:[#allocation35_spill] sm:$0xff] %v11874_v30  ;;  %v11876_v16 = vpop.f32.mrf.mxu3  ;;  %v5070_v48 = vpop.f32.mrf.mxu1  ;;  %v4983_v27 = vadd.f32 %v4982_v37, %v11717_v31  ;;  %v8943_v31 = vld [vmem:[#allocation2 + $0x918] sm:$0xf]  ;;  %v8945_v37 = vld [vmem:[#allocation2 + $0x938] sm:$0xf0] }
 0x670   : > { %12778 = vst [vmem:[#allocation36_spill] sm:$0xff] %v11876_v16 }
 0x671   : > { %v5071_v46 = vadd.f32 %v5070_v48, %v4983_v27  ;;  %5293 = vmatmul.bf16.gmra.mxu0 %v8912_v39  ;;  %v10159_v39 = vld [vmem:[#allocation2 + $0x934] sm:$0xf0]  ;;  %v10589_v48 = vld [vmem:[%s10681_s24 + $0xc8] sm:$0xff] }
 0x672   : > { %5381 = vmatmul.bf16.gmra.mxu1 %v8916_v7  ;;  %6679 = vmatpush.bf16.msrb.mxu2 %v10588_v34  ;;  %v10155_v7 = vld [vmem:[#allocation2 + $0x91c] sm:$0xf] }
 0x673   : > { %v8948_v3 = vor.u32 %v10155_v7, %v8945_v37  ;;  %v10167_v7 = vld [vmem:[#allocation2 + $0x974] sm:$0xf0]  ;;  %v10163_v37 = vld [vmem:[#allocation2 + $0x95c] sm:$0xf] }
 0x676   : > { %v5158_v63 = vpop.f32.mrf.mxu2  ;;  %v4984_v30 = vpop.f32.mrf.mxu0  ;;  %6680 = vmatpush.bf16.msrb.mxu2 %v10589_v48 }
 0x677   : > { %v5246_v15 = vpop.f32.mrf.mxu3  ;;  %v5159_v57 = vadd.f32 %v5158_v63, %v5071_v46  ;;  %v5072_v16 = vpop.f32.mrf.mxu1  ;;  %v4985_v56 = vadd.f32 %v4984_v30, %v11721_v41  ;;  %v8944_v46 = vor.u32 %v10159_v39, %v8943_v31  ;;  %v8975_v39 = vld [vmem:[#allocation2 + $0x958] sm:$0xf] }
 0x679   : > { %v11883_v24 = vadd.f32 %v5246_v15, %v5159_v57  ;;  %v11885_v47 = vadd.f32 %v5072_v16, %v4985_v56 }
 0x67a   : > { %6681 = vmatpush.bf16.msrb.mxu2 %v10590_v35  ;;  %v8977_v35 = vld [vmem:[#allocation2 + $0x978] sm:$0xf0] }
 0x67b   : > { %12779 = vst [vmem:[#allocation37_spill] sm:$0xff] %v11883_v24 }
 0x67e   : > { %v11888_v59 = vpop.f32.mrf.mxu2  ;;  %v4987_v63 = vpop.f32.mrf.mxu0 }
 0x67f   : > { %12780 = vst [vmem:[#allocation38_spill] sm:$0xff] %v11888_v59  ;;  %v11890_v27 = vpop.f32.mrf.mxu3  ;;  %v5075_v34 = vpop.f32.mrf.mxu1  ;;  %v4988_v41 = vadd.f32 %v4987_v63, %v11725_v61 }
 0x680   : > { %12781 = vst [vmem:[#allocation39_spill] sm:$0xff] %v11890_v27 }
 0x681   : > { %v5076_v57 = vadd.f32 %v5075_v34, %v4988_v41  ;;  %5298 = vmatmul.bf16.gmra.mxu0 %v8944_v46  ;;  %v8976_v46 = vor.u32 %v10167_v7, %v8975_v39  ;;  %v9007_v39 = vld [vmem:[#allocation2 + $0x998] sm:$0xf] }
 0x682   : > { %5386 = vmatmul.bf16.gmra.mxu1 %v8948_v3  ;;  %v8980_v3 = vor.u32 %v10163_v37, %v8977_v35  ;;  %v10175_v7 = vld [vmem:[#allocation2 + $0x9b4] sm:$0xf0]  ;;  %v10171_v37 = vld [vmem:[#allocation2 + $0x99c] sm:$0xf] }
 0x683   : > { %v9009_v35 = vld [vmem:[#allocation2 + $0x9b8] sm:$0xf0] }
 0x686   : > { %v5163_v30 = vpop.f32.mrf.mxu2  ;;  %v4989_v56 = vpop.f32.mrf.mxu0 }
 0x687   : > { %v5251_v16 = vpop.f32.mrf.mxu3  ;;  %v5164_v15 = vadd.f32 %v5163_v30, %v5076_v57  ;;  %v5077_v48 = vpop.f32.mrf.mxu1  ;;  %v4990_v24 = vadd.f32 %v4989_v56, %v11729_v32 }
 0x689   : > { %v11895_v59 = vadd.f32 %v5251_v16, %v5164_v15  ;;  %v11897_v31 = vadd.f32 %v5077_v48, %v4990_v24 }
 0x68b   : > { %12782 = vst [vmem:[#allocation40_spill] sm:$0xff] %v11895_v59 }
 0x68e   : > { %v11899_v27 = vpop.f32.mrf.mxu2  ;;  %v4992_v63 = vpop.f32.mrf.mxu0 }
 0x68f   : > { %v11901_v61 = vpop.f32.mrf.mxu3  ;;  %v5080_v34 = vpop.f32.mrf.mxu1  ;;  %v4993_v41 = vadd.f32 %v4992_v63, %v11733_v5  ;;  %v9279_v63 = vld [vmem:[#allocation2 + $0xba0] sm:$0xf] }
 0x690   : > { %12783 = vst [vmem:[#allocation41_spill] sm:$0xff] %v11901_v61 }
 0x691   : > { %v5081_v57 = vadd.f32 %v5080_v34, %v4993_v41  ;;  %5303 = vmatmul.bf16.gmra.mxu0 %v8976_v46  ;;  %v9008_v46 = vor.u32 %v10175_v7, %v9007_v39  ;;  %v10240_v34 = vld [vmem:[#allocation2 + $0xbbc] sm:$0xf0]  ;;  %v9039_v39 = vld [vmem:[#allocation2 + $0x9d8] sm:$0xf] }
 0x692   : > { %5391 = vmatmul.bf16.gmra.mxu1 %v8980_v3  ;;  %v9012_v3 = vor.u32 %v10171_v37, %v9009_v35  ;;  %v10183_v7 = vld [vmem:[#allocation2 + $0x9f4] sm:$0xf0]  ;;  %v10179_v37 = vld [vmem:[#allocation2 + $0x9dc] sm:$0xf] }
 0x693   : > { %v9041_v35 = vld [vmem:[#allocation2 + $0x9f8] sm:$0xf0] }
 0x696   : > { %v5168_v32 = vpop.f32.mrf.mxu2  ;;  %v4994_v16 = vpop.f32.mrf.mxu0 }
 0x697   : > { %v5256_v24 = vpop.f32.mrf.mxu3  ;;  %v5169_v30 = vadd.f32 %v5168_v32, %v5081_v57  ;;  %v5082_v15 = vpop.f32.mrf.mxu1  ;;  %v4995_v56 = vadd.f32 %v4994_v16, %v11737_v51  ;;  %v9280_v32 = vor.u32 %v10240_v34, %v9279_v63  ;;  %v9311_v63 = vld [vmem:[#allocation2 + $0xbe0] sm:$0xf] }
 0x698   : > { %v10248_v34 = vld [vmem:[#allocation2 + $0xbfc] sm:$0xf0] }
 0x699   : > { %v11905_v48 = vadd.f32 %v5256_v24, %v5169_v30  ;;  %v11907_v59 = vadd.f32 %v5082_v15, %v4995_v56  ;;  %6418 = vmatmul.bf16.vlgmr.msra.gmra.mxu3 %v9280_v32 }
 0x69b   : > { %12784 = vst [vmem:[#allocation42_spill] sm:$0xff] %v11905_v48 }
 0x69c   : > { %12785 = vst [vmem:[#allocation43_spill] sm:$0xff] %v11907_v59  ;;  %v9044_v59 = vor.u32 %v10179_v37, %v9041_v35 }
 0x69e   : > { %v11909_v61 = vpop.f32.mrf.mxu2  ;;  %v4997_v41 = vpop.f32.mrf.mxu0 }
 0x69f   : > { %12786 = vst [vmem:[#allocation44_spill] sm:$0xff] %v11909_v61  ;;  %v11911_v5 = vpop.f32.mrf.mxu3  ;;  %v5085_v57 = vpop.f32.mrf.mxu1  ;;  %v4998_v51 = vadd.f32 %v4997_v41, %v11744_v18 }
 0x6a0   : > { %12787 = vst [vmem:[#allocation45_spill] sm:$0xff] %v11911_v5  ;;  %v9040_v5 = vor.u32 %v10183_v7, %v9039_v39  ;;  %v10187_v39 = vld [vmem:[#allocation2 + $0xa1c] sm:$0xf] }
 0x6a1   : > { %v5086_v24 = vadd.f32 %v5085_v57, %v4998_v51  ;;  %5308 = vmatmul.bf16.gmra.mxu0 %v9008_v46  ;;  %v9073_v7 = vld [vmem:[#allocation2 + $0xa38] sm:$0xf0] }
 0x6a2   : > { %5396 = vmatmul.bf16.gmra.mxu1 %v9012_v3  ;;  %v9312_v3 = vor.u32 %v10248_v34, %v9311_v63 }
 0x6a6   : > { %v5173_v30 = vpop.f32.mrf.mxu2  ;;  %v4999_v56 = vpop.f32.mrf.mxu0 }
 0x6a7   : > { %v5261_v16 = vpop.f32.mrf.mxu3  ;;  %v5174_v15 = vadd.f32 %v5173_v30, %v5086_v24  ;;  %v5087_v48 = vpop.f32.mrf.mxu1  ;;  %v10191_v56 = vld [vmem:[#allocation2 + $0xa34] sm:$0xf0] }
 0x6a9   : > { %v11914_v61 = vadd.f32 %v5261_v16, %v5174_v15  ;;  %6423 = vmatmul.bf16.gmra.mxu3 %v9312_v3  ;;  %v9071_v15 = vld [vmem:[#allocation2 + $0xa18] sm:$0xf] }
 0x6aa   : > { %v9072_v35 = vor.u32 %v10191_v56, %v9071_v15  ;;  %v10195_v15 = vld [vmem:[#allocation2 + $0xa5c] sm:$0xf] }
 0x6ab   : > { %v9105_v56 = vld [vmem:[#allocation2 + $0xa78] sm:$0xf0] }
 0x6ae   : > { %v5175_v18 = vpop.f32.mrf.mxu2  ;;  %v5274_v57 = vpop.f32.mrf.mxu0 }
 0x6af   : > { %v5263_v41 = vpop.f32.mrf.mxu3  ;;  %v5362_v46 = vpop.f32.mrf.mxu1  ;;  %v5275_v48 = vadd.f32 %v5274_v57, %v11748_v1  ;;  %v10256_v1 = vld [vmem:[#allocation2 + $0xc3c] sm:$0xf0] }
 0x6b0   : > { %v10592_v41 = vld [vmem:[%s10681_s24 + $0x1f0] sm:$0xff] }
 0x6b1   : > { %5313 = vmatmul.bf16.gmra.mxu0 %v9040_v5  ;;  %v5363_v30 = vadd.f32 %v5362_v46, %v5275_v48  ;;  %v9076_v5 = vor.u32 %v10187_v39, %v9073_v7  ;;  %v10593_v48 = vld [vmem:[%s10681_s24 + $0x1e8] sm:$0xff]  ;;  %v10594_v39 = vld [vmem:[%s10681_s24 + $0x1e0] sm:$0xff] }
 0x6b2   : > { %5401 = vmatmul.bf16.gmra.mxu1 %v9044_v59  ;;  %v9343_v59 = vld [vmem:[#allocation2 + $0xc20] sm:$0xf] }
 0x6b3   : > { %v9344_v18 = vor.u32 %v10256_v1, %v9343_v59 }
 0x6b6   : > { %v5276_v32 = vpop.f32.mrf.mxu0 }
 0x6b7   : > { %v5364_v51 = vpop.f32.mrf.mxu1  ;;  %v5277_v24 = vadd.f32 %v5276_v32, %v11751_v20  ;;  %v10591_v20 = vld [vmem:[%s10681_s24 + $0x1f8] sm:$0xff] }
 0x6b9   : > { %v5365_v16 = vadd.f32 %v5364_v51, %v5277_v24  ;;  %6428 = vmatmul.bf16.gmra.mxu3 %v9344_v18 }
 0x6bb   : > { %v5441_v37 = vpack.c.bf16 %v5365_v16, %v5363_v30  ;;  %v9103_v30 = vld [vmem:[#allocation2 + $0xa58] sm:$0xf] }
 0x6bc   : > { %v10199_v16 = vld [vmem:[#allocation2 + $0xa74] sm:$0xf0] }
 0x6bd   : > { %9261 = vmatmul.msk.bf16.vlgmr.msra.gmra.mxu2 %vm3687_vm0, %v5441_v37  ;;  %v9108_v37 = vor.u32 %v10195_v15, %v9105_v56 }
 0x6be   : > { %v5279_v63 = vpop.f32.mrf.mxu0  ;;  %7026 = vmatpush.bf16.msra.mxu2 %v10591_v20 }
 0x6bf   : > { %v5367_v34 = vpop.f32.mrf.mxu1  ;;  %v5280_v57 = vadd.f32 %v5279_v63, %v11754_v22  ;;  %v9104_v22 = vor.u32 %v10199_v16, %v9103_v30  ;;  %v10595_v63 = vld [vmem:[%s10681_s24 + $0x1d8] sm:$0xff]  ;;  %v10598_v16 = vld [vmem:[%s10681_s24 + $0x1c0] sm:$0xff] }
 0x6c0   : > { %v9137_v30 = vld [vmem:[#allocation2 + $0xab8] sm:$0xf0] }
 0x6c1   : > { %5318 = vmatmul.bf16.gmra.mxu0 %v9072_v35  ;;  %v5368_v51 = vadd.f32 %v5367_v34, %v5280_v57  ;;  %v9375_v35 = vld [vmem:[#allocation2 + $0xc60] sm:$0xf]  ;;  %v10596_v34 = vld [vmem:[%s10681_s24 + $0x1d0] sm:$0xff]  ;;  %v10597_v57 = vld [vmem:[%s10681_s24 + $0x1c8] sm:$0xff] }
 0x6c2   : > { %5406 = vmatmul.bf16.gmra.mxu1 %v9076_v5  ;;  %7027 = vmatpush.bf16.msra.mxu2 %v10592_v41  ;;  %v10264_v5 = vld [vmem:[#allocation2 + $0xc7c] sm:$0xf0] }
 0x6c3   : > { %v9376_v1 = vor.u32 %v10264_v5, %v9375_v35 }
 0x6c6   : > { %v5281_v46 = vpop.f32.mrf.mxu0  ;;  %7028 = vmatpush.bf16.msra.mxu2 %v10593_v48 }
 0x6c7   : > { %v5369_v3 = vpop.f32.mrf.mxu1  ;;  %v5282_v32 = vadd.f32 %v5281_v46, %v11757_v26 }
 0x6c9   : > { %v5370_v24 = vadd.f32 %v5369_v3, %v5282_v32  ;;  %6433 = vmatmul.bf16.gmra.mxu3 %v9376_v1  ;;  %v9135_v32 = vld [vmem:[#allocation2 + $0xa98] sm:$0xf] }
 0x6ca   : > { %7029 = vmatpush.bf16.msra.mxu2 %v10594_v39 }
 0x6cb   : > { %v5442_v7 = vpack.c.bf16 %v5370_v24, %v5368_v51  ;;  %v10207_v51 = vld [vmem:[#allocation2 + $0xab4] sm:$0xf0]  ;;  %v10203_v24 = vld [vmem:[#allocation2 + $0xa9c] sm:$0xf] }
 0x6cc   : > { %v9136_v56 = vor.u32 %v10207_v51, %v9135_v32  ;;  %v9140_v39 = vor.u32 %v10203_v24, %v9137_v30  ;;  %v10280_v32 = vld [vmem:[#allocation2 + $0xcfc] sm:$0xf0] }
 0x6cd   : > { %9262 = vmatmul.msk.bf16.gmra.mxu2 %vm3687_vm0, %v5442_v7  ;;  %v10272_v7 = vld [vmem:[#allocation2 + $0xcbc] sm:$0xf0] }
 0x6ce   : > { %v5284_v59 = vpop.f32.mrf.mxu0  ;;  %7030 = vmatpush.bf16.msra.mxu2 %v10595_v63 }
 0x6cf   : > { %v5372_v26 = vpop.f32.mrf.mxu1  ;;  %v5285_v18 = vadd.f32 %v5284_v59, %v11760_v2  ;;  %v9407_v2 = vld [vmem:[#allocation2 + $0xca0] sm:$0xf] }
 0x6d0   : > { %v9408_v35 = vor.u32 %v10272_v7, %v9407_v2 }
 0x6d1   : > { %5323 = vmatmul.bf16.gmra.mxu0 %v9104_v22  ;;  %v5373_v3 = vadd.f32 %v5372_v26, %v5285_v18  ;;  %v10215_v18 = vld [vmem:[#allocation2 + $0xaf4] sm:$0xf0] }
 0x6d2   : > { %5411 = vmatmul.bf16.gmra.mxu1 %v9108_v37  ;;  %7031 = vmatpush.bf16.msra.mxu2 %v10596_v34  ;;  %v9167_v34 = vld [vmem:[#allocation2 + $0xad8] sm:$0xf] }
 0x6d6   : > { %v5286_v20 = vpop.f32.mrf.mxu0  ;;  %7032 = vmatpush.bf16.msra.mxu2 %v10597_v57 }
 0x6d7   : > { %v5374_v41 = vpop.f32.mrf.mxu1  ;;  %v5287_v46 = vadd.f32 %v5286_v20, %v11766_v12  ;;  %v10211_v20 = vld [vmem:[#allocation2 + $0xadc] sm:$0xf] }
 0x6d9   : > { %v5375_v48 = vadd.f32 %v5374_v41, %v5287_v46  ;;  %6438 = vmatmul.bf16.gmra.mxu3 %v9408_v35  ;;  %v9169_v41 = vld [vmem:[#allocation2 + $0xaf8] sm:$0xf0]  ;;  %v9168_v46 = vor.u32 %v10215_v18, %v9167_v34 }
 0x6da   : > { %7033 = vmatpush.bf16.msra.mxu2 %v10598_v16  ;;  %v10219_v35 = vld [vmem:[#allocation2 + $0xb1c] sm:$0xf] }
 0x6db   : > { %v5443_v15 = vpack.c.bf16 %v5375_v48, %v5373_v3  ;;  %v9172_v3 = vor.u32 %v10211_v20, %v9169_v41  ;;  %v9439_v48 = vld [vmem:[#allocation2 + $0xce0] sm:$0xf] }
 0x6dd   : > { %9263 = vmatmul.msk.bf16.gmra.mxu2 %vm3687_vm0, %v5443_v15 }
 0x6de   : > { %v5289_v22 = vpop.f32.mrf.mxu0 }
 0x6df   : > { %v5377_v37 = vpop.f32.mrf.mxu1  ;;  %v5290_v12 = vadd.f32 %v5289_v22, %v11769_v14  ;;  %v9440_v14 = vor.u32 %v10280_v32, %v9439_v48  ;;  %v9199_v22 = vld [vmem:[#allocation2 + $0xb18] sm:$0xf] }
 0x6e0   : > { %v9231_v48 = vld [vmem:[#allocation2 + $0xb58] sm:$0xf] }
 0x6e1   : > { %5328 = vmatmul.bf16.gmra.mxu0 %v9136_v56  ;;  %v5378_v1 = vadd.f32 %v5377_v37, %v5290_v12  ;;  %v10223_v37 = vld [vmem:[#allocation2 + $0xb34] sm:$0xf0]  ;;  %v9201_v12 = vld [vmem:[#allocation2 + $0xb38] sm:$0xf0] }
 0x6e2   : > { %5416 = vmatmul.bf16.gmra.mxu1 %v9140_v39  ;;  %v10231_v32 = vld [vmem:[#allocation2 + $0xb74] sm:$0xf0] }
 0x6e6   : > { %v5291_v5 = vpop.f32.mrf.mxu0 }
 0x6e7   : > { %v5379_v59 = vpop.f32.mrf.mxu1  ;;  %v5292_v26 = vadd.f32 %v5291_v5, %v11772_v19  ;;  %v5121_v19 = vadd.f32 %v11779_v40, %v11777_v58  ;;  %v9204_v58 = vor.u32 %v10219_v35, %v9201_v12  ;;  %v9471_v40 = vld [vmem:[#allocation2 + $0xd20] sm:$0xf] }
 0x6e9   : > { %v5380_v63 = vadd.f32 %v5379_v59, %v5292_v26  ;;  %6443 = vmatmul.bf16.gmra.mxu3 %v9440_v14  ;;  %v5209_v30 = vadd.f32 %v11781_v17, %v5121_v19  ;;  %v9200_v59 = vor.u32 %v10223_v37, %v9199_v22  ;;  %v10288_v26 = vld [vmem:[#allocation2 + $0xd3c] sm:$0xf0]  ;;  %v9232_v19 = vor.u32 %v10231_v32, %v9231_v48  ;;  %v4108_v22 = vld [vmem:[#allocation2 + $0xb98] sm:$0xff]  ;;  %v9281_v48 = vld [vmem:[#allocation2 + $0xbc0] sm:$0xf0] }
 0x6ea   : > { %v9287_v32 = vld [vmem:[#allocation2 + $0xba8] sm:$0xf] }
 0x6eb   : > { %v5444_v57 = vpack.c.bf16 %v5380_v63, %v5378_v1  ;;  %v9472_v63 = vor.u32 %v10288_v26, %v9471_v40 }
 0x6ed   : > { %9264 = vmatmul.msk.bf16.gmra.mxu2 %vm3687_vm0, %v5444_v57 }
 0x6ee   : > { %v5294_v51 = vpop.f32.mrf.mxu0 }
 0x6ef   : > { %v5382_v24 = vpop.f32.mrf.mxu1  ;;  %v5295_v16 = vadd.f32 %v5294_v51, %v11775_v43  ;;  %v5126_v43 = vadd.f32 %v11789_v28, %v11787_v29  ;;  %v10227_v51 = vld [vmem:[#allocation2 + $0xb5c] sm:$0xf]  ;;  %v9503_v28 = vld [vmem:[#allocation2 + $0xd60] sm:$0xf] }
 0x6f1   : > { %5333 = vmatmul.bf16.gmra.mxu0 %v9168_v46  ;;  %v5383_v2 = vadd.f32 %v5382_v24, %v5295_v16  ;;  %v5214_v34 = vadd.f32 %v11791_v11, %v5126_v43  ;;  %v9233_v24 = vld [vmem:[#allocation2 + $0xb78] sm:$0xf0] }
 0x6f2   : > { %5421 = vmatmul.bf16.gmra.mxu1 %v9172_v3  ;;  %v9236_v29 = vor.u32 %v10227_v51, %v9233_v24  ;;  %v10241_v51 = vld [vmem:[#allocation2 + $0xbc4] sm:$0xf0] }
 0x6f6   : > { %v5296_v15 = vpop.f32.mrf.mxu0 }
 0x6f7   : > { %v5384_v56 = vpop.f32.mrf.mxu1  ;;  %v5297_v39 = vadd.f32 %v5296_v15, %v5209_v30  ;;  %v10296_v30 = vld [vmem:[#allocation2 + $0xd7c] sm:$0xf0] }
 0x6f8   : > { %v9504_v15 = vor.u32 %v10296_v30, %v9503_v28  ;;  %v5141_v30 = vadd.f32 %v11828_v36, %v11824_v23 }
 0x6f9   : > { %v5385_v7 = vadd.f32 %v5384_v56, %v5297_v39  ;;  %6448 = vmatmul.bf16.gmra.mxu3 %v9472_v63 }
 0x6fb   : > { %v5445_v5 = vpack.c.bf16 %v5385_v7, %v5383_v2 }
 0x6fd   : > { %9265 = vmatmul.msk.bf16.gmra.mxu2 %vm3687_vm0, %v5445_v5  ;;  %v4479_v5 = vunpack.c.l.b16 %v4108_v22 }
 0x6fe   : > { %v5299_v1 = vpop.f32.mrf.mxu0 }
 0x6ff   : > { %v5387_v17 = vpop.f32.mrf.mxu1  ;;  %v5300_v18 = vadd.f32 %v5299_v1, %v11785_v9  ;;  %v5131_v9 = vadd.f32 %v11799_v42, %v11797_v53  ;;  %v4607_v40 = vpack.c.b16 %v4479_v5, %v4479_v5  ;;  %v9535_v53 = vld [vmem:[#allocation2 + $0xda0] sm:$0xf] }
 0x700   : > { %v10304_v42 = vld [vmem:[#allocation2 + $0xdbc] sm:$0xf0] }
 0x701   : > { %5338 = vmatmul.bf16.gmra.mxu0 %v9200_v59  ;;  %v5388_v46 = vadd.f32 %v5387_v17, %v5300_v18  ;;  %v5219_v56 = vadd.f32 %v11801_v21, %v5131_v9  ;;  %v4480_v59 = vunpack.c.h.b16 %v4108_v22  ;;  %v9536_v21 = vor.u32 %v10304_v42, %v9535_v53  ;;  %v10244_v22 = vld [vmem:[#allocation2 + $0xbe4] sm:$0xf] }
 0x702   : > { %5426 = vmatmul.bf16.gmra.mxu1 %v9204_v58  ;;  %v5146_v42 = vadd.f32 %v11846_v0, %v11842_v54  ;;  %v10252_v54 = vld [vmem:[#allocation2 + $0xc24] sm:$0xf]  ;;  %v9351_v0 = vld [vmem:[#allocation2 + $0xc28] sm:$0xf] }
 0x703   : > { %v4608_v26 = vpack.c.b16 %v4480_v59, %v4480_v59 }
 0x706   : > { %v5301_v20 = vpop.f32.mrf.mxu0 }
 0x707   : > { %v5389_v41 = vpop.f32.mrf.mxu1  ;;  %v5302_v57 = vadd.f32 %v5301_v20, %v5214_v34 }
 0x709   : > { %v5390_v3 = vadd.f32 %v5389_v41, %v5302_v57  ;;  %6453 = vmatmul.bf16.gmra.mxu3 %v9504_v15 }
 0x70b   : > { %v5446_v14 = vpack.c.bf16 %v5390_v3, %v5388_v46  ;;  %v10236_v3 = vld [vmem:[#allocation2 + $0xba4] sm:$0xf] }
 0x70d   : > { %9266 = vmatmul.msk.bf16.gmra.mxu2 %vm3687_vm0, %v5446_v14 }
 0x70e   : > { %v5304_v16 = vpop.f32.mrf.mxu0 }
 0x70f   : > { %v5392_v11 = vpop.f32.mrf.mxu1  ;;  %v5305_v39 = vadd.f32 %v5304_v16, %v11795_v62  ;;  %v5136_v62 = vadd.f32 %v11812_v49, %v11810_v6  ;;  %v9284_v6 = vor.u32 %v10236_v3, %v9281_v48  ;;  %v9288_v49 = vor.u32 %v10241_v51, %v9287_v32  ;;  %v10257_v3 = vld [vmem:[#allocation2 + $0xc44] sm:$0xf0]  ;;  %v9631_v51 = vld [vmem:[#allocation2 + $0xe60] sm:$0xf] }
 0x711   : > { %5343 = vmatmul.bf16.gmra.mxu0 %v9232_v19  ;;  %v5393_v35 = vadd.f32 %v5392_v11, %v5305_v39  ;;  %v5224_v43 = vadd.f32 %v11814_v13, %v5136_v62  ;;  %v9567_v19 = vld [vmem:[#allocation2 + $0xde0] sm:$0xf]  ;;  %v5229_v11 = vadd.f32 %v11830_v33, %v5141_v30 }
 0x712   : > { %5431 = vmatmul.bf16.gmra.mxu1 %v9236_v29  ;;  %v10312_v13 = vld [vmem:[#allocation2 + $0xdfc] sm:$0xf0] }
 0x713   : > { %v9568_v28 = vor.u32 %v10312_v13, %v9567_v19  ;;  %v10320_v33 = vld [vmem:[#allocation2 + $0xe3c] sm:$0xf0] }
 0x716   : > { %v5306_v2 = vpop.f32.mrf.mxu0 }
 0x717   : > { %v5394_v7 = vpop.f32.mrf.mxu1  ;;  %v5307_v37 = vadd.f32 %v5306_v2, %v5219_v56 }
 0x719   : > { %v5395_v12 = vadd.f32 %v5394_v7, %v5307_v37  ;;  %6458 = vmatmul.bf16.gmra.mxu3 %v9536_v21  ;;  %v9313_v37 = vld [vmem:[#allocation2 + $0xc00] sm:$0xf0]  ;;  %v5234_v21 = vadd.f32 %v11848_v8, %v5146_v42 }
 0x71a   : > { %v9316_v23 = vor.u32 %v10244_v22, %v9313_v37  ;;  %v10265_v37 = vld [vmem:[#allocation2 + $0xc84] sm:$0xf0]  ;;  %v12791_v42 = vld [vmem:[#allocation25_spill] sm:$0xff] }
 0x71b   : > { %v5447_v58 = vpack.c.bf16 %v5395_v12, %v5393_v35  ;;  %v9319_v35 = vld [vmem:[#allocation2 + $0xbe8] sm:$0xf] }
 0x71c   : > { %v11953_v63 = vpop.f32.mrf.mxu3  ;;  %v10249_v12 = vld [vmem:[#allocation2 + $0xc04] sm:$0xf0] }
 0x71d   : > { %9267 = vmatmul.msk.bf16.gmra.mxu2 %vm3687_vm0, %v5447_v58  ;;  %v9320_v36 = vor.u32 %v10249_v12, %v9319_v35  ;;  %v9599_v58 = vld [vmem:[#allocation2 + $0xe20] sm:$0xf] }
 0x71e   : > { %v5309_v1 = vpop.f32.mrf.mxu0 }
 0x71f   : > { %v5397_v17 = vpop.f32.mrf.mxu1  ;;  %v5310_v34 = vadd.f32 %v5309_v1, %v11808_v52 }
 0x721   : > { %5348 = vmatmul.bf16.gmra.mxu0 %v4607_v40  ;;  %v5398_v57 = vadd.f32 %v5397_v17, %v5310_v34 }
 0x722   : > { %5436 = vmatmul.bf16.gmra.mxu1 %v4608_v26  ;;  %v9600_v26 = vor.u32 %v10320_v33, %v9599_v58 }
 0x724   : > { %v11957_v14 = vpop.f32.mrf.mxu3 }
 0x726   : > { %v5311_v18 = vpop.f32.mrf.mxu0 }
 0x727   : > { %v5399_v20 = vpop.f32.mrf.mxu1  ;;  %v5312_v41 = vadd.f32 %v5311_v18, %v5224_v43 }
 0x729   : > { %v5400_v46 = vadd.f32 %v5399_v20, %v5312_v41  ;;  %6463 = vmatmul.bf16.gmra.mxu3 %v9568_v28 }
 0x72b   : > { %v5448_v24 = vpack.c.bf16 %v5400_v46, %v5398_v57 }
 0x72c   : > { %v11962_v16 = vpop.f32.mrf.mxu3 }
 0x72d   : > { %9268 = vmatmul.msk.bf16.gmra.mxu2 %vm3687_vm0, %v5448_v24  ;;  %v10328_v24 = vld [vmem:[#allocation2 + $0xe7c] sm:$0xf0] }
 0x72e   : > { %v5314_v29 = vpop.f32.mrf.mxu0  ;;  %v9632_v19 = vor.u32 %v10328_v24, %v9631_v51  ;;  %v9409_v51 = vld [vmem:[#allocation2 + $0xcc0] sm:$0xf0]  ;;  %v9415_v24 = vld [vmem:[#allocation2 + $0xca8] sm:$0xf] }
 0x72f   : > { %v5402_v52 = vpop.f32.mrf.mxu1  ;;  %v5315_v15 = vadd.f32 %v5314_v29, %v11822_v55 }
 0x731   : > { %6506 = vmatmul.bf16.vlgmr.msrb.gmra.mxu0 %v9284_v6  ;;  %v5403_v2 = vadd.f32 %v5402_v52, %v5315_v15 }
 0x732   : > { %6594 = vmatmul.bf16.vlgmr.msrb.gmra.mxu1 %v9288_v49 }
 0x734   : > { %v11966_v59 = vpop.f32.mrf.mxu3 }
 0x736   : > { %v5316_v9 = vpop.f32.mrf.mxu0 }
 0x737   : > { %v5404_v56 = vpop.f32.mrf.mxu1  ;;  %v5317_v39 = vadd.f32 %v5316_v9, %v5229_v11 }
 0x739   : > { %v5405_v7 = vadd.f32 %v5404_v56, %v5317_v39  ;;  %6468 = vmatmul.bf16.gmra.mxu3 %v9600_v26  ;;  %v12790_v26 = vld [vmem:[#allocation35_spill] sm:$0xff] }
 0x73b   : > { %v5449_v5 = vpack.c.bf16 %v5405_v7, %v5403_v2  ;;  %v12788_v7 = vld [vmem:[#allocation13_spill] sm:$0xff] }
 0x73c   : > { %v11974_v17 = vpop.f32.mrf.mxu3 }
 0x73d   : > { %9269 = vmatmul.msk.bf16.gmra.mxu2 %vm3687_vm0, %v5449_v5  ;;  %v9663_v5 = vld [vmem:[#allocation2 + $0xea0] sm:$0xf] }
 0x73e   : > { %v5319_v40 = vpop.f32.mrf.mxu0 }
 0x73f   : > { %v5407_v55 = vpop.f32.mrf.mxu1  ;;  %v5320_v62 = vadd.f32 %v5319_v40, %v11840_v10  ;;  %v9352_v10 = vor.u32 %v10257_v3, %v9351_v0 }
 0x740   : > { %v5547_v53 = vpop.f32.mrf.mxu2 }
 0x741   : > { %v11972_v1 = vadd.f32 %v5547_v53, %v11533_v44  ;;  %6511 = vmatmul.bf16.gmra.mxu0 %v9316_v23  ;;  %v5408_v41 = vadd.f32 %v5407_v55, %v5320_v62  ;;  %v9345_v44 = vld [vmem:[#allocation2 + $0xc40] sm:$0xf0]  ;;  %v10336_v23 = vld [vmem:[#allocation2 + $0xebc] sm:$0xf0]  ;;  %v12789_v55 = vld [vmem:[#allocation34_spill] sm:$0xff] }
 0x742   : > { %6599 = vmatmul.bf16.gmra.mxu1 %v9320_v36  ;;  %v9348_v8 = vor.u32 %v10252_v54, %v9345_v44  ;;  %v9664_v33 = vor.u32 %v10336_v23, %v9663_v5  ;;  %v5156_v53 = vadd.f32 %v12790_v26, %v12789_v55  ;;  %v9441_v26 = vld [vmem:[#allocation2 + $0xd00] sm:$0xf0] }
 0x744   : > { %v11981_v32 = vpop.f32.mrf.mxu3 }
 0x746   : > { %v5321_v43 = vpop.f32.mrf.mxu0 }
 0x747   : > { %v5409_v34 = vpop.f32.mrf.mxu1  ;;  %v5322_v18 = vadd.f32 %v5321_v43, %v5234_v21  ;;  %v12793_v43 = vld [vmem:[#allocation36_spill] sm:$0xff] }
 0x748   : > { %v5549_v20 = vpop.f32.mrf.mxu2 }
 0x749   : > { %v5410_v57 = vadd.f32 %v5409_v34, %v5322_v18  ;;  %v11979_v46 = vadd.f32 %v5549_v20, %v11545_v4  ;;  %6473 = vmatmul.bf16.gmra.mxu3 %v9632_v19  ;;  %v5151_v4 = vadd.f32 %v11858_v50, %v11856_v25  ;;  %v10260_v25 = vld [vmem:[#allocation2 + $0xc64] sm:$0xf]  ;;  %v9383_v50 = vld [vmem:[#allocation2 + $0xc68] sm:$0xf]  ;;  %v5244_v34 = vadd.f32 %v12793_v43, %v5156_v53 }
 0x74a   : > { %v12794_v18 = vld [vmem:[#allocation33_spill] sm:$0xff]  ;;  %v9447_v53 = vld [vmem:[#allocation2 + $0xce8] sm:$0xf] }
 0x74b   : > { %v5450_v48 = vpack.c.bf16 %v5410_v57, %v5408_v41  ;;  %v5239_v28 = vadd.f32 %v11860_v60, %v5151_v4 }
 0x74c   : > { %v11989_v52 = vpop.f32.mrf.mxu3 }
 0x74d   : > { %9270 = vmatmul.msk.bf16.gmra.mxu2 %vm3687_vm0, %v5450_v48  ;;  %v12795_v48 = vld [vmem:[#allocation26_spill] sm:$0xff] }
 0x74e   : > { %v5324_v6 = vpop.f32.mrf.mxu0 }
 0x74f   : > { %v5412_v49 = vpop.f32.mrf.mxu1  ;;  %v5325_v30 = vadd.f32 %v5324_v6, %v11854_v38  ;;  %v9384_v38 = vor.u32 %v10265_v37, %v9383_v50  ;;  %v10273_v6 = vld [vmem:[#allocation2 + $0xcc4] sm:$0xf0]  ;;  %v12800_v50 = vld [vmem:[#allocation39_spill] sm:$0xff] }
 0x750   : > { %v5552_v13 = vpop.f32.mrf.mxu2  ;;  %v9416_v4 = vor.u32 %v10273_v6, %v9415_v24  ;;  %v12806_v6 = vld [vmem:[#allocation41_spill] sm:$0xff] }
 0x751   : > { %v11987_v29 = vadd.f32 %v5552_v13, %v11549_v45  ;;  %6516 = vmatmul.bf16.gmra.mxu0 %v9348_v8  ;;  %v5413_v39 = vadd.f32 %v5412_v49, %v5325_v30  ;;  %v9377_v45 = vld [vmem:[#allocation2 + $0xc80] sm:$0xf0]  ;;  %v10344_v30 = vld [vmem:[#allocation2 + $0xefc] sm:$0xf0] }
 0x752   : > { %6604 = vmatmul.bf16.gmra.mxu1 %v9352_v10  ;;  %v9380_v60 = vor.u32 %v10260_v25, %v9377_v45  ;;  %v10268_v10 = vld [vmem:[#allocation2 + $0xca4] sm:$0xf] }
 0x753   : > { %v9412_v13 = vor.u32 %v10268_v10, %v9409_v51  ;;  %v12804_v10 = vld [vmem:[#allocation21_spill] sm:$0xff] }
 0x754   : > { %v11996_v12 = vpop.f32.mrf.mxu3 }
 0x756   : > { %v5326_v11 = vpop.f32.mrf.mxu0 }
 0x757   : > { %v5414_v15 = vpop.f32.mrf.mxu1  ;;  %v5327_v9 = vadd.f32 %v5326_v11, %v5239_v28  ;;  %v9695_v28 = vld [vmem:[#allocation2 + $0xee0] sm:$0xf] }
 0x758   : > { %v5554_v56 = vpop.f32.mrf.mxu2 }
 0x759   : > { %v5415_v2 = vadd.f32 %v5414_v15, %v5327_v9  ;;  %v11994_v22 = vadd.f32 %v5554_v56, %v12788_v7  ;;  %6478 = vmatmul.bf16.gmra.mxu3 %v9664_v33  ;;  %v9696_v9 = vor.u32 %v10344_v30, %v9695_v28  ;;  %v12798_v7 = vld [vmem:[#allocation5_spill] sm:$0xff] }
 0x75b   : > { %v5451_v35 = vpack.c.bf16 %v5415_v2, %v5413_v39  ;;  %v12797_v39 = vld [vmem:[#allocation38_spill] sm:$0xff] }
 0x75c   : > { %v12004_v62 = vpop.f32.mrf.mxu3  ;;  %v5161_v2 = vadd.f32 %v12797_v39, %v11885_v47  ;;  %v10276_v47 = vld [vmem:[#allocation2 + $0xce4] sm:$0xf]  ;;  %v12808_v39 = vld [vmem:[#allocation6_spill] sm:$0xff] }
 0x75d   : > { %9271 = vmatmul.msk.bf16.gmra.mxu2 %vm3687_vm0, %v5451_v35  ;;  %v12801_v35 = vld [vmem:[#allocation37_spill] sm:$0xff] }
 0x75e   : > { %v5329_v36 = vpop.f32.mrf.mxu0  ;;  %v5249_v37 = vadd.f32 %v12800_v50, %v5161_v2  ;;  %v10289_v50 = vld [vmem:[#allocation2 + $0xd44] sm:$0xf0] }
 0x75f   : > { %v5417_v58 = vpop.f32.mrf.mxu1  ;;  %v5330_v20 = vadd.f32 %v5329_v36, %v12794_v18  ;;  %v9444_v18 = vor.u32 %v10276_v47, %v9441_v26  ;;  %v12810_v47 = vld [vmem:[#allocation43_spill] sm:$0xff]  ;;  %v12811_v26 = vld [vmem:[#allocation44_spill] sm:$0xff] }
 0x760   : > { %v5557_v40 = vpop.f32.mrf.mxu2 }
 0x761   : > { %v12002_v21 = vadd.f32 %v5557_v40, %v12791_v42  ;;  %6521 = vmatmul.bf16.gmra.mxu0 %v9380_v60  ;;  %v5418_v0 = vadd.f32 %v5417_v58, %v5330_v20  ;;  %v12802_v40 = vld [vmem:[#allocation14_spill] sm:$0xff] }
 0x762   : > { %6609 = vmatmul.bf16.gmra.mxu1 %v9384_v38  ;;  %v10281_v42 = vld [vmem:[#allocation2 + $0xd04] sm:$0xf0] }
 0x763   : > { %12792 = vst [vmem:[#allocation13_spill] sm:$0xff] %v12002_v21  ;;  %v9448_v20 = vor.u32 %v10281_v42, %v9447_v53  ;;  %v5171_v53 = vadd.f32 %v12811_v26, %v12810_v47  ;;  %v12812_v42 = vld [vmem:[#allocation7_spill] sm:$0xff]  ;;  %v10263_v21 = vld [vmem:[#allocation2 + $0xc7c] sm:$0xf] }
 0x764   : > { %v12011_v19 = vpop.f32.mrf.mxu3 }
 0x766   : > { %v5331_v41 = vpop.f32.mrf.mxu0 }
 0x767   : > { %v5419_v57 = vpop.f32.mrf.mxu1  ;;  %v5332_v54 = vadd.f32 %v5331_v41, %v5244_v34  ;;  %v9727_v41 = vld [vmem:[#allocation2 + $0xf20] sm:$0xf] }
 0x768   : > { %v5559_v44 = vpop.f32.mrf.mxu2 }
 0x769   : > { %v5420_v3 = vadd.f32 %v5419_v57, %v5332_v54  ;;  %v12009_v8 = vadd.f32 %v5559_v44, %v12795_v48  ;;  %6483 = vmatmul.bf16.gmra.mxu3 %v9696_v9  ;;  %v10352_v57 = vld [vmem:[#allocation2 + $0xf3c] sm:$0xf0]  ;;  %v5166_v48 = vadd.f32 %v11899_v27, %v11897_v31  ;;  %v10284_v27 = vld [vmem:[#allocation2 + $0xd24] sm:$0xf] }
 0x76a   : > { %v9473_v31 = vld [vmem:[#allocation2 + $0xd40] sm:$0xf0] }
 0x76b   : > { %12796 = vst [vmem:[#allocation34_spill] sm:$0xff] %v12009_v8  ;;  %v5452_v49 = vpack.c.bf16 %v5420_v3, %v5418_v0  ;;  %v9728_v0 = vor.u32 %v10352_v57, %v9727_v41  ;;  %v12815_v57 = vld [vmem:[#allocation42_spill] sm:$0xff]  ;;  %v10255_v8 = vld [vmem:[#allocation2 + $0xc3c] sm:$0xf] }
 0x76c   : > { %v12019_v45 = vpop.f32.mrf.mxu3 }
 0x76d   : > { %9272 = vmatmul.msk.bf16.gmra.mxu2 %vm3687_vm0, %v5452_v49  ;;  %v5254_v49 = vadd.f32 %v12806_v6, %v5166_v48 }
 0x76e   : > { %v5334_v11 = vpop.f32.mrf.mxu0 }
 0x76f   : > { %v5422_v15 = vpop.f32.mrf.mxu1  ;;  %v5335_v60 = vadd.f32 %v5334_v11, %v12801_v35 }
 0x770   : > { %v5562_v56 = vpop.f32.mrf.mxu2 }
 0x771   : > { %v12017_v25 = vadd.f32 %v5562_v56, %v12798_v7  ;;  %6526 = vmatmul.bf16.gmra.mxu0 %v9412_v13  ;;  %v5423_v58 = vadd.f32 %v5422_v15, %v5335_v60  ;;  %v12807_v13 = vld [vmem:[#allocation40_spill] sm:$0xff]  ;;  %v9479_v7 = vld [vmem:[#allocation2 + $0xd28] sm:$0xf]  ;;  %v12043_v60 = vld [vmem:[#allocation2 + $0xf60] sm:$0xff] }
 0x772   : > { %6614 = vmatmul.bf16.gmra.mxu1 %v9416_v4 }
 0x773   : > { %12799 = vst [vmem:[#allocation35_spill] sm:$0xff] %v12017_v25  ;;  %v10247_v25 = vld [vmem:[#allocation2 + $0xbfc] sm:$0xf] }
 0x774   : > { %v12026_v34 = vpop.f32.mrf.mxu3 }
 0x776   : > { %v5336_v38 = vpop.f32.mrf.mxu0 }
 0x777   : > { %v5424_v5 = vpop.f32.mrf.mxu1  ;;  %v5337_v23 = vadd.f32 %v5336_v38, %v5249_v37  ;;  %v6146_v38 = vunpack.c.l.b16 %v12043_v60 }
 0x778   : > { %v5564_v36 = vpop.f32.mrf.mxu2 }
 0x779   : > { %v5425_v33 = vadd.f32 %v5424_v5, %v5337_v23  ;;  %v12024_v55 = vadd.f32 %v5564_v36, %v12802_v40  ;;  %6488 = vmatmul.bf16.gmra.mxu3 %v9728_v0  ;;  %v9476_v5 = vor.u32 %v10284_v27, %v9473_v31  ;;  %v9480_v23 = vor.u32 %v10289_v50, %v9479_v7  ;;  %v9295_v27 = vld [vmem:[#allocation2 + $0xbb0] sm:$0xf] }
 0x77a   : > { %v10242_v31 = vld [vmem:[#allocation2 + $0xbcc] sm:$0xf0] }
 0x77b   : > { %12803 = vst [vmem:[#allocation25_spill] sm:$0xff] %v12024_v55  ;;  %v5453_v43 = vpack.c.bf16 %v5425_v33, %v5423_v58  ;;  %v6274_v33 = vpack.c.b16 %v6146_v38, %v6146_v38 }
 0x77c   : > { %v12034_v24 = vpop.f32.mrf.mxu3 }
 0x77d   : > { %9273 = vmatmul.msk.bf16.gmra.mxu2 %vm3687_vm0, %v5453_v43 }
 0x77e   : > { %v5339_v54 = vpop.f32.mrf.mxu0 }
 0x77f   : > { %v5427_v44 = vpop.f32.mrf.mxu1  ;;  %v5340_v4 = vadd.f32 %v5339_v54, %v12807_v13 }
 0x780   : > { %v5567_v3 = vpop.f32.mrf.mxu2 }
 0x781   : > { %v12032_v51 = vadd.f32 %v5567_v3, %v12804_v10  ;;  %6531 = vmatmul.bf16.gmra.mxu0 %v9444_v18  ;;  %v5428_v9 = vadd.f32 %v5427_v44, %v5340_v4  ;;  %v10292_v4 = vld [vmem:[#allocation2 + $0xd64] sm:$0xf] }
 0x782   : > { %6619 = vmatmul.bf16.gmra.mxu1 %v9448_v20  ;;  %v12814_v20 = vld [vmem:[#allocation45_spill] sm:$0xff] }
 0x783   : > { %12805 = vst [vmem:[#allocation36_spill] sm:$0xff] %v12032_v51  ;;  %v5259_v41 = vadd.f32 %v12814_v20, %v5171_v53  ;;  %v12820_v53 = vld [vmem:[#allocation8_spill] sm:$0xff]  ;;  %v10300_v20 = vld [vmem:[#allocation2 + $0xda4] sm:$0xf] }
 0x784   : > { %v12041_v35 = vpop.f32.mrf.mxu3 }
 0x786   : > { %v5341_v28 = vpop.f32.mrf.mxu0 }
 0x787   : > { %v5429_v30 = vpop.f32.mrf.mxu1  ;;  %v5342_v11 = vadd.f32 %v5341_v28, %v5254_v49  ;;  %v12816_v49 = vld [vmem:[#allocation22_spill] sm:$0xff]  ;;  %v9505_v28 = vld [vmem:[#allocation2 + $0xd80] sm:$0xf0] }
 0x788   : > { %v5569_v15 = vpop.f32.mrf.mxu2 }
 0x789   : > { %v5430_v56 = vadd.f32 %v5429_v30, %v5342_v11  ;;  %v12039_v2 = vadd.f32 %v5569_v15, %v12808_v39  ;;  %6493 = vmatmul.bf16.gmra.mxu3 %v6274_v33  ;;  %v9511_v30 = vld [vmem:[#allocation2 + $0xd68] sm:$0xf] }
 0x78a   : > { %v10297_v11 = vld [vmem:[#allocation2 + $0xd84] sm:$0xf0] }
 0x78b   : > { %12809 = vst [vmem:[#allocation33_spill] sm:$0xff] %v12039_v2  ;;  %v5454_v37 = vpack.c.bf16 %v5430_v56, %v5428_v9  ;;  %v9508_v56 = vor.u32 %v10292_v4, %v9505_v28  ;;  %v9512_v39 = vor.u32 %v10297_v11, %v9511_v30  ;;  %v12822_v11 = vld [vmem:[#allocation17_spill] sm:$0xff] }
 0x78c   : > { %v12052_v18 = vpop.f32.mrf.mxu3 }
 0x78d   : > { %9274 = vmatmul.msk.bf16.gmra.mxu2 %vm3687_vm0, %v5454_v37  ;;  %v9296_v37 = vor.u32 %v10242_v31, %v9295_v27 }
 0x78e   : > { %v5344_v36 = vpop.f32.mrf.mxu0 }
 0x78f   : > { %v5432_v58 = vpop.f32.mrf.mxu1  ;;  %v5345_v54 = vadd.f32 %v5344_v36, %v12815_v57  ;;  %v9543_v57 = vld [vmem:[#allocation2 + $0xda8] sm:$0xf] }
 0x790   : > { %v5572_v40 = vpop.f32.mrf.mxu2 }
 0x791   : > { %v12050_v43 = vadd.f32 %v5572_v40, %v12812_v42  ;;  %6536 = vmatmul.bf16.gmra.mxu0 %v9476_v5  ;;  %v5433_v10 = vadd.f32 %v5432_v58, %v5345_v54  ;;  %v12818_v5 = vld [vmem:[#allocation9_spill] sm:$0xff]  ;;  %v10305_v54 = vld [vmem:[#allocation2 + $0xdc4] sm:$0xf0] }
 0x792   : > { %6624 = vmatmul.bf16.gmra.mxu1 %v9480_v23 }
 0x793   : > { %12813 = vst [vmem:[#allocation26_spill] sm:$0xff] %v12050_v43 }
 0x794   : > { %v12059_v9 = vpop.f32.mrf.mxu3 }
 0x796   : > { %v5346_v44 = vpop.f32.mrf.mxu0 }
 0x797   : > { %v5434_v0 = vpop.f32.mrf.mxu1  ;;  %v5347_v3 = vadd.f32 %v5346_v44, %v5259_v41  ;;  %v9537_v41 = vld [vmem:[#allocation2 + $0xdc0] sm:$0xf0] }
 0x798   : > { %v5574_v48 = vpop.f32.mrf.mxu2 }
 0x799   : > { %v5435_v6 = vadd.f32 %v5434_v0, %v5347_v3  ;;  %v12057_v13 = vadd.f32 %v5574_v48, %v12816_v49  ;;  %6770 = vmatmul.bf16.vlgmr.msrb.gmra.mxu3 %v9296_v37  ;;  %v9540_v3 = vor.u32 %v10300_v20, %v9537_v41  ;;  %v9327_v48 = vld [vmem:[#allocation2 + $0xbf0] sm:$0xf] }
 0x79b   : > { %12817 = vst [vmem:[#allocation38_spill] sm:$0xff] %v12057_v13  ;;  %v5455_v15 = vpack.c.bf16 %v5435_v6, %v5433_v10  ;;  %v10250_v10 = vld [vmem:[#allocation2 + $0xc0c] sm:$0xf0] }
 0x79c   : > { %v12066_v58 = vpop.f32.mrf.mxu3  ;;  %v9328_v4 = vor.u32 %v10250_v10, %v9327_v48 }
 0x79d   : > { %9275 = vmatmul.msk.bf16.gmra.mxu2 %vm3687_vm0, %v5455_v15 }
 0x79e   : > { %v5349_v7 = vpop.f32.mrf.mxu0 }
 0x79f   : > { %v5437_v50 = vpop.f32.mrf.mxu1  ;;  %v5350_v36 = vadd.f32 %v5349_v7, %v11914_v61  ;;  %v9544_v61 = vor.u32 %v10305_v54, %v9543_v57  ;;  %v10237_v7 = vld [vmem:[#allocation2 + $0xbac] sm:$0xf]  ;;  %v9359_v54 = vld [vmem:[#allocation2 + $0xc30] sm:$0xf] }
 0x7a0   : > { %v5577_v38 = vpop.f32.mrf.mxu2 }
 0x7a1   : > { %v12063_v23 = vadd.f32 %v5577_v38, %v12818_v5  ;;  %6541 = vmatmul.bf16.gmra.mxu0 %v9508_v56  ;;  %v5438_v47 = vadd.f32 %v5437_v50, %v5350_v36  ;;  %v9289_v50 = vld [vmem:[#allocation2 + $0xbc8] sm:$0xf0] }
 0x7a2   : > { %6629 = vmatmul.bf16.gmra.mxu1 %v9512_v39  ;;  %v12824_v5 = vld [vmem:[#allocation10_spill] sm:$0xff] }
 0x7a3   : > { %12819 = vst [vmem:[#allocation5_spill] sm:$0xff] %v12063_v23  ;;  %v5456_v44 = vpack.c.bf16 %v5438_v47, %v5438_v47  ;;  %v9569_v47 = vld [vmem:[#allocation2 + $0xe00] sm:$0xf0] }
 0x7a4   : > { %v12071_v0 = vpop.f32.mrf.mxu3 }
 0x7a6   : > { %v5351_v33 = vpop.f32.mrf.mxu0 }
 0x7a7   : > { %v5439_v40 = vpop.f32.mrf.mxu1  ;;  %v9292_v33 = vor.u32 %v10237_v7, %v9289_v50 }
 0x7a8   : > { %v5579_v26 = vpop.f32.mrf.mxu2  ;;  %v10308_v40 = vld [vmem:[#allocation2 + $0xde4] sm:$0xf] }
 0x7a9   : > { %v12069_v42 = vadd.f32 %v5579_v26, %v12820_v53  ;;  %6775 = vmatmul.bf16.gmra.mxu3 %v9328_v4  ;;  %v9575_v26 = vld [vmem:[#allocation2 + $0xde8] sm:$0xf]  ;;  %v9572_v41 = vor.u32 %v10308_v40, %v9569_v47  ;;  %v9601_v40 = vld [vmem:[#allocation2 + $0xe40] sm:$0xf0] }
 0x7aa   : > { %v10313_v53 = vld [vmem:[#allocation2 + $0xe04] sm:$0xf0] }
 0x7ab   : > { %12821 = vst [vmem:[#allocation39_spill] sm:$0xff] %v12069_v42  ;;  %v9576_v57 = vor.u32 %v10313_v53, %v9575_v26  ;;  %v9607_v47 = vld [vmem:[#allocation2 + $0xe28] sm:$0xf] }
 0x7ac   : > { %v12080_v39 = vpop.f32.mrf.mxu3  ;;  %v10321_v26 = vld [vmem:[#allocation2 + $0xe44] sm:$0xf0] }
 0x7ad   : > { %9276 = vmatmul.msk.bf16.gmra.mxu2 %vm3687_vm0, %v5456_v44  ;;  %v10258_v44 = vld [vmem:[#allocation2 + $0xc4c] sm:$0xf0] }
 0x7ae   : > { %v6507_v6 = vpop.f32.mrf.mxu0 }
 0x7af   : > { %v6595_v49 = vpop.f32.mrf.mxu1  ;;  %v6508_v28 = vadd.f32 %v6507_v6, %v11953_v63  ;;  %v12826_v6 = vld [vmem:[#allocation11_spill] sm:$0xff] }
 0x7b0   : > { %v5582_v30 = vpop.f32.mrf.mxu2 }
 0x7b1   : > { %v12076_v15 = vadd.f32 %v5582_v30, %v12822_v11  ;;  %v12078_v56 = vadd.f32 %v6595_v49, %v6508_v28  ;;  %6546 = vmatmul.bf16.gmra.mxu0 %v9540_v3 }
 0x7b2   : > { %6634 = vmatmul.bf16.gmra.mxu1 %v9544_v61  ;;  %v9360_v61 = vor.u32 %v10258_v44, %v9359_v54  ;;  %v9391_v54 = vld [vmem:[#allocation2 + $0xc70] sm:$0xf] }
 0x7b3   : > { %12823 = vst [vmem:[#allocation37_spill] sm:$0xff] %v12076_v15  ;;  %v10266_v44 = vld [vmem:[#allocation2 + $0xc8c] sm:$0xf0] }
 0x7b4   : > { %v12088_v20 = vpop.f32.mrf.mxu3 }
 0x7b6   : > { %v6509_v27 = vpop.f32.mrf.mxu0 }
 0x7b7   : > { %v6597_v31 = vpop.f32.mrf.mxu1  ;;  %v6510_v37 = vadd.f32 %v6509_v27, %v11957_v14  ;;  %v10245_v27 = vld [vmem:[#allocation2 + $0xbec] sm:$0xf] }
 0x7b8   : > { %v5584_v38 = vpop.f32.mrf.mxu2 }
 0x7b9   : > { %v12084_v63 = vadd.f32 %v5584_v38, %v12824_v5  ;;  %v12086_v36 = vadd.f32 %v6597_v31, %v6510_v37  ;;  %6780 = vmatmul.bf16.gmra.mxu3 %v9360_v61  ;;  %v9321_v31 = vld [vmem:[#allocation2 + $0xc08] sm:$0xf0] }
 0x7ba   : > { %v12828_v37 = vld [vmem:[#allocation18_spill] sm:$0xff]  ;;  %v9324_v5 = vor.u32 %v10245_v27, %v9321_v31 }
 0x7bb   : > { %12825 = vst [vmem:[#allocation14_spill] sm:$0xff] %v12084_v63  ;;  %v10298_v63 = vld [vmem:[#allocation2 + $0xd8c] sm:$0xf0] }
 0x7bc   : > { %v12096_v28 = vpop.f32.mrf.mxu3 }
 0x7bd   : > { %6682 = vmatmul.bf16.vlgmr.msrb.gmra.mxu2 %v9292_v33  ;;  %v10316_v33 = vld [vmem:[#allocation2 + $0xe24] sm:$0xf] }
 0x7be   : > { %v6512_v3 = vpop.f32.mrf.mxu0 }
 0x7bf   : > { %v6600_v14 = vpop.f32.mrf.mxu1  ;;  %v6513_v48 = vadd.f32 %v6512_v3, %v11962_v16 }
 0x7c0   : > { %v5587_v10 = vpop.f32.mrf.mxu2 }
 0x7c1   : > { %v12092_v49 = vadd.f32 %v5587_v10, %v12826_v6  ;;  %v12094_v4 = vadd.f32 %v6600_v14, %v6513_v48  ;;  %6551 = vmatmul.bf16.gmra.mxu0 %v9572_v41  ;;  %v9604_v41 = vor.u32 %v10316_v33, %v9601_v40  ;;  %v9392_v14 = vor.u32 %v10266_v44, %v9391_v54  ;;  %v12830_v10 = vld [vmem:[#allocation15_spill] sm:$0xff]  ;;  %v12832_v33 = vld [vmem:[#allocation12_spill] sm:$0xff]  ;;  %v9633_v54 = vld [vmem:[#allocation2 + $0xe80] sm:$0xf0] }
 0x7c2   : > { %6639 = vmatmul.bf16.gmra.mxu1 %v9576_v57  ;;  %v9608_v57 = vor.u32 %v10321_v26, %v9607_v47  ;;  %v10324_v26 = vld [vmem:[#allocation2 + $0xe64] sm:$0xf]  ;;  %v9639_v44 = vld [vmem:[#allocation2 + $0xe68] sm:$0xf] }
 0x7c3   : > { %12827 = vst [vmem:[#allocation21_spill] sm:$0xff] %v12092_v49 }
 0x7c4   : > { %v12104_v53 = vpop.f32.mrf.mxu3 }
 0x7c6   : > { %v6514_v30 = vpop.f32.mrf.mxu0 }
 0x7c7   : > { %v6602_v11 = vpop.f32.mrf.mxu1  ;;  %v6515_v7 = vadd.f32 %v6514_v30, %v11966_v59 }
 0x7c8   : > { %v5589_v50 = vpop.f32.mrf.mxu2 }
 0x7c9   : > { %v12100_v16 = vadd.f32 %v5589_v50, %v12828_v37  ;;  %v12102_v38 = vadd.f32 %v6602_v11, %v6515_v7  ;;  %6785 = vmatmul.bf16.gmra.mxu3 %v9392_v14  ;;  %v10253_v7 = vld [vmem:[#allocation2 + $0xc2c] sm:$0xf]  ;;  %v9423_v14 = vld [vmem:[#allocation2 + $0xcb0] sm:$0xf] }
 0x7ca   : > { %v9353_v50 = vld [vmem:[#allocation2 + $0xc48] sm:$0xf0] }
 0x7cb   : > { %12829 = vst [vmem:[#allocation41_spill] sm:$0xff] %v12100_v16  ;;  %v9356_v47 = vor.u32 %v10253_v7, %v9353_v50  ;;  %v10290_v16 = vld [vmem:[#allocation2 + $0xd4c] sm:$0xf0] }
 0x7cc   : > { %v12112_v11 = vpop.f32.mrf.mxu3 }
 0x7cd   : > { %6687 = vmatmul.bf16.gmra.mxu2 %v9324_v5 }
 0x7ce   : > { %v6517_v3 = vpop.f32.mrf.mxu0 }
 0x7cf   : > { %v6605_v59 = vpop.f32.mrf.mxu1  ;;  %v6518_v61 = vadd.f32 %v6517_v3, %v11974_v17  ;;  %v9636_v3 = vor.u32 %v10324_v26, %v9633_v54  ;;  %v10261_v26 = vld [vmem:[#allocation2 + $0xc6c] sm:$0xf] }
 0x7d0   : > { %v5592_v48 = vpop.f32.mrf.mxu2  ;;  %v9385_v54 = vld [vmem:[#allocation2 + $0xc88] sm:$0xf0] }
 0x7d1   : > { %v12108_v6 = vadd.f32 %v5592_v48, %v12830_v10  ;;  %v12110_v30 = vadd.f32 %v6605_v59, %v6518_v61  ;;  %6556 = vmatmul.bf16.gmra.mxu0 %v9604_v41  ;;  %v10329_v41 = vld [vmem:[#allocation2 + $0xe84] sm:$0xf0]  ;;  %v10274_v61 = vld [vmem:[#allocation2 + $0xccc] sm:$0xf0] }
 0x7d2   : > { %6644 = vmatmul.bf16.gmra.mxu1 %v9608_v57  ;;  %v9640_v59 = vor.u32 %v10329_v41, %v9639_v44  ;;  %v9424_v10 = vor.u32 %v10274_v61, %v9423_v14  ;;  %v12836_v14 = vld [vmem:[#allocation16_spill] sm:$0xff] }
 0x7d3   : > { %12831 = vst [vmem:[#allocation40_spill] sm:$0xff] %v12108_v6 }
 0x7d4   : > { %v12120_v57 = vpop.f32.mrf.mxu3 }
 0x7d6   : > { %v6519_v27 = vpop.f32.mrf.mxu0 }
 0x7d7   : > { %v6607_v31 = vpop.f32.mrf.mxu1  ;;  %v6520_v37 = vadd.f32 %v6519_v27, %v11981_v32 }
 0x7d8   : > { %v5594_v5 = vpop.f32.mrf.mxu2 }
 0x7d9   : > { %v12116_v17 = vadd.f32 %v5594_v5, %v12832_v33  ;;  %v12118_v40 = vadd.f32 %v6607_v31, %v6520_v37  ;;  %6790 = vmatmul.bf16.gmra.mxu3 %v9424_v10  ;;  %v12834_v31 = vld [vmem:[#allocation19_spill] sm:$0xff]  ;;  %v10332_v10 = vld [vmem:[#allocation2 + $0xea4] sm:$0xf] }
 0x7db   : > { %12833 = vst [vmem:[#allocation6_spill] sm:$0xff] %v12116_v17  ;;  %v10282_v17 = vld [vmem:[#allocation2 + $0xd0c] sm:$0xf0] }
 0x7dc   : > { %v12128_v37 = vpop.f32.mrf.mxu3 }
 0x7dd   : > { %6692 = vmatmul.bf16.gmra.mxu2 %v9356_v47 }
 0x7de   : > { %v6522_v48 = vpop.f32.mrf.mxu0 }
 0x7df   : > { %v6610_v32 = vpop.f32.mrf.mxu1  ;;  %v6523_v27 = vadd.f32 %v6522_v48, %v11989_v52  ;;  %v9388_v48 = vor.u32 %v10261_v26, %v9385_v54 }
 0x7e0   : > { %v5597_v5 = vpop.f32.mrf.mxu2 }
 0x7e1   : > { %v12124_v7 = vadd.f32 %v5597_v5, %v12834_v31  ;;  %v12126_v50 = vadd.f32 %v6610_v32, %v6523_v27  ;;  %6561 = vmatmul.bf16.gmra.mxu0 %v9636_v3  ;;  %v9665_v32 = vld [vmem:[#allocation2 + $0xec0] sm:$0xf0]  ;;  %v9671_v27 = vld [vmem:[#allocation2 + $0xea8] sm:$0xf] }
 0x7e2   : > { %6649 = vmatmul.bf16.gmra.mxu1 %v9640_v59  ;;  %v10337_v3 = vld [vmem:[#allocation2 + $0xec4] sm:$0xf0]  ;;  %v9668_v5 = vor.u32 %v10332_v10, %v9665_v32  ;;  %v10269_v32 = vld [vmem:[#allocation2 + $0xcac] sm:$0xf] }
 0x7e3   : > { %12835 = vst [vmem:[#allocation43_spill] sm:$0xff] %v12124_v7  ;;  %v9672_v31 = vor.u32 %v10337_v3, %v9671_v27  ;;  %v9455_v7 = vld [vmem:[#allocation2 + $0xcf0] sm:$0xf]  ;;  %v9417_v27 = vld [vmem:[#allocation2 + $0xcc8] sm:$0xf0] }
 0x7e4   : > { %v12136_v59 = vpop.f32.mrf.mxu3 }
 0x7e6   : > { %v6524_v33 = vpop.f32.mrf.mxu0 }
 0x7e7   : > { %v6612_v47 = vpop.f32.mrf.mxu1  ;;  %v6525_v44 = vadd.f32 %v6524_v33, %v11996_v12  ;;  %v9456_v33 = vor.u32 %v10282_v17, %v9455_v7  ;;  %v12840_v7 = vld [vmem:[#allocation20_spill] sm:$0xff] }
 0x7e8   : > { %v5599_v41 = vpop.f32.mrf.mxu2 }
 0x7e9   : > { %v12132_v52 = vadd.f32 %v5599_v41, %v12836_v14  ;;  %v12134_v61 = vadd.f32 %v6612_v47, %v6525_v44  ;;  %6795 = vmatmul.bf16.gmra.mxu3 %v9456_v33  ;;  %v12838_v47 = vld [vmem:[#allocation23_spill] sm:$0xff]  ;;  %v9420_v33 = vor.u32 %v10269_v32, %v9417_v27 }
 0x7eb   : > { %12837 = vst [vmem:[#allocation44_spill] sm:$0xff] %v12132_v52  ;;  %v9487_v52 = vld [vmem:[#allocation2 + $0xd30] sm:$0xf] }
 0x7ec   : > { %v12144_v44 = vpop.f32.mrf.mxu3 }
 0x7ed   : > { %6697 = vmatmul.bf16.gmra.mxu2 %v9388_v48 }
 0x7ee   : > { %v6527_v6 = vpop.f32.mrf.mxu0 }
 0x7ef   : > { %v6615_v12 = vpop.f32.mrf.mxu1  ;;  %v6528_v41 = vadd.f32 %v6527_v6, %v12004_v62 }
 0x7f0   : > { %v5602_v14 = vpop.f32.mrf.mxu2 }
 0x7f1   : > { %v12140_v26 = vadd.f32 %v5602_v14, %v12838_v47  ;;  %v12142_v54 = vadd.f32 %v6615_v12, %v6528_v41  ;;  %6566 = vmatmul.bf16.gmra.mxu0 %v9668_v5  ;;  %v10340_v14 = vld [vmem:[#allocation2 + $0xee4] sm:$0xf]  ;;  %v9703_v41 = vld [vmem:[#allocation2 + $0xee8] sm:$0xf] }
 0x7f2   : > { %6654 = vmatmul.bf16.gmra.mxu1 %v9672_v31  ;;  %v9697_v12 = vld [vmem:[#allocation2 + $0xf00] sm:$0xf0]  ;;  %v10345_v5 = vld [vmem:[#allocation2 + $0xf04] sm:$0xf0] }
 0x7f3   : > { %12839 = vst [vmem:[#allocation7_spill] sm:$0xff] %v12140_v26  ;;  %v9700_v47 = vor.u32 %v10340_v14, %v9697_v12  ;;  %v9704_v26 = vor.u32 %v10345_v5, %v9703_v41  ;;  %v10277_v12 = vld [vmem:[#allocation2 + $0xcec] sm:$0xf] }
 0x7f4   : > { %v12152_v31 = vpop.f32.mrf.mxu3  ;;  %v9449_v41 = vld [vmem:[#allocation2 + $0xd08] sm:$0xf0] }
 0x7f6   : > { %v6529_v48 = vpop.f32.mrf.mxu0 }
 0x7f7   : > { %v6617_v10 = vpop.f32.mrf.mxu1  ;;  %v6530_v3 = vadd.f32 %v6529_v48, %v12011_v19  ;;  %v9488_v48 = vor.u32 %v10290_v16, %v9487_v52  ;;  %v12844_v52 = vld [vmem:[#allocation27_spill] sm:$0xff] }
 0x7f8   : > { %v5604_v17 = vpop.f32.mrf.mxu2 }
 0x7f9   : > { %v12148_v62 = vadd.f32 %v5604_v17, %v12840_v7  ;;  %v12150_v6 = vadd.f32 %v6617_v10, %v6530_v3  ;;  %6800 = vmatmul.bf16.gmra.mxu3 %v9488_v48  ;;  %v12842_v10 = vld [vmem:[#allocation24_spill] sm:$0xff]  ;;  %v9452_v48 = vor.u32 %v10277_v12, %v9449_v41 }
 0x7fb   : > { %12841 = vst [vmem:[#allocation45_spill] sm:$0xff] %v12148_v62  ;;  %v9519_v62 = vld [vmem:[#allocation2 + $0xd70] sm:$0xf] }
 0x7fc   : > { %v12160_v3 = vpop.f32.mrf.mxu3 }
 0x7fd   : > { %6702 = vmatmul.bf16.gmra.mxu2 %v9420_v33 }
 0x7fe   : > { %v6532_v49 = vpop.f32.mrf.mxu0 }
 0x7ff   : > { %v6620_v19 = vpop.f32.mrf.mxu1  ;;  %v6533_v17 = vadd.f32 %v6532_v49, %v12019_v45 }
 0x800   : > { %v5607_v7 = vpop.f32.mrf.mxu2 }
 0x801   : > { %v12156_v32 = vadd.f32 %v5607_v7, %v12842_v10  ;;  %v12158_v27 = vadd.f32 %v6620_v19, %v6533_v17  ;;  %6571 = vmatmul.bf16.gmra.mxu0 %v9700_v47  ;;  %v10348_v7 = vld [vmem:[#allocation2 + $0xf24] sm:$0xf]  ;;  %v9735_v17 = vld [vmem:[#allocation2 + $0xf28] sm:$0xf] }
 0x802   : > { %6659 = vmatmul.bf16.gmra.mxu1 %v9704_v26  ;;  %v9729_v19 = vld [vmem:[#allocation2 + $0xf40] sm:$0xf0]  ;;  %v10353_v47 = vld [vmem:[#allocation2 + $0xf44] sm:$0xf0] }
 0x803   : > { %12843 = vst [vmem:[#allocation42_spill] sm:$0xff] %v12156_v32  ;;  %v9732_v10 = vor.u32 %v10348_v7, %v9729_v19  ;;  %v9736_v32 = vor.u32 %v10353_v47, %v9735_v17  ;;  %v9481_v7 = vld [vmem:[#allocation2 + $0xd48] sm:$0xf0] }
 0x804   : > { %v12168_v26 = vpop.f32.mrf.mxu3  ;;  %v12178_v47 = vld [vmem:[#allocation2 + $0xf68] sm:$0xff] }
 0x806   : > { %v6534_v33 = vpop.f32.mrf.mxu0 }
 0x807   : > { %v6622_v14 = vpop.f32.mrf.mxu1  ;;  %v6535_v5 = vadd.f32 %v6534_v33, %v12026_v34  ;;  %v9520_v33 = vor.u32 %v10298_v63, %v9519_v62  ;;  %v12848_v62 = vld [vmem:[#allocation29_spill] sm:$0xff] }
 0x808   : > { %v5609_v16 = vpop.f32.mrf.mxu2 }
 0x809   : > { %v12164_v45 = vadd.f32 %v5609_v16, %v12844_v52  ;;  %v12166_v49 = vadd.f32 %v6622_v14, %v6535_v5  ;;  %6805 = vmatmul.bf16.gmra.mxu3 %v9520_v33  ;;  %v12846_v14 = vld [vmem:[#allocation28_spill] sm:$0xff] }
 0x80b   : > { %12845 = vst [vmem:[#allocation22_spill] sm:$0xff] %v12164_v45  ;;  %v10306_v45 = vld [vmem:[#allocation2 + $0xdcc] sm:$0xf0] }
 0x80c   : > { %v12176_v5 = vpop.f32.mrf.mxu3 }
 0x80d   : > { %6707 = vmatmul.bf16.gmra.mxu2 %v9452_v48  ;;  %v10285_v48 = vld [vmem:[#allocation2 + $0xd2c] sm:$0xf] }
 0x80e   : > { %v6537_v15 = vpop.f32.mrf.mxu0 }
 0x80f   : > { %v6625_v34 = vpop.f32.mrf.mxu1  ;;  %v6538_v16 = vadd.f32 %v6537_v15, %v12034_v24  ;;  %v9484_v15 = vor.u32 %v10285_v48, %v9481_v7 }
 0x810   : > { %v5612_v52 = vpop.f32.mrf.mxu2 }
 0x811   : > { %v12172_v12 = vadd.f32 %v5612_v52, %v12846_v14  ;;  %v12174_v41 = vadd.f32 %v6625_v34, %v6538_v16  ;;  %6576 = vmatmul.bf16.gmra.mxu0 %v9732_v10  ;;  %v6147_v10 = vunpack.c.h.b16 %v12043_v60 }
 0x812   : > { %6664 = vmatmul.bf16.gmra.mxu1 %v9736_v32  ;;  %v6148_v32 = vunpack.c.l.b16 %v12178_v47 }
 0x813   : > { %12847 = vst [vmem:[#allocation9_spill] sm:$0xff] %v12172_v12  ;;  %v6275_v16 = vpack.c.b16 %v6147_v10, %v6147_v10  ;;  %v9551_v12 = vld [vmem:[#allocation2 + $0xdb0] sm:$0xf]  ;;  %v9513_v10 = vld [vmem:[#allocation2 + $0xd88] sm:$0xf0] }
 0x814   : > { %v6496_v34 = vpop.f32.mrf.mxu3  ;;  %v6276_v14 = vpack.c.b16 %v6148_v32, %v6148_v32 }
 0x816   : > { %v6539_v19 = vpop.f32.mrf.mxu0 }
 0x817   : > { %v6627_v17 = vpop.f32.mrf.mxu1  ;;  %v6540_v63 = vadd.f32 %v6539_v19, %v12041_v35  ;;  %v9552_v35 = vor.u32 %v10306_v45, %v9551_v12  ;;  %v12850_v19 = vld [vmem:[#allocation30_spill] sm:$0xff]  ;;  %v12852_v45 = vld [vmem:[#allocation31_spill] sm:$0xff] }
 0x818   : > { %v5614_v24 = vpop.f32.mrf.mxu2 }
 0x819   : > { %v12182_v33 = vadd.f32 %v5614_v24, %v12848_v62  ;;  %v12184_v52 = vadd.f32 %v6627_v17, %v6540_v63  ;;  %6810 = vmatmul.bf16.gmra.mxu3 %v9552_v35  ;;  %v10293_v62 = vld [vmem:[#allocation2 + $0xd6c] sm:$0xf]  ;;  %v10238_v35 = vld [vmem:[#allocation2 + $0xbb4] sm:$0xf] }
 0x81b   : > { %12849 = vst [vmem:[#allocation8_spill] sm:$0xff] %v12182_v33 }
 0x81c   : > { %v6771_v60 = vpop.f32.mrf.mxu3 }
 0x81d   : > { %6712 = vmatmul.bf16.gmra.mxu2 %v9484_v15 }
 0x81e   : > { %v6542_v42 = vpop.f32.mrf.mxu0 }
 0x81f   : > { %v6630_v23 = vpop.f32.mrf.mxu1  ;;  %v6543_v48 = vadd.f32 %v6542_v42, %v12052_v18  ;;  %v9516_v42 = vor.u32 %v10293_v62, %v9513_v10  ;;  %v12854_v10 = vld [vmem:[#allocation32_spill] sm:$0xff] }
 0x820   : > { %v5617_v7 = vpop.f32.mrf.mxu2 }
 0x821   : > { %v12190_v17 = vadd.f32 %v5617_v7, %v12850_v19  ;;  %v12192_v63 = vadd.f32 %v6630_v23, %v6543_v48  ;;  %6581 = vmatmul.bf16.gmra.mxu0 %v6275_v16  ;;  %v9297_v7 = vld [vmem:[#allocation2 + $0xbd0] sm:$0xf0]  ;;  %v9303_v23 = vld [vmem:[#allocation2 + $0xbb8] sm:$0xf] }
 0x822   : > { %6669 = vmatmul.bf16.gmra.mxu1 %v6276_v14  ;;  %v10243_v48 = vld [vmem:[#allocation2 + $0xbd4] sm:$0xf0]  ;;  %v9300_v14 = vor.u32 %v10238_v35, %v9297_v7 }
 0x823   : > { %12851 = vst [vmem:[#allocation17_spill] sm:$0xff] %v12190_v17  ;;  %v9304_v19 = vor.u32 %v10243_v48, %v9303_v23  ;;  %v10359_v17 = vld [vmem:[%s12611_s2 + $0x78] sm:$0xff]  ;;  %v10301_v48 = vld [vmem:[#allocation2 + $0xdac] sm:$0xf] }
 0x824   : > { %v6773_v16 = vpop.f32.mrf.mxu3  ;;  %7215 = vmatpush.bf16.msra.mxu3 %v10359_v17  ;;  %v9329_v17 = vld [vmem:[#allocation2 + $0xc10] sm:$0xf0] }
 0x826   : > { %v6544_v24 = vpop.f32.mrf.mxu0 }
 0x827   : > { %v6632_v15 = vpop.f32.mrf.mxu1  ;;  %v6545_v32 = vadd.f32 %v6544_v24, %v12059_v9  ;;  %v9583_v9 = vld [vmem:[#allocation2 + $0xdf0] sm:$0xf] }
 0x828   : > { %v5619_v34 = vpop.f32.mrf.mxu2  ;;  %v10314_v24 = vld [vmem:[#allocation2 + $0xe0c] sm:$0xf0] }
 0x829   : > { %v12196_v12 = vadd.f32 %v5619_v34, %v12852_v45  ;;  %v12198_v18 = vadd.f32 %v6632_v15, %v6545_v32  ;;  %v9584_v45 = vor.u32 %v10314_v24, %v9583_v9 }
 0x82b   : > { %12853 = vst [vmem:[#allocation10_spill] sm:$0xff] %v12196_v12  ;;  %6815 = vmatmul.bf16.gmra.mxu3 %v9584_v45  ;;  %v9545_v12 = vld [vmem:[#allocation2 + $0xdc8] sm:$0xf0]  ;;  %v9335_v45 = vld [vmem:[#allocation2 + $0xbf8] sm:$0xf] }
 0x82c   : > { %v6776_v35 = vpop.f32.mrf.mxu3 }
 0x82d   : > { %6717 = vmatmul.bf16.gmra.mxu2 %v9516_v42 }
 0x82e   : > { %v6547_v33 = vpop.f32.mrf.mxu0 }
 0x82f   : > { %v6635_v34 = vpop.f32.mrf.mxu1  ;;  %v6548_v15 = vadd.f32 %v6547_v33, %v12066_v58  ;;  %v9548_v58 = vor.u32 %v10301_v48, %v9545_v12  ;;  %v10246_v33 = vld [vmem:[#allocation2 + $0xbf4] sm:$0xf] }
 0x830   : > { %v5622_v62 = vpop.f32.mrf.mxu2 }
 0x831   : > { %v12205_v32 = vadd.f32 %v5622_v62, %v12854_v10  ;;  %v12207_v42 = vadd.f32 %v6635_v34, %v6548_v15  ;;  %6858 = vmatmul.bf16.vlgmr.msra.gmra.mxu0 %v9300_v14  ;;  %v10251_v62 = vld [vmem:[#allocation2 + $0xc14] sm:$0xf0]  ;;  %v9332_v14 = vor.u32 %v10246_v33, %v9329_v17  ;;  %v9615_v34 = vld [vmem:[#allocation2 + $0xe30] sm:$0xf]  ;;  %v10309_v33 = vld [vmem:[#allocation2 + $0xdec] sm:$0xf] }
 0x832   : > { %6946 = vmatmul.bf16.vlgmr.msra.gmra.mxu1 %v9304_v19  ;;  %v9336_v19 = vor.u32 %v10251_v62, %v9335_v45  ;;  %v10322_v15 = vld [vmem:[#allocation2 + $0xe4c] sm:$0xf0]  ;;  %v9577_v17 = vld [vmem:[#allocation2 + $0xe08] sm:$0xf0] }
 0x833   : > { %12855 = vst [vmem:[#allocation11_spill] sm:$0xff] %v12205_v32  ;;  %v9616_v2 = vor.u32 %v10322_v15, %v9615_v34 }
 0x834   : > { %v12212_v10 = vpop.f32.mrf.mxu3 }
 0x836   : > { %v6549_v7 = vpop.f32.mrf.mxu0 }
 0x837   : > { %v6637_v23 = vpop.f32.mrf.mxu1  ;;  %v6550_v13 = vadd.f32 %v6549_v7, %v12071_v0 }
 0x838   : > { %v5624_v9 = vpop.f32.mrf.mxu2 }
 0x839   : > { %v12210_v24 = vadd.f32 %v6637_v23, %v6550_v13 }
 0x83b   : > { %6820 = vmatmul.bf16.gmra.mxu3 %v9616_v2 }
 0x83c   : > { %v12220_v48 = vpop.f32.mrf.mxu3 }
 0x83d   : > { %6722 = vmatmul.bf16.gmra.mxu2 %v9548_v58 }
 0x83e   : > { %v6552_v32 = vpop.f32.mrf.mxu0 }
 0x83f   : > { %v6640_v43 = vpop.f32.mrf.mxu1  ;;  %v6553_v0 = vadd.f32 %v6552_v32, %v12080_v39  ;;  %v10254_v32 = vld [vmem:[#allocation2 + $0xc34] sm:$0xf] }
 0x840   : > { %v6683_v7 = vpop.f32.mrf.mxu2 }
 0x841   : > { %v12215_v13 = vadd.f32 %v6640_v43, %v6553_v0  ;;  %v6684_v12 = vadd.f32 %v6683_v7, %v12078_v56  ;;  %6863 = vmatmul.bf16.gmra.mxu0 %v9332_v14  ;;  %v9580_v43 = vor.u32 %v10309_v33, %v9577_v17  ;;  %v9361_v56 = vld [vmem:[#allocation2 + $0xc50] sm:$0xf0]  ;;  %v9367_v14 = vld [vmem:[#allocation2 + $0xc38] sm:$0xf]  ;;  %v9647_v7 = vld [vmem:[#allocation2 + $0xe70] sm:$0xf] }
 0x842   : > { %6951 = vmatmul.bf16.gmra.mxu1 %v9336_v19  ;;  %v10259_v19 = vld [vmem:[#allocation2 + $0xc54] sm:$0xf0]  ;;  %v9364_v15 = vor.u32 %v10254_v32, %v9361_v56  ;;  %v10317_v32 = vld [vmem:[#allocation2 + $0xe2c] sm:$0xf] }
 0x843   : > { %v12218_v23 = vadd.f32 %v6771_v60, %v6684_v12  ;;  %v9368_v0 = vor.u32 %v10259_v19, %v9367_v14  ;;  %v10330_v12 = vld [vmem:[#allocation2 + $0xe8c] sm:$0xf0]  ;;  %v9609_v56 = vld [vmem:[#allocation2 + $0xe48] sm:$0xf0] }
 0x844   : > { %v12228_v34 = vpop.f32.mrf.mxu3 }
 0x846   : > { %v6554_v9 = vpop.f32.mrf.mxu0 }
 0x847   : > { %v6642_v58 = vpop.f32.mrf.mxu1  ;;  %v6555_v45 = vadd.f32 %v6554_v9, %v12088_v20 }
 0x848   : > { %v6685_v62 = vpop.f32.mrf.mxu2 }
 0x849   : > { %v12223_v39 = vadd.f32 %v6642_v58, %v6555_v45  ;;  %v6686_v2 = vadd.f32 %v6685_v62, %v12086_v36  ;;  %v9648_v58 = vor.u32 %v10330_v12, %v9647_v7  ;;  %v9612_v12 = vor.u32 %v10317_v32, %v9609_v56 }
 0x84b   : > { %v12226_v60 = vadd.f32 %v6773_v16, %v6686_v2  ;;  %6825 = vmatmul.bf16.gmra.mxu3 %v9648_v58 }
 0x84c   : > { %v12236_v62 = vpop.f32.mrf.mxu3 }
 0x84d   : > { %6727 = vmatmul.bf16.gmra.mxu2 %v9580_v43 }
 0x84e   : > { %v6557_v20 = vpop.f32.mrf.mxu0 }
 0x84f   : > { %v6645_v9 = vpop.f32.mrf.mxu1  ;;  %v6558_v45 = vadd.f32 %v6557_v20, %v12096_v28  ;;  %v10262_v20 = vld [vmem:[#allocation2 + $0xc74] sm:$0xf] }
 0x850   : > { %v6688_v36 = vpop.f32.mrf.mxu2 }
 0x851   : > { %v12231_v33 = vadd.f32 %v6645_v9, %v6558_v45  ;;  %v6689_v17 = vadd.f32 %v6688_v36, %v12094_v4  ;;  %6868 = vmatmul.bf16.gmra.mxu0 %v9364_v15  ;;  %v9393_v4 = vld [vmem:[#allocation2 + $0xc90] sm:$0xf0]  ;;  %v9399_v15 = vld [vmem:[#allocation2 + $0xc78] sm:$0xf]  ;;  %v9679_v36 = vld [vmem:[#allocation2 + $0xeb0] sm:$0xf] }
 0x852   : > { %6956 = vmatmul.bf16.gmra.mxu1 %v9368_v0  ;;  %v10267_v0 = vld [vmem:[#allocation2 + $0xc94] sm:$0xf0]  ;;  %v9396_v58 = vor.u32 %v10262_v20, %v9393_v4  ;;  %v10325_v20 = vld [vmem:[#allocation2 + $0xe6c] sm:$0xf] }
 0x853   : > { %v12234_v16 = vadd.f32 %v6776_v35, %v6689_v17  ;;  %v9400_v45 = vor.u32 %v10267_v0, %v9399_v15  ;;  %v9641_v4 = vld [vmem:[#allocation2 + $0xe88] sm:$0xf0] }
 0x854   : > { %v12245_v9 = vpop.f32.mrf.mxu3 }
 0x856   : > { %v6559_v2 = vpop.f32.mrf.mxu0 }
 0x857   : > { %v6647_v43 = vpop.f32.mrf.mxu1  ;;  %v6560_v14 = vadd.f32 %v6559_v2, %v12104_v53  ;;  %v10338_v53 = vld [vmem:[#allocation2 + $0xecc] sm:$0xf0] }
 0x858   : > { %v6690_v19 = vpop.f32.mrf.mxu2 }
 0x859   : > { %v12239_v28 = vadd.f32 %v6647_v43, %v6560_v14  ;;  %v6691_v7 = vadd.f32 %v6690_v19, %v12102_v38  ;;  %v9680_v43 = vor.u32 %v10338_v53, %v9679_v36  ;;  %v9644_v53 = vor.u32 %v10325_v20, %v9641_v4 }
 0x85b   : > { %v12243_v35 = vadd.f32 %v12212_v10, %v6691_v7  ;;  %6830 = vmatmul.bf16.gmra.mxu3 %v9680_v43 }
 0x85c   : > { %v12254_v19 = vpop.f32.mrf.mxu3 }
 0x85d   : > { %6732 = vmatmul.bf16.gmra.mxu2 %v9612_v12 }
 0x85e   : > { %v6562_v17 = vpop.f32.mrf.mxu0 }
 0x85f   : > { %v6650_v2 = vpop.f32.mrf.mxu1  ;;  %v6563_v38 = vadd.f32 %v6562_v17, %v12112_v11  ;;  %v10275_v17 = vld [vmem:[#allocation2 + $0xcd4] sm:$0xf0] }
 0x860   : > { %v6693_v32 = vpop.f32.mrf.mxu2 }
 0x861   : > { %v12248_v56 = vadd.f32 %v6650_v2, %v6563_v38  ;;  %v6694_v14 = vadd.f32 %v6693_v32, %v12110_v30  ;;  %6873 = vmatmul.bf16.gmra.mxu0 %v9396_v58  ;;  %v10270_v30 = vld [vmem:[#allocation2 + $0xcb4] sm:$0xf]  ;;  %v9711_v32 = vld [vmem:[#allocation2 + $0xef0] sm:$0xf] }
 0x862   : > { %6961 = vmatmul.bf16.gmra.mxu1 %v9400_v45  ;;  %v9425_v58 = vld [vmem:[#allocation2 + $0xcd0] sm:$0xf0]  ;;  %v9431_v45 = vld [vmem:[#allocation2 + $0xcb8] sm:$0xf] }
 0x863   : > { %v12252_v10 = vadd.f32 %v12220_v48, %v6694_v14  ;;  %v9428_v43 = vor.u32 %v10270_v30, %v9425_v58  ;;  %v9432_v38 = vor.u32 %v10275_v17, %v9431_v45  ;;  %v10346_v14 = vld [vmem:[#allocation2 + $0xf0c] sm:$0xf0]  ;;  %v10333_v58 = vld [vmem:[#allocation2 + $0xeac] sm:$0xf] }
 0x864   : > { %v12263_v2 = vpop.f32.mrf.mxu3  ;;  %v9673_v45 = vld [vmem:[#allocation2 + $0xec8] sm:$0xf0] }
 0x866   : > { %v6564_v7 = vpop.f32.mrf.mxu0 }
 0x867   : > { %v6652_v12 = vpop.f32.mrf.mxu1  ;;  %v6565_v15 = vadd.f32 %v6564_v7, %v12120_v57  ;;  %v10358_v57 = vld [vmem:[%s12611_s2 + $0x70] sm:$0xff] }
 0x868   : > { %v6695_v11 = vpop.f32.mrf.mxu2  ;;  %7216 = vmatpush.bf16.msra.mxu3 %v10358_v57 }
 0x869   : > { %v12257_v0 = vadd.f32 %v6652_v12, %v6565_v15  ;;  %v6696_v36 = vadd.f32 %v6695_v11, %v12118_v40  ;;  %v9712_v12 = vor.u32 %v10346_v14, %v9711_v32  ;;  %v9676_v14 = vor.u32 %v10333_v58, %v9673_v45 }
 0x86b   : > { %v12261_v48 = vadd.f32 %v12228_v34, %v6696_v36  ;;  %6835 = vmatmul.bf16.gmra.mxu3 %v9712_v12 }
 0x86c   : > { %v6796_v36 = vpop.f32.mrf.mxu3 }
 0x86d   : > { %6737 = vmatmul.bf16.gmra.mxu2 %v9644_v53 }
 0x86e   : > { %v6567_v40 = vpop.f32.mrf.mxu0 }
 0x86f   : > { %v6655_v7 = vpop.f32.mrf.mxu1  ;;  %v6568_v20 = vadd.f32 %v6567_v40, %v12128_v37  ;;  %v10278_v40 = vld [vmem:[#allocation2 + $0xcf4] sm:$0xf] }
 0x870   : > { %v6698_v4 = vpop.f32.mrf.mxu2 }
 0x871   : > { %v12269_v34 = vadd.f32 %v6655_v7, %v6568_v20  ;;  %v6699_v15 = vadd.f32 %v6698_v4, %v12126_v50  ;;  %6878 = vmatmul.bf16.gmra.mxu0 %v9428_v43  ;;  %v9457_v50 = vld [vmem:[#allocation2 + $0xd10] sm:$0xf0]  ;;  %v9463_v43 = vld [vmem:[#allocation2 + $0xcf8] sm:$0xf]  ;;  %v9743_v4 = vld [vmem:[#allocation2 + $0xf30] sm:$0xf] }
 0x872   : > { %6966 = vmatmul.bf16.gmra.mxu1 %v9432_v38  ;;  %v10283_v38 = vld [vmem:[#allocation2 + $0xd14] sm:$0xf0]  ;;  %v9460_v12 = vor.u32 %v10278_v40, %v9457_v50  ;;  %v10341_v40 = vld [vmem:[#allocation2 + $0xeec] sm:$0xf] }
 0x873   : > { %v12273_v11 = vadd.f32 %v12236_v62, %v6699_v15  ;;  %v9464_v20 = vor.u32 %v10283_v38, %v9463_v43  ;;  %v9705_v50 = vld [vmem:[#allocation2 + $0xf08] sm:$0xf0] }
 0x874   : > { %v12282_v7 = vpop.f32.mrf.mxu3 }
 0x876   : > { %v6569_v53 = vpop.f32.mrf.mxu0 }
 0x877   : > { %v6657_v30 = vpop.f32.mrf.mxu1  ;;  %v6570_v17 = vadd.f32 %v6569_v53, %v12136_v59  ;;  %v10354_v59 = vld [vmem:[#allocation2 + $0xf4c] sm:$0xf0] }
 0x878   : > { %v6700_v37 = vpop.f32.mrf.mxu2 }
 0x879   : > { %v12276_v57 = vadd.f32 %v6657_v30, %v6570_v17  ;;  %v6701_v32 = vadd.f32 %v6700_v37, %v12134_v61  ;;  %v9744_v30 = vor.u32 %v10354_v59, %v9743_v4  ;;  %v9708_v59 = vor.u32 %v10341_v40, %v9705_v50 }
 0x87b   : > { %v12280_v62 = vadd.f32 %v12245_v9, %v6701_v32  ;;  %6840 = vmatmul.bf16.gmra.mxu3 %v9744_v30 }
 0x87c   : > { %v6801_v37 = vpop.f32.mrf.mxu3 }
 0x87d   : > { %6742 = vmatmul.bf16.gmra.mxu2 %v9676_v14 }
 0x87e   : > { %v6572_v15 = vpop.f32.mrf.mxu0 }
 0x87f   : > { %v6660_v53 = vpop.f32.mrf.mxu1  ;;  %v6573_v61 = vadd.f32 %v6572_v15, %v12144_v44  ;;  %v10291_v15 = vld [vmem:[#allocation2 + $0xd54] sm:$0xf0] }
 0x880   : > { %v6703_v58 = vpop.f32.mrf.mxu2 }
 0x881   : > { %v12285_v45 = vadd.f32 %v6660_v53, %v6573_v61  ;;  %v6704_v17 = vadd.f32 %v6703_v58, %v12142_v54  ;;  %6883 = vmatmul.bf16.gmra.mxu0 %v9460_v12  ;;  %v10286_v54 = vld [vmem:[#allocation2 + $0xd34] sm:$0xf] }
 0x882   : > { %6971 = vmatmul.bf16.gmra.mxu1 %v9464_v20  ;;  %v9489_v12 = vld [vmem:[#allocation2 + $0xd50] sm:$0xf0]  ;;  %v9495_v20 = vld [vmem:[#allocation2 + $0xd38] sm:$0xf] }
 0x883   : > { %v12289_v9 = vadd.f32 %v12254_v19, %v6704_v17  ;;  %v12299_v53 = vld [vmem:[#allocation2 + $0xf70] sm:$0xff]  ;;  %v9492_v61 = vor.u32 %v10286_v54, %v9489_v12  ;;  %v10349_v54 = vld [vmem:[#allocation2 + $0xf2c] sm:$0xf] }
 0x884   : > { %v12297_v19 = vpop.f32.mrf.mxu3  ;;  %v6150_v30 = vunpack.c.l.b16 %v12299_v53  ;;  %v9737_v12 = vld [vmem:[#allocation2 + $0xf48] sm:$0xf0] }
 0x886   : > { %v6574_v32 = vpop.f32.mrf.mxu0 }
 0x887   : > { %v6662_v14 = vpop.f32.mrf.mxu1  ;;  %v6575_v43 = vadd.f32 %v6574_v32, %v12152_v31  ;;  %v9496_v31 = vor.u32 %v10291_v15, %v9495_v20  ;;  %v6278_v32 = vpack.c.b16 %v6150_v30, %v6150_v30 }
 0x888   : > { %v6705_v38 = vpop.f32.mrf.mxu2 }
 0x889   : > { %v12292_v44 = vadd.f32 %v6662_v14, %v6575_v43  ;;  %v12295_v4 = vadd.f32 %v6705_v38, %v12150_v6 }
 0x88b   : > { %6845 = vmatmul.bf16.gmra.mxu3 %v6278_v32 }
 0x88c   : > { %v6806_v38 = vpop.f32.mrf.mxu3 }
 0x88d   : > { %6747 = vmatmul.bf16.gmra.mxu2 %v9708_v59 }
 0x88e   : > { %v6577_v58 = vpop.f32.mrf.mxu0 }
 0x88f   : > { %v6665_v17 = vpop.f32.mrf.mxu1  ;;  %v6578_v6 = vadd.f32 %v6577_v58, %v12160_v3  ;;  %v9740_v58 = vor.u32 %v10349_v54, %v9737_v12 }
 0x890   : > { %v6708_v14 = vpop.f32.mrf.mxu2 }
 0x891   : > { %v12303_v40 = vadd.f32 %v6665_v17, %v6578_v6  ;;  %v6709_v50 = vadd.f32 %v6708_v14, %v12158_v27  ;;  %6888 = vmatmul.bf16.gmra.mxu0 %v9492_v61  ;;  %v10294_v17 = vld [vmem:[#allocation2 + $0xd74] sm:$0xf]  ;;  %v9527_v61 = vld [vmem:[#allocation2 + $0xd78] sm:$0xf] }
 0x892   : > { %6976 = vmatmul.bf16.gmra.mxu1 %v9496_v31  ;;  %v9521_v27 = vld [vmem:[#allocation2 + $0xd90] sm:$0xf0]  ;;  %v10299_v31 = vld [vmem:[#allocation2 + $0xd94] sm:$0xf0] }
 0x893   : > { %v12306_v43 = vadd.f32 %v6796_v36, %v6709_v50  ;;  %v9524_v32 = vor.u32 %v10294_v17, %v9521_v27  ;;  %v9528_v6 = vor.u32 %v10299_v31, %v9527_v61  ;;  %v9553_v31 = vld [vmem:[#allocation2 + $0xdd0] sm:$0xf0] }
 0x894   : > { %v12314_v36 = vpop.f32.mrf.mxu3 }
 0x896   : > { %v6579_v51 = vpop.f32.mrf.mxu0 }
 0x897   : > { %v6667_v59 = vpop.f32.mrf.mxu1  ;;  %v6580_v20 = vadd.f32 %v6579_v51, %v12168_v26 }
 0x898   : > { %v6710_v15 = vpop.f32.mrf.mxu2 }
 0x899   : > { %v12309_v30 = vadd.f32 %v6667_v59, %v6580_v20  ;;  %v12312_v3 = vadd.f32 %v6710_v15, %v12166_v49  ;;  %v6149_v20 = vunpack.c.h.b16 %v12178_v47  ;;  %v10357_v47 = vld [vmem:[%s12611_s2 + $0x68] sm:$0xff] }
 0x89a   : > { %7217 = vmatpush.bf16.msra.mxu3 %v10357_v47 }
 0x89b   : > { %v6277_v61 = vpack.c.b16 %v6149_v20, %v6149_v20 }
 0x89c   : > { %v6811_v12 = vpop.f32.mrf.mxu3 }
 0x89d   : > { %6752 = vmatmul.bf16.gmra.mxu2 %v9740_v58 }
 0x89e   : > { %v6582_v14 = vpop.f32.mrf.mxu0 }
 0x89f   : > { %v6670_v50 = vpop.f32.mrf.mxu1  ;;  %v6583_v51 = vadd.f32 %v6582_v14, %v12176_v5  ;;  %v10302_v5 = vld [vmem:[#allocation2 + $0xdb4] sm:$0xf]  ;;  %v9559_v14 = vld [vmem:[#allocation2 + $0xdb8] sm:$0xf] }
 0x8a0   : > { %v6713_v26 = vpop.f32.mrf.mxu2 }
 0x8a1   : > { %v12317_v59 = vadd.f32 %v6670_v50, %v6583_v51  ;;  %v6714_v49 = vadd.f32 %v6713_v26, %v12174_v41  ;;  %6893 = vmatmul.bf16.gmra.mxu0 %v9524_v32  ;;  %v10307_v50 = vld [vmem:[#allocation2 + $0xdd4] sm:$0xf0]  ;;  %v9556_v41 = vor.u32 %v10302_v5, %v9553_v31  ;;  %v10239_v5 = vld [vmem:[#allocation2 + $0xbbc] sm:$0xf] }
 0x8a2   : > { %6981 = vmatmul.bf16.gmra.mxu1 %v9528_v6  ;;  %v9305_v31 = vld [vmem:[#allocation2 + $0xbd8] sm:$0xf0] }
 0x8a3   : > { %v12320_v54 = vadd.f32 %v6801_v37, %v6714_v49  ;;  %v9560_v37 = vor.u32 %v10307_v50, %v9559_v14 }
 0x8a4   : > { %v12326_v51 = vpop.f32.mrf.mxu3 }
 0x8a6   : > { %v6584_v15 = vpop.f32.mrf.mxu0 }
 0x8a7   : > { %v6672_v58 = vpop.f32.mrf.mxu1 }
 0x8a8   : > { %v6715_v17 = vpop.f32.mrf.mxu2 }
 0x8a9   : > { %v12324_v27 = vadd.f32 %v6715_v17, %v12184_v52 }
 0x8ad   : > { %6757 = vmatmul.bf16.gmra.mxu2 %v6277_v61 }
 0x8ae   : > { %v6859_v32 = vpop.f32.mrf.mxu0  ;;  %v6816_v58 = vpop.f32.mrf.mxu3 }
 0x8af   : > { %v6947_v6 = vpop.f32.mrf.mxu1  ;;  %v6860_v26 = vadd.f32 %v6859_v32, %v12218_v23  ;;  %v10310_v32 = vld [vmem:[#allocation2 + $0xdf4] sm:$0xf] }
 0x8b0   : > { %v6718_v52 = vpop.f32.mrf.mxu2 }
 0x8b1   : > { %v6719_v49 = vadd.f32 %v6718_v52, %v12192_v63  ;;  %v12333_v20 = vadd.f32 %v6947_v6, %v6860_v26  ;;  %6898 = vmatmul.bf16.gmra.mxu0 %v9556_v41  ;;  %v9308_v63 = vor.u32 %v10239_v5, %v9305_v31  ;;  %v9585_v6 = vld [vmem:[#allocation2 + $0xe10] sm:$0xf0]  ;;  %v9591_v41 = vld [vmem:[#allocation2 + $0xdf8] sm:$0xf] }
 0x8b2   : > { %6986 = vmatmul.bf16.gmra.mxu1 %v9560_v37  ;;  %v10315_v37 = vld [vmem:[#allocation2 + $0xe14] sm:$0xf0]  ;;  %v9588_v26 = vor.u32 %v10310_v32, %v9585_v6 }
 0x8b3   : > { %v12335_v15 = vadd.f32 %v6806_v38, %v6719_v49  ;;  %v9592_v52 = vor.u32 %v10315_v37, %v9591_v41  ;;  %v9617_v37 = vld [vmem:[#allocation2 + $0xe50] sm:$0xf0] }
 0x8b6   : > { %v6861_v17 = vpop.f32.mrf.mxu0  ;;  %v12343_v38 = vpop.f32.mrf.mxu3 }
 0x8b7   : > { %v6949_v61 = vpop.f32.mrf.mxu1  ;;  %v6862_v14 = vadd.f32 %v6861_v17, %v12226_v60 }
 0x8b8   : > { %v6720_v50 = vpop.f32.mrf.mxu2 }
 0x8b9   : > { %v12339_v23 = vadd.f32 %v6720_v50, %v12198_v18  ;;  %v12341_v47 = vadd.f32 %v6949_v61, %v6862_v14 }
 0x8bd   : > { %7034 = vmatmul.bf16.vlgmr.msra.gmra.mxu2 %v9308_v63  ;;  %v9337_v63 = vld [vmem:[#allocation2 + $0xc18] sm:$0xf0] }
 0x8be   : > { %v6864_v49 = vpop.f32.mrf.mxu0  ;;  %v6821_v5 = vpop.f32.mrf.mxu3 }
 0x8bf   : > { %v6952_v55 = vpop.f32.mrf.mxu1  ;;  %v6865_v60 = vadd.f32 %v6864_v49, %v12234_v16 }
 0x8c0   : > { %v6723_v17 = vpop.f32.mrf.mxu2 }
 0x8c1   : > { %v6724_v18 = vadd.f32 %v6723_v17, %v12207_v42  ;;  %v12347_v50 = vadd.f32 %v6952_v55, %v6865_v60  ;;  %6903 = vmatmul.bf16.gmra.mxu0 %v9588_v26  ;;  %v9340_v42 = vor.u32 %v10247_v25, %v9337_v63  ;;  %v10318_v55 = vld [vmem:[#allocation2 + $0xe34] sm:$0xf]  ;;  %v9623_v26 = vld [vmem:[#allocation2 + $0xe38] sm:$0xf] }
 0x8c2   : > { %6991 = vmatmul.bf16.gmra.mxu1 %v9592_v52  ;;  %v10323_v52 = vld [vmem:[#allocation2 + $0xe54] sm:$0xf0]  ;;  %v9620_v49 = vor.u32 %v10318_v55, %v9617_v37 }
 0x8c3   : > { %v12349_v61 = vadd.f32 %v6811_v12, %v6724_v18  ;;  %v9624_v60 = vor.u32 %v10323_v52, %v9623_v26  ;;  %v10326_v52 = vld [vmem:[#allocation2 + $0xe74] sm:$0xf] }
 0x8c6   : > { %v6866_v31 = vpop.f32.mrf.mxu0  ;;  %v12357_v12 = vpop.f32.mrf.mxu3 }
 0x8c7   : > { %v6954_v14 = vpop.f32.mrf.mxu1  ;;  %v6867_v32 = vadd.f32 %v6866_v31, %v12243_v35 }
 0x8c8   : > { %v6725_v6 = vpop.f32.mrf.mxu2 }
 0x8c9   : > { %v12353_v41 = vadd.f32 %v6725_v6, %v12210_v24  ;;  %v12355_v16 = vadd.f32 %v6954_v14, %v6867_v32 }
 0x8cd   : > { %7039 = vmatmul.bf16.gmra.mxu2 %v9340_v42  ;;  %v9369_v42 = vld [vmem:[#allocation2 + $0xc58] sm:$0xf0] }
 0x8ce   : > { %v6869_v17 = vpop.f32.mrf.mxu0  ;;  %v6826_v14 = vpop.f32.mrf.mxu3 }
 0x8cf   : > { %v6957_v18 = vpop.f32.mrf.mxu1  ;;  %v6870_v35 = vadd.f32 %v6869_v17, %v12252_v10  ;;  %v9649_v17 = vld [vmem:[#allocation2 + $0xe90] sm:$0xf0] }
 0x8d0   : > { %v6728_v31 = vpop.f32.mrf.mxu2 }
 0x8d1   : > { %v6729_v24 = vadd.f32 %v6728_v31, %v12215_v13  ;;  %v12361_v6 = vadd.f32 %v6957_v18, %v6870_v35  ;;  %6908 = vmatmul.bf16.gmra.mxu0 %v9620_v49  ;;  %v9372_v13 = vor.u32 %v10255_v8, %v9369_v42  ;;  %v9655_v49 = vld [vmem:[#allocation2 + $0xe78] sm:$0xf]  ;;  %v9652_v18 = vor.u32 %v10326_v52, %v9649_v17 }
 0x8d2   : > { %6996 = vmatmul.bf16.gmra.mxu1 %v9624_v60  ;;  %v10331_v60 = vld [vmem:[#allocation2 + $0xe94] sm:$0xf0] }
 0x8d3   : > { %v12363_v25 = vadd.f32 %v6816_v58, %v6729_v24  ;;  %v9656_v35 = vor.u32 %v10331_v60, %v9655_v49  ;;  %v10334_v60 = vld [vmem:[#allocation2 + $0xeb4] sm:$0xf] }
 0x8d6   : > { %v6871_v63 = vpop.f32.mrf.mxu0  ;;  %v12371_v58 = vpop.f32.mrf.mxu3 }
 0x8d7   : > { %v6959_v32 = vpop.f32.mrf.mxu1  ;;  %v6872_v55 = vadd.f32 %v6871_v63, %v12261_v48 }
 0x8d8   : > { %v6730_v37 = vpop.f32.mrf.mxu2 }
 0x8d9   : > { %v12367_v26 = vadd.f32 %v6730_v37, %v12223_v39  ;;  %v12369_v10 = vadd.f32 %v6959_v32, %v6872_v55 }
 0x8dd   : > { %7044 = vmatmul.bf16.gmra.mxu2 %v9372_v13  ;;  %v9401_v13 = vld [vmem:[#allocation2 + $0xc98] sm:$0xf0] }
 0x8de   : > { %v6874_v31 = vpop.f32.mrf.mxu0  ;;  %v6831_v32 = vpop.f32.mrf.mxu3 }
 0x8df   : > { %v6962_v24 = vpop.f32.mrf.mxu1  ;;  %v6875_v48 = vadd.f32 %v6874_v31, %v12273_v11  ;;  %v9681_v31 = vld [vmem:[#allocation2 + $0xed0] sm:$0xf0] }
 0x8e0   : > { %v6733_v63 = vpop.f32.mrf.mxu2 }
 0x8e1   : > { %v6734_v39 = vadd.f32 %v6733_v63, %v12231_v33  ;;  %v12375_v37 = vadd.f32 %v6962_v24, %v6875_v48  ;;  %6913 = vmatmul.bf16.gmra.mxu0 %v9652_v18  ;;  %v9404_v33 = vor.u32 %v10263_v21, %v9401_v13  ;;  %v9687_v18 = vld [vmem:[#allocation2 + $0xeb8] sm:$0xf]  ;;  %v9684_v24 = vor.u32 %v10334_v60, %v9681_v31  ;;  %v10271_v31 = vld [vmem:[#allocation2 + $0xcbc] sm:$0xf] }
 0x8e2   : > { %7001 = vmatmul.bf16.gmra.mxu1 %v9656_v35  ;;  %v10339_v35 = vld [vmem:[#allocation2 + $0xed4] sm:$0xf0] }
 0x8e3   : > { %v12377_v8 = vadd.f32 %v6821_v5, %v6734_v39  ;;  %v9688_v48 = vor.u32 %v10339_v35, %v9687_v18  ;;  %v9433_v18 = vld [vmem:[#allocation2 + $0xcd8] sm:$0xf0] }
 0x8e6   : > { %v6876_v42 = vpop.f32.mrf.mxu0  ;;  %v12385_v5 = vpop.f32.mrf.mxu3 }
 0x8e7   : > { %v6964_v55 = vpop.f32.mrf.mxu1  ;;  %v6877_v52 = vadd.f32 %v6876_v42, %v12280_v62  ;;  %v10356_v62 = vld [vmem:[%s12611_s2 + $0x60] sm:$0xff] }
 0x8e8   : > { %v6735_v17 = vpop.f32.mrf.mxu2  ;;  %7218 = vmatpush.bf16.msra.mxu3 %v10356_v62 }
 0x8e9   : > { %v12381_v49 = vadd.f32 %v6735_v17, %v12239_v28  ;;  %v12383_v11 = vadd.f32 %v6964_v55, %v6877_v52  ;;  %v6794_v17 = vadd.f32 %v12263_v2, %v12295_v4 }
 0x8ed   : > { %7049 = vmatmul.bf16.gmra.mxu2 %v9404_v33 }
 0x8ee   : > { %v6879_v63 = vpop.f32.mrf.mxu0  ;;  %v6836_v52 = vpop.f32.mrf.mxu3 }
 0x8ef   : > { %v6967_v39 = vpop.f32.mrf.mxu1  ;;  %v6880_v28 = vadd.f32 %v6879_v63, %v12289_v9  ;;  %v9436_v63 = vor.u32 %v10271_v31, %v9433_v18  ;;  %v6799_v18 = vadd.f32 %v12282_v7, %v12312_v3 }
 0x8f0   : > { %v6738_v42 = vpop.f32.mrf.mxu2 }
 0x8f1   : > { %v6739_v21 = vadd.f32 %v6738_v42, %v12248_v56  ;;  %v12392_v55 = vadd.f32 %v6967_v39, %v6880_v28  ;;  %6918 = vmatmul.bf16.gmra.mxu0 %v9684_v24  ;;  %v10342_v24 = vld [vmem:[#allocation2 + $0xef4] sm:$0xf]  ;;  %v10347_v39 = vld [vmem:[#allocation2 + $0xf14] sm:$0xf0] }
 0x8f2   : > { %7006 = vmatmul.bf16.gmra.mxu1 %v9688_v48  ;;  %v9713_v48 = vld [vmem:[#allocation2 + $0xf10] sm:$0xf0] }
 0x8f3   : > { %v12394_v13 = vadd.f32 %v6826_v14, %v6739_v21  ;;  %v9719_v14 = vld [vmem:[#allocation2 + $0xef8] sm:$0xf]  ;;  %v9716_v2 = vor.u32 %v10342_v24, %v9713_v48  ;;  %v10279_v24 = vld [vmem:[#allocation2 + $0xcfc] sm:$0xf] }
 0x8f4   : > { %v9720_v4 = vor.u32 %v10347_v39, %v9719_v14  ;;  %v9465_v48 = vld [vmem:[#allocation2 + $0xd18] sm:$0xf0] }
 0x8f6   : > { %v6881_v33 = vpop.f32.mrf.mxu0  ;;  %v12403_v28 = vpop.f32.mrf.mxu3 }
 0x8f7   : > { %v6969_v60 = vpop.f32.mrf.mxu1  ;;  %v6882_v35 = vadd.f32 %v6881_v33, %v6794_v17 }
 0x8f8   : > { %v6740_v9 = vpop.f32.mrf.mxu2 }
 0x8f9   : > { %v12399_v62 = vadd.f32 %v6740_v9, %v12257_v0  ;;  %v12401_v56 = vadd.f32 %v6969_v60, %v6882_v35 }
 0x8fd   : > { %7054 = vmatmul.bf16.gmra.mxu2 %v9436_v63 }
 0x8fe   : > { %v6884_v42 = vpop.f32.mrf.mxu0  ;;  %v6841_v31 = vpop.f32.mrf.mxu3 }
 0x8ff   : > { %v6972_v21 = vpop.f32.mrf.mxu1  ;;  %v6885_v17 = vadd.f32 %v6884_v42, %v12306_v43  ;;  %v9468_v42 = vor.u32 %v10279_v24, %v9465_v48  ;;  %v6804_v48 = vadd.f32 %v12297_v19, %v12324_v27 }
 0x900   : > { %v6743_v33 = vpop.f32.mrf.mxu2 }
 0x901   : > { %v6744_v0 = vadd.f32 %v6743_v33, %v12269_v34  ;;  %v12407_v9 = vadd.f32 %v6972_v21, %v6885_v17  ;;  %6923 = vmatmul.bf16.gmra.mxu0 %v9716_v2  ;;  %v10350_v2 = vld [vmem:[#allocation2 + $0xf34] sm:$0xf]  ;;  %v10355_v21 = vld [vmem:[#allocation2 + $0xf54] sm:$0xf0] }
 0x902   : > { %7011 = vmatmul.bf16.gmra.mxu1 %v9720_v4  ;;  %v9745_v4 = vld [vmem:[#allocation2 + $0xf50] sm:$0xf0] }
 0x903   : > { %v12409_v60 = vadd.f32 %v6831_v32, %v6744_v0  ;;  %v9751_v32 = vld [vmem:[#allocation2 + $0xf38] sm:$0xf]  ;;  %v9748_v7 = vor.u32 %v10350_v2, %v9745_v4 }
 0x904   : > { %v9752_v3 = vor.u32 %v10355_v21, %v9751_v32  ;;  %v12428_v32 = vld [vmem:[#allocation2 + $0xf78] sm:$0xff] }
 0x906   : > { %v6886_v35 = vpop.f32.mrf.mxu0  ;;  %v12418_v17 = vpop.f32.mrf.mxu3 }
 0x907   : > { %v6974_v63 = vpop.f32.mrf.mxu1  ;;  %v6887_v14 = vadd.f32 %v6886_v35, %v6799_v18 }
 0x908   : > { %v6745_v39 = vpop.f32.mrf.mxu2 }
 0x909   : > { %v12414_v43 = vadd.f32 %v6745_v39, %v12276_v57  ;;  %v12416_v34 = vadd.f32 %v6974_v63, %v6887_v14  ;;  %v10287_v14 = vld [vmem:[#allocation2 + $0xd3c] sm:$0xf] }
 0x90d   : > { %7059 = vmatmul.bf16.gmra.mxu2 %v9468_v42  ;;  %v9497_v42 = vld [vmem:[#allocation2 + $0xd58] sm:$0xf0] }
 0x90e   : > { %v6889_v33 = vpop.f32.mrf.mxu0  ;;  %v6846_v24 = vpop.f32.mrf.mxu3 }
 0x90f   : > { %v6977_v0 = vpop.f32.mrf.mxu1  ;;  %v6890_v18 = vadd.f32 %v6889_v33, %v12320_v54  ;;  %v9500_v33 = vor.u32 %v10287_v14, %v9497_v42 }
 0x910   : > { %v6748_v35 = vpop.f32.mrf.mxu2 }
 0x911   : > { %v6749_v57 = vadd.f32 %v6748_v35, %v12285_v45  ;;  %v12422_v39 = vadd.f32 %v6977_v0, %v6890_v18  ;;  %6928 = vmatmul.bf16.gmra.mxu0 %v9748_v7 }
 0x912   : > { %7016 = vmatmul.bf16.gmra.mxu1 %v9752_v3  ;;  %v6152_v3 = vunpack.c.l.b16 %v12428_v32 }
 0x913   : > { %v12424_v63 = vadd.f32 %v6836_v52, %v6749_v57  ;;  %v6151_v52 = vunpack.c.h.b16 %v12299_v53  ;;  %v6809_v53 = vadd.f32 %v12314_v36, %v12339_v23 }
 0x914   : > { %v6280_v27 = vpack.c.b16 %v6152_v3, %v6152_v3 }
 0x915   : > { %v6279_v19 = vpack.c.b16 %v6151_v52, %v6151_v52 }
 0x916   : > { %v6891_v2 = vpop.f32.mrf.mxu0  ;;  %v6848_v0 = vpop.f32.mrf.mxu3 }
 0x917   : > { %v6979_v4 = vpop.f32.mrf.mxu1  ;;  %v6892_v54 = vadd.f32 %v6891_v2, %v6804_v48 }
 0x918   : > { %v6750_v21 = vpop.f32.mrf.mxu2 }
 0x919   : > { %v12431_v45 = vadd.f32 %v6750_v21, %v12292_v44  ;;  %v12433_v7 = vadd.f32 %v6979_v4, %v6892_v54  ;;  %v10295_v54 = vld [vmem:[#allocation2 + $0xd7c] sm:$0xf] }
 0x91a   : > { %v9529_v21 = vld [vmem:[#allocation2 + $0xd98] sm:$0xf0] }
 0x91d   : > { %7064 = vmatmul.bf16.gmra.mxu2 %v9500_v33 }
 0x91e   : > { %v6894_v18 = vpop.f32.mrf.mxu0 }
 0x91f   : > { %v6982_v35 = vpop.f32.mrf.mxu1  ;;  %v6895_v57 = vadd.f32 %v6894_v18, %v12335_v15 }
 0x920   : > { %v6753_v48 = vpop.f32.mrf.mxu2 }
 0x921   : > { %v6754_v14 = vadd.f32 %v6753_v48, %v12303_v40  ;;  %v12439_v42 = vadd.f32 %v6982_v35, %v6895_v57  ;;  %6933 = vmatmul.bf16.gmra.mxu0 %v6279_v19  ;;  %v9532_v40 = vor.u32 %v10295_v54, %v9529_v21  ;;  %v6814_v35 = vadd.f32 %v12326_v51, %v12353_v41  ;;  %v10303_v48 = vld [vmem:[#allocation2 + $0xdbc] sm:$0xf] }
 0x922   : > { %7021 = vmatmul.bf16.gmra.mxu1 %v6280_v27  ;;  %v6819_v51 = vadd.f32 %v12343_v38, %v12367_v26 }
 0x923   : > { %v12441_v44 = vadd.f32 %v6841_v31, %v6754_v14  ;;  %v9561_v14 = vld [vmem:[#allocation2 + $0xdd8] sm:$0xf0] }
 0x924   : > { %v9564_v54 = vor.u32 %v10303_v48, %v9561_v14 }
 0x926   : > { %v6896_v2 = vpop.f32.mrf.mxu0 }
 0x927   : > { %v6984_v4 = vpop.f32.mrf.mxu1  ;;  %v6897_v33 = vadd.f32 %v6896_v2, %v6809_v53 }
 0x928   : > { %v6755_v52 = vpop.f32.mrf.mxu2 }
 0x929   : > { %v12446_v15 = vadd.f32 %v6755_v52, %v12309_v30  ;;  %v12448_v3 = vadd.f32 %v6984_v4, %v6897_v33 }
 0x92d   : > { %7069 = vmatmul.bf16.gmra.mxu2 %v9532_v40  ;;  %v10311_v40 = vld [vmem:[#allocation2 + $0xdfc] sm:$0xf] }
 0x92e   : > { %v6899_v0 = vpop.f32.mrf.mxu0 }
 0x92f   : > { %v6987_v19 = vpop.f32.mrf.mxu1  ;;  %v6900_v31 = vadd.f32 %v6899_v0, %v12349_v61  ;;  %v9593_v0 = vld [vmem:[#allocation2 + $0xe18] sm:$0xf0] }
 0x930   : > { %v6758_v27 = vpop.f32.mrf.mxu2 }
 0x931   : > { %v6759_v36 = vadd.f32 %v6758_v27, %v12317_v59  ;;  %v12452_v23 = vadd.f32 %v6987_v19, %v6900_v31 }
 0x933   : > { %v12454_v18 = vadd.f32 %v6846_v24, %v6759_v36 }
 0x936   : > { %v6901_v30 = vpop.f32.mrf.mxu0 }
 0x937   : > { %v6989_v57 = vpop.f32.mrf.mxu1  ;;  %v6902_v53 = vadd.f32 %v6901_v30, %v6814_v35  ;;  %v9596_v30 = vor.u32 %v10311_v40, %v9593_v0 }
 0x938   : > { %v6760_v2 = vpop.f32.mrf.mxu2 }
 0x939   : > { %v12458_v4 = vadd.f32 %v6989_v57, %v6902_v53  ;;  %v6824_v53 = vadd.f32 %v12357_v12, %v12381_v49 }
 0x93d   : > { %7074 = vmatmul.bf16.gmra.mxu2 %v9564_v54  ;;  %v10319_v54 = vld [vmem:[#allocation2 + $0xe3c] sm:$0xf] }
 0x93e   : > { %v6904_v61 = vpop.f32.mrf.mxu0 }
 0x93f   : > { %v6992_v21 = vpop.f32.mrf.mxu1  ;;  %v6905_v59 = vadd.f32 %v6904_v61, %v12363_v25  ;;  %v9625_v61 = vld [vmem:[#allocation2 + $0xe58] sm:$0xf0] }
 0x940   : > { %v7035_v33 = vpop.f32.mrf.mxu2 }
 0x941   : > { %v12461_v24 = vadd.f32 %v6992_v21, %v6905_v59  ;;  %v7036_v27 = vadd.f32 %v7035_v33, %v12333_v20 }
 0x946   : > { %v6906_v41 = vpop.f32.mrf.mxu0 }
 0x947   : > { %v6994_v52 = vpop.f32.mrf.mxu1  ;;  %v6907_v19 = vadd.f32 %v6906_v41, %v6819_v51  ;;  %v9628_v41 = vor.u32 %v10319_v54, %v9625_v61  ;;  %v10335_v61 = vld [vmem:[#allocation2 + $0xebc] sm:$0xf] }
 0x948   : > { %v7037_v31 = vpop.f32.mrf.mxu2 }
 0x949   : > { %v12466_v36 = vadd.f32 %v6994_v52, %v6907_v19  ;;  %v7038_v35 = vadd.f32 %v7037_v31, %v12341_v47  ;;  %v6829_v19 = vadd.f32 %v12371_v58, %v12399_v62 }
 0x94b   : > { %v7114_v25 = vpack.c.bf16 %v7038_v35, %v7036_v27  ;;  %v10327_v27 = vld [vmem:[#allocation2 + $0xe7c] sm:$0xf] }
 0x94c   : > { %v9657_v35 = vld [vmem:[#allocation2 + $0xe98] sm:$0xf0] }
 0x94d   : > { %7079 = vmatmul.bf16.gmra.mxu2 %v9596_v30  ;;  %9781 = vmatmul.msk.bf16.vlgmr.msra.gmra.mxu3 %vm3687_vm0, %v7114_v25 }
 0x94e   : > { %v6909_v57 = vpop.f32.mrf.mxu0 }
 0x94f   : > { %v6997_v48 = vpop.f32.mrf.mxu1  ;;  %v6910_v38 = vadd.f32 %v6909_v57, %v12377_v8 }
 0x950   : > { %v7040_v26 = vpop.f32.mrf.mxu2 }
 0x951   : > { %v12471_v14 = vadd.f32 %v6997_v48, %v6910_v38  ;;  %v7041_v59 = vadd.f32 %v7040_v26, %v12347_v50  ;;  %v9660_v38 = vor.u32 %v10327_v27, %v9657_v35 }
 0x956   : > { %v6911_v20 = vpop.f32.mrf.mxu0 }
 0x957   : > { %v6999_v2 = vpop.f32.mrf.mxu1  ;;  %v6912_v47 = vadd.f32 %v6911_v20, %v6824_v53 }
 0x958   : > { %v7042_v21 = vpop.f32.mrf.mxu2 }
 0x959   : > { %v12476_v33 = vadd.f32 %v6999_v2, %v6912_v47  ;;  %v7043_v51 = vadd.f32 %v7042_v21, %v12355_v16  ;;  %v6834_v2 = vadd.f32 %v12385_v5, %v12414_v43  ;;  %v9689_v47 = vld [vmem:[#allocation2 + $0xed8] sm:$0xf0] }
 0x95b   : > { %v7115_v8 = vpack.c.bf16 %v7043_v51, %v7041_v59 }
 0x95d   : > { %7084 = vmatmul.bf16.gmra.mxu2 %v9628_v41  ;;  %9782 = vmatmul.msk.bf16.gmra.mxu3 %vm3687_vm0, %v7115_v8  ;;  %v9692_v8 = vor.u32 %v10335_v61, %v9689_v47 }
 0x95e   : > { %v6914_v52 = vpop.f32.mrf.mxu0 }
 0x95f   : > { %v7002_v40 = vpop.f32.mrf.mxu1  ;;  %v6915_v12 = vadd.f32 %v6914_v52, %v12394_v13 }
 0x960   : > { %v7045_v49 = vpop.f32.mrf.mxu2 }
 0x961   : > { %v12481_v0 = vadd.f32 %v7002_v40, %v6915_v12  ;;  %v7046_v25 = vadd.f32 %v7045_v49, %v12361_v6  ;;  %v6839_v49 = vadd.f32 %v12403_v28, %v12431_v45 }
 0x966   : > { %v6916_v50 = vpop.f32.mrf.mxu0 }
 0x967   : > { %v7004_v31 = vpop.f32.mrf.mxu1  ;;  %v6917_v16 = vadd.f32 %v6916_v50, %v6829_v19  ;;  %v10343_v50 = vld [vmem:[#allocation2 + $0xefc] sm:$0xf] }
 0x968   : > { %v7047_v30 = vpop.f32.mrf.mxu2 }
 0x969   : > { %v12486_v57 = vadd.f32 %v7004_v31, %v6917_v16  ;;  %v7048_v48 = vadd.f32 %v7047_v30, %v12369_v10  ;;  %v9721_v31 = vld [vmem:[#allocation2 + $0xf18] sm:$0xf0] }
 0x96b   : > { %v7116_v13 = vpack.c.bf16 %v7048_v48, %v7046_v25  ;;  %v9724_v25 = vor.u32 %v10343_v50, %v9721_v31 }
 0x96d   : > { %7089 = vmatmul.bf16.gmra.mxu2 %v9660_v38  ;;  %9783 = vmatmul.msk.bf16.gmra.mxu3 %vm3687_vm0, %v7116_v13 }
 0x96e   : > { %v6919_v26 = vpop.f32.mrf.mxu0 }
 0x96f   : > { %v7007_v53 = vpop.f32.mrf.mxu1  ;;  %v6920_v58 = vadd.f32 %v6919_v26, %v12409_v60  ;;  %v6844_v26 = vadd.f32 %v12418_v17, %v12446_v15 }
 0x970   : > { %v7050_v62 = vpop.f32.mrf.mxu2 }
 0x971   : > { %v12491_v20 = vadd.f32 %v7007_v53, %v6920_v58  ;;  %v7051_v59 = vadd.f32 %v7050_v62, %v12375_v37  ;;  %v10351_v58 = vld [vmem:[#allocation2 + $0xf3c] sm:$0xf] }
 0x972   : > { %v9753_v62 = vld [vmem:[#allocation2 + $0xf58] sm:$0xf0] }
 0x973   : > { %v9756_v47 = vor.u32 %v10351_v58, %v9753_v62 }
 0x976   : > { %v6921_v6 = vpop.f32.mrf.mxu0 }
 0x977   : > { %v7009_v54 = vpop.f32.mrf.mxu1  ;;  %v6922_v10 = vadd.f32 %v6921_v6, %v6834_v2 }
 0x978   : > { %v7052_v21 = vpop.f32.mrf.mxu2 }
 0x979   : > { %v12496_v51 = vadd.f32 %v7009_v54, %v6922_v10  ;;  %v7053_v41 = vadd.f32 %v7052_v21, %v12383_v11 }
 0x97b   : > { %v7117_v60 = vpack.c.bf16 %v7053_v41, %v7051_v59  ;;  %v6153_v41 = vunpack.c.h.b16 %v12428_v32 }
 0x97d   : > { %7094 = vmatmul.bf16.gmra.mxu2 %v9692_v8  ;;  %9784 = vmatmul.msk.bf16.gmra.mxu3 %vm3687_vm0, %v7117_v60 }
 0x97e   : > { %v6924_v52 = vpop.f32.mrf.mxu0 }
 0x97f   : > { %v7012_v40 = vpop.f32.mrf.mxu1  ;;  %v6925_v5 = vadd.f32 %v6924_v52, %v12424_v63 }
 0x980   : > { %v7055_v43 = vpop.f32.mrf.mxu2 }
 0x981   : > { %v12501_v12 = vadd.f32 %v7012_v40, %v6925_v5  ;;  %v7056_v35 = vadd.f32 %v7055_v43, %v12392_v55  ;;  %v6281_v40 = vpack.c.b16 %v6153_v41, %v6153_v41  ;;  %v12858_v41 = vld [vmem:[#allocation35_spill] sm:$0xff] }
 0x986   : > { %v6926_v37 = vpop.f32.mrf.mxu0 }
 0x987   : > { %v7014_v19 = vpop.f32.mrf.mxu1  ;;  %v6927_v11 = vadd.f32 %v6926_v37, %v6839_v49 }
 0x988   : > { %v7057_v27 = vpop.f32.mrf.mxu2 }
 0x989   : > { %v12506_v16 = vadd.f32 %v7014_v19, %v6927_v11  ;;  %v7058_v30 = vadd.f32 %v7057_v27, %v12401_v56 }
 0x98b   : > { %v7118_v63 = vpack.c.bf16 %v7058_v30, %v7056_v35 }
 0x98d   : > { %7099 = vmatmul.bf16.gmra.mxu2 %v9724_v25  ;;  %9785 = vmatmul.msk.bf16.gmra.mxu3 %vm3687_vm0, %v7118_v63 }
 0x98e   : > { %v6929_v48 = vpop.f32.mrf.mxu0 }
 0x98f   : > { %v7017_v38 = vpop.f32.mrf.mxu1  ;;  %v6930_v28 = vadd.f32 %v6929_v48, %v12441_v44 }
 0x990   : > { %v7060_v45 = vpop.f32.mrf.mxu2 }
 0x991   : > { %v12511_v13 = vadd.f32 %v7017_v38, %v6930_v28  ;;  %v7061_v6 = vadd.f32 %v7060_v45, %v12407_v9 }
 0x996   : > { %v6931_v55 = vpop.f32.mrf.mxu0 }
 0x997   : > { %v7019_v53 = vpop.f32.mrf.mxu1  ;;  %v6932_v56 = vadd.f32 %v6931_v55, %v6844_v26 }
 0x998   : > { %v7062_v2 = vpop.f32.mrf.mxu2 }
 0x999   : > { %v12516_v54 = vadd.f32 %v7019_v53, %v6932_v56  ;;  %v7063_v61 = vadd.f32 %v7062_v2, %v12416_v34 }
 0x99b   : > { %v7119_v44 = vpack.c.bf16 %v7063_v61, %v7061_v6  ;;  %v12856_v6 = vld [vmem:[#allocation13_spill] sm:$0xff]  ;;  %v12857_v61 = vld [vmem:[#allocation34_spill] sm:$0xff] }
 0x99d   : > { %7104 = vmatmul.bf16.gmra.mxu2 %v9756_v47  ;;  %9786 = vmatmul.msk.bf16.gmra.mxu3 %vm3687_vm0, %v7119_v44 }
 0x99e   : > { %v6934_v10 = vpop.f32.mrf.mxu0 }
 0x99f   : > { %v7022_v21 = vpop.f32.mrf.mxu1  ;;  %v6935_v17 = vadd.f32 %v6934_v10, %v12454_v18 }
 0x9a0   : > { %v7065_v15 = vpop.f32.mrf.mxu2 }
 0x9a1   : > { %v12521_v59 = vadd.f32 %v7022_v21, %v6935_v17  ;;  %v7066_v52 = vadd.f32 %v7065_v15, %v12422_v39 }
 0x9a6   : > { %v6936_v8 = vpop.f32.mrf.mxu0 }
 0x9a7   : > { %v7024_v9 = vpop.f32.mrf.mxu1 }
 0x9a8   : > { %v7067_v60 = vpop.f32.mrf.mxu2  ;;  %v12859_v9 = vld [vmem:[#allocation25_spill] sm:$0xff] }
 0x9a9   : > { %v7068_v34 = vadd.f32 %v7067_v60, %v12433_v7 }
 0x9ab   : > { %v7120_v5 = vpack.c.bf16 %v7068_v34, %v7066_v52 }
 0x9ad   : > { %7109 = vmatmul.bf16.gmra.mxu2 %v6281_v40  ;;  %9787 = vmatmul.msk.bf16.gmra.mxu3 %vm3687_vm0, %v7120_v5 }
 0x9b0   : > { %v7070_v43 = vpop.f32.mrf.mxu2 }
 0x9b1   : > { %v7071_v49 = vadd.f32 %v7070_v43, %v12439_v42 }
 0x9b8   : > { %v7072_v18 = vpop.f32.mrf.mxu2 }
 0x9b9   : > { %v7073_v37 = vadd.f32 %v7072_v18, %v12448_v3 }
 0x9bb   : > { %v7121_v32 = vpack.c.bf16 %v7073_v37, %v7071_v49  ;;  %v12860_v49 = vld [vmem:[#allocation36_spill] sm:$0xff] }
 0x9bd   : > { %9788 = vmatmul.msk.bf16.gmra.mxu3 %vm3687_vm0, %v7121_v32  ;;  %v12861_v32 = vld [vmem:[#allocation33_spill] sm:$0xff] }
 0x9c0   : > { %v7075_v19 = vpop.f32.mrf.mxu2 }
 0x9c1   : > { %v7076_v39 = vadd.f32 %v7075_v19, %v12452_v23 }
 0x9c8   : > { %v7077_v50 = vpop.f32.mrf.mxu2 }
 0x9c9   : > { %v7078_v7 = vadd.f32 %v7077_v50, %v12458_v4 }
 0x9cb   : > { %v7122_v31 = vpack.c.bf16 %v7078_v7, %v7076_v39 }
 0x9cd   : > { %9789 = vmatmul.msk.bf16.gmra.mxu3 %vm3687_vm0, %v7122_v31 }
 0x9d0   : > { %v7080_v11 = vpop.f32.mrf.mxu2  ;;  %v7220_v27 = vpop.f32.mrf.mxu3 }
 0x9d1   : > { %v7081_v42 = vadd.f32 %v7080_v11, %v12461_v24  ;;  %v7299_v3 = vadd.f32 %v7220_v27, %v11972_v1 }
 0x9d8   : > { %v7082_v35 = vpop.f32.mrf.mxu2  ;;  %v7222_v30 = vpop.f32.mrf.mxu3 }
 0x9d9   : > { %v7083_v25 = vadd.f32 %v7082_v35, %v12466_v36  ;;  %v7300_v63 = vadd.f32 %v7222_v30, %v11979_v46  ;;  %v12862_v35 = vld [vmem:[#allocation26_spill] sm:$0xff] }
 0x9db   : > { %v7123_v23 = vpack.c.bf16 %v7083_v25, %v7081_v42  ;;  %v10363_v4 = vpack.c.bf16 %v7300_v63, %v7299_v3 }
 0x9dd   : > { %10364 = vst [vmem:[%s12541_s8] sm:$0xff] %v10363_v4   ;;  %9790 = vmatmul.msk.bf16.gmra.mxu3 %vm3687_vm0, %v7123_v23 }
 0x9e0   : > { %v7085_v48 = vpop.f32.mrf.mxu2  ;;  %v7225_v24 = vpop.f32.mrf.mxu3 }
 0x9e1   : > { %v7086_v36 = vadd.f32 %v7085_v48, %v12471_v14  ;;  %v7301_v46 = vadd.f32 %v7225_v24, %v11987_v29 }
 0x9e8   : > { %v7087_v38 = vpop.f32.mrf.mxu2  ;;  %v7227_v1 = vpop.f32.mrf.mxu3 }
 0x9e9   : > { %v7088_v28 = vadd.f32 %v7087_v38, %v12476_v33  ;;  %v7302_v45 = vadd.f32 %v7227_v1, %v11994_v22  ;;  %v12865_v1 = vld [vmem:[#allocation39_spill] sm:$0xff] }
 0x9eb   : > { %v7124_v26 = vpack.c.bf16 %v7088_v28, %v7086_v36  ;;  %v10368_v55 = vpack.c.bf16 %v7302_v45, %v7301_v46 }
 0x9ed   : > { %10435 = vst [vmem:[%s12541_s8 + $0x8] sm:$0xff] %v10368_v55   ;;  %9791 = vmatmul.msk.bf16.gmra.mxu3 %vm3687_vm0, %v7124_v26  ;;  %v12866_v26 = vld [vmem:[#allocation37_spill] sm:$0xff] }
 0x9f0   : > { %v7090_v53 = vpop.f32.mrf.mxu2  ;;  %v7230_v58 = vpop.f32.mrf.mxu3 }
 0x9f1   : > { %v7091_v2 = vadd.f32 %v7090_v53, %v12481_v0  ;;  %v7303_v14 = vadd.f32 %v7230_v58, %v12856_v6  ;;  %v12867_v53 = vld [vmem:[#allocation14_spill] sm:$0xff] }
 0x9f8   : > { %v7092_v62 = vpop.f32.mrf.mxu2  ;;  %v7232_v56 = vpop.f32.mrf.mxu3 }
 0x9f9   : > { %v7093_v29 = vadd.f32 %v7092_v62, %v12486_v57  ;;  %v7304_v33 = vadd.f32 %v7232_v56, %v12857_v61 }
 0x9fb   : > { %v7125_v47 = vpack.c.bf16 %v7093_v29, %v7091_v2  ;;  %v10373_v22 = vpack.c.bf16 %v7304_v33, %v7303_v14  ;;  %v12868_v2 = vld [vmem:[#allocation21_spill] sm:$0xff] }
 0x9fc   : > { %v12869_v14 = vld [vmem:[#allocation41_spill] sm:$0xff] }
 0x9fd   : > { %10436 = vst [vmem:[%s12541_s8 + $0x10] sm:$0xff] %v10373_v22   ;;  %9792 = vmatmul.msk.bf16.gmra.mxu3 %vm3687_vm0, %v7125_v47  ;;  %v12870_v22 = vld [vmem:[#allocation40_spill] sm:$0xff] }
 0xa00   : > { %v7095_v44 = vpop.f32.mrf.mxu2  ;;  %v7235_v10 = vpop.f32.mrf.mxu3 }
 0xa01   : > { %v7096_v15 = vadd.f32 %v7095_v44, %v12491_v20  ;;  %v7305_v0 = vadd.f32 %v7235_v10, %v12858_v41  ;;  %v12871_v10 = vld [vmem:[#allocation6_spill] sm:$0xff] }
 0xa08   : > { %v7097_v21 = vpop.f32.mrf.mxu2  ;;  %v7237_v17 = vpop.f32.mrf.mxu3 }
 0xa09   : > { %v7098_v8 = vadd.f32 %v7097_v21, %v12496_v51  ;;  %v7306_v57 = vadd.f32 %v7237_v17, %v12859_v9  ;;  %v12873_v9 = vld [vmem:[#allocation44_spill] sm:$0xff] }
 0xa0b   : > { %v7126_v60 = vpack.c.bf16 %v7098_v8, %v7096_v15  ;;  %v10378_v52 = vpack.c.bf16 %v7306_v57, %v7305_v0  ;;  %v12872_v0 = vld [vmem:[#allocation43_spill] sm:$0xff] }
 0xa0d   : > { %10437 = vst [vmem:[%s12541_s8 + $0x18] sm:$0xff] %v10378_v52   ;;  %9793 = vmatmul.msk.bf16.gmra.mxu3 %vm3687_vm0, %v7126_v60 }
 0xa10   : > { %v7100_v34 = vpop.f32.mrf.mxu2  ;;  %v7240_v40 = vpop.f32.mrf.mxu3 }
 0xa11   : > { %v7101_v18 = vadd.f32 %v7100_v34, %v12501_v12  ;;  %v7307_v20 = vadd.f32 %v7240_v40, %v12860_v49  ;;  %v12874_v40 = vld [vmem:[#allocation7_spill] sm:$0xff] }
 0xa18   : > { %v7102_v5 = vpop.f32.mrf.mxu2  ;;  %v7242_v43 = vpop.f32.mrf.mxu3 }
 0xa19   : > { %v7103_v37 = vadd.f32 %v7102_v5, %v12506_v16  ;;  %v7308_v51 = vadd.f32 %v7242_v43, %v12861_v32  ;;  %v12863_v16 = vld [vmem:[#allocation38_spill] sm:$0xff]  ;;  %v12875_v43 = vld [vmem:[#allocation45_spill] sm:$0xff] }
 0xa1a   : > { %v12876_v32 = vld [vmem:[#allocation42_spill] sm:$0xff] }
 0xa1b   : > { %v7127_v19 = vpack.c.bf16 %v7103_v37, %v7101_v18  ;;  %v10383_v50 = vpack.c.bf16 %v7308_v51, %v7307_v20 }
 0xa1d   : > { %10438 = vst [vmem:[%s12541_s8 + $0x20] sm:$0xff] %v10383_v50   ;;  %9794 = vmatmul.msk.bf16.gmra.mxu3 %vm3687_vm0, %v7127_v19  ;;  %v12877_v19 = vld [vmem:[#allocation22_spill] sm:$0xff] }
 0xa20   : > { %v7105_v39 = vpop.f32.mrf.mxu2  ;;  %v7245_v7 = vpop.f32.mrf.mxu3 }
 0xa21   : > { %v7106_v27 = vadd.f32 %v7105_v39, %v12511_v13  ;;  %v7309_v12 = vadd.f32 %v7245_v7, %v12862_v35  ;;  %v12864_v13 = vld [vmem:[#allocation5_spill] sm:$0xff]  ;;  %v12879_v35 = vld [vmem:[#allocation8_spill] sm:$0xff] }
 0xa28   : > { %v7107_v31 = vpop.f32.mrf.mxu2  ;;  %v7247_v11 = vpop.f32.mrf.mxu3 }
 0xa29   : > { %v7108_v30 = vadd.f32 %v7107_v31, %v12516_v54  ;;  %v7310_v42 = vadd.f32 %v7247_v11, %v12863_v16  ;;  %v12878_v11 = vld [vmem:[#allocation9_spill] sm:$0xff] }
 0xa2b   : > { %v7128_v3 = vpack.c.bf16 %v7108_v30, %v7106_v27  ;;  %v10388_v25 = vpack.c.bf16 %v7310_v42, %v7309_v12 }
 0xa2d   : > { %10439 = vst [vmem:[%s12541_s8 + $0x28] sm:$0xff] %v10388_v25   ;;  %9795 = vmatmul.msk.bf16.gmra.mxu3 %vm3687_vm0, %v7128_v3  ;;  %v12880_v3 = vld [vmem:[#allocation17_spill] sm:$0xff] }
 0xa30   : > { %v7110_v63 = vpop.f32.mrf.mxu2  ;;  %v7250_v23 = vpop.f32.mrf.mxu3 }
 0xa31   : > { %v7111_v4 = vadd.f32 %v7110_v63, %v12521_v59  ;;  %v7311_v38 = vadd.f32 %v7250_v23, %v12864_v13  ;;  %v12881_v63 = vld [vmem:[#allocation10_spill] sm:$0xff] }
 0xa33   : > { %v7129_v54 = vpack.c.bf16 %v7111_v4, %v7111_v4 }
 0xa38   : > { %v7112_v48 = vpop.f32.mrf.mxu2  ;;  %v7252_v24 = vpop.f32.mrf.mxu3 }
 0xa39   : > { %v7312_v36 = vadd.f32 %v7252_v24, %v12865_v1  ;;  %v12882_v24 = vld [vmem:[#allocation11_spill] sm:$0xff] }
 0xa3b   : > { %v10393_v46 = vpack.c.bf16 %v7312_v36, %v7311_v38 }
 0xa3d   : > { %10440 = vst [vmem:[%s12541_s8 + $0x30] sm:$0xff] %v10393_v46   ;;  %9796 = vmatmul.msk.bf16.gmra.mxu3 %vm3687_vm0, %v7129_v54 }
 0xa40   : > { %v7255_v28 = vpop.f32.mrf.mxu3 }
 0xa41   : > { %v7313_v55 = vadd.f32 %v7255_v28, %v12866_v26 }
 0xa48   : > { %v7257_v45 = vpop.f32.mrf.mxu3 }
 0xa49   : > { %v7314_v58 = vadd.f32 %v7257_v45, %v12867_v53 }
 0xa4b   : > { %v10398_v59 = vpack.c.bf16 %v7314_v58, %v7313_v55 }
 0xa4d   : > { %10441 = vst [vmem:[%s12541_s8 + $0x38] sm:$0xff] %v10398_v59  }
 0xa50   : > { %v7260_v62 = vpop.f32.mrf.mxu3 }
 0xa51   : > { %v7315_v6 = vadd.f32 %v7260_v62, %v12868_v2 }
 0xa58   : > { %v7262_v56 = vpop.f32.mrf.mxu3 }
 0xa59   : > { %v7316_v29 = vadd.f32 %v7262_v56, %v12869_v14 }
 0xa5b   : > { %v10403_v61 = vpack.c.bf16 %v7316_v29, %v7315_v6 }
 0xa5d   : > { %10442 = vst [vmem:[%s12541_s8 + $0x40] sm:$0xff] %v10403_v61  }
 0xa60   : > { %v7265_v33 = vpop.f32.mrf.mxu3 }
 0xa61   : > { %v7317_v44 = vadd.f32 %v7265_v33, %v12870_v22 }
 0xa68   : > { %v7267_v47 = vpop.f32.mrf.mxu3 }
 0xa69   : > { %v7318_v21 = vadd.f32 %v7267_v47, %v12871_v10 }
 0xa6b   : > { %v10408_v17 = vpack.c.bf16 %v7318_v21, %v7317_v44 }
 0xa6d   : > { %10443 = vst [vmem:[%s12541_s8 + $0x48] sm:$0xff] %v10408_v17  }
 0xa70   : > { %v7270_v15 = vpop.f32.mrf.mxu3 }
 0xa71   : > { %v7319_v8 = vadd.f32 %v7270_v15, %v12872_v0 }
 0xa78   : > { %v7272_v41 = vpop.f32.mrf.mxu3 }
 0xa79   : > { %v7320_v57 = vadd.f32 %v7272_v41, %v12873_v9 }
 0xa7b   : > { %v10413_v60 = vpack.c.bf16 %v7320_v57, %v7319_v8 }
 0xa7d   : > { %10444 = vst [vmem:[%s12541_s8 + $0x50] sm:$0xff] %v10413_v60  }
 0xa80   : > { %v7275_v52 = vpop.f32.mrf.mxu3 }
 0xa81   : > { %v7321_v5 = vadd.f32 %v7275_v52, %v12874_v40 }
 0xa88   : > { %v7277_v34 = vpop.f32.mrf.mxu3 }
 0xa89   : > { %v7322_v18 = vadd.f32 %v7277_v34, %v12875_v43 }
 0xa8b   : > { %v10418_v49 = vpack.c.bf16 %v7322_v18, %v7321_v5 }
 0xa8d   : > { %10445 = vst [vmem:[%s12541_s8 + $0x58] sm:$0xff] %v10418_v49  }
 0xa90   : > { %v7280_v20 = vpop.f32.mrf.mxu3 }
 0xa91   : > { %v7323_v51 = vadd.f32 %v7280_v20, %v12876_v32 }
 0xa98   : > { %v7282_v37 = vpop.f32.mrf.mxu3 }
 0xa99   : > { %v7324_v50 = vadd.f32 %v7282_v37, %v12877_v19 }
 0xa9b   : > { %v10423_v39 = vpack.c.bf16 %v7324_v50, %v7323_v51 }
 0xa9d   : > { %10446 = vst [vmem:[%s12541_s8 + $0x60] sm:$0xff] %v10423_v39  }
 0xaa0   : > { %v7285_v7 = vpop.f32.mrf.mxu3 }
 0xaa1   : > { %v7325_v27 = vadd.f32 %v7285_v7, %v12878_v11 }
 0xaa8   : > { %v7287_v31 = vpop.f32.mrf.mxu3 }
 0xaa9   : > { %v7326_v12 = vadd.f32 %v7287_v31, %v12879_v35 }
 0xaab   : > { %v10428_v30 = vpack.c.bf16 %v7326_v12, %v7325_v27 }
 0xaad   : > { %10447 = vst [vmem:[%s12541_s8 + $0x68] sm:$0xff] %v10428_v30  }
 0xab0   : > { %v7290_v16 = vpop.f32.mrf.mxu3 }
 0xab1   : > { %v7327_v25 = vadd.f32 %v7290_v16, %v12880_v3 }
 0xab8   : > { %v7292_v42 = vpop.f32.mrf.mxu3 }
 0xab9   : > { %v7328_v23 = vadd.f32 %v7292_v42, %v12881_v63 }
 0xabb   : > { %v10433_v4 = vpack.c.bf16 %v7328_v23, %v7327_v25 }
 0xabd   : > { %10448 = vst [vmem:[%s12541_s8 + $0x70] sm:$0xff] %v10433_v4  }
 0xac0   : > { %v7295_v48 = vpop.f32.mrf.mxu3 }
 0xac1   : > { %v7329_v13 = vadd.f32 %v7295_v48, %v12882_v24 }
 0xac3   : > { %v7360_v38 = vpack.c.bf16 %v7329_v13, %v7329_v13 }
 0xac5   : > { %7391 = vst [vmem:[%s12541_s8 + $0x78] sm:$0xf] %v7360_v38 }
 0xac8   : > { %v7297_v1 = vpop.f32.mrf.mxu3 }
 0xac9 PF: > { %s14_s12 = sadd.s32 1, %s10639_s12  }
 0xaca   : > { %p11_p7 = scmp.ge.s32.totalorder %s14_s12, 4  }
 0xacc   :  { %13 = sbr.rel (!%p11_p7) target bundleno = 1 (0x1), region = 73 }
 0xad1   :  { %7413 = vsyncpa [#allocation3], 1 }
 0xad2   :  { %7415 = vsyncpa [#allocation3 + $0x1], 1 }

</bundles_post_ra>
